<compile_context>
chip_gen: v5e
topology: v5e:2x2
jax: 0.10.0
libtpu: 0.0.40
codegen_flags: <defaults>
</compile_context>

<pallas_src>
import jax
import jax.numpy as jnp
from jax.experimental import pallas as pl
from jax.experimental.pallas import tpu as pltpu


# ------------------------------ fused model kernel ------------------------------

def _make_fused_kernel(num_layers, seq_len, batch):
    """Builds the fused embedding + LSTM stack + FC kernel (static L, T, B)."""
    L, T, B = num_layers, seq_len, batch

    def kernel(*refs):
        n_lw = 2 * (L - 1)
        ids_ref, h0_ref, c0_ref, w0_ref, b0_ref, whh0_ref = refs[:6]
        lrefs = refs[6:6 + n_lw]
        wcat_refs = [lrefs[2 * i] for i in range(L - 1)]      # (2H, 4H) bf16
        bias_refs = [lrefs[2 * i + 1] for i in range(L - 1)]  # (1, 4H)  f32
        fcw_ref, fcb_ref = refs[6 + n_lw:8 + n_lw]
        logits_ref, hT_ref, cT_ref = refs[8 + n_lw:11 + n_lw]
        xproj0_scr, xbuf_scr = refs[11 + n_lw:]

        H = whh0_ref.shape[0]
        V_pad = w0_ref.shape[0]
        TB = T * B
        H3 = 3 * H

        # ---- layer-0 input projection for ALL timesteps (embedding folded in) ----
        ids = ids_ref[...]                                               # (TB, 1) i32
        iota = jax.lax.broadcasted_iota(jnp.int32, (TB, V_pad), 1)
        one_hot = jnp.where(iota == ids, 1.0, 0.0).astype(jnp.bfloat16)  # (TB, V_pad)
        xproj0_scr[...] = jnp.dot(one_hot, w0_ref[...],
                                  preferred_element_type=jnp.float32) + b0_ref[...]

        # ---- wavefront over (layer, time) cells with t + l = wave ----
        h_cur = [h0_ref[l, :, :] for l in range(L)]                      # (B, H) f32
        c_cur = [c0_ref[l, :, :] for l in range(L)]

        def cell(gates, c_prev):
            # gate order after host permutation: [i | f | o] (sigmoid), [g] (tanh)
            s = jax.nn.sigmoid(gates[:, :H3])
            g = jnp.tanh(gates[:, H3:])
            i_g = s[:, 0 * H:1 * H]
            f_g = s[:, 1 * H:2 * H]
            o_g = s[:, 2 * H:3 * H]
            c_new = f_g * c_prev + i_g * g
            h_new = o_g * jnp.tanh(c_new)
            return h_new, c_new

        for w in range(T + L - 1):                 # static -> fully unrolled
            new_h, new_c = {}, {}
            for l in range(max(0, w - (T - 1)), min(L - 1, w) + 1):
                t = w - l
                if l == 0:
                    gates = xproj0_scr[pl.ds(t * B, B), :] + jnp.dot(
                        h_cur[0].astype(jnp.bfloat16), whh0_ref[...],
                        preferred_element_type=jnp.float32)
                else:
                    # fused input + recurrent projection:
                    #   [h_{l-1,t}, h_{l,t-1}] @ [[W_ih]; [W_hh]]
                    xin = jnp.concatenate([h_cur[l - 1], h_cur[l]],
                                          axis=1).astype(jnp.bfloat16)   # (B, 2H)
                    gates = jnp.dot(xin, wcat_refs[l - 1][...],
                                    preferred_element_type=jnp.float32) \
                        + bias_refs[l - 1][...]
                h_new, c_new = cell(gates, c_cur[l])
                new_h[l], new_c[l] = h_new, c_new
                if l == L - 1:
                    xbuf_scr[pl.ds(t * B, B), :] = h_new
            for l in new_h:                        # commit after the wave
                h_cur[l] = new_h[l]
                c_cur[l] = new_c[l]

        # ---- final states ----
        for l in range(L):
            hT_ref[l, :, :] = h_cur[l]
            cT_ref[l, :, :] = c_cur[l]

        # ---- classifier: (TB, H) @ (H, V_pad), lane-dense output ----
        logits_ref[...] = jnp.dot(xbuf_scr[...].astype(jnp.bfloat16), fcw_ref[...],
                                  preferred_element_type=jnp.float32) + fcb_ref[...]

    return kernel


# ---------------------------- one-time parameter prep ---------------------------

def prepare_params(params):
    """One-time host-side re-layout of the PyTorch-style parameters.

    Transposes weights to (in, out), permutes gate columns (i,f,g,o) -> (i,f,o,g)
    so sigmoid gates are contiguous, folds the embedding into layer-0's input
    projection, fuses b_ih + b_hh, pads vocab dims to a multiple of 128 and casts
    all MXU operands to bfloat16.  Run ONCE, outside the generation loop.
    """
    emb = params["embedding"].astype(jnp.float32)
    V, _E = emb.shape
    H = params["lstm"][0]["w_hh"].shape[1]
    L = len(params["lstm"])
    V_pad = ((V + 127) // 128) * 128

    # gate permutation: PyTorch (i, f, g, o) -> (i, f, o, g)
    perm = jnp.concatenate([jnp.arange(2 * H), jnp.arange(3 * H, 4 * H),
                            jnp.arange(2 * H, 3 * H)])

    l0 = params["lstm"][0]
    w0 = (emb @ l0["w_ih"].T)[:, perm]                                   # (V, 4H) f32
    w0_pad = (jnp.zeros((V_pad, 4 * H), jnp.float32)
              .at[:V].set(w0).astype(jnp.bfloat16))
    b0 = (l0["b_ih"] + l0["b_hh"])[perm].reshape(1, 4 * H).astype(jnp.float32)
    whh0 = l0["w_hh"].T[:, perm].astype(jnp.bfloat16)                    # (H, 4H)

    wcat, bias = [], []
    for lp in params["lstm"][1:]:
        wc = jnp.concatenate([lp["w_ih"].T, lp["w_hh"].T], axis=0)[:, perm]  # (2H,4H)
        wcat.append(wc.astype(jnp.bfloat16))
        bias.append((lp["b_ih"] + lp["b_hh"])[perm]
                    .reshape(1, 4 * H).astype(jnp.float32))

    fcw = (jnp.zeros((H, V_pad), jnp.float32)
           .at[:, :V].set(params["fc_w"].T).astype(jnp.bfloat16))        # (H, V_pad)
    fcb = jnp.zeros((1, V_pad), jnp.float32).at[:, :V].set(
        params["fc_b"].reshape(1, V))                                    # (1, V_pad)

    return {"V": V, "V_pad": V_pad, "H": H, "L": L,
            "w0": w0_pad, "b0": b0, "whh0": whh0,
            "wcat": wcat, "bias": bias, "fcw": fcw, "fcb": fcb}


# ------------------------------ full model forward -----------------------------

def model_forward(prepped, x_ids, prev_state):
    """Equivalent of Model.forward(x, prev_state) in eval mode.

    x_ids: (T, B) int32 token ids (time-major, nn.LSTM batch_first=False);
    prev_state = (h0, c0), each (L, B, H).
    Returns (logits (T, B, V), (h_n, c_n)).
    Note: out-of-range ids (>= vocab) silently map to a zero embedding row.
    """
    h0, c0 = prev_state
    T, B = x_ids.shape
    L, _, H = h0.shape
    V, V_pad = prepped["V"], prepped["V_pad"]
    TB = T * B

    ids2d = x_ids.reshape(TB, 1).astype(jnp.int32)

    inputs = [ids2d, h0, c0, prepped["w0"], prepped["b0"], prepped["whh0"]]
    for wc, b in zip(prepped["wcat"], prepped["bias"]):
        inputs += [wc, b]
    inputs += [prepped["fcw"], prepped["fcb"]]

    out_shapes = (jax.ShapeDtypeStruct((TB, V_pad), jnp.float32),
                  jax.ShapeDtypeStruct((L, B, H), jnp.float32),
                  jax.ShapeDtypeStruct((L, B, H), jnp.float32))

    vmem = pl.BlockSpec(memory_space=pltpu.MemorySpace.VMEM)

    logits_pad, h_n, c_n = pl.pallas_call(
        _make_fused_kernel(L, T, B),
        out_shape=out_shapes,
        in_specs=[vmem] * len(inputs),
        out_specs=(vmem, vmem, vmem),
        scratch_shapes=[pltpu.VMEM((TB, 4 * H), jnp.float32),   # layer-0 xproj
                        pltpu.VMEM((TB, H), jnp.float32)],      # last-layer outputs
        input_output_aliases={1: 1, 2: 2},                      # h0->h_n, c0->c_n
    )(*inputs)

    logits = logits_pad[:, :V].reshape(T, B, V)
    return logits, (h_n, c_n)


# ------------------------------ pure-JAX reference ------------------------------

def _reference_forward(params, x_ids, prev_state):
    """Float32 reference with PyTorch LSTM semantics (eval mode, no dropout)."""
    h0, c0 = prev_state
    emb = jnp.take(params["embedding"], x_ids, axis=0)
    layer_in = emb
    h_out, c_out = [], []
    for l, lp in enumerate(params["lstm"]):
        H = lp["w_hh"].shape[1]

        def step(carry, x_t, lp=lp, H=H):
            h, c = carry
            g = x_t @ lp["w_ih"].T + h @ lp["w_hh"].T + lp["b_ih"] + lp["b_hh"]
            i = jax.nn.sigmoid(g[:, :H])
            f = jax.nn.sigmoid(g[:, H:2 * H])
            gg = jnp.tanh(g[:, 2 * H:3 * H])
            o = jax.nn.sigmoid(g[:, 3 * H:])
            c_new = f * c + i * gg
            h_new = o * jnp.tanh(c_new)
            return (h_new, c_new), h_new

        (hT, cT), ys = jax.lax.scan(step, (h0[l], c0[l]), layer_in)
        layer_in = ys
        h_out.append(hT)
        c_out.append(cT)
    logits = layer_in @ params["fc_w"].T + params["fc_b"]
    return logits, (jnp.stack(h_out, 0), jnp.stack(c_out, 0))


# ----------------------------------- params -----------------------------------

def init_params(key, vocab_size, embed_dim=64, hidden=128, num_layers=3):
    keys = jax.random.split(key, 2 + 4 * num_layers + 2)
    k_iter = iter(keys)
    params = {}
    params["embedding"] = jax.random.normal(next(k_iter), (vocab_size, embed_dim),
                                            jnp.float32)
    bound = 1.0 / jnp.sqrt(hidden)
    lstm = []
    for l in range(num_layers):
        in_dim = embed_dim if l == 0 else hidden
        lstm.append({
            "w_ih": jax.random.uniform(next(k_iter), (4 * hidden, in_dim),
                                       jnp.float32, -bound, bound),
            "w_hh": jax.random.uniform(next(k_iter), (4 * hidden, hidden),
                                       jnp.float32, -bound, bound),
            "b_ih": jax.random.uniform(next(k_iter), (4 * hidden,),
                                       jnp.float32, -bound, bound),
            "b_hh": jax.random.uniform(next(k_iter), (4 * hidden,),
                                       jnp.float32, -bound, bound),
        })
    params["lstm"] = lstm
    params["fc_w"] = jax.random.uniform(next(k_iter), (vocab_size, hidden),
                                        jnp.float32, -bound, bound)
    params["fc_b"] = jax.random.uniform(next(k_iter), (vocab_size,),
                                        jnp.float32, -bound, bound)
    return params


# ------------------------------------ main ------------------------------------

if __name__ == "__main__":
    VOCAB, T, B, E, H, L = 50, 4, 8, 64, 128, 3

    key = jax.random.PRNGKey(0)
    k_par, k_x, k_h, k_c = jax.random.split(key, 4)

    params = init_params(k_par, VOCAB, E, H, L)
    x_ids = jax.random.randint(k_x, (T, B), 0, VOCAB, dtype=jnp.int32)
    h0 = jax.random.uniform(k_h, (L, B, H), jnp.float32)   # like Model.init_state
    c0 = jax.random.uniform(k_c, (L, B, H), jnp.float32)

    # Pure-f32 reference (computed first; h0/c0 are aliased to the kernel outputs).
    ref_logits, (ref_h, ref_c) = _reference_forward(params, x_ids, (h0, c0))

    prepped = prepare_params(params)            # one-time host-side weight layout
    logits, (h_n, c_n) = model_forward(prepped, x_ids, (h0, c0))
    jax.block_until_ready((logits, h_n, c_n))

    # bf16 MXU operands with f32 accumulation -> ~1e-2 drift over T*L=12 recurrent
    # steps; 5e-2 still catches gate-order / weight-layout bugs (O(0.1..1) errors).
    assert logits.shape == (T, B, VOCAB)
    assert h_n.shape == (L, B, H) and c_n.shape == (L, B, H)
    assert jnp.allclose(logits, ref_logits, atol=5e-2, rtol=5e-2)
    assert jnp.allclose(h_n, ref_h, atol=5e-2, rtol=5e-2)
    assert jnp.allclose(c_n, ref_c, atol=5e-2, rtol=5e-2)

    print("KERNEL_OK")
</pallas_src>

<mosaic_0001>
module attributes {stable_mosaic.version = 11 : i64} {
  func.func @kernel(%arg0: memref<32x1xi32, #tpu.memory_space<vmem>>, %arg1: memref<3x8x128xf32, #tpu.memory_space<vmem>>, %arg2: memref<3x8x128xf32, #tpu.memory_space<vmem>>, %arg3: memref<128x512xbf16, #tpu.memory_space<vmem>>, %arg4: memref<1x512xf32, #tpu.memory_space<vmem>>, %arg5: memref<128x512xbf16, #tpu.memory_space<vmem>>, %arg6: memref<256x512xbf16, #tpu.memory_space<vmem>>, %arg7: memref<1x512xf32, #tpu.memory_space<vmem>>, %arg8: memref<256x512xbf16, #tpu.memory_space<vmem>>, %arg9: memref<1x512xf32, #tpu.memory_space<vmem>>, %arg10: memref<128x128xbf16, #tpu.memory_space<vmem>>, %arg11: memref<1x128xf32, #tpu.memory_space<vmem>>, %arg12: memref<32x128xf32, #tpu.memory_space<vmem>>, %arg13: memref<3x8x128xf32, #tpu.memory_space<vmem>>, %arg14: memref<3x8x128xf32, #tpu.memory_space<vmem>>, %arg15: memref<32x512xf32, #tpu.memory_space<vmem>>, %arg16: memref<32x128xf32, #tpu.memory_space<vmem>>) attributes {dimension_semantics = [], scalar_prefetch = 0 : i64, scratch_operands = 2 : i64, tpu.core_type = #tpu.core_type<tc>} {
    %c0 = arith.constant 0 : index
    %c0_0 = arith.constant 0 : index
    %0 = vector.load %arg0[%c0, %c0_0] : memref<32x1xi32, #tpu.memory_space<vmem>>, vector<32x1xi32>
    %1 = tpu.iota {dimensions = array<i32: 1>} : vector<32x128xi32>
    %2 = vector.broadcast %0 : vector<32x1xi32> to vector<32x128xi32>
    %3 = arith.cmpi eq, %1, %2 : vector<32x128xi32>
    %cst = arith.constant 1.000000e+00 : f32
    %cst_1 = arith.constant 0.000000e+00 : f32
    %4 = vector.broadcast %cst : f32 to vector<32x128xf32>
    %5 = vector.broadcast %cst_1 : f32 to vector<32x128xf32>
    %6 = arith.select %3, %4, %5 : vector<32x128xi1>, vector<32x128xf32>
    %7 = arith.truncf %6 : vector<32x128xf32> to vector<32x128xbf16>
    %c0_2 = arith.constant 0 : index
    %c0_3 = arith.constant 0 : index
    %8 = vector.load %arg3[%c0_2, %c0_3] : memref<128x512xbf16, #tpu.memory_space<vmem>>, vector<128x512xbf16>
    %cst_4 = arith.constant dense<0.000000e+00> : vector<32x512xf32>
    %9 = tpu.matmul %7, %8, %cst_4 {dimension_numbers = #tpu.dot_dimension_numbers<[1], [0], [0], [1], [0, 0, 1, 1], [], []>} : vector<32x128xbf16>, vector<128x512xbf16>, vector<32x512xf32> -> vector<32x512xf32>
    %c0_5 = arith.constant 0 : index
    %c0_6 = arith.constant 0 : index
    %10 = vector.load %arg4[%c0_5, %c0_6] : memref<1x512xf32, #tpu.memory_space<vmem>>, vector<1x512xf32>
    %11 = vector.broadcast %10 : vector<1x512xf32> to vector<32x512xf32>
    %12 = arith.addf %9, %11 : vector<32x512xf32>
    %c0_7 = arith.constant 0 : index
    %c0_8 = arith.constant 0 : index
    %13 = vector.load %arg15[%c0_7, %c0_8] : memref<32x512xf32, #tpu.memory_space<vmem>>, vector<32x512xf32>
    tpu.vector_store %arg15[%c0_7, %c0_8], %12 {strides = array<i32>} : memref<32x512xf32, #tpu.memory_space<vmem>>, vector<32x512xf32>,
    %c0_9 = arith.constant 0 : index
    %c0_10 = arith.constant 0 : index
    %c0_11 = arith.constant 0 : index
    %14 = vector.load %arg1[%c0_9, %c0_10, %c0_11] : memref<3x8x128xf32, #tpu.memory_space<vmem>>, vector<1x8x128xf32>
    %15 = vector.shape_cast %14 : vector<1x8x128xf32> to vector<8x128xf32>
    %c1 = arith.constant 1 : index
    %c0_12 = arith.constant 0 : index
    %c0_13 = arith.constant 0 : index
    %16 = vector.load %arg1[%c1, %c0_12, %c0_13] : memref<3x8x128xf32, #tpu.memory_space<vmem>>, vector<1x8x128xf32>
    %17 = vector.shape_cast %16 : vector<1x8x128xf32> to vector<8x128xf32>
    %c2 = arith.constant 2 : index
    %c0_14 = arith.constant 0 : index
    %c0_15 = arith.constant 0 : index
    %18 = vector.load %arg1[%c2, %c0_14, %c0_15] : memref<3x8x128xf32, #tpu.memory_space<vmem>>, vector<1x8x128xf32>
    %19 = vector.shape_cast %18 : vector<1x8x128xf32> to vector<8x128xf32>
    %c0_16 = arith.constant 0 : index
    %c0_17 = arith.constant 0 : index
    %c0_18 = arith.constant 0 : index
    %20 = vector.load %arg2[%c0_16, %c0_17, %c0_18] : memref<3x8x128xf32, #tpu.memory_space<vmem>>, vector<1x8x128xf32>
    %21 = vector.shape_cast %20 : vector<1x8x128xf32> to vector<8x128xf32>
    %c1_19 = arith.constant 1 : index
    %c0_20 = arith.constant 0 : index
    %c0_21 = arith.constant 0 : index
    %22 = vector.load %arg2[%c1_19, %c0_20, %c0_21] : memref<3x8x128xf32, #tpu.memory_space<vmem>>, vector<1x8x128xf32>
    %23 = vector.shape_cast %22 : vector<1x8x128xf32> to vector<8x128xf32>
    %c2_22 = arith.constant 2 : index
    %c0_23 = arith.constant 0 : index
    %c0_24 = arith.constant 0 : index
    %24 = vector.load %arg2[%c2_22, %c0_23, %c0_24] : memref<3x8x128xf32, #tpu.memory_space<vmem>>, vector<1x8x128xf32>
    %25 = vector.shape_cast %24 : vector<1x8x128xf32> to vector<8x128xf32>
    %c0_25 = arith.constant 0 : index
    %c0_26 = arith.constant 0 : index
    %26 = vector.load %arg15[%c0_25, %c0_26] : memref<32x512xf32, #tpu.memory_space<vmem>>, vector<8x512xf32>
    %27 = arith.truncf %15 : vector<8x128xf32> to vector<8x128xbf16>
    %c0_27 = arith.constant 0 : index
    %c0_28 = arith.constant 0 : index
    %28 = vector.load %arg5[%c0_27, %c0_28] : memref<128x512xbf16, #tpu.memory_space<vmem>>, vector<128x512xbf16>
    %cst_29 = arith.constant dense<0.000000e+00> : vector<8x512xf32>
    %29 = tpu.matmul %27, %28, %cst_29 {dimension_numbers = #tpu.dot_dimension_numbers<[1], [0], [0], [1], [0, 0, 1, 1], [], []>} : vector<8x128xbf16>, vector<128x512xbf16>, vector<8x512xf32> -> vector<8x512xf32>
    %30 = arith.addf %26, %29 : vector<8x512xf32>
    %31 = vector.extract_strided_slice %30 {offsets = [0, 0], sizes = [8, 384], strides = [1, 1]} : vector<8x512xf32> to vector<8x384xf32>
    %32 = arith.negf %31 : vector<8x384xf32>
    %33 = math.exp %32 : vector<8x384xf32>
    %cst_30 = arith.constant 1.000000e+00 : f32
    %34 = vector.broadcast %cst_30 : f32 to vector<8x384xf32>
    %35 = arith.addf %34, %33 : vector<8x384xf32>
    %36 = arith.divf %34, %35 : vector<8x384xf32>
    %37 = vector.extract_strided_slice %30 {offsets = [0, 384], sizes = [8, 128], strides = [1, 1]} : vector<8x512xf32> to vector<8x128xf32>
    %38 = math.tanh %37 : vector<8x128xf32>
    %39 = vector.extract_strided_slice %36 {offsets = [0, 0], sizes = [8, 128], strides = [1, 1]} : vector<8x384xf32> to vector<8x128xf32>
    %40 = vector.extract_strided_slice %36 {offsets = [0, 128], sizes = [8, 128], strides = [1, 1]} : vector<8x384xf32> to vector<8x128xf32>
    %41 = vector.extract_strided_slice %36 {offsets = [0, 256], sizes = [8, 128], strides = [1, 1]} : vector<8x384xf32> to vector<8x128xf32>
    %42 = arith.mulf %40, %21 : vector<8x128xf32>
    %43 = arith.mulf %39, %38 : vector<8x128xf32>
    %44 = arith.addf %42, %43 : vector<8x128xf32>
    %45 = math.tanh %44 : vector<8x128xf32>
    %46 = arith.mulf %41, %45 : vector<8x128xf32>
    %c8 = arith.constant 8 : index
    %c0_31 = arith.constant 0 : index
    %47 = vector.load %arg15[%c8, %c0_31] : memref<32x512xf32, #tpu.memory_space<vmem>>, vector<8x512xf32>
    %48 = arith.truncf %46 : vector<8x128xf32> to vector<8x128xbf16>
    %c0_32 = arith.constant 0 : index
    %c0_33 = arith.constant 0 : index
    %49 = vector.load %arg5[%c0_32, %c0_33] : memref<128x512xbf16, #tpu.memory_space<vmem>>, vector<128x512xbf16>
    %cst_34 = arith.constant dense<0.000000e+00> : vector<8x512xf32>
    %50 = tpu.matmul %48, %49, %cst_34 {dimension_numbers = #tpu.dot_dimension_numbers<[1], [0], [0], [1], [0, 0, 1, 1], [], []>} : vector<8x128xbf16>, vector<128x512xbf16>, vector<8x512xf32> -> vector<8x512xf32>
    %51 = arith.addf %47, %50 : vector<8x512xf32>
    %52 = vector.extract_strided_slice %51 {offsets = [0, 0], sizes = [8, 384], strides = [1, 1]} : vector<8x512xf32> to vector<8x384xf32>
    %53 = arith.negf %52 : vector<8x384xf32>
    %54 = math.exp %53 : vector<8x384xf32>
    %cst_35 = arith.constant 1.000000e+00 : f32
    %55 = vector.broadcast %cst_35 : f32 to vector<8x384xf32>
    %56 = arith.addf %55, %54 : vector<8x384xf32>
    %57 = arith.divf %55, %56 : vector<8x384xf32>
    %58 = vector.extract_strided_slice %51 {offsets = [0, 384], sizes = [8, 128], strides = [1, 1]} : vector<8x512xf32> to vector<8x128xf32>
    %59 = math.tanh %58 : vector<8x128xf32>
    %60 = vector.extract_strided_slice %57 {offsets = [0, 0], sizes = [8, 128], strides = [1, 1]} : vector<8x384xf32> to vector<8x128xf32>
    %61 = vector.extract_strided_slice %57 {offsets = [0, 128], sizes = [8, 128], strides = [1, 1]} : vector<8x384xf32> to vector<8x128xf32>
    %62 = vector.extract_strided_slice %57 {offsets = [0, 256], sizes = [8, 128], strides = [1, 1]} : vector<8x384xf32> to vector<8x128xf32>
    %63 = arith.mulf %61, %44 : vector<8x128xf32>
    %64 = arith.mulf %60, %59 : vector<8x128xf32>
    %65 = arith.addf %63, %64 : vector<8x128xf32>
    %66 = math.tanh %65 : vector<8x128xf32>
    %67 = arith.mulf %62, %66 : vector<8x128xf32>
    %68 = tpu.concatenate %46, %17 in 1 : vector<8x128xf32>, vector<8x128xf32> -> vector<8x256xf32>
    %69 = arith.truncf %68 : vector<8x256xf32> to vector<8x256xbf16>
    %c0_36 = arith.constant 0 : index
    %c0_37 = arith.constant 0 : index
    %70 = vector.load %arg6[%c0_36, %c0_37] : memref<256x512xbf16, #tpu.memory_space<vmem>>, vector<256x512xbf16>
    %cst_38 = arith.constant dense<0.000000e+00> : vector<8x512xf32>
    %71 = tpu.matmul %69, %70, %cst_38 {dimension_numbers = #tpu.dot_dimension_numbers<[1], [0], [0], [1], [0, 0, 1, 1], [], []>} : vector<8x256xbf16>, vector<256x512xbf16>, vector<8x512xf32> -> vector<8x512xf32>
    %c0_39 = arith.constant 0 : index
    %c0_40 = arith.constant 0 : index
    %72 = vector.load %arg7[%c0_39, %c0_40] : memref<1x512xf32, #tpu.memory_space<vmem>>, vector<1x512xf32>
    %73 = vector.broadcast %72 : vector<1x512xf32> to vector<8x512xf32>
    %74 = arith.addf %71, %73 : vector<8x512xf32>
    %75 = vector.extract_strided_slice %74 {offsets = [0, 0], sizes = [8, 384], strides = [1, 1]} : vector<8x512xf32> to vector<8x384xf32>
    %76 = arith.negf %75 : vector<8x384xf32>
    %77 = math.exp %76 : vector<8x384xf32>
    %cst_41 = arith.constant 1.000000e+00 : f32
    %78 = vector.broadcast %cst_41 : f32 to vector<8x384xf32>
    %79 = arith.addf %78, %77 : vector<8x384xf32>
    %80 = arith.divf %78, %79 : vector<8x384xf32>
    %81 = vector.extract_strided_slice %74 {offsets = [0, 384], sizes = [8, 128], strides = [1, 1]} : vector<8x512xf32> to vector<8x128xf32>
    %82 = math.tanh %81 : vector<8x128xf32>
    %83 = vector.extract_strided_slice %80 {offsets = [0, 0], sizes = [8, 128], strides = [1, 1]} : vector<8x384xf32> to vector<8x128xf32>
    %84 = vector.extract_strided_slice %80 {offsets = [0, 128], sizes = [8, 128], strides = [1, 1]} : vector<8x384xf32> to vector<8x128xf32>
    %85 = vector.extract_strided_slice %80 {offsets = [0, 256], sizes = [8, 128], strides = [1, 1]} : vector<8x384xf32> to vector<8x128xf32>
    %86 = arith.mulf %84, %23 : vector<8x128xf32>
    %87 = arith.mulf %83, %82 : vector<8x128xf32>
    %88 = arith.addf %86, %87 : vector<8x128xf32>
    %89 = math.tanh %88 : vector<8x128xf32>
    %90 = arith.mulf %85, %89 : vector<8x128xf32>
    %c16 = arith.constant 16 : index
    %c0_42 = arith.constant 0 : index
    %91 = vector.load %arg15[%c16, %c0_42] : memref<32x512xf32, #tpu.memory_space<vmem>>, vector<8x512xf32>
    %92 = arith.truncf %67 : vector<8x128xf32> to vector<8x128xbf16>
    %c0_43 = arith.constant 0 : index
    %c0_44 = arith.constant 0 : index
    %93 = vector.load %arg5[%c0_43, %c0_44] : memref<128x512xbf16, #tpu.memory_space<vmem>>, vector<128x512xbf16>
    %cst_45 = arith.constant dense<0.000000e+00> : vector<8x512xf32>
    %94 = tpu.matmul %92, %93, %cst_45 {dimension_numbers = #tpu.dot_dimension_numbers<[1], [0], [0], [1], [0, 0, 1, 1], [], []>} : vector<8x128xbf16>, vector<128x512xbf16>, vector<8x512xf32> -> vector<8x512xf32>
    %95 = arith.addf %91, %94 : vector<8x512xf32>
    %96 = vector.extract_strided_slice %95 {offsets = [0, 0], sizes = [8, 384], strides = [1, 1]} : vector<8x512xf32> to vector<8x384xf32>
    %97 = arith.negf %96 : vector<8x384xf32>
    %98 = math.exp %97 : vector<8x384xf32>
    %cst_46 = arith.constant 1.000000e+00 : f32
    %99 = vector.broadcast %cst_46 : f32 to vector<8x384xf32>
    %100 = arith.addf %99, %98 : vector<8x384xf32>
    %101 = arith.divf %99, %100 : vector<8x384xf32>
    %102 = vector.extract_strided_slice %95 {offsets = [0, 384], sizes = [8, 128], strides = [1, 1]} : vector<8x512xf32> to vector<8x128xf32>
    %103 = math.tanh %102 : vector<8x128xf32>
    %104 = vector.extract_strided_slice %101 {offsets = [0, 0], sizes = [8, 128], strides = [1, 1]} : vector<8x384xf32> to vector<8x128xf32>
    %105 = vector.extract_strided_slice %101 {offsets = [0, 128], sizes = [8, 128], strides = [1, 1]} : vector<8x384xf32> to vector<8x128xf32>
    %106 = vector.extract_strided_slice %101 {offsets = [0, 256], sizes = [8, 128], strides = [1, 1]} : vector<8x384xf32> to vector<8x128xf32>
    %107 = arith.mulf %105, %65 : vector<8x128xf32>
    %108 = arith.mulf %104, %103 : vector<8x128xf32>
    %109 = arith.addf %107, %108 : vector<8x128xf32>
    %110 = math.tanh %109 : vector<8x128xf32>
    %111 = arith.mulf %106, %110 : vector<8x128xf32>
    %112 = tpu.concatenate %67, %90 in 1 : vector<8x128xf32>, vector<8x128xf32> -> vector<8x256xf32>
    %113 = arith.truncf %112 : vector<8x256xf32> to vector<8x256xbf16>
    %c0_47 = arith.constant 0 : index
    %c0_48 = arith.constant 0 : index
    %114 = vector.load %arg6[%c0_47, %c0_48] : memref<256x512xbf16, #tpu.memory_space<vmem>>, vector<256x512xbf16>
    %cst_49 = arith.constant dense<0.000000e+00> : vector<8x512xf32>
    %115 = tpu.matmul %113, %114, %cst_49 {dimension_numbers = #tpu.dot_dimension_numbers<[1], [0], [0], [1], [0, 0, 1, 1], [], []>} : vector<8x256xbf16>, vector<256x512xbf16>, vector<8x512xf32> -> vector<8x512xf32>
    %c0_50 = arith.constant 0 : index
    %c0_51 = arith.constant 0 : index
    %116 = vector.load %arg7[%c0_50, %c0_51] : memref<1x512xf32, #tpu.memory_space<vmem>>, vector<1x512xf32>
    %117 = vector.broadcast %116 : vector<1x512xf32> to vector<8x512xf32>
    %118 = arith.addf %115, %117 : vector<8x512xf32>
    %119 = vector.extract_strided_slice %118 {offsets = [0, 0], sizes = [8, 384], strides = [1, 1]} : vector<8x512xf32> to vector<8x384xf32>
    %120 = arith.negf %119 : vector<8x384xf32>
    %121 = math.exp %120 : vector<8x384xf32>
    %cst_52 = arith.constant 1.000000e+00 : f32
    %122 = vector.broadcast %cst_52 : f32 to vector<8x384xf32>
    %123 = arith.addf %122, %121 : vector<8x384xf32>
    %124 = arith.divf %122, %123 : vector<8x384xf32>
    %125 = vector.extract_strided_slice %118 {offsets = [0, 384], sizes = [8, 128], strides = [1, 1]} : vector<8x512xf32> to vector<8x128xf32>
    %126 = math.tanh %125 : vector<8x128xf32>
    %127 = vector.extract_strided_slice %124 {offsets = [0, 0], sizes = [8, 128], strides = [1, 1]} : vector<8x384xf32> to vector<8x128xf32>
    %128 = vector.extract_strided_slice %124 {offsets = [0, 128], sizes = [8, 128], strides = [1, 1]} : vector<8x384xf32> to vector<8x128xf32>
    %129 = vector.extract_strided_slice %124 {offsets = [0, 256], sizes = [8, 128], strides = [1, 1]} : vector<8x384xf32> to vector<8x128xf32>
    %130 = arith.mulf %128, %88 : vector<8x128xf32>
    %131 = arith.mulf %127, %126 : vector<8x128xf32>
    %132 = arith.addf %130, %131 : vector<8x128xf32>
    %133 = math.tanh %132 : vector<8x128xf32>
    %134 = arith.mulf %129, %133 : vector<8x128xf32>
    %135 = tpu.concatenate %90, %19 in 1 : vector<8x128xf32>, vector<8x128xf32> -> vector<8x256xf32>
    %136 = arith.truncf %135 : vector<8x256xf32> to vector<8x256xbf16>
    %c0_53 = arith.constant 0 : index
    %c0_54 = arith.constant 0 : index
    %137 = vector.load %arg8[%c0_53, %c0_54] : memref<256x512xbf16, #tpu.memory_space<vmem>>, vector<256x512xbf16>
    %cst_55 = arith.constant dense<0.000000e+00> : vector<8x512xf32>
    %138 = tpu.matmul %136, %137, %cst_55 {dimension_numbers = #tpu.dot_dimension_numbers<[1], [0], [0], [1], [0, 0, 1, 1], [], []>} : vector<8x256xbf16>, vector<256x512xbf16>, vector<8x512xf32> -> vector<8x512xf32>
    %c0_56 = arith.constant 0 : index
    %c0_57 = arith.constant 0 : index
    %139 = vector.load %arg9[%c0_56, %c0_57] : memref<1x512xf32, #tpu.memory_space<vmem>>, vector<1x512xf32>
    %140 = vector.broadcast %139 : vector<1x512xf32> to vector<8x512xf32>
    %141 = arith.addf %138, %140 : vector<8x512xf32>
    %142 = vector.extract_strided_slice %141 {offsets = [0, 0], sizes = [8, 384], strides = [1, 1]} : vector<8x512xf32> to vector<8x384xf32>
    %143 = arith.negf %142 : vector<8x384xf32>
    %144 = math.exp %143 : vector<8x384xf32>
    %cst_58 = arith.constant 1.000000e+00 : f32
    %145 = vector.broadcast %cst_58 : f32 to vector<8x384xf32>
    %146 = arith.addf %145, %144 : vector<8x384xf32>
    %147 = arith.divf %145, %146 : vector<8x384xf32>
    %148 = vector.extract_strided_slice %141 {offsets = [0, 384], sizes = [8, 128], strides = [1, 1]} : vector<8x512xf32> to vector<8x128xf32>
    %149 = math.tanh %148 : vector<8x128xf32>
    %150 = vector.extract_strided_slice %147 {offsets = [0, 0], sizes = [8, 128], strides = [1, 1]} : vector<8x384xf32> to vector<8x128xf32>
    %151 = vector.extract_strided_slice %147 {offsets = [0, 128], sizes = [8, 128], strides = [1, 1]} : vector<8x384xf32> to vector<8x128xf32>
    %152 = vector.extract_strided_slice %147 {offsets = [0, 256], sizes = [8, 128], strides = [1, 1]} : vector<8x384xf32> to vector<8x128xf32>
    %153 = arith.mulf %151, %25 : vector<8x128xf32>
    %154 = arith.mulf %150, %149 : vector<8x128xf32>
    %155 = arith.addf %153, %154 : vector<8x128xf32>
    %156 = math.tanh %155 : vector<8x128xf32>
    %157 = arith.mulf %152, %156 : vector<8x128xf32>
    %c0_59 = arith.constant 0 : index
    %c0_60 = arith.constant 0 : index
    %158 = vector.load %arg16[%c0_59, %c0_60] : memref<32x128xf32, #tpu.memory_space<vmem>>, vector<8x128xf32>
    tpu.vector_store %arg16[%c0_59, %c0_60], %157 {strides = array<i32>} : memref<32x128xf32, #tpu.memory_space<vmem>>, vector<8x128xf32>,
    %c24 = arith.constant 24 : index
    %c0_61 = arith.constant 0 : index
    %159 = vector.load %arg15[%c24, %c0_61] : memref<32x512xf32, #tpu.memory_space<vmem>>, vector<8x512xf32>
    %160 = arith.truncf %111 : vector<8x128xf32> to vector<8x128xbf16>
    %c0_62 = arith.constant 0 : index
    %c0_63 = arith.constant 0 : index
    %161 = vector.load %arg5[%c0_62, %c0_63] : memref<128x512xbf16, #tpu.memory_space<vmem>>, vector<128x512xbf16>
    %cst_64 = arith.constant dense<0.000000e+00> : vector<8x512xf32>
    %162 = tpu.matmul %160, %161, %cst_64 {dimension_numbers = #tpu.dot_dimension_numbers<[1], [0], [0], [1], [0, 0, 1, 1], [], []>} : vector<8x128xbf16>, vector<128x512xbf16>, vector<8x512xf32> -> vector<8x512xf32>
    %163 = arith.addf %159, %162 : vector<8x512xf32>
    %164 = vector.extract_strided_slice %163 {offsets = [0, 0], sizes = [8, 384], strides = [1, 1]} : vector<8x512xf32> to vector<8x384xf32>
    %165 = arith.negf %164 : vector<8x384xf32>
    %166 = math.exp %165 : vector<8x384xf32>
    %cst_65 = arith.constant 1.000000e+00 : f32
    %167 = vector.broadcast %cst_65 : f32 to vector<8x384xf32>
    %168 = arith.addf %167, %166 : vector<8x384xf32>
    %169 = arith.divf %167, %168 : vector<8x384xf32>
    %170 = vector.extract_strided_slice %163 {offsets = [0, 384], sizes = [8, 128], strides = [1, 1]} : vector<8x512xf32> to vector<8x128xf32>
    %171 = math.tanh %170 : vector<8x128xf32>
    %172 = vector.extract_strided_slice %169 {offsets = [0, 0], sizes = [8, 128], strides = [1, 1]} : vector<8x384xf32> to vector<8x128xf32>
    %173 = vector.extract_strided_slice %169 {offsets = [0, 128], sizes = [8, 128], strides = [1, 1]} : vector<8x384xf32> to vector<8x128xf32>
    %174 = vector.extract_strided_slice %169 {offsets = [0, 256], sizes = [8, 128], strides = [1, 1]} : vector<8x384xf32> to vector<8x128xf32>
    %175 = arith.mulf %173, %109 : vector<8x128xf32>
    %176 = arith.mulf %172, %171 : vector<8x128xf32>
    %177 = arith.addf %175, %176 : vector<8x128xf32>
    %178 = math.tanh %177 : vector<8x128xf32>
    %179 = arith.mulf %174, %178 : vector<8x128xf32>
    %180 = tpu.concatenate %111, %134 in 1 : vector<8x128xf32>, vector<8x128xf32> -> vector<8x256xf32>
    %181 = arith.truncf %180 : vector<8x256xf32> to vector<8x256xbf16>
    %c0_66 = arith.constant 0 : index
    %c0_67 = arith.constant 0 : index
    %182 = vector.load %arg6[%c0_66, %c0_67] : memref<256x512xbf16, #tpu.memory_space<vmem>>, vector<256x512xbf16>
    %cst_68 = arith.constant dense<0.000000e+00> : vector<8x512xf32>
    %183 = tpu.matmul %181, %182, %cst_68 {dimension_numbers = #tpu.dot_dimension_numbers<[1], [0], [0], [1], [0, 0, 1, 1], [], []>} : vector<8x256xbf16>, vector<256x512xbf16>, vector<8x512xf32> -> vector<8x512xf32>
    %c0_69 = arith.constant 0 : index
    %c0_70 = arith.constant 0 : index
    %184 = vector.load %arg7[%c0_69, %c0_70] : memref<1x512xf32, #tpu.memory_space<vmem>>, vector<1x512xf32>
    %185 = vector.broadcast %184 : vector<1x512xf32> to vector<8x512xf32>
    %186 = arith.addf %183, %185 : vector<8x512xf32>
    %187 = vector.extract_strided_slice %186 {offsets = [0, 0], sizes = [8, 384], strides = [1, 1]} : vector<8x512xf32> to vector<8x384xf32>
    %188 = arith.negf %187 : vector<8x384xf32>
    %189 = math.exp %188 : vector<8x384xf32>
    %cst_71 = arith.constant 1.000000e+00 : f32
    %190 = vector.broadcast %cst_71 : f32 to vector<8x384xf32>
    %191 = arith.addf %190, %189 : vector<8x384xf32>
    %192 = arith.divf %190, %191 : vector<8x384xf32>
    %193 = vector.extract_strided_slice %186 {offsets = [0, 384], sizes = [8, 128], strides = [1, 1]} : vector<8x512xf32> to vector<8x128xf32>
    %194 = math.tanh %193 : vector<8x128xf32>
    %195 = vector.extract_strided_slice %192 {offsets = [0, 0], sizes = [8, 128], strides = [1, 1]} : vector<8x384xf32> to vector<8x128xf32>
    %196 = vector.extract_strided_slice %192 {offsets = [0, 128], sizes = [8, 128], strides = [1, 1]} : vector<8x384xf32> to vector<8x128xf32>
    %197 = vector.extract_strided_slice %192 {offsets = [0, 256], sizes = [8, 128], strides = [1, 1]} : vector<8x384xf32> to vector<8x128xf32>
    %198 = arith.mulf %196, %132 : vector<8x128xf32>
    %199 = arith.mulf %195, %194 : vector<8x128xf32>
    %200 = arith.addf %198, %199 : vector<8x128xf32>
    %201 = math.tanh %200 : vector<8x128xf32>
    %202 = arith.mulf %197, %201 : vector<8x128xf32>
    %203 = tpu.concatenate %134, %157 in 1 : vector<8x128xf32>, vector<8x128xf32> -> vector<8x256xf32>
    %204 = arith.truncf %203 : vector<8x256xf32> to vector<8x256xbf16>
    %c0_72 = arith.constant 0 : index
    %c0_73 = arith.constant 0 : index
    %205 = vector.load %arg8[%c0_72, %c0_73] : memref<256x512xbf16, #tpu.memory_space<vmem>>, vector<256x512xbf16>
    %cst_74 = arith.constant dense<0.000000e+00> : vector<8x512xf32>
    %206 = tpu.matmul %204, %205, %cst_74 {dimension_numbers = #tpu.dot_dimension_numbers<[1], [0], [0], [1], [0, 0, 1, 1], [], []>} : vector<8x256xbf16>, vector<256x512xbf16>, vector<8x512xf32> -> vector<8x512xf32>
    %c0_75 = arith.constant 0 : index
    %c0_76 = arith.constant 0 : index
    %207 = vector.load %arg9[%c0_75, %c0_76] : memref<1x512xf32, #tpu.memory_space<vmem>>, vector<1x512xf32>
    %208 = vector.broadcast %207 : vector<1x512xf32> to vector<8x512xf32>
    %209 = arith.addf %206, %208 : vector<8x512xf32>
    %210 = vector.extract_strided_slice %209 {offsets = [0, 0], sizes = [8, 384], strides = [1, 1]} : vector<8x512xf32> to vector<8x384xf32>
    %211 = arith.negf %210 : vector<8x384xf32>
    %212 = math.exp %211 : vector<8x384xf32>
    %cst_77 = arith.constant 1.000000e+00 : f32
    %213 = vector.broadcast %cst_77 : f32 to vector<8x384xf32>
    %214 = arith.addf %213, %212 : vector<8x384xf32>
    %215 = arith.divf %213, %214 : vector<8x384xf32>
    %216 = vector.extract_strided_slice %209 {offsets = [0, 384], sizes = [8, 128], strides = [1, 1]} : vector<8x512xf32> to vector<8x128xf32>
    %217 = math.tanh %216 : vector<8x128xf32>
    %218 = vector.extract_strided_slice %215 {offsets = [0, 0], sizes = [8, 128], strides = [1, 1]} : vector<8x384xf32> to vector<8x128xf32>
    %219 = vector.extract_strided_slice %215 {offsets = [0, 128], sizes = [8, 128], strides = [1, 1]} : vector<8x384xf32> to vector<8x128xf32>
    %220 = vector.extract_strided_slice %215 {offsets = [0, 256], sizes = [8, 128], strides = [1, 1]} : vector<8x384xf32> to vector<8x128xf32>
    %221 = arith.mulf %219, %155 : vector<8x128xf32>
    %222 = arith.mulf %218, %217 : vector<8x128xf32>
    %223 = arith.addf %221, %222 : vector<8x128xf32>
    %224 = math.tanh %223 : vector<8x128xf32>
    %225 = arith.mulf %220, %224 : vector<8x128xf32>
    %c8_78 = arith.constant 8 : index
    %c0_79 = arith.constant 0 : index
    %226 = vector.load %arg16[%c8_78, %c0_79] : memref<32x128xf32, #tpu.memory_space<vmem>>, vector<8x128xf32>
    tpu.vector_store %arg16[%c8_78, %c0_79], %225 {strides = array<i32>} : memref<32x128xf32, #tpu.memory_space<vmem>>, vector<8x128xf32>,
    %227 = tpu.concatenate %179, %202 in 1 : vector<8x128xf32>, vector<8x128xf32> -> vector<8x256xf32>
    %228 = arith.truncf %227 : vector<8x256xf32> to vector<8x256xbf16>
    %c0_80 = arith.constant 0 : index
    %c0_81 = arith.constant 0 : index
    %229 = vector.load %arg6[%c0_80, %c0_81] : memref<256x512xbf16, #tpu.memory_space<vmem>>, vector<256x512xbf16>
    %cst_82 = arith.constant dense<0.000000e+00> : vector<8x512xf32>
    %230 = tpu.matmul %228, %229, %cst_82 {dimension_numbers = #tpu.dot_dimension_numbers<[1], [0], [0], [1], [0, 0, 1, 1], [], []>} : vector<8x256xbf16>, vector<256x512xbf16>, vector<8x512xf32> -> vector<8x512xf32>
    %c0_83 = arith.constant 0 : index
    %c0_84 = arith.constant 0 : index
    %231 = vector.load %arg7[%c0_83, %c0_84] : memref<1x512xf32, #tpu.memory_space<vmem>>, vector<1x512xf32>
    %232 = vector.broadcast %231 : vector<1x512xf32> to vector<8x512xf32>
    %233 = arith.addf %230, %232 : vector<8x512xf32>
    %234 = vector.extract_strided_slice %233 {offsets = [0, 0], sizes = [8, 384], strides = [1, 1]} : vector<8x512xf32> to vector<8x384xf32>
    %235 = arith.negf %234 : vector<8x384xf32>
    %236 = math.exp %235 : vector<8x384xf32>
    %cst_85 = arith.constant 1.000000e+00 : f32
    %237 = vector.broadcast %cst_85 : f32 to vector<8x384xf32>
    %238 = arith.addf %237, %236 : vector<8x384xf32>
    %239 = arith.divf %237, %238 : vector<8x384xf32>
    %240 = vector.extract_strided_slice %233 {offsets = [0, 384], sizes = [8, 128], strides = [1, 1]} : vector<8x512xf32> to vector<8x128xf32>
    %241 = math.tanh %240 : vector<8x128xf32>
    %242 = vector.extract_strided_slice %239 {offsets = [0, 0], sizes = [8, 128], strides = [1, 1]} : vector<8x384xf32> to vector<8x128xf32>
    %243 = vector.extract_strided_slice %239 {offsets = [0, 128], sizes = [8, 128], strides = [1, 1]} : vector<8x384xf32> to vector<8x128xf32>
    %244 = vector.extract_strided_slice %239 {offsets = [0, 256], sizes = [8, 128], strides = [1, 1]} : vector<8x384xf32> to vector<8x128xf32>
    %245 = arith.mulf %243, %200 : vector<8x128xf32>
    %246 = arith.mulf %242, %241 : vector<8x128xf32>
    %247 = arith.addf %245, %246 : vector<8x128xf32>
    %248 = math.tanh %247 : vector<8x128xf32>
    %249 = arith.mulf %244, %248 : vector<8x128xf32>
    %250 = tpu.concatenate %202, %225 in 1 : vector<8x128xf32>, vector<8x128xf32> -> vector<8x256xf32>
    %251 = arith.truncf %250 : vector<8x256xf32> to vector<8x256xbf16>
    %c0_86 = arith.constant 0 : index
    %c0_87 = arith.constant 0 : index
    %252 = vector.load %arg8[%c0_86, %c0_87] : memref<256x512xbf16, #tpu.memory_space<vmem>>, vector<256x512xbf16>
    %cst_88 = arith.constant dense<0.000000e+00> : vector<8x512xf32>
    %253 = tpu.matmul %251, %252, %cst_88 {dimension_numbers = #tpu.dot_dimension_numbers<[1], [0], [0], [1], [0, 0, 1, 1], [], []>} : vector<8x256xbf16>, vector<256x512xbf16>, vector<8x512xf32> -> vector<8x512xf32>
    %c0_89 = arith.constant 0 : index
    %c0_90 = arith.constant 0 : index
    %254 = vector.load %arg9[%c0_89, %c0_90] : memref<1x512xf32, #tpu.memory_space<vmem>>, vector<1x512xf32>
    %255 = vector.broadcast %254 : vector<1x512xf32> to vector<8x512xf32>
    %256 = arith.addf %253, %255 : vector<8x512xf32>
    %257 = vector.extract_strided_slice %256 {offsets = [0, 0], sizes = [8, 384], strides = [1, 1]} : vector<8x512xf32> to vector<8x384xf32>
    %258 = arith.negf %257 : vector<8x384xf32>
    %259 = math.exp %258 : vector<8x384xf32>
    %cst_91 = arith.constant 1.000000e+00 : f32
    %260 = vector.broadcast %cst_91 : f32 to vector<8x384xf32>
    %261 = arith.addf %260, %259 : vector<8x384xf32>
    %262 = arith.divf %260, %261 : vector<8x384xf32>
    %263 = vector.extract_strided_slice %256 {offsets = [0, 384], sizes = [8, 128], strides = [1, 1]} : vector<8x512xf32> to vector<8x128xf32>
    %264 = math.tanh %263 : vector<8x128xf32>
    %265 = vector.extract_strided_slice %262 {offsets = [0, 0], sizes = [8, 128], strides = [1, 1]} : vector<8x384xf32> to vector<8x128xf32>
    %266 = vector.extract_strided_slice %262 {offsets = [0, 128], sizes = [8, 128], strides = [1, 1]} : vector<8x384xf32> to vector<8x128xf32>
    %267 = vector.extract_strided_slice %262 {offsets = [0, 256], sizes = [8, 128], strides = [1, 1]} : vector<8x384xf32> to vector<8x128xf32>
    %268 = arith.mulf %266, %223 : vector<8x128xf32>
    %269 = arith.mulf %265, %264 : vector<8x128xf32>
    %270 = arith.addf %268, %269 : vector<8x128xf32>
    %271 = math.tanh %270 : vector<8x128xf32>
    %272 = arith.mulf %267, %271 : vector<8x128xf32>
    %c16_92 = arith.constant 16 : index
    %c0_93 = arith.constant 0 : index
    %273 = vector.load %arg16[%c16_92, %c0_93] : memref<32x128xf32, #tpu.memory_space<vmem>>, vector<8x128xf32>
    tpu.vector_store %arg16[%c16_92, %c0_93], %272 {strides = array<i32>} : memref<32x128xf32, #tpu.memory_space<vmem>>, vector<8x128xf32>,
    %274 = tpu.concatenate %249, %272 in 1 : vector<8x128xf32>, vector<8x128xf32> -> vector<8x256xf32>
    %275 = arith.truncf %274 : vector<8x256xf32> to vector<8x256xbf16>
    %c0_94 = arith.constant 0 : index
    %c0_95 = arith.constant 0 : index
    %276 = vector.load %arg8[%c0_94, %c0_95] : memref<256x512xbf16, #tpu.memory_space<vmem>>, vector<256x512xbf16>
    %cst_96 = arith.constant dense<0.000000e+00> : vector<8x512xf32>
    %277 = tpu.matmul %275, %276, %cst_96 {dimension_numbers = #tpu.dot_dimension_numbers<[1], [0], [0], [1], [0, 0, 1, 1], [], []>} : vector<8x256xbf16>, vector<256x512xbf16>, vector<8x512xf32> -> vector<8x512xf32>
    %c0_97 = arith.constant 0 : index
    %c0_98 = arith.constant 0 : index
    %278 = vector.load %arg9[%c0_97, %c0_98] : memref<1x512xf32, #tpu.memory_space<vmem>>, vector<1x512xf32>
    %279 = vector.broadcast %278 : vector<1x512xf32> to vector<8x512xf32>
    %280 = arith.addf %277, %279 : vector<8x512xf32>
    %281 = vector.extract_strided_slice %280 {offsets = [0, 0], sizes = [8, 384], strides = [1, 1]} : vector<8x512xf32> to vector<8x384xf32>
    %282 = arith.negf %281 : vector<8x384xf32>
    %283 = math.exp %282 : vector<8x384xf32>
    %cst_99 = arith.constant 1.000000e+00 : f32
    %284 = vector.broadcast %cst_99 : f32 to vector<8x384xf32>
    %285 = arith.addf %284, %283 : vector<8x384xf32>
    %286 = arith.divf %284, %285 : vector<8x384xf32>
    %287 = vector.extract_strided_slice %280 {offsets = [0, 384], sizes = [8, 128], strides = [1, 1]} : vector<8x512xf32> to vector<8x128xf32>
    %288 = math.tanh %287 : vector<8x128xf32>
    %289 = vector.extract_strided_slice %286 {offsets = [0, 0], sizes = [8, 128], strides = [1, 1]} : vector<8x384xf32> to vector<8x128xf32>
    %290 = vector.extract_strided_slice %286 {offsets = [0, 128], sizes = [8, 128], strides = [1, 1]} : vector<8x384xf32> to vector<8x128xf32>
    %291 = vector.extract_strided_slice %286 {offsets = [0, 256], sizes = [8, 128], strides = [1, 1]} : vector<8x384xf32> to vector<8x128xf32>
    %292 = arith.mulf %290, %270 : vector<8x128xf32>
    %293 = arith.mulf %289, %288 : vector<8x128xf32>
    %294 = arith.addf %292, %293 : vector<8x128xf32>
    %295 = math.tanh %294 : vector<8x128xf32>
    %296 = arith.mulf %291, %295 : vector<8x128xf32>
    %c24_100 = arith.constant 24 : index
    %c0_101 = arith.constant 0 : index
    %297 = vector.load %arg16[%c24_100, %c0_101] : memref<32x128xf32, #tpu.memory_space<vmem>>, vector<8x128xf32>
    tpu.vector_store %arg16[%c24_100, %c0_101], %296 {strides = array<i32>} : memref<32x128xf32, #tpu.memory_space<vmem>>, vector<8x128xf32>,
    %c0_102 = arith.constant 0 : index
    %c0_103 = arith.constant 0 : index
    %c0_104 = arith.constant 0 : index
    %298 = vector.load %arg13[%c0_102, %c0_103, %c0_104] : memref<3x8x128xf32, #tpu.memory_space<vmem>>, vector<1x8x128xf32>
    %299 = vector.shape_cast %298 : vector<1x8x128xf32> to vector<8x128xf32>
    %300 = vector.shape_cast %179 : vector<8x128xf32> to vector<1x8x128xf32>
    tpu.vector_store %arg13[%c0_102, %c0_103, %c0_104], %300 {strides = array<i32>} : memref<3x8x128xf32, #tpu.memory_space<vmem>>, vector<1x8x128xf32>,
    %c0_105 = arith.constant 0 : index
    %c0_106 = arith.constant 0 : index
    %c0_107 = arith.constant 0 : index
    %301 = vector.load %arg14[%c0_105, %c0_106, %c0_107] : memref<3x8x128xf32, #tpu.memory_space<vmem>>, vector<1x8x128xf32>
    %302 = vector.shape_cast %301 : vector<1x8x128xf32> to vector<8x128xf32>
    %303 = vector.shape_cast %177 : vector<8x128xf32> to vector<1x8x128xf32>
    tpu.vector_store %arg14[%c0_105, %c0_106, %c0_107], %303 {strides = array<i32>} : memref<3x8x128xf32, #tpu.memory_space<vmem>>, vector<1x8x128xf32>,
    %c1_108 = arith.constant 1 : index
    %c0_109 = arith.constant 0 : index
    %c0_110 = arith.constant 0 : index
    %304 = vector.load %arg13[%c1_108, %c0_109, %c0_110] : memref<3x8x128xf32, #tpu.memory_space<vmem>>, vector<1x8x128xf32>
    %305 = vector.shape_cast %304 : vector<1x8x128xf32> to vector<8x128xf32>
    %306 = vector.shape_cast %249 : vector<8x128xf32> to vector<1x8x128xf32>
    tpu.vector_store %arg13[%c1_108, %c0_109, %c0_110], %306 {strides = array<i32>} : memref<3x8x128xf32, #tpu.memory_space<vmem>>, vector<1x8x128xf32>,
    %c1_111 = arith.constant 1 : index
    %c0_112 = arith.constant 0 : index
    %c0_113 = arith.constant 0 : index
    %307 = vector.load %arg14[%c1_111, %c0_112, %c0_113] : memref<3x8x128xf32, #tpu.memory_space<vmem>>, vector<1x8x128xf32>
    %308 = vector.shape_cast %307 : vector<1x8x128xf32> to vector<8x128xf32>
    %309 = vector.shape_cast %247 : vector<8x128xf32> to vector<1x8x128xf32>
    tpu.vector_store %arg14[%c1_111, %c0_112, %c0_113], %309 {strides = array<i32>} : memref<3x8x128xf32, #tpu.memory_space<vmem>>, vector<1x8x128xf32>,
    %c2_114 = arith.constant 2 : index
    %c0_115 = arith.constant 0 : index
    %c0_116 = arith.constant 0 : index
    %310 = vector.load %arg13[%c2_114, %c0_115, %c0_116] : memref<3x8x128xf32, #tpu.memory_space<vmem>>, vector<1x8x128xf32>
    %311 = vector.shape_cast %310 : vector<1x8x128xf32> to vector<8x128xf32>
    %312 = vector.shape_cast %296 : vector<8x128xf32> to vector<1x8x128xf32>
    tpu.vector_store %arg13[%c2_114, %c0_115, %c0_116], %312 {strides = array<i32>} : memref<3x8x128xf32, #tpu.memory_space<vmem>>, vector<1x8x128xf32>,
    %c2_117 = arith.constant 2 : index
    %c0_118 = arith.constant 0 : index
    %c0_119 = arith.constant 0 : index
    %313 = vector.load %arg14[%c2_117, %c0_118, %c0_119] : memref<3x8x128xf32, #tpu.memory_space<vmem>>, vector<1x8x128xf32>
    %314 = vector.shape_cast %313 : vector<1x8x128xf32> to vector<8x128xf32>
    %315 = vector.shape_cast %294 : vector<8x128xf32> to vector<1x8x128xf32>
    tpu.vector_store %arg14[%c2_117, %c0_118, %c0_119], %315 {strides = array<i32>} : memref<3x8x128xf32, #tpu.memory_space<vmem>>, vector<1x8x128xf32>,
    %c0_120 = arith.constant 0 : index
    %c0_121 = arith.constant 0 : index
    %316 = vector.load %arg16[%c0_120, %c0_121] : memref<32x128xf32, #tpu.memory_space<vmem>>, vector<32x128xf32>
    %317 = arith.truncf %316 : vector<32x128xf32> to vector<32x128xbf16>
    %c0_122 = arith.constant 0 : index
    %c0_123 = arith.constant 0 : index
    %318 = vector.load %arg10[%c0_122, %c0_123] : memref<128x128xbf16, #tpu.memory_space<vmem>>, vector<128x128xbf16>
    %cst_124 = arith.constant dense<0.000000e+00> : vector<32x128xf32>
    %319 = tpu.matmul %317, %318, %cst_124 {dimension_numbers = #tpu.dot_dimension_numbers<[1], [0], [0], [1], [0, 0, 1, 1], [], []>} : vector<32x128xbf16>, vector<128x128xbf16>, vector<32x128xf32> -> vector<32x128xf32>
    %c0_125 = arith.constant 0 : index
    %c0_126 = arith.constant 0 : index
    %320 = vector.load %arg11[%c0_125, %c0_126] : memref<1x128xf32, #tpu.memory_space<vmem>>, vector<1x128xf32>
    %321 = vector.broadcast %320 : vector<1x128xf32> to vector<32x128xf32>
    %322 = arith.addf %319, %321 : vector<32x128xf32>
    %c0_127 = arith.constant 0 : index
    %c0_128 = arith.constant 0 : index
    %323 = vector.load %arg12[%c0_127, %c0_128] : memref<32x128xf32, #tpu.memory_space<vmem>>, vector<32x128xf32>
    tpu.vector_store %arg12[%c0_127, %c0_128], %322 {strides = array<i32>} : memref<32x128xf32, #tpu.memory_space<vmem>>, vector<32x128xf32>,
    return
  }
}

</mosaic_0001>

<bundles_post_ra>
// kernel: tpu_custom_call.1
= control target key start
LH: loop header
LB: loop body
LE: loop exit
PB: predicated region body
PF: predicated region fallthrough
CT: control target
= control target key end

     0   :  { %20 = vsyncpa [#allocation5], 0  ;;  %s10260_s0 = inlined_call_operand.vmem [shape: s32[32,1], index: 0, kind: input, shape index: {}]   ;;  %s10261_s1 = inlined_call_operand.hbm [shape: f32[3,8,128], index: 1, kind: input, shape index: {}, may-alias: {1,13}]   ;;  %s10262_s2 = inlined_call_operand.hbm [shape: f32[3,8,128], index: 2, kind: input, shape index: {}, may-alias: {2,14}]   ;;  %s10263_s3 = inlined_call_operand.hbm [shape: bf16[128,512], index: 3, kind: input, shape index: {}]   ;;  %s10264_s4 = inlined_call_operand.vmem [shape: f32[1,512], index: 4, kind: input, shape index: {}]   ;;  %s10265_s5 = inlined_call_operand.hbm [shape: bf16[128,512], index: 5, kind: input, shape index: {}]   ;;  %s10266_s6 = inlined_call_operand.hbm [shape: bf16[256,512], index: 6, kind: input, shape index: {}]   ;;  %s10267_s7 = inlined_call_operand.vmem [shape: f32[1,512], index: 7, kind: input, shape index: {}]   ;;  %s10268_s8 = inlined_call_operand.hbm [shape: bf16[256,512], index: 8, kind: input, shape index: {}]   ;;  %s10269_s9 = inlined_call_operand.vmem [shape: f32[1,512], index: 9, kind: input, shape index: {}]   ;;  %s10270_s10 = inlined_call_operand.vmem [shape: bf16[128,128], index: 10, kind: input, shape index: {}]   ;;  %s10271_s11 = inlined_call_operand.vmem [shape: f32[1,128], index: 11, kind: input, shape index: {}]   ;;  %s10272_s12 = inlined_call_operand.hbm [shape: f32[32,128], index: 12, kind: output, shape index: {0}]   ;;  %s10273_s13 = inlined_call_operand.hbm [shape: f32[3,8,128], index: 13, kind: output, shape index: {1}, may-alias: {1,13}]   ;;  %s10274_s14 = inlined_call_operand.hbm [shape: f32[3,8,128], index: 14, kind: output, shape index: {2}, may-alias: {2,14}]  }
   0x1   :  { %21 = vsyncpa [#allocation8], 0 }
   0x2   :  { %22 = vsyncpa [#allocation11], 0 }
   0x3   :  { %23 = vsyncpa [#allocation14], 0 }
   0x4   :  { %24 = vsyncpa [#allocation6], 0 }
   0x5   :  { %25 = vsyncpa [#allocation17], 0  ;;  %s45_s15 = sshll.u32 %s10262_s2, 4  ;;  %s8874_s16 = smov [#allocation7]   ;;  %s46_s15 = int_to_ptr.hbm [resolvable:$true] %s45_s15 }
   0x6   :  { %s47_s17 = sshll.u32 %s8874_s16, 4  ;;  %s8875_s18 = smov 128   ;;  %s48_s17 = int_to_ptr.vmem [resolvable:$true] %s47_s17 }
   0x7   :  { %s8876_s19 = smov 8   ;;  %s73_s22 = sshll.u32 %s10265_s5, 4  ;;  %s74_s22 = int_to_ptr.hbm [resolvable:$true] %s73_s22 }
   0x8   :  { %53 = dma.hbm_to_vmem [thread:$0]  %s46_s15, 384, %s48_s17, [#allocation8], %s8875_s18, %s8875_s18, %s8876_s19  }
   0x9   :  { %s8877_s23 = smov [#allocation10]   ;;  %s32_s2 = sshll.u32 %s10261_s1, 4  ;;  %s33_s2 = int_to_ptr.hbm [resolvable:$true] %s32_s2 }
   0xa   :  { %s75_s24 = sshll.u32 %s8877_s23, 4  ;;  %s8878_s27 = smov 256   ;;  %s76_s24 = int_to_ptr.vmem [resolvable:$true] %s75_s24 }
   0xb   :  { %s8879_s28 = smov 16   ;;  %s58_s15 = sshll.u32 %s10263_s3, 4  ;;  %s59_s15 = int_to_ptr.hbm [resolvable:$true] %s58_s15 }
   0xc   :  { %81 = dma.hbm_to_vmem [thread:$0]  %s74_s22, 4096, %s76_s24, [#allocation11], %s8878_s27, %s8878_s27, %s8879_s28  }
   0xd   :  { %s8880_s16 = smov [#allocation4]   ;;  %s8881_s5 = smov [#allocation9]  }
   0xe   :  { %s34_s17 = sshll.u32 %s8880_s16, 4  ;;  %s60_s20 = sshll.u32 %s8881_s5, 4  ;;  %s35_s17 = int_to_ptr.vmem [resolvable:$true] %s34_s17  ;;  %s61_s20 = int_to_ptr.vmem [resolvable:$true] %s60_s20 }
   0xf   :  { %40 = dma.hbm_to_vmem [thread:$0]  %s33_s2, 384, %s35_s17, [#allocation5], %s8875_s18, %s8875_s18, %s8876_s19  }
  0x10   :  { %s86_s23 = sshll.u32 %s10266_s6, 4  ;;  %s101_s3 = sshll.u32 %s10268_s8, 4  ;;  %s87_s23 = int_to_ptr.hbm [resolvable:$true] %s86_s23  ;;  %s102_s3 = int_to_ptr.hbm [resolvable:$true] %s101_s3 }
  0x11   :  { %66 = dma.hbm_to_vmem [thread:$0]  %s59_s15, 4096, %s61_s20, [#allocation8], %s8878_s27, %s8878_s27, %s8879_s28  }
  0x12   :  { %s8882_s25 = smov [#allocation12]   ;;  %s8883_s29 = smov [#allocation13]  }
  0x13   :  { %s88_s26 = sshll.u32 %s8882_s25, 4  ;;  %s103_s2 = sshll.u32 %s8883_s29, 4  ;;  %s89_s26 = int_to_ptr.vmem [resolvable:$true] %s88_s26  ;;  %s104_s2 = int_to_ptr.vmem [resolvable:$true] %s103_s2 }
  0x14   :  { %94 = dma.hbm_to_vmem [thread:$0]  %s87_s23, 8192, %s89_s26, [#allocation11], %s8878_s27, %s8878_s27, %s8879_s28  }
  0x15   :  { %109 = dma.hbm_to_vmem [thread:$0]  %s102_s3, 8192, %s104_s2, [#allocation14], %s8878_s27, %s8878_s27, %s8879_s28  }
  0x16   :  { %8862 = dma.done.wait [#allocation5], 384  }
  0x17   :  { %8863 = vsyncadd [#allocation5], 4294966912 }
  0x18   :  { %8864 = dma.done.wait [#allocation8], 4480  }
  0x19   :  { %8865 = vsyncadd [#allocation8], 4294962816 }
  0x1a   :  { %8866 = dma.done.wait [#allocation11], 12288  }
  0x1b   :  { %8867 = vsyncadd [#allocation11], 4294955008 }
  0x1c   :  { %8868 = dma.done.wait [#allocation14], 8192  }
  0x1d   :  { %8869 = vsyncadd [#allocation14], 4294959104  ;;  %v8884_v0 = vmov 0   ;;  %v140_v1 = vld [vmem:[%s10260_s0] sm:$0xff]  ;;  %v142_v2 = vld [vmem:[%s10260_s0 + $0x10] sm:$0xff]  ;;  %s8887_s29 = smov [#allocation18]  }
  0x1e   :  { %8451 = vset.pattern.permute.xlu0 %v8884_v0  ;;  %8452 = vset.pattern.permute.xlu1 %v8884_v0  ;;  %v5738_v3 = vld [vmem:[#allocation9 + $0xe0] sm:$0xf]  ;;  %v7914_v4 = vld [vmem:[#allocation9 + $0xec] sm:$0xf0]  ;;  %v5746_v6 = vld [vmem:[#allocation9 + $0xe8] sm:$0xf] }
  0x1f   :  { %147 = vperm.xlu0 %8451, %v140_v1   ;;  %153 = vperm.xlu1 %8452, %v142_v2   ;;  %v5739_v5 = vor.u32 %v7914_v4, %v5738_v3  ;;  %v7915_v7 = vld [vmem:[#allocation9 + $0xf4] sm:$0xf0]  ;;  %v7913_v8 = vld [vmem:[#allocation9 + $0xec] sm:$0xf]  ;;  %v5748_v10 = vld [vmem:[#allocation9 + $0xf8] sm:$0xf0] }
  0x20   :  { %v5747_v9 = vor.u32 %v7915_v7, %v5746_v6  ;;  %v5882_v11 = vld [vmem:[#allocation10 + $0xe0] sm:$0xf]  ;;  %v7946_v12 = vld [vmem:[#allocation10 + $0xec] sm:$0xf0]  ;;  %v141_v13 = vld [vmem:[%s10260_s0 + $0x8] sm:$0xff]  ;;  %v5751_v15 = vor.u32 %v7913_v8, %v5748_v10  ;;  %s5597_s2 = sshll.u32 %s8887_s29, 4  ;;  %s5598_s2 = int_to_ptr.vmem [resolvable:$true] %s5597_s2 }
  0x21   :  { %v143_v14 = vld [vmem:[%s10260_s0 + $0x18] sm:$0xff]  ;;  %370 = vmatpush.bf16.msra.mxu1 %v5739_v5  ;;  %v9000_v16 = vor.u32 %v7946_v12, %v5882_v11  ;;  %v5722_v17 = vld [vmem:[#allocation9 + $0xc0] sm:$0xf]  ;;  %v7910_v18 = vld [vmem:[#allocation9 + $0xcc] sm:$0xf0]  ;;  %s5599_s30 = sshll.u32 %s10274_s14, 4  ;;  %s5600_s30 = int_to_ptr.hbm [resolvable:$true] %s5599_s30 }
  0x22   :  { %v5730_v19 = vld [vmem:[#allocation9 + $0xc8] sm:$0xf]  ;;  %408 = vmatpush.bf16.msra.mxu2 %v5747_v9  ;;  %v5723_v20 = vor.u32 %v7910_v18, %v5722_v17  ;;  %v7911_v21 = vld [vmem:[#allocation9 + $0xd4] sm:$0xf0]  ;;  %v7909_v22 = vld [vmem:[#allocation9 + $0xcc] sm:$0xf]  ;;  %427 = vmatpush.bf16.msra.mxu3 %v5751_v15 }
  0x23   :  { %v5732_v23 = vld [vmem:[#allocation9 + $0xd8] sm:$0xf0]  ;;  %669 = vmatpush.bf16.msra.mxu0 %v9000_v16  ;;  %v5731_v24 = vor.u32 %v7911_v21, %v5730_v19  ;;  %v5866_v26 = vld [vmem:[#allocation10 + $0xc0] sm:$0xf]  ;;  %v7942_v27 = vld [vmem:[#allocation10 + $0xcc] sm:$0xf0] }
  0x24   :  { %v5735_v25 = vor.u32 %v7909_v22, %v5732_v23  ;;  %v5706_v28 = vld [vmem:[#allocation9 + $0xa0] sm:$0xf]  ;;  %v9003_v29 = vor.u32 %v7942_v27, %v5866_v26  ;;  %v7906_v30 = vld [vmem:[#allocation9 + $0xac] sm:$0xf0]  ;;  %v5714_v31 = vld [vmem:[#allocation9 + $0xa8] sm:$0xf] }
  0x25   :  { %v7907_v32 = vld [vmem:[#allocation9 + $0xb4] sm:$0xf0]  ;;  %371 = vmatpush.bf16.msra.mxu1 %v5723_v20  ;;  %v5707_v33 = vor.u32 %v7906_v30, %v5706_v28  ;;  %v7905_v34 = vld [vmem:[#allocation9 + $0xac] sm:$0xf]  ;;  %v5716_v35 = vld [vmem:[#allocation9 + $0xb8] sm:$0xf0] }
  0x26   :  { %v5850_v36 = vld [vmem:[#allocation10 + $0xa0] sm:$0xf]  ;;  %v7938_v37 = vld [vmem:[#allocation10 + $0xac] sm:$0xf0]  ;;  %409 = vmatpush.bf16.msra.mxu2 %v5731_v24  ;;  %428 = vmatpush.bf16.msra.mxu3 %v5735_v25  ;;  %v5715_v40 = vor.u32 %v7907_v32, %v5714_v31  ;;  %v5719_v41 = vor.u32 %v7905_v34, %v5716_v35  ;;  %v5698_v42 = vld [vmem:[#allocation9 + $0x88] sm:$0xf] }
  0x27   :  { %150 = vperm.xlu0 %8451, %v141_v13   ;;  %156 = vperm.xlu1 %8452, %v143_v14   ;;  %v5690_v38 = vld [vmem:[#allocation9 + $0x80] sm:$0xf]  ;;  %v7902_v39 = vld [vmem:[#allocation9 + $0x8c] sm:$0xf0]  ;;  %v9006_v43 = vor.u32 %v7938_v37, %v5850_v36  ;;  %v7903_v44 = vld [vmem:[#allocation9 + $0x94] sm:$0xf0] }
  0x28   :  { %670 = vmatpush.bf16.msra.mxu0 %v9003_v29  ;;  %v7901_v45 = vld [vmem:[#allocation9 + $0x8c] sm:$0xf]  ;;  %v5700_v46 = vld [vmem:[#allocation9 + $0x98] sm:$0xf0]  ;;  %v5691_v47 = vor.u32 %v7902_v39, %v5690_v38  ;;  %v5834_v48 = vld [vmem:[#allocation10 + $0x80] sm:$0xf]  ;;  %v5699_v52 = vor.u32 %v7903_v44, %v5698_v42 }
  0x29   :  { %372 = vmatpush.bf16.msra.mxu1 %v5707_v33  ;;  %v7934_v49 = vld [vmem:[#allocation10 + $0x8c] sm:$0xf0]  ;;  %v5674_v50 = vld [vmem:[#allocation9 + $0x60] sm:$0xf]  ;;  %v5703_v53 = vor.u32 %v7901_v45, %v5700_v46  ;;  %v5682_v54 = vld [vmem:[#allocation9 + $0x68] sm:$0xf] }
  0x2a   :  { %v7898_v51 = vld [vmem:[#allocation9 + $0x6c] sm:$0xf0]  ;;  %410 = vmatpush.bf16.msra.mxu2 %v5715_v40  ;;  %429 = vmatpush.bf16.msra.mxu3 %v5719_v41  ;;  %v9009_v55 = vor.u32 %v7934_v49, %v5834_v48  ;;  %v7899_v56 = vld [vmem:[#allocation9 + $0x74] sm:$0xf0]  ;;  %v7897_v57 = vld [vmem:[#allocation9 + $0x6c] sm:$0xf] }
  0x2b   :  { %v5684_v58 = vld [vmem:[#allocation9 + $0x78] sm:$0xf0]  ;;  %v5675_v59 = vor.u32 %v7898_v51, %v5674_v50  ;;  %v5818_v60 = vld [vmem:[#allocation10 + $0x60] sm:$0xf]  ;;  %v7930_v61 = vld [vmem:[#allocation10 + $0x6c] sm:$0xf0]  ;;  %v5683_v0 = vor.u32 %v7899_v56, %v5682_v54 }
  0x2c   :  { %671 = vmatpush.bf16.msra.mxu0 %v9006_v43  ;;  %v5658_v62 = vld [vmem:[#allocation9 + $0x40] sm:$0xf]  ;;  %v7894_v63 = vld [vmem:[#allocation9 + $0x4c] sm:$0xf0]  ;;  %v5687_v1 = vor.u32 %v7897_v57, %v5684_v58  ;;  %v5666_v2 = vld [vmem:[#allocation9 + $0x48] sm:$0xf]  ;;  %v9012_v3 = vor.u32 %v7930_v61, %v5818_v60 }
  0x2d   :  { %373 = vmatpush.bf16.msra.mxu1 %v5691_v47  ;;  %v7895_v4 = vld [vmem:[#allocation9 + $0x54] sm:$0xf0]  ;;  %v7893_v5 = vld [vmem:[#allocation9 + $0x4c] sm:$0xf]  ;;  %v5668_v6 = vld [vmem:[#allocation9 + $0x58] sm:$0xf0]  ;;  %v5659_v7 = vor.u32 %v7894_v63, %v5658_v62 }
  0x2e   :  { %411 = vmatpush.bf16.msra.mxu2 %v5699_v52  ;;  %430 = vmatpush.bf16.msra.mxu3 %v5703_v53  ;;  %v5667_v8 = vor.u32 %v7895_v4, %v5666_v2  ;;  %v5671_v9 = vor.u32 %v7893_v5, %v5668_v6  ;;  %v5802_v10 = vld [vmem:[#allocation10 + $0x40] sm:$0xf]  ;;  %v7926_v11 = vld [vmem:[#allocation10 + $0x4c] sm:$0xf0]  ;;  %v5650_v15 = vld [vmem:[#allocation9 + $0x28] sm:$0xf] }
  0x2f   :  { %v9015_v12 = vor.u32 %v7926_v11, %v5802_v10  ;;  %v5642_v13 = vld [vmem:[#allocation9 + $0x20] sm:$0xf]  ;;  %v7890_v14 = vld [vmem:[#allocation9 + $0x2c] sm:$0xf0]  ;;  %v7891_v18 = vld [vmem:[#allocation9 + $0x34] sm:$0xf0] }
  0x30   :  { %672 = vmatpush.bf16.msra.mxu0 %v9009_v55  ;;  %v5643_v17 = vor.u32 %v7890_v14, %v5642_v13  ;;  %v7889_v19 = vld [vmem:[#allocation9 + $0x2c] sm:$0xf]  ;;  %v5652_v20 = vld [vmem:[#allocation9 + $0x38] sm:$0xf0]  ;;  %v5651_v21 = vor.u32 %v7891_v18, %v5650_v15  ;;  %v5786_v23 = vld [vmem:[#allocation10 + $0x20] sm:$0xf] }
  0x31   :  { %374 = vmatpush.bf16.msra.mxu1 %v5675_v59  ;;  %v5655_v22 = vor.u32 %v7889_v19, %v5652_v20  ;;  %v7922_v24 = vld [vmem:[#allocation10 + $0x2c] sm:$0xf0]  ;;  %v5626_v25 = vld [vmem:[#allocation9] sm:$0xf]  ;;  %v5634_v28 = vld [vmem:[#allocation9 + $0x8] sm:$0xf] }
  0x32   :  { %412 = vmatpush.bf16.msra.mxu2 %v5683_v0  ;;  %431 = vmatpush.bf16.msra.mxu3 %v5687_v1  ;;  %v9018_v26 = vor.u32 %v7922_v24, %v5786_v23  ;;  %v7886_v27 = vld [vmem:[#allocation9 + $0xc] sm:$0xf0]  ;;  %v7887_v30 = vld [vmem:[#allocation9 + $0x14] sm:$0xf0]  ;;  %v7885_v33 = vld [vmem:[#allocation9 + $0xc] sm:$0xf] }
  0x33   :  { %v5627_v31 = vor.u32 %v7886_v27, %v5626_v25  ;;  %v5635_v32 = vor.u32 %v7887_v30, %v5634_v28  ;;  %v5636_v34 = vld [vmem:[#allocation9 + $0x18] sm:$0xf0]  ;;  %v5770_v36 = vld [vmem:[#allocation10] sm:$0xf]  ;;  %v7918_v37 = vld [vmem:[#allocation10 + $0xc] sm:$0xf0] }
  0x34   :  { %673 = vmatpush.bf16.msra.mxu0 %v9012_v3  ;;  %v5639_v35 = vor.u32 %v7885_v33, %v5636_v34  ;;  %v9021_v38 = vor.u32 %v7918_v37, %v5770_v36  ;;  %v7912_v39 = vld [vmem:[#allocation9 + $0xe4] sm:$0xf]  ;;  %v5740_v40 = vld [vmem:[#allocation9 + $0xf0] sm:$0xf0]  ;;  %v5890_v42 = vld [vmem:[#allocation10 + $0xe8] sm:$0xf] }
  0x35   :  { %375 = vmatpush.bf16.msra.mxu1 %v5659_v7  ;;  %v5743_v41 = vor.u32 %v7912_v39, %v5740_v40  ;;  %v7947_v44 = vld [vmem:[#allocation10 + $0xf4] sm:$0xf0]  ;;  %v7945_v45 = vld [vmem:[#allocation10 + $0xec] sm:$0xf]  ;;  %v5892_v47 = vld [vmem:[#allocation10 + $0xf8] sm:$0xf0] }
  0x36   :  { %413 = vmatpush.bf16.msra.mxu2 %v5667_v8  ;;  %432 = vmatpush.bf16.msra.mxu3 %v5671_v9  ;;  %v9025_v46 = vor.u32 %v7947_v44, %v5890_v42  ;;  %v462_v48 = vld [vmem:[#allocation4] sm:$0xff]  ;;  %v7908_v49 = vld [vmem:[#allocation9 + $0xc4] sm:$0xf]  ;;  %v9027_v50 = vor.u32 %v7945_v45, %v5892_v47  ;;  %v5874_v53 = vld [vmem:[#allocation10 + $0xc8] sm:$0xf]  ;;  %s5573_s16 = sshll.u32 %s10272_s12, 4  ;;  %s5574_s16 = int_to_ptr.hbm [resolvable:$true] %s5573_s16 }
  0x37   :  { %v9029_v51 = vpack.c.bf16 %v462_v48, %v462_v48  ;;  %v5724_v52 = vld [vmem:[#allocation9 + $0xd0] sm:$0xf0]  ;;  %v7943_v54 = vld [vmem:[#allocation10 + $0xd4] sm:$0xf0]  ;;  %v7941_v58 = vld [vmem:[#allocation10 + $0xcc] sm:$0xf]  ;;  %v144_v48 = vlaneseq }
  0x38   :  { %674 = vmatpush.bf16.msra.mxu0 %v9015_v12  ;;  %v5727_v56 = vor.u32 %v7908_v49, %v5724_v52  ;;  %v9032_v57 = vor.u32 %v7943_v54, %v5874_v53  ;;  %v5876_v59 = vld [vmem:[#allocation10 + $0xd8] sm:$0xf0]  ;;  %v7904_v60 = vld [vmem:[#allocation9 + $0xa4] sm:$0xf]  ;;  %v5708_v62 = vld [vmem:[#allocation9 + $0xb0] sm:$0xf0] }
  0x39   :  { %376 = vmatpush.bf16.msra.mxu1 %v5643_v17  ;;  %v9036_v61 = vor.u32 %v7941_v58, %v5876_v59  ;;  %v5858_v63 = vld [vmem:[#allocation10 + $0xa8] sm:$0xf]  ;;  %v7939_v0 = vld [vmem:[#allocation10 + $0xb4] sm:$0xf0]  ;;  %v7937_v1 = vld [vmem:[#allocation10 + $0xac] sm:$0xf]  ;;  %v5711_v4 = vor.u32 %v7904_v60, %v5708_v62 }
  0x3a   :  { %414 = vmatpush.bf16.msra.mxu2 %v5651_v21  ;;  %433 = vmatpush.bf16.msra.mxu3 %v5655_v22  ;;  %v5860_v2 = vld [vmem:[#allocation10 + $0xb8] sm:$0xf0]  ;;  %v9040_v5 = vor.u32 %v7939_v0, %v5858_v63  ;;  %v7900_v6 = vld [vmem:[#allocation9 + $0x84] sm:$0xf]  ;;  %v5692_v7 = vld [vmem:[#allocation9 + $0x90] sm:$0xf0] }
  0x3b   :  { %v9043_v8 = vor.u32 %v7937_v1, %v5860_v2  ;;  %v5842_v9 = vld [vmem:[#allocation10 + $0x88] sm:$0xf]  ;;  %v7935_v10 = vld [vmem:[#allocation10 + $0x94] sm:$0xf0]  ;;  %v7933_v11 = vld [vmem:[#allocation10 + $0x8c] sm:$0xf]  ;;  %v5695_v14 = vor.u32 %v7900_v6, %v5692_v7 }
  0x3c   :  { %675 = vmatpush.bf16.msra.mxu0 %v9018_v26  ;;  %v5844_v13 = vld [vmem:[#allocation10 + $0x98] sm:$0xf0]  ;;  %v9047_v15 = vor.u32 %v7935_v10, %v5842_v9  ;;  %v7896_v18 = vld [vmem:[#allocation9 + $0x64] sm:$0xf]  ;;  %v5676_v19 = vld [vmem:[#allocation9 + $0x70] sm:$0xf0] }
  0x3d   :  { %377 = vmatpush.bf16.msra.mxu1 %v5627_v31  ;;  %v9050_v17 = vor.u32 %v7933_v11, %v5844_v13  ;;  %v5826_v20 = vld [vmem:[#allocation10 + $0x68] sm:$0xf]  ;;  %v5679_v21 = vor.u32 %v7896_v18, %v5676_v19  ;;  %v7931_v22 = vld [vmem:[#allocation10 + $0x74] sm:$0xf0]  ;;  %v7929_v23 = vld [vmem:[#allocation10 + $0x6c] sm:$0xf] }
  0x3e   :  { %415 = vmatpush.bf16.msra.mxu2 %v5635_v32  ;;  %434 = vmatpush.bf16.msra.mxu3 %v5639_v35  ;;  %v5828_v24 = vld [vmem:[#allocation10 + $0x78] sm:$0xf0]  ;;  %v9055_v25 = vor.u32 %v7931_v22, %v5826_v20  ;;  %v7892_v28 = vld [vmem:[#allocation9 + $0x44] sm:$0xf]  ;;  %v5660_v30 = vld [vmem:[#allocation9 + $0x50] sm:$0xf0] }
  0x3f   :  { %v9057_v27 = vor.u32 %v7929_v23, %v5828_v24  ;;  %v5810_v31 = vld [vmem:[#allocation10 + $0x48] sm:$0xf]  ;;  %v5663_v32 = vor.u32 %v7892_v28, %v5660_v30  ;;  %v7927_v33 = vld [vmem:[#allocation10 + $0x54] sm:$0xf0]  ;;  %v7925_v34 = vld [vmem:[#allocation10 + $0x4c] sm:$0xf] }
  0x40   :  { %676 = vmatpush.bf16.msra.mxu0 %v9021_v38  ;;  %v5812_v35 = vld [vmem:[#allocation10 + $0x58] sm:$0xf0]  ;;  %v9061_v36 = vor.u32 %v7927_v33, %v5810_v31  ;;  %v7888_v37 = vld [vmem:[#allocation9 + $0x24] sm:$0xf]  ;;  %v5644_v39 = vld [vmem:[#allocation9 + $0x30] sm:$0xf0] }
  0x41   :  { %389 = vmatpush.bf16.msrb.mxu1 %v5743_v41  ;;  %v9064_v40 = vor.u32 %v7925_v34, %v5812_v35  ;;  %v5794_v41 = vld [vmem:[#allocation10 + $0x28] sm:$0xf]  ;;  %v7923_v42 = vld [vmem:[#allocation10 + $0x34] sm:$0xf0]  ;;  %v7921_v45 = vld [vmem:[#allocation10 + $0x2c] sm:$0xf]  ;;  %v5647_v49 = vor.u32 %v7888_v37, %v5644_v39 }
  0x42   :  { %695 = vmatpush.bf16.msrb.mxu2 %v9025_v46  ;;  %708 = vmatpush.bf16.msrb.mxu3 %v9027_v50  ;;  %v5796_v47 = vld [vmem:[#allocation10 + $0x38] sm:$0xf0]  ;;  %v9068_v52 = vor.u32 %v7923_v42, %v5794_v41  ;;  %v7884_v53 = vld [vmem:[#allocation9 + $0x4] sm:$0xf]  ;;  %v5628_v54 = vld [vmem:[#allocation9 + $0x10] sm:$0xf0] }
  0x43   :  { %677 = vmatmul.bf16.vlgmr.msra.gmra.mxu0 %v9029_v51  ;;  %v5778_v58 = vld [vmem:[#allocation10 + $0x8] sm:$0xf]  ;;  %v7919_v59 = vld [vmem:[#allocation10 + $0x14] sm:$0xf0]  ;;  %v145_v60 = vand.u32 127, %v144_v48  ;;  %v5631_v62 = vor.u32 %v7884_v53, %v5628_v54 }
  0x44   :  { %793 = vmatpush.bf16.msrb.mxu0 %v9000_v16  ;;  %v9075_v63 = vor.u32 %v7919_v59, %v5778_v58  ;;  %v7917_v0 = vld [vmem:[#allocation10 + $0xc] sm:$0xf]  ;;  %v5780_v1 = vld [vmem:[#allocation10 + $0x18] sm:$0xf0]  ;;  %v7944_v9 = vld [vmem:[#allocation10 + $0xe4] sm:$0xf] }
  0x45   :  { %390 = vmatpush.bf16.msrb.mxu1 %v5727_v56  ;;  %v9071_v56 = vor.u32 %v7921_v45, %v5796_v47  ;;  %v5884_v10 = vld [vmem:[#allocation10 + $0xf0] sm:$0xf0]  ;;  %v8885_v11 = vmov 1.0|1.0   ;;  %v7936_v20 = vld [vmem:[#allocation10 + $0xa4] sm:$0xf] }
  0x46   :  { %696 = vmatpush.bf16.msrb.mxu2 %v9032_v57  ;;  %709 = vmatpush.bf16.msrb.mxu3 %v9036_v61  ;;  %v9092_v13 = vor.u32 %v7944_v9, %v5884_v10  ;;  %v5868_v18 = vld [vmem:[#allocation10 + $0xd0] sm:$0xf0]  ;;  %v7932_v23 = vld [vmem:[#allocation10 + $0x84] sm:$0xf]  ;;  %v200_v54 = vld [vmem:[%s10264_s4] sm:$0xf] }
  0x47   :  { %v5836_v24 = vld [vmem:[#allocation10 + $0x90] sm:$0xf0]  ;;  %v7924_v35 = vld [vmem:[#allocation10 + $0x44] sm:$0xf]  ;;  %v9169_v58 = vperm.slane %v200_v54, 0 }
  0x48   :  { %794 = vmatpush.bf16.msrb.mxu0 %v9003_v29  ;;  %v9110_v30 = vor.u32 %v7932_v23, %v5836_v24  ;;  %v5820_v33 = vld [vmem:[#allocation10 + $0x70] sm:$0xf0]  ;;  %v7920_v41 = vld [vmem:[#allocation10 + $0x24] sm:$0xf] }
  0x49   :  { %391 = vmatpush.bf16.msrb.mxu1 %v5711_v4  ;;  %v9079_v4 = vor.u32 %v7917_v0, %v5780_v1  ;;  %v5804_v37 = vld [vmem:[#allocation10 + $0x50] sm:$0xf0]  ;;  %v7916_v45 = vld [vmem:[#allocation10 + $0x4] sm:$0xf]  ;;  %10334 = vst [vmem:[#allocation25_spill] sm:$0xff] %v9169_v58 }
  0x4a   :  { %697 = vmatpush.bf16.msrb.mxu2 %v9040_v5  ;;  %710 = vmatpush.bf16.msrb.mxu3 %v9043_v8  ;;  %v9133_v39 = vor.u32 %v7924_v35, %v5804_v37  ;;  %v5788_v42 = vld [vmem:[#allocation10 + $0x30] sm:$0xf0] }
  0x4b   :  { %v5772_v47 = vld [vmem:[#allocation10 + $0x10] sm:$0xf0] }
  0x4c   :  { %795 = vmatpush.bf16.msrb.mxu0 %v9006_v43  ;;  %v9143_v48 = vor.u32 %v7916_v45, %v5772_v47 }
  0x4d   :  { %392 = vmatpush.bf16.msrb.mxu1 %v5695_v14  ;;  %v7940_v14 = vld [vmem:[#allocation10 + $0xc4] sm:$0xf] }
  0x4e   :  { %698 = vmatpush.bf16.msrb.mxu2 %v9047_v15  ;;  %711 = vmatpush.bf16.msrb.mxu3 %v9050_v17  ;;  %v9100_v19 = vor.u32 %v7940_v14, %v5868_v18  ;;  %v9183_v18 = vperm.slane %v200_v54, 2 }
  0x50   :  { %796 = vmatpush.bf16.msrb.mxu0 %v9009_v55  ;;  %10339 = vst [vmem:[#allocation30_spill] sm:$0xff] %v9183_v18 }
  0x51   :  { %393 = vmatpush.bf16.msrb.mxu1 %v5679_v21  ;;  %v5852_v21 = vld [vmem:[#allocation10 + $0xb0] sm:$0xf0] }
  0x52   :  { %699 = vmatpush.bf16.msrb.mxu2 %v9055_v25  ;;  %712 = vmatpush.bf16.msrb.mxu3 %v9057_v27  ;;  %v9105_v22 = vor.u32 %v7936_v20, %v5852_v21  ;;  %v9185_v20 = vperm.slane %v200_v54, 3 }
  0x54   :  { %797 = vmatpush.bf16.msrb.mxu0 %v9012_v3  ;;  %10340 = vst [vmem:[#allocation31_spill] sm:$0xff] %v9185_v20 }
  0x55   :  { %394 = vmatpush.bf16.msrb.mxu1 %v5663_v32  ;;  %v7928_v32 = vld [vmem:[#allocation10 + $0x64] sm:$0xf] }
  0x56   :  { %700 = vmatpush.bf16.msrb.mxu2 %v9061_v36  ;;  %713 = vmatpush.bf16.msrb.mxu3 %v9064_v40  ;;  %v9126_v34 = vor.u32 %v7928_v32, %v5820_v33 }
  0x58   :  { %798 = vmatpush.bf16.msrb.mxu0 %v9015_v12 }
  0x59   :  { %395 = vmatpush.bf16.msrb.mxu1 %v5647_v49 }
  0x5a   :  { %701 = vmatpush.bf16.msrb.mxu2 %v9068_v52  ;;  %714 = vmatpush.bf16.msrb.mxu3 %v9071_v56 }
  0x5c   :  { %799 = vmatpush.bf16.msrb.mxu0 %v9018_v26 }
  0x5d   :  { %396 = vmatpush.bf16.msrb.mxu1 %v5631_v62 }
  0x5e   :  { %702 = vmatpush.bf16.msrb.mxu2 %v9075_v63  ;;  %715 = vmatpush.bf16.msrb.mxu3 %v9079_v4 }
  0x60   :  { %800 = vmatpush.bf16.msrb.mxu0 %v9021_v38 }
  0x91   :  { %v148_v44 = vpop.permute.xlu0 %147  ;;  %v154_v6 = vpop.permute.xlu1 %153 }
  0x92   :  { %vm158_vm0 = vcmp.eq.s32.totalorder %v145_v60, %v148_v44  ;;  %vm160_vm3 = vcmp.eq.s32.totalorder %v145_v60, %v154_v6  ;;  %v9138_v44 = vor.u32 %v7920_v41, %v5788_v42 }
  0x99   :  { %v151_v2 = vpop.permute.xlu0 %150  ;;  %v157_v28 = vpop.permute.xlu1 %156 }
  0x9a   :  { %vm159_vm1 = vcmp.eq.s32.totalorder %v145_v60, %v151_v2  ;;  %vm161_vm4 = vcmp.eq.s32.totalorder %v145_v60, %v157_v28 }
  0x9b   :  { %vm9081_vm2 = vmpackc.low %vm159_vm1, %vm158_vm0 }
  0x9c   :  { %5753 = vmatmul.msk.bf16.vlgmr.msra.gmra.mxu1 %vm9081_vm2, %v8885_v11  ;;  %5761 = vmatmul.msk.bf16.vlgmr.msra.gmra.mxu2 %vm9081_vm2, %v8885_v11  ;;  %vm9115_vm5 = vmpackc.low %vm161_vm4, %vm160_vm3 }
  0x9d   :  { %5765 = vmatmul.msk.bf16.vlgmr.msra.gmra.mxu3 %vm9081_vm2, %v8885_v11  ;;  %819 = vmatpush.bf16.msra.mxu2 %v9025_v46 }
  0x9e   :  { %682 = vmatpush.bf16.msra.mxu1 %v9092_v13  ;;  %832 = vmatpush.bf16.msra.mxu3 %v9027_v50 }
  0xa1   :  { %820 = vmatpush.bf16.msra.mxu2 %v9032_v57 }
  0xa2   :  { %683 = vmatpush.bf16.msra.mxu1 %v9100_v19  ;;  %833 = vmatpush.bf16.msra.mxu3 %v9036_v61 }
  0xa5   :  { %821 = vmatpush.bf16.msra.mxu2 %v9040_v5 }
  0xa6   :  { %684 = vmatpush.bf16.msra.mxu1 %v9105_v22  ;;  %834 = vmatpush.bf16.msra.mxu3 %v9043_v8 }
  0xa9   :  { %822 = vmatpush.bf16.msra.mxu2 %v9047_v15 }
  0xaa   :  { %685 = vmatpush.bf16.msra.mxu1 %v9110_v30  ;;  %835 = vmatpush.bf16.msra.mxu3 %v9050_v17 }
  0xac   :  { %5755 = vmatmul.msk.bf16.gmra.mxu1 %vm9115_vm5, %v8885_v11  ;;  %5763 = vmatmul.msk.bf16.gmra.mxu2 %vm9115_vm5, %v8885_v11 }
  0xad   :  { %5767 = vmatmul.msk.bf16.gmra.mxu3 %vm9115_vm5, %v8885_v11  ;;  %823 = vmatpush.bf16.msra.mxu2 %v9055_v25 }
  0xae   :  { %686 = vmatpush.bf16.msra.mxu1 %v9126_v34  ;;  %836 = vmatpush.bf16.msra.mxu3 %v9057_v27 }
  0xb1   :  { %824 = vmatpush.bf16.msra.mxu2 %v9061_v36 }
  0xb2   :  { %687 = vmatpush.bf16.msra.mxu1 %v9133_v39  ;;  %837 = vmatpush.bf16.msra.mxu3 %v9064_v40 }
  0xb5   :  { %825 = vmatpush.bf16.msra.mxu2 %v9068_v52 }
  0xb6   :  { %688 = vmatpush.bf16.msra.mxu1 %v9138_v44  ;;  %838 = vmatpush.bf16.msra.mxu3 %v9071_v56 }
  0xb9   :  { %826 = vmatpush.bf16.msra.mxu2 %v9075_v63 }
  0xba   :  { %689 = vmatpush.bf16.msra.mxu1 %v9143_v48  ;;  %839 = vmatpush.bf16.msra.mxu3 %v9079_v4 }
  0xbc   :  { %5757 = vmatmul.msk.bf16.vlgmr.msrb.gmra.mxu1 %vm9081_vm2, %v8885_v11  ;;  %703 = vmatmul.bf16.vlgmr.msrb.gmra.mxu2 %v9029_v51 }
  0xbd   :  { %716 = vmatmul.bf16.vlgmr.msrb.gmra.mxu3 %v9029_v51 }
  0xbe   :  { %806 = vmatpush.bf16.msrb.mxu1 %v9092_v13 }
  0xc0   :  { %v678_v49 = vpop.f32.mrf.mxu0 }
  0xc2   :  { %807 = vmatpush.bf16.msrb.mxu1 %v9100_v19 }
  0xc6   :  { %808 = vmatpush.bf16.msrb.mxu1 %v9105_v22 }
  0xc8   :  { %v680_v53 = vpop.f32.mrf.mxu0 }
  0xca   :  { %809 = vmatpush.bf16.msrb.mxu1 %v9110_v30 }
  0xcc   :  { %5759 = vmatmul.msk.bf16.gmra.mxu1 %vm9115_vm5, %v8885_v11 }
  0xce   :  { %810 = vmatpush.bf16.msrb.mxu1 %v9126_v34 }
  0xd2   :  { %811 = vmatpush.bf16.msrb.mxu1 %v9133_v39 }
  0xd6   :  { %812 = vmatpush.bf16.msrb.mxu1 %v9138_v44 }
  0xda   :  { %813 = vmatpush.bf16.msrb.mxu1 %v9143_v48 }
  0xdc   :  { %690 = vmatmul.bf16.vlgmr.msra.gmra.mxu1 %v9029_v51 }
 0x119   :  { %v379_v59 = vpop.f32.mrf.mxu1 }
 0x11a   :  { %v380_v60 = vadd.f32 %v379_v59, %v9169_v58 }
 0x11c   :  { %v721_v62 = vadd.f32 %v678_v49, %v380_v60 }
 0x11e   :  { %v5896_v0 = vmul.f32 -1.442695, %v721_v62 }
 0x11f   :  { %v9172_v1 = vpop.f32.mrf.mxu2 }
 0x120   :  { %8454 = vpow2.f32 %v5896_v0  ;;  %v436_v2 = vpop.f32.mrf.mxu3 }
 0x121   :  { %v9174_v6 = vpop.f32.mrf.mxu1  ;;  %v437_v47 = vadd.f32 %v436_v2, %v9185_v20 }
 0x122   :  { %10335 = vst [vmem:[#allocation26_spill] sm:$0xff] %v9174_v6  ;;  %v7992_v6 = vld [vmem:[#allocation12 + $0x164] sm:$0xf] }
 0x126   :  { %v8455_v51 = vpop.eup %8454 }
 0x127   :  { %v9176_v7 = vpop.f32.mrf.mxu2  ;;  %v734_v10 = vadd.f32 1.0, %v8455_v51 }
 0x128   :  { %10336 = vst [vmem:[#allocation27_spill] sm:$0xff] %v9176_v7  ;;  %v9178_v9 = vpop.f32.mrf.mxu3  ;;  %v7996_v7 = vld [vmem:[#allocation12 + $0x184] sm:$0xf] }
 0x129   :  { %10337 = vst [vmem:[#allocation28_spill] sm:$0xff] %v9178_v9  ;;  %v384_v11 = vpop.f32.mrf.mxu1  ;;  %8456 = vrcp.f32 %v734_v10  ;;  %v748_v0 = vand.u32 2147483648, %v734_v10  ;;  %vm742_vm7 = vweird.f32 %v734_v10  ;;  %v746_v51 = vand.u32 2147483647, %v734_v10  ;;  %v5970_v9 = vld [vmem:[#allocation12 + $0x90] sm:$0xf0] }
 0x12a   :  { %v9181_v14 = vadd.f32 %v384_v11, %v9169_v58 }
 0x12b   :  { %vm747_vm9 = vcmp.eq.f32.partialorder %v746_v51, 8.507059e+37 }
 0x12c   :  { %10338 = vst [vmem:[#allocation29_spill] sm:$0xff] %v9181_v14  ;;  %v6114_v14 = vld [vmem:[#allocation12 + $0x1b0] sm:$0xf0] }
 0x12f   :  { %v422_v21 = vpop.f32.mrf.mxu2  ;;  %v8457_v32 = vpop.eup %8456 }
 0x130   :  { %v9188_v23 = vadd.f32 %v422_v21, %v9183_v18  ;;  %v441_v24 = vpop.f32.mrf.mxu3  ;;  %v738_v33 = vmul.f32 %v8457_v32, %v734_v10  ;;  %vm743_vm6 = vweird.f32 %v8457_v32  ;;  %v749_v21 = vor.u32 1.1754944e-38, %v748_v0  ;;  %v8010_v0 = vld [vmem:[#allocation12 + $0x1ec] sm:$0xf0] }
 0x131   :  { %v9191_v28 = vadd.f32 %v441_v24, %v9185_v20  ;;  %v9193_v31 = vpop.f32.mrf.mxu1  ;;  %vm744_vm8 = vmor %vm742_vm7, %vm743_vm6 }
 0x132   :  { %10341 = vst [vmem:[#allocation32_spill] sm:$0xff] %v9188_v23  ;;  %v739_v42 = vsub.f32 1.0, %v738_v33  ;;  %v6130_v23 = vld [vmem:[#allocation12 + $0x1d0] sm:$0xf0] }
 0x133   :  { %10342 = vst [vmem:[#allocation33_spill] sm:$0xff] %v9191_v28  ;;  %v8004_v28 = vld [vmem:[#allocation12 + $0x1c4] sm:$0xf] }
 0x134   :  { %10343 = vst [vmem:[#allocation34_spill] sm:$0xff] %v9193_v31  ;;  %v740_v45 = vmul.f32 %v8457_v32, %v739_v42  ;;  %v7976_v31 = vld [vmem:[#allocation12 + $0xe4] sm:$0xf] }
 0x136   :  { %v741_v62 = vadd.f32 %v8457_v32, %v740_v45 }
 0x137   :  { %v9195_v35 = vpop.f32.mrf.mxu2 }
 0x138   :  { %10344 = vst [vmem:[#allocation35_spill] sm:$0xff] %v9195_v35  ;;  %v9197_v37 = vpop.f32.mrf.mxu3  ;;  %v745_v11 = vsel %vm744_vm8, %v8457_v32, %v741_v62  ;;  %v6018_v32 = vld [vmem:[#allocation12 + $0xf0] sm:$0xf0] }
 0x139   :  { %10345 = vst [vmem:[#allocation36_spill] sm:$0xff] %v9197_v37  ;;  %v9199_v41 = vpop.f32.mrf.mxu1  ;;  %v9204_v37 = vperm.slane %v200_v54, 1  ;;  %v750_v42 = vsel %vm747_vm9, %v749_v21, %v745_v11  ;;  %v9213_v62 = vor.u32 %v7976_v31, %v6018_v32  ;;  %v6144_v54 = vld [vmem:[#allocation12 + $0x1e0] sm:$0xf]  ;;  %v8008_v11 = vld [vmem:[#allocation12 + $0x1e4] sm:$0xf]  ;;  %v418_v31 = vadd.f32 %v9172_v1, %v9183_v18 }
 0x13a   :  { %v9216_v51 = vor.u32 %v8010_v0, %v6144_v54  ;;  %v6146_v21 = vld [vmem:[#allocation12 + $0x1f0] sm:$0xf0]  ;;  %v6128_v32 = vld [vmem:[#allocation12 + $0x1c0] sm:$0xf]  ;;  %v8006_v54 = vld [vmem:[#allocation12 + $0x1cc] sm:$0xf0]  ;;  %v9235_v1 = vor.u32 %v8004_v28, %v6130_v23 }
 0x13b   :  { %10347 = vst [vmem:[#allocation38_spill] sm:$0xff] %v9204_v37  ;;  %1333 = vmatpush.bf16.msrb.mxu2 %v9213_v62  ;;  %v9229_v0 = vor.u32 %v8006_v54, %v6128_v32  ;;  %v5986_v32 = vld [vmem:[#allocation12 + $0xb0] sm:$0xf0] }
 0x13c   :  { %1320 = vmatpush.bf16.msra.mxu1 %v9216_v51 }
 0x13f   :  { %v704_v49 = vpop.f32.mrf.mxu2 }
 0x140   :  { %v717_v53 = vpop.f32.mrf.mxu3  ;;  %1321 = vmatpush.bf16.msra.mxu1 %v9229_v0 }
 0x141   :  { %v724_v59 = vadd.f32 %v717_v53, %v437_v47  ;;  %v9202_v60 = vpop.f32.mrf.mxu1  ;;  %v6016_v47 = vld [vmem:[#allocation12 + $0xe0] sm:$0xf]  ;;  %v7978_v53 = vld [vmem:[#allocation12 + $0xec] sm:$0xf0] }
 0x142   :  { %10346 = vst [vmem:[#allocation37_spill] sm:$0xff] %v9202_v60  ;;  %v9211_v10 = vor.u32 %v7978_v53, %v6016_v47 }
 0x143   :  { %8458 = vtanh.f32 %v724_v59 }
 0x144   :  { %1307 = vmatpush.bf16.msra.mxu0 %v9211_v10 }
 0x147   :  { %v706_v24 = vpop.f32.mrf.mxu2 }
 0x148   :  { %v719_v33 = vpop.f32.mrf.mxu3  ;;  %v6000_v24 = vld [vmem:[#allocation12 + $0xc0] sm:$0xf] }
 0x149   :  { %v8459_v2 = vpop.eup %8458  ;;  %v403_v35 = vpop.f32.mrf.mxu1  ;;  %v7974_v33 = vld [vmem:[#allocation12 + $0xcc] sm:$0xf0] }
 0x14a   :  { %v9206_v45 = vmul.f32 %v8459_v2, %v750_v42  ;;  %v9209_v59 = vadd.f32 %v403_v35, %v9204_v37  ;;  %v9220_v35 = vor.u32 %v8008_v11, %v6146_v21  ;;  %v7972_v2 = vld [vmem:[#allocation12 + $0xc4] sm:$0xf]  ;;  %v6002_v42 = vld [vmem:[#allocation12 + $0xd0] sm:$0xf0]  ;;  %v9224_v47 = vor.u32 %v7974_v33, %v6000_v24  ;;  %v5984_v24 = vld [vmem:[#allocation12 + $0xa0] sm:$0xf] }
 0x14b   :  { %v9226_v53 = vor.u32 %v7972_v2, %v6002_v42  ;;  %v723_v11 = vadd.f32 %v704_v49, %v418_v31  ;;  %v7970_v33 = vld [vmem:[#allocation12 + $0xac] sm:$0xf0]  ;;  %v7968_v2 = vld [vmem:[#allocation12 + $0xa4] sm:$0xf] }
 0x14c   :  { %10348 = vst [vmem:[#allocation39_spill] sm:$0xff] %v9209_v59  ;;  %1346 = vmatpush.bf16.msrb.mxu3 %v9220_v35  ;;  %1308 = vmatpush.bf16.msra.mxu0 %v9224_v47  ;;  %v9238_v42 = vor.u32 %v7970_v33, %v5984_v24  ;;  %v9240_v54 = vor.u32 %v7968_v2, %v5986_v32  ;;  %v6112_v59 = vld [vmem:[#allocation12 + $0x1a0] sm:$0xf]  ;;  %v8002_v49 = vld [vmem:[#allocation12 + $0x1ac] sm:$0xf0] }
 0x14d   :  { %1334 = vmatpush.bf16.msrb.mxu2 %v9226_v53  ;;  %v8000_v31 = vld [vmem:[#allocation12 + $0x1a4] sm:$0xf]  ;;  %v5898_v23 = vmul.f32 -1.442695, %v723_v11  ;;  %v5968_v24 = vld [vmem:[#allocation12 + $0x80] sm:$0xf]  ;;  %v399_v11 = vadd.f32 %v9199_v41, %v9204_v37 }
 0x14e   :  { %10350 = vst [vmem:[#allocation41_spill] sm:$0xff] %v9238_v42  ;;  %v9247_v28 = vor.u32 %v8000_v31, %v6114_v14  ;;  %v7966_v33 = vld [vmem:[#allocation12 + $0x8c] sm:$0xf0]  ;;  %v7964_v32 = vld [vmem:[#allocation12 + $0x84] sm:$0xf] }
 0x14f   :  { %10351 = vst [vmem:[#allocation42_spill] sm:$0xff] %v9240_v54  ;;  %v9250_v2 = vor.u32 %v7966_v33, %v5968_v24  ;;  %v9252_v20 = vor.u32 %v7964_v32, %v5970_v9  ;;  %v6098_v31 = vld [vmem:[#allocation12 + $0x190] sm:$0xf0]  ;;  %8460 = vpow2.f32 %v5898_v23  ;;  %v5952_v9 = vld [vmem:[#allocation12 + $0x60] sm:$0xf] }
 0x150   :  { %1347 = vmatpush.bf16.msrb.mxu3 %v9235_v1  ;;  %1309 = vmatpush.bf16.msra.mxu0 %v9238_v42  ;;  %10353 = vst [vmem:[#allocation44_spill] sm:$0xff] %v9247_v28  ;;  %v9261_v24 = vor.u32 %v7996_v7, %v6098_v31  ;;  %v7962_v33 = vld [vmem:[#allocation12 + $0x6c] sm:$0xf0]  ;;  %v7960_v32 = vld [vmem:[#allocation12 + $0x64] sm:$0xf] }
 0x151   :  { %v9231_v21 = vpop.f32.mrf.mxu1  ;;  %1335 = vmatpush.bf16.msrb.mxu2 %v9240_v54  ;;  %10354 = vst [vmem:[#allocation45_spill] sm:$0xff] %v9250_v2  ;;  %v9264_v41 = vor.u32 %v7962_v33, %v5952_v9  ;;  %v5954_v37 = vld [vmem:[#allocation12 + $0x70] sm:$0xf0]  ;;  %v7994_v23 = vld [vmem:[#allocation12 + $0x16c] sm:$0xf0] }
 0x152   :  { %10349 = vst [vmem:[#allocation40_spill] sm:$0xff] %v9231_v21  ;;  %v9243_v21 = vor.u32 %v8002_v49, %v6112_v59  ;;  %v6096_v59 = vld [vmem:[#allocation12 + $0x180] sm:$0xf]  ;;  %v7998_v49 = vld [vmem:[#allocation12 + $0x18c] sm:$0xf0] }
 0x153   :  { %10355 = vst [vmem:[#allocation46_spill] sm:$0xff] %v9252_v20  ;;  %v9257_v14 = vor.u32 %v7998_v49, %v6096_v59  ;;  %v9266_v59 = vor.u32 %v7960_v32, %v5954_v37  ;;  %v6080_v49 = vld [vmem:[#allocation12 + $0x160] sm:$0xf]  ;;  %v6082_v7 = vld [vmem:[#allocation12 + $0x170] sm:$0xf0] }
 0x154   :  { %10352 = vst [vmem:[#allocation43_spill] sm:$0xff] %v9243_v21  ;;  %1322 = vmatpush.bf16.msra.mxu1 %v9243_v21  ;;  %1348 = vmatpush.bf16.msrb.mxu3 %v9247_v28  ;;  %v7958_v31 = vld [vmem:[#allocation12 + $0x4c] sm:$0xf0]  ;;  %v7956_v9 = vld [vmem:[#allocation12 + $0x44] sm:$0xf] }
 0x155   :  { %10356 = vst [vmem:[#allocation47_spill] sm:$0xff] %v9257_v14  ;;  %1310 = vmatpush.bf16.msra.mxu0 %v9250_v2  ;;  %1336 = vmatpush.bf16.msrb.mxu2 %v9252_v20  ;;  %v9269_v20 = vor.u32 %v7994_v23, %v6080_v49  ;;  %v8461_v33 = vpop.eup %8460  ;;  %v6064_v49 = vld [vmem:[#allocation12 + $0x140] sm:$0xf]  ;;  %v7990_v23 = vld [vmem:[#allocation12 + $0x14c] sm:$0xf0] }
 0x156   :  { %10357 = vst [vmem:[#allocation48_spill] sm:$0xff] %v9261_v24  ;;  %v6120_v54 = vld [vmem:[#allocation12 + $0x1a8] sm:$0xf]  ;;  %v8001_v21 = vld [vmem:[#allocation12 + $0x1ac] sm:$0xf] }
 0x157   :  { %10358 = vst [vmem:[#allocation49_spill] sm:$0xff] %v9264_v41  ;;  %v7985_v42 = vld [vmem:[#allocation12 + $0x12c] sm:$0xf] }
 0x158   :  { %1323 = vmatpush.bf16.msra.mxu1 %v9257_v14  ;;  %10359 = vst [vmem:[#allocation50_spill] sm:$0xff] %v9266_v59  ;;  %1349 = vmatpush.bf16.msrb.mxu3 %v9261_v24  ;;  %v7988_v24 = vld [vmem:[#allocation12 + $0x144] sm:$0xf] }
 0x159   :  { %v691_v18 = vpop.f32.mrf.mxu1  ;;  %10360 = vst [vmem:[#allocation51_spill] sm:$0xff] %v9269_v20  ;;  %1311 = vmatpush.bf16.msra.mxu0 %v9264_v41  ;;  %1337 = vmatpush.bf16.msrb.mxu2 %v9266_v59  ;;  %v9281_v59 = vor.u32 %v7990_v23, %v6064_v49  ;;  %v6048_v23 = vld [vmem:[#allocation12 + $0x120] sm:$0xf]  ;;  %v7984_v41 = vld [vmem:[#allocation12 + $0x124] sm:$0xf] }
 0x15a   :  { %v722_v60 = vadd.f32 %v691_v18, %v399_v11  ;;  %v9273_v18 = vor.u32 %v7992_v6, %v6082_v7  ;;  %v5936_v11 = vld [vmem:[#allocation12 + $0x40] sm:$0xf]  ;;  %v6066_v6 = vld [vmem:[#allocation12 + $0x150] sm:$0xf0] }
 0x15b   :  { %v9276_v37 = vor.u32 %v7958_v31, %v5936_v11  ;;  %10364 = vst [vmem:[#allocation55_spill] sm:$0xff] %v9281_v59  ;;  %v5920_v11 = vld [vmem:[#allocation12 + $0x20] sm:$0xf]  ;;  %v7954_v31 = vld [vmem:[#allocation12 + $0x2c] sm:$0xf0] }
 0x15c   :  { %v5897_v58 = vmul.f32 -1.442695, %v722_v60  ;;  %10361 = vst [vmem:[#allocation52_spill] sm:$0xff] %v9273_v18  ;;  %1324 = vmatpush.bf16.msra.mxu1 %v9269_v20  ;;  %v5938_v60 = vld [vmem:[#allocation12 + $0x50] sm:$0xf0]  ;;  %1350 = vmatpush.bf16.msrb.mxu3 %v9273_v18 }
 0x15d   :  { %10362 = vst [vmem:[#allocation53_spill] sm:$0xff] %v9276_v37  ;;  %v9278_v32 = vor.u32 %v7956_v9, %v5938_v60  ;;  %1312 = vmatpush.bf16.msra.mxu0 %v9276_v37  ;;  %v7952_v20 = vld [vmem:[#allocation12 + $0x24] sm:$0xf]  ;;  %v9287_v9 = vadd.f32 1.0, %v8461_v33  ;;  %v9290_v60 = vor.u32 %v7954_v31, %v5920_v11  ;;  %v5922_v18 = vld [vmem:[#allocation12 + $0x30] sm:$0xf0] }
 0x15e   :  { %8462 = vpow2.f32 %v5897_v58  ;;  %v9285_v58 = vor.u32 %v7988_v24, %v6066_v6  ;;  %v9292_v49 = vor.u32 %v7952_v20, %v5922_v18  ;;  %v6050_v6 = vld [vmem:[#allocation12 + $0x130] sm:$0xf0]  ;;  %v5904_v11 = vld [vmem:[#allocation12] sm:$0xf]  ;;  %v7950_v31 = vld [vmem:[#allocation12 + $0xc] sm:$0xf0] }
 0x15f   :  { %10363 = vst [vmem:[#allocation54_spill] sm:$0xff] %v9278_v32  ;;  %1338 = vmatpush.bf16.msrb.mxu2 %v9278_v32  ;;  %v9299_v33 = vor.u32 %v7984_v41, %v6050_v6  ;;  %8464 = vrcp.f32 %v9287_v9  ;;  %v9303_v20 = vor.u32 %v7950_v31, %v5904_v11  ;;  %v7948_v18 = vld [vmem:[#allocation12 + $0x4] sm:$0xf]  ;;  %v7982_v41 = vld [vmem:[#allocation12 + $0x10c] sm:$0xf0]  ;;  %vm772_vm15 = vweird.f32 %v9287_v9 }
 0x160   :  { %10365 = vst [vmem:[#allocation56_spill] sm:$0xff] %v9285_v58  ;;  %1325 = vmatpush.bf16.msra.mxu1 %v9281_v59  ;;  %1351 = vmatpush.bf16.msrb.mxu3 %v9285_v58  ;;  %v5906_v58 = vld [vmem:[#allocation12 + $0x10] sm:$0xf0] }
 0x161   :  { %v693_v7 = vpop.f32.mrf.mxu1  ;;  %10366 = vst [vmem:[#allocation57_spill] sm:$0xff] %v9290_v60  ;;  %1313 = vmatpush.bf16.msra.mxu0 %v9290_v60 }
 0x162   :  { %10367 = vst [vmem:[#allocation58_spill] sm:$0xff] %v9292_v49  ;;  %v7986_v7 = vld [vmem:[#allocation12 + $0x12c] sm:$0xf0] }
 0x163   :  { %v9295_v24 = vor.u32 %v7986_v7, %v6048_v23  ;;  %1339 = vmatpush.bf16.msrb.mxu2 %v9292_v49  ;;  %10369 = vst [vmem:[#allocation60_spill] sm:$0xff] %v9299_v33  ;;  %v6032_v23 = vld [vmem:[#allocation12 + $0x100] sm:$0xf]  ;;  %v7980_v7 = vld [vmem:[#allocation12 + $0x104] sm:$0xf] }
 0x164   :  { %v8463_v37 = vpop.eup %8462  ;;  %10370 = vst [vmem:[#allocation61_spill] sm:$0xff] %v9303_v20  ;;  %1352 = vmatpush.bf16.msrb.mxu3 %v9299_v33  ;;  %v9310_v6 = vor.u32 %v7982_v41, %v6032_v23  ;;  %v6034_v49 = vld [vmem:[#allocation12 + $0x110] sm:$0xf0]  ;;  %v467_v41 = vld [vmem:[#allocation7] sm:$0xff] }
 0x165   :  { %10368 = vst [vmem:[#allocation59_spill] sm:$0xff] %v9295_v24  ;;  %v735_v32 = vadd.f32 1.0, %v8463_v37  ;;  %1326 = vmatpush.bf16.msra.mxu1 %v9295_v24  ;;  %v9306_v37 = vor.u32 %v7948_v18, %v5906_v58  ;;  %1314 = vmatpush.bf16.msra.mxu0 %v9303_v20  ;;  %v9312_v24 = vor.u32 %v7980_v7, %v6034_v49  ;;  %v8465_v11 = vpop.eup %8464 }
 0x166   :  { %10372 = vst [vmem:[#allocation63_spill] sm:$0xff] %v9310_v6  ;;  %v768_v18 = vmul.f32 %v8465_v11, %v9287_v9  ;;  %vm773_vm14 = vweird.f32 %v8465_v11 }
 0x167   :  { %8466 = vrcp.f32 %v735_v32  ;;  %10371 = vst [vmem:[#allocation62_spill] sm:$0xff] %v9306_v37  ;;  %1340 = vmatpush.bf16.msrb.mxu2 %v9306_v37  ;;  %v763_v20 = vand.u32 2147483648, %v735_v32  ;;  %v761_v59 = vand.u32 2147483647, %v735_v32  ;;  %vm757_vm11 = vweird.f32 %v735_v32  ;;  %vm774_vm0 = vmor %vm772_vm15, %vm773_vm14 }
 0x168   :  { %10373 = vst [vmem:[#allocation64_spill] sm:$0xff] %v9312_v24  ;;  %1353 = vmatpush.bf16.msrb.mxu3 %v9312_v24  ;;  %v769_v37 = vsub.f32 1.0, %v768_v18  ;;  %v8011_v18 = vld [vmem:[#allocation12 + $0x1f4] sm:$0xf0] }
 0x169   :  { %1327 = vmatpush.bf16.msra.mxu1 %v9310_v6  ;;  %v764_v49 = vor.u32 1.1754944e-38, %v763_v20  ;;  %vm762_vm13 = vcmp.eq.f32.partialorder %v761_v59, 8.507059e+37  ;;  %v6024_v59 = vld [vmem:[#allocation12 + $0xe8] sm:$0xf] }
 0x16a   :  { %v770_v6 = vmul.f32 %v8465_v11, %v769_v37  ;;  %v7979_v37 = vld [vmem:[#allocation12 + $0xf4] sm:$0xf0] }
 0x16c   :  { %v771_v28 = vadd.f32 %v8465_v11, %v770_v6  ;;  %v6152_v6 = vld [vmem:[#allocation12 + $0x1e8] sm:$0xf] }
 0x16d   :  { %v8467_v31 = vpop.eup %8466 }
 0x16e   :  { %v753_v58 = vmul.f32 %v8467_v31, %v735_v32  ;;  %vm758_vm10 = vweird.f32 %v8467_v31  ;;  %v776_v32 = vand.u32 2147483647, %v9287_v9 }
 0x16f   :  { %vm759_vm12 = vmor %vm757_vm11, %vm758_vm10 }
 0x170   :  { %v754_v33 = vsub.f32 1.0, %v753_v58  ;;  %vm777_vm1 = vcmp.eq.f32.partialorder %v776_v32, 8.507059e+37 }
 0x172   :  { %v755_v60 = vmul.f32 %v8467_v31, %v754_v33  ;;  %v778_v33 = vand.u32 2147483648, %v9287_v9 }
 0x174   :  { %v756_v23 = vadd.f32 %v8467_v31, %v755_v60  ;;  %v775_v60 = vsel %vm774_vm0, %v8465_v11, %v771_v28  ;;  %v779_v20 = vor.u32 1.1754944e-38, %v778_v33  ;;  %v6008_v28 = vld [vmem:[#allocation12 + $0xc8] sm:$0xf]  ;;  %v7975_v11 = vld [vmem:[#allocation12 + $0xd4] sm:$0xf0]  ;;  %v9330_v33 = vor.u32 %v8011_v18, %v6152_v6 }
 0x176   :  { %v760_v7 = vsel %vm759_vm12, %v8467_v31, %v756_v23  ;;  %v780_v31 = vsel %vm777_vm1, %v779_v20, %v775_v60  ;;  %v8009_v23 = vld [vmem:[#allocation12 + $0x1ec] sm:$0xf]  ;;  %10377 = vst [vmem:[#allocation68_spill] sm:$0xff] %v9330_v33  ;;  %v6010_v20 = vld [vmem:[#allocation12 + $0xd8] sm:$0xf0] }
 0x177   :  { %v765_v14 = vsel %vm762_vm13, %v764_v49, %v760_v7  ;;  %v9326_v7 = vor.u32 %v7979_v37, %v6024_v59  ;;  %v7973_v60 = vld [vmem:[#allocation12 + $0xcc] sm:$0xf]  ;;  %v9340_v59 = vor.u32 %v7975_v11, %v6008_v28 }
 0x178   :  { %v783_v2 = vmul.f32 %v765_v14, %v467_v41  ;;  %v6154_v41 = vld [vmem:[#allocation12 + $0x1f8] sm:$0xf0]  ;;  %v9342_v37 = vor.u32 %v7973_v60, %v6010_v20  ;;  %v5976_v60 = vld [vmem:[#allocation12 + $0x88] sm:$0xf]  ;;  %v7967_v20 = vld [vmem:[#allocation12 + $0x94] sm:$0xf0] }
 0x179   :  { %10375 = vst [vmem:[#allocation66_spill] sm:$0xff] %v9326_v7  ;;  %v9332_v32 = vor.u32 %v8009_v23, %v6154_v41  ;;  %v7969_v23 = vld [vmem:[#allocation12 + $0xac] sm:$0xf]  ;;  %v5994_v41 = vld [vmem:[#allocation12 + $0xb8] sm:$0xf0] }
 0x17a   :  { %v9318_v24 = vadd.f32 %v9206_v45, %v783_v2  ;;  %v7977_v45 = vld [vmem:[#allocation12 + $0xec] sm:$0xf]  ;;  %v6026_v2 = vld [vmem:[#allocation12 + $0xf8] sm:$0xf0]  ;;  %10379 = vst [vmem:[#allocation70_spill] sm:$0xff] %v9340_v59  ;;  %v9354_v11 = vor.u32 %v7969_v23, %v5994_v41 }
 0x17b   :  { %v9328_v9 = vor.u32 %v7977_v45, %v6026_v2  ;;  %10378 = vst [vmem:[#allocation69_spill] sm:$0xff] %v9332_v32  ;;  %v5992_v45 = vld [vmem:[#allocation12 + $0xa8] sm:$0xf]  ;;  %v7971_v2 = vld [vmem:[#allocation12 + $0xb4] sm:$0xf0] }
 0x17c   :  { %10374 = vst [vmem:[#allocation65_spill] sm:$0xff] %v9318_v24  ;;  %8468 = vtanh.f32 %v9318_v24  ;;  %v6136_v24 = vld [vmem:[#allocation12 + $0x1c8] sm:$0xf]  ;;  %v9352_v28 = vor.u32 %v7971_v2, %v5992_v45  ;;  %v464_v45 = vld [vmem:[#allocation4 + $0x8] sm:$0xff]  ;;  %v9364_v2 = vor.u32 %v7967_v20, %v5976_v60  ;;  %v7993_v60 = vld [vmem:[#allocation12 + $0x16c] sm:$0xf] }
 0x17d   :  { %10376 = vst [vmem:[#allocation67_spill] sm:$0xff] %v9328_v9  ;;  %v5960_v41 = vld [vmem:[#allocation12 + $0x68] sm:$0xf]  ;;  %v6090_v20 = vld [vmem:[#allocation12 + $0x178] sm:$0xf0] }
 0x17e   :  { %10380 = vst [vmem:[#allocation71_spill] sm:$0xff] %v9342_v37 }
 0x17f   :  { %10383 = vst [vmem:[#allocation74_spill] sm:$0xff] %v9352_v28 }
 0x180   :  { %10384 = vst [vmem:[#allocation75_spill] sm:$0xff] %v9354_v11 }
 0x181   :  { %10387 = vst [vmem:[#allocation78_spill] sm:$0xff] %v9364_v2 }
 0x182   :  { %v8469_v14 = vpop.eup %8468 }
 0x183   :  { %v787_v58 = vmul.f32 %v8469_v14, %v780_v31  ;;  %v8007_v14 = vld [vmem:[#allocation12 + $0x1d4] sm:$0xf0]  ;;  %v8005_v31 = vld [vmem:[#allocation12 + $0x1cc] sm:$0xf] }
 0x184   :  { %v9346_v6 = vor.u32 %v8007_v14, %v6136_v24 }
 0x185   :  { %v9324_v49 = vpack.c.bf16 %v787_v58, %v787_v58  ;;  %v6138_v58 = vld [vmem:[#allocation12 + $0x1d8] sm:$0xf0] }
 0x186   :  { %10381 = vst [vmem:[#allocation72_spill] sm:$0xff] %v9346_v6  ;;  %v9348_v18 = vor.u32 %v8005_v31, %v6138_v58  ;;  %v7965_v31 = vld [vmem:[#allocation12 + $0x8c] sm:$0xf]  ;;  %v5978_v58 = vld [vmem:[#allocation12 + $0x98] sm:$0xf0] }
 0x187   :  { %801 = vmatmul.bf16.vlgmr.msrb.gmra.mxu0 %v9324_v49  ;;  %814 = vmatmul.bf16.vlgmr.msrb.gmra.mxu1 %v9324_v49  ;;  %v9366_v23 = vor.u32 %v7965_v31, %v5978_v58 }
 0x188   :  { %827 = vmatmul.bf16.vlgmr.msra.gmra.mxu2 %v9324_v49  ;;  %840 = vmatmul.bf16.vlgmr.msra.gmra.mxu3 %v9324_v49  ;;  %10382 = vst [vmem:[#allocation73_spill] sm:$0xff] %v9348_v18 }
 0x189   :  { %1359 = vmatpush.bf16.msrb.mxu0 %v9326_v7  ;;  %1385 = vmatpush.bf16.msra.mxu2 %v9328_v9  ;;  %v8003_v7 = vld [vmem:[#allocation12 + $0x1b4] sm:$0xf0]  ;;  %v6122_v9 = vld [vmem:[#allocation12 + $0x1b8] sm:$0xf0]  ;;  %10388 = vst [vmem:[#allocation79_spill] sm:$0xff] %v9366_v23 }
 0x18a   :  { %1372 = vmatpush.bf16.msrb.mxu1 %v9330_v33  ;;  %1398 = vmatpush.bf16.msra.mxu3 %v9332_v32  ;;  %v9358_v24 = vor.u32 %v8003_v7, %v6120_v54  ;;  %v9360_v14 = vor.u32 %v8001_v21, %v6122_v9  ;;  %v6104_v32 = vld [vmem:[#allocation12 + $0x188] sm:$0xf]  ;;  %v7997_v33 = vld [vmem:[#allocation12 + $0x18c] sm:$0xf]  ;;  %v7963_v54 = vld [vmem:[#allocation12 + $0x74] sm:$0xf0] }
 0x18b   :  { %v7961_v9 = vld [vmem:[#allocation12 + $0x6c] sm:$0xf]  ;;  %v9378_v31 = vor.u32 %v7963_v54, %v5960_v41  ;;  %v7991_v41 = vld [vmem:[#allocation12 + $0x154] sm:$0xf0]  ;;  %v6074_v54 = vld [vmem:[#allocation12 + $0x158] sm:$0xf0] }
 0x18c   :  { %10385 = vst [vmem:[#allocation76_spill] sm:$0xff] %v9358_v24 }
 0x18d   :  { %1360 = vmatpush.bf16.msrb.mxu0 %v9340_v59  ;;  %1386 = vmatpush.bf16.msra.mxu2 %v9342_v37  ;;  %10386 = vst [vmem:[#allocation77_spill] sm:$0xff] %v9360_v14  ;;  %v7999_v59 = vld [vmem:[#allocation12 + $0x194] sm:$0xf0]  ;;  %v6106_v37 = vld [vmem:[#allocation12 + $0x198] sm:$0xf0] }
 0x18e   :  { %1373 = vmatpush.bf16.msrb.mxu1 %v9346_v6  ;;  %1399 = vmatpush.bf16.msra.mxu3 %v9348_v18  ;;  %v9370_v21 = vor.u32 %v7999_v59, %v6104_v32  ;;  %v9372_v7 = vor.u32 %v7997_v33, %v6106_v37  ;;  %v5962_v18 = vld [vmem:[#allocation12 + $0x78] sm:$0xf0]  ;;  %v6088_v6 = vld [vmem:[#allocation12 + $0x168] sm:$0xf]  ;;  %10391 = vst [vmem:[#allocation82_spill] sm:$0xff] %v9378_v31 }
 0x18f   :  { %v9380_v58 = vor.u32 %v7961_v9, %v5962_v18  ;;  %v5944_v32 = vld [vmem:[#allocation12 + $0x48] sm:$0xf]  ;;  %v7959_v59 = vld [vmem:[#allocation12 + $0x54] sm:$0xf0]  ;;  %v9386_v37 = vor.u32 %v7993_v60, %v6090_v20  ;;  %v7989_v18 = vld [vmem:[#allocation12 + $0x14c] sm:$0xf] }
 0x190   :  { %10389 = vst [vmem:[#allocation80_spill] sm:$0xff] %v9370_v21  ;;  %v5928_v9 = vld [vmem:[#allocation12 + $0x28] sm:$0xf]  ;;  %v7955_v60 = vld [vmem:[#allocation12 + $0x34] sm:$0xf0] }
 0x191   :  { %1361 = vmatpush.bf16.msrb.mxu0 %v9352_v28  ;;  %1387 = vmatpush.bf16.msra.mxu2 %v9354_v11  ;;  %10390 = vst [vmem:[#allocation81_spill] sm:$0xff] %v9372_v7  ;;  %v9374_v28 = vpack.c.bf16 %v464_v45, %v464_v45  ;;  %v7995_v11 = vld [vmem:[#allocation12 + $0x174] sm:$0xf0]  ;;  %v7957_v45 = vld [vmem:[#allocation12 + $0x4c] sm:$0xf] }
 0x192   :  { %1374 = vmatpush.bf16.msrb.mxu1 %v9358_v24  ;;  %1400 = vmatpush.bf16.msra.mxu3 %v9360_v14  ;;  %10392 = vst [vmem:[#allocation83_spill] sm:$0xff] %v9380_v58  ;;  %v9384_v33 = vor.u32 %v7995_v11, %v6088_v6  ;;  %v5946_v14 = vld [vmem:[#allocation12 + $0x58] sm:$0xf0]  ;;  %v6072_v24 = vld [vmem:[#allocation12 + $0x148] sm:$0xf]  ;;  %v9394_v6 = vor.u32 %v7959_v59, %v5944_v32 }
 0x193   :  { %10394 = vst [vmem:[#allocation85_spill] sm:$0xff] %v9386_v37  ;;  %v9396_v11 = vor.u32 %v7957_v45, %v5946_v14  ;;  %v9400_v20 = vor.u32 %v7991_v41, %v6072_v24  ;;  %v9406_v14 = vor.u32 %v7955_v60, %v5928_v9  ;;  %v5912_v59 = vld [vmem:[#allocation12 + $0x8] sm:$0xf]  ;;  %v7951_v45 = vld [vmem:[#allocation12 + $0x14] sm:$0xf0] }
 0x194   :  { %10393 = vst [vmem:[#allocation84_spill] sm:$0xff] %v9384_v33 }
 0x195   :  { %1362 = vmatpush.bf16.msrb.mxu0 %v9364_v2  ;;  %1388 = vmatpush.bf16.msra.mxu2 %v9366_v23  ;;  %10395 = vst [vmem:[#allocation86_spill] sm:$0xff] %v9394_v6  ;;  %v7953_v23 = vld [vmem:[#allocation12 + $0x2c] sm:$0xf]  ;;  %v6056_v2 = vld [vmem:[#allocation12 + $0x128] sm:$0xf] }
 0x196   :  { %1375 = vmatpush.bf16.msrb.mxu1 %v9370_v21  ;;  %1401 = vmatpush.bf16.msra.mxu3 %v9372_v7  ;;  %10396 = vst [vmem:[#allocation87_spill] sm:$0xff] %v9396_v11  ;;  %v9402_v7 = vor.u32 %v7989_v18, %v6074_v54  ;;  %v5930_v21 = vld [vmem:[#allocation12 + $0x38] sm:$0xf0]  ;;  %v7949_v18 = vld [vmem:[#allocation12 + $0xc] sm:$0xf] }
 0x197   :  { %1315 = vmatmul.bf16.vlgmr.msra.gmra.mxu0 %v9324_v49  ;;  %1328 = vmatmul.bf16.vlgmr.msra.gmra.mxu1 %v9374_v28  ;;  %v9408_v32 = vor.u32 %v7953_v23, %v5930_v21  ;;  %v5914_v54 = vld [vmem:[#allocation12 + $0x18] sm:$0xf0]  ;;  %v9418_v23 = vor.u32 %v7951_v45, %v5912_v59 }
 0x198   :  { %1341 = vmatmul.bf16.vlgmr.msrb.gmra.mxu2 %v9324_v49  ;;  %1354 = vmatmul.bf16.vlgmr.msrb.gmra.mxu3 %v9374_v28  ;;  %v9420_v21 = vor.u32 %v7949_v18, %v5914_v54 }
 0x199   :  { %1363 = vmatpush.bf16.msrb.mxu0 %v9378_v31  ;;  %1389 = vmatpush.bf16.msra.mxu2 %v9380_v58  ;;  %v7987_v31 = vld [vmem:[#allocation12 + $0x134] sm:$0xf0]  ;;  %v6058_v58 = vld [vmem:[#allocation12 + $0x138] sm:$0xf0] }
 0x19a   :  { %1376 = vmatpush.bf16.msrb.mxu1 %v9384_v33  ;;  %1402 = vmatpush.bf16.msra.mxu3 %v9386_v37  ;;  %v9412_v24 = vor.u32 %v7987_v31, %v6056_v2  ;;  %v9414_v41 = vor.u32 %v7985_v42, %v6058_v58  ;;  %v6040_v37 = vld [vmem:[#allocation12 + $0x108] sm:$0xf]  ;;  %v7981_v33 = vld [vmem:[#allocation12 + $0x10c] sm:$0xf] }
 0x19d   :  { %1364 = vmatpush.bf16.msrb.mxu0 %v9394_v6  ;;  %1390 = vmatpush.bf16.msra.mxu2 %v9396_v11  ;;  %v7983_v6 = vld [vmem:[#allocation12 + $0x114] sm:$0xf0]  ;;  %v6042_v11 = vld [vmem:[#allocation12 + $0x118] sm:$0xf0] }
 0x19e   :  { %1377 = vmatpush.bf16.msrb.mxu1 %v9400_v20  ;;  %1403 = vmatpush.bf16.msra.mxu3 %v9402_v7  ;;  %v9424_v42 = vor.u32 %v7983_v6, %v6040_v37  ;;  %v9426_v2 = vor.u32 %v7981_v33, %v6042_v11  ;;  %v9509_v37 = vld [vmem:[%s10267_s7] sm:$0xf] }
 0x19f   :  { %v979_v59 = vperm.slane %v9509_v37, 0 }
 0x1a1   :  { %1365 = vmatpush.bf16.msrb.mxu0 %v9406_v14  ;;  %1391 = vmatpush.bf16.msra.mxu2 %v9408_v32 }
 0x1a2   :  { %1378 = vmatpush.bf16.msrb.mxu1 %v9412_v24  ;;  %1404 = vmatpush.bf16.msra.mxu3 %v9414_v41 }
 0x1a5   :  { %1366 = vmatpush.bf16.msrb.mxu0 %v9418_v23  ;;  %1392 = vmatpush.bf16.msra.mxu2 %v9420_v21 }
 0x1a6   :  { %1379 = vmatpush.bf16.msrb.mxu1 %v9424_v42  ;;  %1405 = vmatpush.bf16.msra.mxu3 %v9426_v2 }
 0x1a8   :  { %1367 = vmatmul.bf16.vlgmr.msrb.gmra.mxu0 %v9324_v49  ;;  %1393 = vmatmul.bf16.vlgmr.msra.gmra.mxu2 %v9324_v49 }
 0x1a9   :  { %1479 = vmatpush.bf16.msra.mxu0 %v9000_v16  ;;  %1380 = vmatmul.bf16.vlgmr.msrb.gmra.mxu1 %v9374_v28  ;;  %v10397_v16 = vld [vmem:[#allocation41_spill] sm:$0xff] }
 0x1aa   :  { %1492 = vmatpush.bf16.msra.mxu1 %v9092_v13  ;;  %1406 = vmatmul.bf16.vlgmr.msra.gmra.mxu3 %v9374_v28  ;;  %v10421_v13 = vld [vmem:[#allocation25_spill] sm:$0xff] }
 0x1ab   :  { %1505 = vmatpush.bf16.msrb.mxu2 %v9025_v46  ;;  %1518 = vmatpush.bf16.msrb.mxu3 %v9027_v50  ;;  %v10405_v46 = vld [vmem:[#allocation49_spill] sm:$0xff]  ;;  %v10406_v50 = vld [vmem:[#allocation51_spill] sm:$0xff] }
 0x1ad   :  { %1480 = vmatpush.bf16.msra.mxu0 %v9003_v29  ;;  %v10398_v29 = vld [vmem:[#allocation43_spill] sm:$0xff] }
 0x1ae   :  { %1493 = vmatpush.bf16.msra.mxu1 %v9100_v19  ;;  %v10422_v19 = vld [vmem:[#allocation26_spill] sm:$0xff] }
 0x1af   :  { %1506 = vmatpush.bf16.msrb.mxu2 %v9032_v57  ;;  %1519 = vmatpush.bf16.msrb.mxu3 %v9036_v61  ;;  %v10407_v57 = vld [vmem:[#allocation50_spill] sm:$0xff]  ;;  %v10408_v61 = vld [vmem:[#allocation52_spill] sm:$0xff] }
 0x1b1   :  { %1481 = vmatpush.bf16.msra.mxu0 %v9006_v43  ;;  %v10399_v43 = vld [vmem:[#allocation42_spill] sm:$0xff] }
 0x1b2   :  { %1494 = vmatpush.bf16.msra.mxu1 %v9105_v22  ;;  %v382_v22 = vadd.f32 %v10422_v19, %v10421_v13 }
 0x1b3   :  { %1507 = vmatpush.bf16.msrb.mxu2 %v9040_v5  ;;  %1520 = vmatpush.bf16.msrb.mxu3 %v9043_v8  ;;  %v10409_v5 = vld [vmem:[#allocation53_spill] sm:$0xff]  ;;  %v10410_v8 = vld [vmem:[#allocation55_spill] sm:$0xff] }
 0x1b5   :  { %1482 = vmatpush.bf16.msra.mxu0 %v9009_v55  ;;  %v10400_v55 = vld [vmem:[#allocation44_spill] sm:$0xff] }
 0x1b6   :  { %1495 = vmatpush.bf16.msra.mxu1 %v9110_v30  ;;  %v10423_v30 = vld [vmem:[#allocation38_spill] sm:$0xff] }
 0x1b7   :  { %1508 = vmatpush.bf16.msrb.mxu2 %v9047_v15  ;;  %1521 = vmatpush.bf16.msrb.mxu3 %v9050_v17  ;;  %v10411_v15 = vld [vmem:[#allocation54_spill] sm:$0xff]  ;;  %v10412_v17 = vld [vmem:[#allocation56_spill] sm:$0xff] }
 0x1b9   :  { %1483 = vmatpush.bf16.msra.mxu0 %v9012_v3  ;;  %v10401_v3 = vld [vmem:[#allocation45_spill] sm:$0xff] }
 0x1ba   :  { %1496 = vmatpush.bf16.msra.mxu1 %v9126_v34  ;;  %v10424_v34 = vld [vmem:[#allocation37_spill] sm:$0xff] }
 0x1bb   :  { %1509 = vmatpush.bf16.msrb.mxu2 %v9055_v25  ;;  %1522 = vmatpush.bf16.msrb.mxu3 %v9057_v27  ;;  %v10413_v25 = vld [vmem:[#allocation57_spill] sm:$0xff]  ;;  %v10414_v27 = vld [vmem:[#allocation59_spill] sm:$0xff] }
 0x1bd   :  { %1484 = vmatpush.bf16.msra.mxu0 %v9015_v12  ;;  %v10402_v12 = vld [vmem:[#allocation47_spill] sm:$0xff] }
 0x1be   :  { %1497 = vmatpush.bf16.msra.mxu1 %v9133_v39  ;;  %v401_v39 = vadd.f32 %v10424_v34, %v10423_v30 }
 0x1bf   :  { %1510 = vmatpush.bf16.msrb.mxu2 %v9061_v36  ;;  %1523 = vmatpush.bf16.msrb.mxu3 %v9064_v40  ;;  %v10415_v36 = vld [vmem:[#allocation58_spill] sm:$0xff]  ;;  %v10416_v40 = vld [vmem:[#allocation60_spill] sm:$0xff] }
 0x1c1   :  { %1485 = vmatpush.bf16.msra.mxu0 %v9018_v26  ;;  %v10403_v26 = vld [vmem:[#allocation46_spill] sm:$0xff] }
 0x1c2   :  { %1498 = vmatpush.bf16.msra.mxu1 %v9138_v44 }
 0x1c3   :  { %1511 = vmatpush.bf16.msrb.mxu2 %v9068_v52  ;;  %1524 = vmatpush.bf16.msrb.mxu3 %v9071_v56  ;;  %v10417_v52 = vld [vmem:[#allocation61_spill] sm:$0xff]  ;;  %v10418_v56 = vld [vmem:[#allocation63_spill] sm:$0xff] }
 0x1c5   :  { %1486 = vmatpush.bf16.msra.mxu0 %v9021_v38  ;;  %v10404_v38 = vld [vmem:[#allocation48_spill] sm:$0xff] }
 0x1c6   :  { %1499 = vmatpush.bf16.msra.mxu1 %v9143_v48 }
 0x1c7   :  { %1512 = vmatpush.bf16.msrb.mxu2 %v9075_v63  ;;  %1525 = vmatpush.bf16.msrb.mxu3 %v9079_v4  ;;  %v10419_v63 = vld [vmem:[#allocation62_spill] sm:$0xff]  ;;  %v10420_v4 = vld [vmem:[#allocation64_spill] sm:$0xff] }
 0x1c9   :  { %1599 = vmatpush.bf16.msrb.mxu0 %v9211_v10 }
 0x1ca   :  { %1612 = vmatpush.bf16.msrb.mxu1 %v9216_v51 }
 0x1cb   :  { %1625 = vmatpush.bf16.msra.mxu2 %v9213_v62  ;;  %1638 = vmatpush.bf16.msra.mxu3 %v9220_v35 }
 0x1cd   :  { %1600 = vmatpush.bf16.msrb.mxu0 %v9224_v47  ;;  %v10425_v47 = vld [vmem:[#allocation30_spill] sm:$0xff] }
 0x1ce   :  { %1613 = vmatpush.bf16.msrb.mxu1 %v9229_v0 }
 0x1cf   :  { %1626 = vmatpush.bf16.msra.mxu2 %v9226_v53  ;;  %1639 = vmatpush.bf16.msra.mxu3 %v9235_v1  ;;  %v10426_v53 = vld [vmem:[#allocation27_spill] sm:$0xff] }
 0x1d0   :  { %v420_v0 = vadd.f32 %v10426_v53, %v10425_v47 }
 0x1d1   :  { %1601 = vmatpush.bf16.msrb.mxu0 %v10397_v16 }
 0x1d2   :  { %1614 = vmatpush.bf16.msrb.mxu1 %v10398_v29  ;;  %v10427_v29 = vld [vmem:[#allocation31_spill] sm:$0xff] }
 0x1d3   :  { %1627 = vmatpush.bf16.msra.mxu2 %v10399_v43  ;;  %1640 = vmatpush.bf16.msra.mxu3 %v10400_v55  ;;  %v10428_v43 = vld [vmem:[#allocation28_spill] sm:$0xff] }
 0x1d4   :  { %v439_v55 = vadd.f32 %v10428_v43, %v10427_v29 }
 0x1d5   :  { %1602 = vmatpush.bf16.msrb.mxu0 %v10401_v3 }
 0x1d6   :  { %1615 = vmatpush.bf16.msrb.mxu1 %v10402_v12 }
 0x1d7   :  { %1628 = vmatpush.bf16.msra.mxu2 %v10403_v26  ;;  %1641 = vmatpush.bf16.msra.mxu3 %v10404_v38 }
 0x1d9   :  { %1603 = vmatpush.bf16.msrb.mxu0 %v10405_v46 }
 0x1da   :  { %1616 = vmatpush.bf16.msrb.mxu1 %v10406_v50 }
 0x1db   :  { %1629 = vmatpush.bf16.msra.mxu2 %v10407_v57  ;;  %1642 = vmatpush.bf16.msra.mxu3 %v10408_v61  ;;  %v980_v57 = vperm.slane %v9509_v37, 1 }
 0x1dd   :  { %1604 = vmatpush.bf16.msrb.mxu0 %v10409_v5 }
 0x1de   :  { %1617 = vmatpush.bf16.msrb.mxu1 %v10410_v8 }
 0x1df   :  { %1630 = vmatpush.bf16.msra.mxu2 %v10411_v15  ;;  %1643 = vmatpush.bf16.msra.mxu3 %v10412_v17 }
 0x1e1   :  { %1605 = vmatpush.bf16.msrb.mxu0 %v10413_v25 }
 0x1e2   :  { %1618 = vmatpush.bf16.msrb.mxu1 %v10414_v27 }
 0x1e3   :  { %1631 = vmatpush.bf16.msra.mxu2 %v10415_v36  ;;  %1644 = vmatpush.bf16.msra.mxu3 %v10416_v40 }
 0x1e5   :  { %1606 = vmatpush.bf16.msrb.mxu0 %v10417_v52 }
 0x1e6   :  { %1619 = vmatpush.bf16.msrb.mxu1 %v10418_v56 }
 0x1e7   :  { %1632 = vmatpush.bf16.msra.mxu2 %v10419_v63  ;;  %1645 = vmatpush.bf16.msra.mxu3 %v10420_v4 }
 0x204   :  { %v802_v44 = vpop.f32.mrf.mxu0  ;;  %v815_v48 = vpop.f32.mrf.mxu1 }
 0x205   :  { %v845_v10 = vadd.f32 %v802_v44, %v382_v22  ;;  %v846_v62 = vadd.f32 %v815_v48, %v401_v39 }
 0x207   :  { %v5899_v51 = vmul.f32 -1.442695, %v845_v10  ;;  %v5900_v35 = vmul.f32 -1.442695, %v846_v62  ;;  %v981_v62 = vperm.slane %v9509_v37, 2 }
 0x209   :  { %8470 = vpow2.f32 %v5899_v51 }
 0x20a   :  { %8472 = vpow2.f32 %v5900_v35 }
 0x20b   :  { %v828_v1 = vpop.f32.mrf.mxu2  ;;  %v841_v49 = vpop.f32.mrf.mxu3 }
 0x20c   :  { %v847_v28 = vadd.f32 %v828_v1, %v420_v0  ;;  %v804_v31 = vpop.f32.mrf.mxu0  ;;  %v817_v58 = vpop.f32.mrf.mxu1  ;;  %v848_v38 = vadd.f32 %v841_v49, %v439_v55 }
 0x20e   :  { %v5901_v33 = vmul.f32 -1.442695, %v847_v28 }
 0x20f   :  { %v8471_v6 = vpop.eup %8470 }
 0x210   :  { %v8473_v11 = vpop.eup %8472  ;;  %v858_v9 = vadd.f32 1.0, %v8471_v6  ;;  %8474 = vpow2.f32 %v5901_v33 }
 0x211   :  { %v859_v60 = vadd.f32 1.0, %v8473_v11 }
 0x212   :  { %8476 = vrcp.f32 %v858_v9  ;;  %v870_v17 = vand.u32 2147483647, %v858_v9  ;;  %v872_v56 = vand.u32 2147483648, %v858_v9  ;;  %vm866_vm5 = vweird.f32 %v858_v9 }
 0x213   :  { %8478 = vrcp.f32 %v859_v60  ;;  %v830_v45 = vpop.f32.mrf.mxu2  ;;  %v843_v18 = vpop.f32.mrf.mxu3  ;;  %v887_v52 = vand.u32 2147483648, %v859_v60  ;;  %v885_v34 = vand.u32 2147483647, %v859_v60  ;;  %vm881_vm4 = vweird.f32 %v859_v60 }
 0x214   :  { %v1316_v54 = vpop.f32.mrf.mxu0  ;;  %v1329_v16 = vpop.f32.mrf.mxu1  ;;  %v873_v35 = vor.u32 1.1754944e-38, %v872_v56  ;;  %vm871_vm8 = vcmp.eq.f32.partialorder %v870_v17, 8.507059e+37 }
 0x215   :  { %v1317_v3 = vadd.f32 %v1316_v54, %v979_v59  ;;  %v888_v49 = vor.u32 1.1754944e-38, %v887_v52  ;;  %vm886_vm9 = vcmp.eq.f32.partialorder %v885_v34, 8.507059e+37  ;;  %v10429_v54 = vld [vmem:[#allocation65_spill] sm:$0xff] }
 0x216   :  { %v8475_v12 = vpop.eup %8474 }
 0x217   :  { %v9516_v26 = vadd.f32 1.0, %v8475_v12  ;;  %v1330_v46 = vadd.f32 %v1329_v16, %v1317_v3 }
 0x218   :  { %v8477_v50 = vpop.eup %8476 }
 0x219   :  { %v8479_v61 = vpop.eup %8478  ;;  %v862_v5 = vmul.f32 %v8477_v50, %v858_v9  ;;  %8480 = vrcp.f32 %v9516_v26  ;;  %v6158_v25 = vmul.f32 -1.442695, %v1330_v46  ;;  %vm867_vm2 = vweird.f32 %v8477_v50 }
 0x21a   :  { %v877_v8 = vmul.f32 %v8479_v61, %v859_v60  ;;  %8482 = vtanh.f32 %v848_v38  ;;  %vm882_vm3 = vweird.f32 %v8479_v61  ;;  %vm868_vm6 = vmor %vm866_vm5, %vm867_vm2  ;;  %vm896_vm11 = vweird.f32 %v9516_v26 }
 0x21b   :  { %v863_v15 = vsub.f32 1.0, %v862_v5  ;;  %v1342_v27 = vpop.f32.mrf.mxu2  ;;  %v1355_v36 = vpop.f32.mrf.mxu3  ;;  %8484 = vpow2.f32 %v6158_v25  ;;  %vm883_vm7 = vmor %vm881_vm4, %vm882_vm3 }
 0x21c   :  { %v878_v40 = vsub.f32 1.0, %v877_v8  ;;  %v1343_v63 = vadd.f32 %v1342_v27, %v980_v57  ;;  %v1318_v4 = vpop.f32.mrf.mxu0  ;;  %v1331_v19 = vpop.f32.mrf.mxu1  ;;  %v982_v8 = vperm.slane %v9509_v37, 3 }
 0x21d   :  { %v864_v22 = vmul.f32 %v8477_v50, %v863_v15  ;;  %v900_v15 = vand.u32 2147483647, %v9516_v26 }
 0x21e   :  { %v879_v39 = vmul.f32 %v8479_v61, %v878_v40  ;;  %v1356_v44 = vadd.f32 %v1355_v36, %v1343_v63 }
 0x21f   :  { %v8481_v48 = vpop.eup %8480  ;;  %v865_v10 = vadd.f32 %v8477_v50, %v864_v22  ;;  %vm901_vm13 = vcmp.eq.f32.partialorder %v900_v15, 8.507059e+37  ;;  %v10436_v15 = vld [vmem:[#allocation70_spill] sm:$0xff] }
 0x220   :  { %v892_v51 = vmul.f32 %v8481_v48, %v9516_v26  ;;  %v880_v53 = vadd.f32 %v8479_v61, %v879_v39  ;;  %v6159_v0 = vmul.f32 -1.442695, %v1356_v44  ;;  %v8483_v1 = vpop.eup %8482  ;;  %vm897_vm10 = vweird.f32 %v8481_v48 }
 0x221   :  { %v869_v28 = vsel %vm868_vm6, %v8477_v50, %v865_v10  ;;  %v8485_v6 = vpop.eup %8484  ;;  %vm898_vm12 = vmor %vm896_vm11, %vm897_vm10 }
 0x222   :  { %v893_v31 = vsub.f32 1.0, %v892_v51  ;;  %v874_v58 = vsel %vm871_vm8, %v873_v35, %v869_v28  ;;  %v884_v33 = vsel %vm883_vm7, %v8479_v61, %v880_v53  ;;  %8486 = vpow2.f32 %v6159_v0 }
 0x223   :  { %v889_v11 = vsel %vm886_vm9, %v888_v49, %v884_v33  ;;  %v908_v9 = vmul.f32 %v8483_v1, %v874_v58  ;;  %v1344_v60 = vpop.f32.mrf.mxu2  ;;  %v1357_v45 = vpop.f32.mrf.mxu3  ;;  %v9525_v43 = vadd.f32 1.0, %v8485_v6  ;;  %v902_v61 = vand.u32 2147483648, %v9516_v26 }
 0x224   :  { %v894_v18 = vmul.f32 %v8481_v48, %v893_v31  ;;  %v907_v16 = vmul.f32 %v889_v11, %v10429_v54  ;;  %v10432_v60 = vld [vmem:[#allocation66_spill] sm:$0xff]  ;;  %v10433_v45 = vld [vmem:[#allocation68_spill] sm:$0xff] }
 0x225   :  { %v1368_v55 = vpop.f32.mrf.mxu0  ;;  %8488 = vrcp.f32 %v9525_v43  ;;  %v903_v52 = vor.u32 1.1754944e-38, %v902_v61  ;;  %v1434_v28 = vand.u32 2147483648, %v9525_v43  ;;  %vm1428_vm15 = vweird.f32 %v9525_v43  ;;  %v469_v61 = vld [vmem:[#allocation7 + $0x8] sm:$0xff] }
 0x226   :  { %v9527_v3 = vadd.f32 %v908_v9, %v907_v16  ;;  %v1369_v12 = vadd.f32 %v1368_v55, %v981_v62  ;;  %v1381_v38 = vpop.f32.mrf.mxu1  ;;  %v895_v46 = vadd.f32 %v8481_v48, %v894_v18  ;;  %v1432_v33 = vand.u32 2147483647, %v9525_v43  ;;  %v10435_v55 = vld [vmem:[#allocation69_spill] sm:$0xff]  ;;  %v10449_v9 = vld [vmem:[#allocation84_spill] sm:$0xff] }
 0x228   :  { %v8487_v50 = vpop.eup %8486  ;;  %8490 = vtanh.f32 %v9527_v3  ;;  %v1382_v5 = vadd.f32 %v1381_v38, %v1369_v12  ;;  %v899_v27 = vsel %vm898_vm12, %v8481_v48, %v895_v46  ;;  %v1435_v12 = vor.u32 1.1754944e-38, %v1434_v28  ;;  %v10446_v28 = vld [vmem:[#allocation79_spill] sm:$0xff] }
 0x229   :  { %v9537_v17 = vadd.f32 1.0, %v8487_v50  ;;  %v904_v22 = vsel %vm901_vm13, %v903_v52, %v899_v27  ;;  %vm1433_vm3 = vcmp.eq.f32.partialorder %v1432_v33, 8.507059e+37 }
 0x22a   :  { %v6160_v25 = vmul.f32 -1.442695, %v1382_v5 }
 0x22b   :  { %8492 = vrcp.f32 %v9537_v17  ;;  %v1394_v36 = vpop.f32.mrf.mxu2  ;;  %v8489_v40 = vpop.eup %8488  ;;  %v1449_v11 = vand.u32 2147483648, %v9537_v17  ;;  %v1447_v16 = vand.u32 2147483647, %v9537_v17  ;;  %vm1443_vm2 = vweird.f32 %v9537_v17 }
 0x22c   :  { %8494 = vpow2.f32 %v6160_v25  ;;  %v1395_v56 = vadd.f32 %v1394_v36, %v982_v8  ;;  %v1424_v4 = vmul.f32 %v8489_v40, %v9525_v43  ;;  %vm1429_vm14 = vweird.f32 %v8489_v40  ;;  %v10434_v43 = vld [vmem:[#allocation67_spill] sm:$0xff]  ;;  %v10437_v25 = vld [vmem:[#allocation72_spill] sm:$0xff] }
 0x22d   :  { %v1407_v63 = vpop.f32.mrf.mxu3  ;;  %v1370_v19 = vpop.f32.mrf.mxu0  ;;  %vm9558_vm0 = vmor %vm1428_vm15, %vm1429_vm14  ;;  %v1450_v50 = vor.u32 1.1754944e-38, %v1449_v11  ;;  %vm1448_vm5 = vcmp.eq.f32.partialorder %v1447_v16, 8.507059e+37  ;;  %v10438_v36 = vld [vmem:[#allocation71_spill] sm:$0xff]  ;;  %v10448_v11 = vld [vmem:[#allocation82_spill] sm:$0xff] }
 0x22e   :  { %v8491_v26 = vpop.eup %8490  ;;  %v1383_v34 = vpop.f32.mrf.mxu1  ;;  %v1425_v44 = vsub.f32 1.0, %v1424_v4  ;;  %v1408_v48 = vadd.f32 %v1407_v63, %v1395_v56  ;;  %v10440_v19 = vld [vmem:[#allocation74_spill] sm:$0xff] }
 0x22f   :  { %v911_v39 = vmul.f32 %v8491_v26, %v904_v22  ;;  %v10441_v26 = vld [vmem:[#allocation76_spill] sm:$0xff]  ;;  %v10452_v16 = vld [vmem:[#allocation86_spill] sm:$0xff] }
 0x230   :  { %v1426_v35 = vmul.f32 %v8489_v40, %v1425_v44  ;;  %8496 = vtanh.f32 %v1408_v48  ;;  %v10443_v44 = vld [vmem:[#allocation77_spill] sm:$0xff] }
 0x231   :  { %v8493_v10 = vpop.eup %8492  ;;  %v9543_v51 = vpack.c.bf16 %v911_v39, %v911_v39  ;;  %v10442_v39 = vld [vmem:[#allocation75_spill] sm:$0xff] }
 0x232   :  { %v8495_v53 = vpop.eup %8494  ;;  %v1439_v0 = vmul.f32 %v8493_v10, %v9537_v17  ;;  %v1427_v49 = vadd.f32 %v8489_v40, %v1426_v35  ;;  %vm1444_vm1 = vweird.f32 %v8493_v10 }
 0x233   :  { %v9546_v1 = vadd.f32 1.0, %v8495_v53  ;;  %v1396_v31 = vpop.f32.mrf.mxu2  ;;  %1487 = vmatmul.bf16.vlgmr.msra.gmra.mxu0 %v9543_v51  ;;  %1500 = vmatmul.bf16.vlgmr.msra.gmra.mxu1 %v9543_v51  ;;  %vm1445_vm4 = vmor %vm1443_vm2, %vm1444_vm1  ;;  %v10444_v53 = vld [vmem:[#allocation78_spill] sm:$0xff] }
 0x234   :  { %v1440_v58 = vsub.f32 1.0, %v1439_v0  ;;  %1513 = vmatmul.bf16.vlgmr.msrb.gmra.mxu2 %v9543_v51  ;;  %1526 = vmatmul.bf16.vlgmr.msrb.gmra.mxu3 %v9543_v51  ;;  %v1431_v54 = vsel %vm9558_vm0, %v8489_v40, %v1427_v49  ;;  %v10439_v40 = vld [vmem:[#allocation73_spill] sm:$0xff]  ;;  %v10445_v0 = vld [vmem:[#allocation80_spill] sm:$0xff] }
 0x235   :  { %v1409_v6 = vpop.f32.mrf.mxu3  ;;  %8498 = vrcp.f32 %v9546_v1  ;;  %1651 = vmatpush.bf16.msra.mxu0 %v10432_v60  ;;  %1664 = vmatpush.bf16.msra.mxu1 %v10433_v45  ;;  %v1436_v5 = vsel %vm1433_vm3, %v1435_v12, %v1431_v54  ;;  %v1464_v48 = vand.u32 2147483648, %v9546_v1  ;;  %v1462_v35 = vand.u32 2147483647, %v9546_v1  ;;  %v10447_v31 = vld [vmem:[#allocation81_spill] sm:$0xff]  ;;  %v10450_v45 = vld [vmem:[#allocation83_spill] sm:$0xff] }
 0x236   :  { %v1441_v18 = vmul.f32 %v8493_v10, %v1440_v58  ;;  %1677 = vmatpush.bf16.msrb.mxu2 %v10434_v43  ;;  %1690 = vmatpush.bf16.msrb.mxu3 %v10435_v55  ;;  %v8497_v46 = vpop.eup %8496  ;;  %vm1458_vm7 = vweird.f32 %v9546_v1  ;;  %v10453_v43 = vld [vmem:[#allocation87_spill] sm:$0xff]  ;;  %v8042_v12 = vld [vmem:[#allocation13 + $0xec] sm:$0xf0] }
 0x237   :  { %v1470_v4 = vmul.f32 %v8497_v46, %v1436_v5  ;;  %v1465_v58 = vor.u32 1.1754944e-38, %v1464_v48  ;;  %vm1463_vm9 = vcmp.eq.f32.partialorder %v1462_v35, 8.507059e+37  ;;  %v6281_v55 = vld [vmem:[#allocation13 + $0xe0] sm:$0xf]  ;;  %v8074_v46 = vld [vmem:[#allocation13 + $0x1ec] sm:$0xf0] }
 0x238   :  { %v1442_v38 = vadd.f32 %v8493_v10, %v1441_v18  ;;  %v8072_v5 = vld [vmem:[#allocation13 + $0x1e4] sm:$0xf]  ;;  %v6233_v35 = vld [vmem:[#allocation13 + $0x80] sm:$0xf] }
 0x239   :  { %1652 = vmatpush.bf16.msra.mxu0 %v10436_v15  ;;  %1665 = vmatpush.bf16.msra.mxu1 %v10437_v25  ;;  %v6265_v25 = vld [vmem:[#allocation13 + $0xc0] sm:$0xf] }
 0x23a   :  { %v1446_v27 = vsel %vm1445_vm4, %v8493_v10, %v1442_v38  ;;  %1678 = vmatpush.bf16.msrb.mxu2 %v10438_v36  ;;  %1691 = vmatpush.bf16.msrb.mxu3 %v10439_v40  ;;  %v6409_v38 = vld [vmem:[#allocation13 + $0x1e0] sm:$0xf] }
 0x23b   :  { %v8499_v52 = vpop.eup %8498  ;;  %v1451_v56 = vsel %vm1448_vm5, %v1450_v50, %v1446_v27  ;;  %v8040_v50 = vld [vmem:[#allocation13 + $0xe4] sm:$0xf]  ;;  %v6410_v15 = vor.u32 %v8074_v46, %v6409_v38  ;;  %v8038_v27 = vld [vmem:[#allocation13 + $0xcc] sm:$0xf0]  ;;  %v6347_v46 = vld [vmem:[#allocation13 + $0x170] sm:$0xf0] }
 0x23c   :  { %v1454_v17 = vmul.f32 %v8499_v52, %v9546_v1  ;;  %v1469_v63 = vmul.f32 %v1451_v56, %v469_v61  ;;  %vm1459_vm6 = vweird.f32 %v8499_v52  ;;  %v10451_v1 = vld [vmem:[#allocation85_spill] sm:$0xff]  ;;  %v8056_v38 = vld [vmem:[#allocation13 + $0x164] sm:$0xf] }
 0x23d   :  { %1653 = vmatpush.bf16.msra.mxu0 %v10440_v19  ;;  %1666 = vmatpush.bf16.msra.mxu1 %v10441_v26  ;;  %vm1460_vm8 = vmor %vm1458_vm7, %vm1459_vm6  ;;  %v6283_v61 = vld [vmem:[#allocation13 + $0xf0] sm:$0xf0]  ;;  %v8070_v56 = vld [vmem:[#allocation13 + $0x1cc] sm:$0xf0] }
 0x23e   :  { %v1455_v22 = vsub.f32 1.0, %v1454_v17  ;;  %v9577_v34 = vadd.f32 %v1470_v4, %v1469_v63  ;;  %1679 = vmatpush.bf16.msrb.mxu2 %v10442_v39  ;;  %1692 = vmatpush.bf16.msrb.mxu3 %v10443_v44  ;;  %v6286_v36 = vor.u32 %v8040_v50, %v6283_v61  ;;  %v8036_v17 = vld [vmem:[#allocation13 + $0xc4] sm:$0xf]  ;;  %v6395_v63 = vld [vmem:[#allocation13 + $0x1d0] sm:$0xf0] }
 0x23f   :  { %v6249_v4 = vld [vmem:[#allocation13 + $0xa0] sm:$0xf]  ;;  %v8034_v19 = vld [vmem:[#allocation13 + $0xac] sm:$0xf0]  ;;  %v8064_v44 = vld [vmem:[#allocation13 + $0x1a4] sm:$0xf] }
 0x240   :  { %v1456_v10 = vmul.f32 %v8499_v52, %v1455_v22  ;;  %8500 = vtanh.f32 %v9577_v34  ;;  %v8066_v39 = vld [vmem:[#allocation13 + $0x1ac] sm:$0xf0]  ;;  %v6250_v48 = vor.u32 %v8034_v19, %v6249_v4  ;;  %v6313_v4 = vld [vmem:[#allocation13 + $0x120] sm:$0xf] }
 0x241   :  { %1654 = vmatpush.bf16.msra.mxu0 %v10444_v53  ;;  %1667 = vmatpush.bf16.msra.mxu1 %v10445_v0  ;;  %v8030_v53 = vld [vmem:[#allocation13 + $0x8c] sm:$0xf0] }
 0x242   :  { %v1457_v49 = vadd.f32 %v8499_v52, %v1456_v10  ;;  %1680 = vmatpush.bf16.msrb.mxu2 %v10446_v28  ;;  %1693 = vmatpush.bf16.msrb.mxu3 %v10447_v31  ;;  %v6361_v28 = vld [vmem:[#allocation13 + $0x180] sm:$0xf]  ;;  %v8062_v31 = vld [vmem:[#allocation13 + $0x18c] sm:$0xf0] }
 0x243   :  { %1607 = vmatmul.bf16.vlgmr.msrb.gmra.mxu0 %v9543_v51  ;;  %v8050_v19 = vld [vmem:[#allocation13 + $0x12c] sm:$0xf0] }
 0x244   :  { %v1461_v33 = vsel %vm1460_vm8, %v8499_v52, %v1457_v49  ;;  %1633 = vmatmul.bf16.vlgmr.msra.gmra.mxu2 %v9543_v51  ;;  %v6393_v52 = vld [vmem:[#allocation13 + $0x1c0] sm:$0xf] }
 0x245   :  { %v1466_v6 = vsel %vm1463_vm9, %v1465_v58, %v1461_v33  ;;  %1655 = vmatpush.bf16.msra.mxu0 %v10448_v11  ;;  %1668 = vmatpush.bf16.msra.mxu1 %v10449_v9  ;;  %v8028_v58 = vld [vmem:[#allocation13 + $0x84] sm:$0xf]  ;;  %v6235_v33 = vld [vmem:[#allocation13 + $0x90] sm:$0xf0]  ;;  %v6362_v9 = vor.u32 %v8062_v31, %v6361_v28 }
 0x246   :  { %v8501_v60 = vpop.eup %8500  ;;  %1681 = vmatpush.bf16.msrb.mxu2 %v10450_v45  ;;  %1694 = vmatpush.bf16.msrb.mxu3 %v10451_v1  ;;  %v6363_v11 = vld [vmem:[#allocation13 + $0x190] sm:$0xf0]  ;;  %v8026_v45 = vld [vmem:[#allocation13 + $0x6c] sm:$0xf0]  ;;  %v6238_v1 = vor.u32 %v8028_v58, %v6235_v33  ;;  %v8044_v28 = vld [vmem:[#allocation13 + $0x104] sm:$0xf] }
 0x247   :  { %v1473_v18 = vmul.f32 %v8501_v60, %v1466_v6  ;;  %v8060_v6 = vld [vmem:[#allocation13 + $0x184] sm:$0xf]  ;;  %v6217_v60 = vld [vmem:[#allocation13 + $0x60] sm:$0xf]  ;;  %v6299_v31 = vld [vmem:[#allocation13 + $0x110] sm:$0xf0] }
 0x248   :  { %v6218_v50 = vor.u32 %v8026_v45, %v6217_v60  ;;  %v6289_v58 = vld [vmem:[#allocation13 + $0xe8] sm:$0xf]  ;;  %v8043_v33 = vld [vmem:[#allocation13 + $0xf4] sm:$0xf0]  ;;  %v6291_v45 = vld [vmem:[#allocation13 + $0xf8] sm:$0xf0] }
 0x249   :  { %v9595_v54 = vpack.c.bf16 %v1473_v18, %v1473_v18  ;;  %1656 = vmatpush.bf16.msra.mxu0 %v10452_v16  ;;  %1669 = vmatpush.bf16.msra.mxu1 %v9400_v20  ;;  %v6411_v20 = vld [vmem:[#allocation13 + $0x1f0] sm:$0xf0]  ;;  %v6366_v18 = vor.u32 %v8060_v6, %v6363_v11  ;;  %v6345_v16 = vld [vmem:[#allocation13 + $0x160] sm:$0xf]  ;;  %v6417_v6 = vld [vmem:[#allocation13 + $0x1e8] sm:$0xf] }
 0x24a   :  { %1682 = vmatpush.bf16.msrb.mxu2 %v10453_v43  ;;  %1695 = vmatpush.bf16.msrb.mxu3 %v9402_v7  ;;  %v6282_v7 = vor.u32 %v8042_v12, %v6281_v55  ;;  %v6414_v40 = vor.u32 %v8072_v5, %v6411_v20  ;;  %v8058_v43 = vld [vmem:[#allocation13 + $0x16c] sm:$0xf0]  ;;  %v8024_v55 = vld [vmem:[#allocation13 + $0x64] sm:$0xf]  ;;  %v6219_v12 = vld [vmem:[#allocation13 + $0x70] sm:$0xf0] }
 0x24b   :  { %1620 = vmatmul.bf16.vlgmr.msrb.gmra.mxu1 %v9595_v54  ;;  %1646 = vmatmul.bf16.vlgmr.msra.gmra.mxu3 %v9595_v54  ;;  %v6346_v61 = vor.u32 %v8058_v43, %v6345_v16  ;;  %v6201_v5 = vld [vmem:[#allocation13 + $0x40] sm:$0xf]  ;;  %v8022_v20 = vld [vmem:[#allocation13 + $0x4c] sm:$0xf0]  ;;  %v8075_v11 = vld [vmem:[#allocation13 + $0x1f4] sm:$0xf0]  ;;  %v6302_v43 = vor.u32 %v8044_v28, %v6299_v31 }
 0x24d   :  { %1657 = vmatpush.bf16.msra.mxu0 %v9406_v14  ;;  %1670 = vmatpush.bf16.msra.mxu1 %v9412_v24  ;;  %v6267_v14 = vld [vmem:[#allocation13 + $0xd0] sm:$0xf0]  ;;  %v8068_v24 = vld [vmem:[#allocation13 + $0x1c4] sm:$0xf] }
 0x24e   :  { %1683 = vmatpush.bf16.msrb.mxu2 %v9408_v32  ;;  %1696 = vmatpush.bf16.msrb.mxu3 %v9414_v41  ;;  %v6266_v32 = vor.u32 %v8038_v27, %v6265_v25  ;;  %v6394_v41 = vor.u32 %v8070_v56, %v6393_v52  ;;  %v6270_v26 = vor.u32 %v8036_v17, %v6267_v14  ;;  %v6329_v25 = vld [vmem:[#allocation13 + $0x140] sm:$0xf]  ;;  %v8054_v27 = vld [vmem:[#allocation13 + $0x14c] sm:$0xf0]  ;;  %v8052_v52 = vld [vmem:[#allocation13 + $0x144] sm:$0xf] }
 0x24f   :  { %v6398_v22 = vor.u32 %v8068_v24, %v6395_v63  ;;  %v6331_v56 = vld [vmem:[#allocation13 + $0x150] sm:$0xf0]  ;;  %v6202_v17 = vor.u32 %v8022_v20, %v6201_v5  ;;  %v6330_v14 = vor.u32 %v8054_v27, %v6329_v25  ;;  %v6185_v24 = vld [vmem:[#allocation13 + $0x20] sm:$0xf]  ;;  %v8018_v63 = vld [vmem:[#allocation13 + $0x2c] sm:$0xf0] }
 0x250   :  { %v6401_v20 = vld [vmem:[#allocation13 + $0x1c8] sm:$0xf]  ;;  %v6275_v25 = vld [vmem:[#allocation13 + $0xd8] sm:$0xf0]  ;;  %v8069_v27 = vld [vmem:[#allocation13 + $0x1cc] sm:$0xf] }
 0x251   :  { %1658 = vmatpush.bf16.msra.mxu0 %v9418_v23  ;;  %1671 = vmatpush.bf16.msra.mxu1 %v9424_v42  ;;  %v6377_v23 = vld [vmem:[#allocation13 + $0x1a0] sm:$0xf]  ;;  %v8032_v42 = vld [vmem:[#allocation13 + $0xa4] sm:$0xf] }
 0x252   :  { %1684 = vmatpush.bf16.msrb.mxu2 %v9420_v21  ;;  %1697 = vmatpush.bf16.msrb.mxu3 %v9426_v2  ;;  %v6251_v21 = vld [vmem:[#allocation13 + $0xb0] sm:$0xf0]  ;;  %v6378_v10 = vor.u32 %v8066_v39, %v6377_v23  ;;  %v8048_v23 = vld [vmem:[#allocation13 + $0x124] sm:$0xf] }
 0x253   :  { %v6379_v2 = vld [vmem:[#allocation13 + $0x1b0] sm:$0xf0]  ;;  %v6254_v0 = vor.u32 %v8032_v42, %v6251_v21  ;;  %v6169_v42 = vld [vmem:[#allocation13] sm:$0xf]  ;;  %v6186_v21 = vor.u32 %v8018_v63, %v6185_v24 }
 0x254   :  { %1659 = vmatmul.bf16.vlgmr.msra.gmra.mxu0 %v9543_v51  ;;  %v6382_v49 = vor.u32 %v8064_v44, %v6379_v2  ;;  %v6315_v39 = vld [vmem:[#allocation13 + $0x130] sm:$0xf0]  ;;  %v6314_v44 = vor.u32 %v8050_v19, %v6313_v4  ;;  %v8014_v2 = vld [vmem:[#allocation13 + $0xc] sm:$0xf0]  ;;  %v8033_v4 = vld [vmem:[#allocation13 + $0xac] sm:$0xf] }
 0x255   :  { %2161 = vmatpush.bf16.msrb.mxu0 %v6282_v7  ;;  %2174 = vmatpush.bf16.msrb.mxu1 %v6410_v15  ;;  %v6222_v7 = vor.u32 %v8024_v55, %v6219_v12  ;;  %v6350_v15 = vor.u32 %v8056_v38, %v6347_v46  ;;  %v6290_v55 = vor.u32 %v8043_v33, %v6289_v58  ;;  %v466_v38 = vld [vmem:[#allocation4 + $0x10] sm:$0xff]  ;;  %v6273_v46 = vld [vmem:[#allocation13 + $0xc8] sm:$0xf]  ;;  %v6259_v19 = vld [vmem:[#allocation13 + $0xb8] sm:$0xf0] }
 0x256   :  { %2187 = vmatpush.bf16.msra.mxu2 %v6286_v36  ;;  %2200 = vmatpush.bf16.msra.mxu3 %v6414_v40  ;;  %v8020_v36 = vld [vmem:[#allocation13 + $0x44] sm:$0xf]  ;;  %v6203_v40 = vld [vmem:[#allocation13 + $0x50] sm:$0xf0]  ;;  %v6418_v12 = vor.u32 %v8075_v11, %v6417_v6  ;;  %v6225_v58 = vld [vmem:[#allocation13 + $0x68] sm:$0xf] }
 0x257   :  { %1685 = vmatmul.bf16.vlgmr.msrb.gmra.mxu2 %v9543_v51  ;;  %v6234_v51 = vor.u32 %v8030_v53, %v6233_v35  ;;  %v6318_v53 = vor.u32 %v8048_v23, %v6315_v39  ;;  %v8027_v33 = vld [vmem:[#allocation13 + $0x74] sm:$0xf0] }
 0x259   :  { %2162 = vmatpush.bf16.msrb.mxu0 %v6266_v32  ;;  %2175 = vmatpush.bf16.msrb.mxu1 %v6394_v41  ;;  %v6206_v32 = vor.u32 %v8020_v36, %v6203_v40  ;;  %v6334_v41 = vor.u32 %v8052_v52, %v6331_v56  ;;  %v6403_v36 = vld [vmem:[#allocation13 + $0x1d8] sm:$0xf0]  ;;  %v9615_v40 = vpack.c.bf16 %v466_v38, %v466_v38 }
 0x25a   :  { %2188 = vmatpush.bf16.msra.mxu2 %v6270_v26  ;;  %2201 = vmatpush.bf16.msra.mxu3 %v6398_v22  ;;  %v8016_v26 = vld [vmem:[#allocation13 + $0x24] sm:$0xf]  ;;  %v6187_v22 = vld [vmem:[#allocation13 + $0x30] sm:$0xf0]  ;;  %v6406_v63 = vor.u32 %v8069_v27, %v6403_v36  ;;  %v6193_v36 = vld [vmem:[#allocation13 + $0x28] sm:$0xf] }
 0x25b   :  { %1672 = vmatmul.bf16.vlgmr.msra.gmra.mxu1 %v9595_v54  ;;  %1698 = vmatmul.bf16.vlgmr.msrb.gmra.mxu3 %v9595_v54  ;;  %v6190_v35 = vor.u32 %v8016_v26, %v6187_v22  ;;  %v8065_v26 = vld [vmem:[#allocation13 + $0x1ac] sm:$0xf]  ;;  %v6387_v22 = vld [vmem:[#allocation13 + $0x1b8] sm:$0xf0] }
 0x25d   :  { %2163 = vmatpush.bf16.msrb.mxu0 %v6250_v48  ;;  %2176 = vmatpush.bf16.msrb.mxu1 %v6378_v10  ;;  %v6297_v48 = vld [vmem:[#allocation13 + $0x100] sm:$0xf]  ;;  %v8046_v10 = vld [vmem:[#allocation13 + $0x10c] sm:$0xf0] }
 0x25e   :  { %2189 = vmatpush.bf16.msra.mxu2 %v6254_v0  ;;  %2202 = vmatpush.bf16.msra.mxu3 %v6382_v49  ;;  %v8012_v0 = vld [vmem:[#allocation13 + $0x4] sm:$0xf]  ;;  %v6171_v49 = vld [vmem:[#allocation13 + $0x10] sm:$0xf0]  ;;  %v6298_v60 = vor.u32 %v8046_v10, %v6297_v48  ;;  %v6369_v48 = vld [vmem:[#allocation13 + $0x188] sm:$0xf] }
 0x25f   :  { %v6174_v16 = vor.u32 %v8012_v0, %v6171_v49  ;;  %v8063_v10 = vld [vmem:[#allocation13 + $0x194] sm:$0xf0]  ;;  %v8061_v0 = vld [vmem:[#allocation13 + $0x18c] sm:$0xf]  ;;  %v6371_v49 = vld [vmem:[#allocation13 + $0x198] sm:$0xf0] }
 0x260   :  { %v6370_v31 = vor.u32 %v8063_v10, %v6369_v48  ;;  %v6374_v11 = vor.u32 %v8061_v0, %v6371_v49  ;;  %v6179_v48 = vld [vmem:[#allocation13 + $0x18] sm:$0xf0]  ;;  %v8045_v10 = vld [vmem:[#allocation13 + $0x10c] sm:$0xf]  ;;  %v8106_v0 = vld [vmem:[#allocation10 + $0xec] sm:$0xf0] }
 0x261   :  { %2164 = vmatpush.bf16.msrb.mxu0 %v6234_v51  ;;  %2177 = vmatpush.bf16.msrb.mxu1 %v6362_v9  ;;  %v8041_v51 = vld [vmem:[#allocation13 + $0xec] sm:$0xf]  ;;  %v6170_v9 = vor.u32 %v8014_v2, %v6169_v42  ;;  %v6241_v42 = vld [vmem:[#allocation13 + $0x88] sm:$0xf]  ;;  %v6390_v2 = vor.u32 %v8065_v26, %v6387_v22 }
 0x262   :  { %2190 = vmatpush.bf16.msra.mxu2 %v6238_v1  ;;  %2203 = vmatpush.bf16.msra.mxu3 %v6366_v18  ;;  %v8073_v1 = vld [vmem:[#allocation13 + $0x1ec] sm:$0xf]  ;;  %v6419_v18 = vld [vmem:[#allocation13 + $0x1f8] sm:$0xf0]  ;;  %v6177_v22 = vld [vmem:[#allocation13 + $0x8] sm:$0xf] }
 0x263   :  { %v6422_v5 = vor.u32 %v8073_v1, %v6419_v18  ;;  %v8057_v1 = vld [vmem:[#allocation13 + $0x16c] sm:$0xf]  ;;  %v6355_v18 = vld [vmem:[#allocation13 + $0x178] sm:$0xf0]  ;;  %v6548_v49 = vld [vmem:[#allocation10 + $0xe8] sm:$0xf] }
 0x265   :  { %2165 = vmatpush.bf16.msrb.mxu0 %v6218_v50  ;;  %2178 = vmatpush.bf16.msrb.mxu1 %v6346_v61  ;;  %v8039_v50 = vld [vmem:[#allocation13 + $0xd4] sm:$0xf0]  ;;  %v6294_v61 = vor.u32 %v8041_v51, %v6291_v45  ;;  %v6353_v51 = vld [vmem:[#allocation13 + $0x168] sm:$0xf]  ;;  %v6227_v45 = vld [vmem:[#allocation13 + $0x78] sm:$0xf0] }
 0x266   :  { %2191 = vmatpush.bf16.msra.mxu2 %v6222_v7  ;;  %2204 = vmatpush.bf16.msra.mxu3 %v6350_v15  ;;  %v8071_v7 = vld [vmem:[#allocation13 + $0x1d4] sm:$0xf0]  ;;  %v8037_v15 = vld [vmem:[#allocation13 + $0xcc] sm:$0xf]  ;;  %v6274_v52 = vor.u32 %v8039_v50, %v6273_v46  ;;  %v6358_v46 = vor.u32 %v8057_v1, %v6355_v18  ;;  %v6337_v50 = vld [vmem:[#allocation13 + $0x148] sm:$0xf] }
 0x267   :  { %v6402_v56 = vor.u32 %v8071_v7, %v6401_v20  ;;  %v6278_v24 = vor.u32 %v8037_v15, %v6275_v25  ;;  %v6211_v20 = vld [vmem:[#allocation13 + $0x58] sm:$0xf0]  ;;  %v8053_v7 = vld [vmem:[#allocation13 + $0x14c] sm:$0xf] }
 0x268   :  { %v6339_v15 = vld [vmem:[#allocation13 + $0x158] sm:$0xf0]  ;;  %v8105_v1 = vld [vmem:[#allocation10 + $0xec] sm:$0xf] }
 0x269   :  { %2166 = vmatpush.bf16.msrb.mxu0 %v6202_v17  ;;  %2179 = vmatpush.bf16.msrb.mxu1 %v6330_v14  ;;  %v6257_v17 = vld [vmem:[#allocation13 + $0xa8] sm:$0xf]  ;;  %v8035_v14 = vld [vmem:[#allocation13 + $0xb4] sm:$0xf0]  ;;  %v6550_v18 = vld [vmem:[#allocation10 + $0xf8] sm:$0xf0] }
 0x26a   :  { %2192 = vmatpush.bf16.msra.mxu2 %v6206_v32  ;;  %2205 = vmatpush.bf16.msra.mxu3 %v6334_v41  ;;  %v6385_v32 = vld [vmem:[#allocation13 + $0x1a8] sm:$0xf]  ;;  %v8067_v41 = vld [vmem:[#allocation13 + $0x1b4] sm:$0xf0]  ;;  %v6258_v23 = vor.u32 %v8035_v14, %v6257_v17  ;;  %v6342_v17 = vor.u32 %v8053_v7, %v6339_v15  ;;  %v8101_v7 = vld [vmem:[#allocation10 + $0xcc] sm:$0xf] }
 0x26b   :  { %v6386_v39 = vor.u32 %v8067_v41, %v6385_v32  ;;  %v6321_v14 = vld [vmem:[#allocation13 + $0x128] sm:$0xf]  ;;  %v6195_v32 = vld [vmem:[#allocation13 + $0x38] sm:$0xf0]  ;;  %v8049_v41 = vld [vmem:[#allocation13 + $0x12c] sm:$0xf] }
 0x26c   :  { %v6534_v15 = vld [vmem:[#allocation10 + $0xd8] sm:$0xf0] }
 0x26d   :  { %2167 = vmatpush.bf16.msrb.mxu0 %v6186_v21  ;;  %2180 = vmatpush.bf16.msrb.mxu1 %v6314_v44  ;;  %v8031_v21 = vld [vmem:[#allocation13 + $0x94] sm:$0xf0]  ;;  %v6262_v44 = vor.u32 %v8033_v4, %v6259_v19  ;;  %v6323_v4 = vld [vmem:[#allocation13 + $0x138] sm:$0xf0] }
 0x26e   :  { %2193 = vmatpush.bf16.msra.mxu2 %v6190_v35  ;;  %2206 = vmatpush.bf16.msra.mxu3 %v6318_v53  ;;  %v8029_v35 = vld [vmem:[#allocation13 + $0x8c] sm:$0xf]  ;;  %v6243_v53 = vld [vmem:[#allocation13 + $0x98] sm:$0xf0]  ;;  %v6242_v28 = vor.u32 %v8031_v21, %v6241_v42  ;;  %v6326_v21 = vor.u32 %v8049_v41, %v6323_v4  ;;  %v8095_v41 = vld [vmem:[#allocation10 + $0x94] sm:$0xf0] }
 0x26f   :  { %v6246_v6 = vor.u32 %v8029_v35, %v6243_v53  ;;  %v6307_v35 = vld [vmem:[#allocation13 + $0x118] sm:$0xf0]  ;;  %v6540_v53 = vld [vmem:[#allocation10 + $0xe0] sm:$0xf]  ;;  %v8096_v4 = vld [vmem:[#allocation10 + $0xa4] sm:$0xf] }
 0x271   :  { %2168 = vmatpush.bf16.msrb.mxu0 %v6170_v9  ;;  %2181 = vmatpush.bf16.msrb.mxu1 %v6298_v60  ;;  %v8059_v9 = vld [vmem:[#allocation13 + $0x174] sm:$0xf0]  ;;  %v8025_v60 = vld [vmem:[#allocation13 + $0x6c] sm:$0xf] }
 0x272   :  { %2194 = vmatpush.bf16.msra.mxu2 %v6174_v16  ;;  %2207 = vmatpush.bf16.msra.mxu3 %v6302_v43  ;;  %v6226_v16 = vor.u32 %v8027_v33, %v6225_v58  ;;  %v6354_v43 = vor.u32 %v8059_v9, %v6353_v51  ;;  %v6230_v38 = vor.u32 %v8025_v60, %v6227_v45  ;;  %v8104_v51 = vld [vmem:[#allocation10 + $0xe4] sm:$0xf]  ;;  %v6542_v45 = vld [vmem:[#allocation10 + $0xf0] sm:$0xf0] }
 0x273   :  { %v6541_v9 = vor.u32 %v8106_v0, %v6540_v53  ;;  %v6502_v0 = vld [vmem:[#allocation10 + $0x98] sm:$0xf0] }
 0x274   :  { %2169 = vmatmul.bf16.vlgmr.msrb.gmra.mxu0 %v9595_v54  ;;  %2182 = vmatmul.bf16.vlgmr.msrb.gmra.mxu1 %v9615_v40 }
 0x275   :  { %2213 = vmatpush.bf16.msra.mxu0 %v6290_v55  ;;  %2226 = vmatpush.bf16.msra.mxu1 %v6418_v12  ;;  %v6209_v55 = vld [vmem:[#allocation13 + $0x48] sm:$0xf]  ;;  %v8023_v12 = vld [vmem:[#allocation13 + $0x54] sm:$0xf0] }
 0x276   :  { %2239 = vmatpush.bf16.msrb.mxu2 %v6294_v61  ;;  %2252 = vmatpush.bf16.msrb.mxu3 %v6422_v5  ;;  %v8055_v61 = vld [vmem:[#allocation13 + $0x154] sm:$0xf0]  ;;  %v8021_v5 = vld [vmem:[#allocation13 + $0x4c] sm:$0xf]  ;;  %v6210_v25 = vor.u32 %v8023_v12, %v6209_v55  ;;  %v6545_v12 = vor.u32 %v8104_v51, %v6542_v45  ;;  %v8088_v51 = vld [vmem:[#allocation10 + $0x64] sm:$0xf] }
 0x277   :  { %2195 = vmatmul.bf16.vlgmr.msra.gmra.mxu2 %v9595_v54  ;;  %2208 = vmatmul.bf16.vlgmr.msra.gmra.mxu3 %v9615_v40  ;;  %v6338_v27 = vor.u32 %v8055_v61, %v6337_v50  ;;  %v8103_v55 = vld [vmem:[#allocation10 + $0xd4] sm:$0xf0]  ;;  %v8100_v50 = vld [vmem:[#allocation10 + $0xc4] sm:$0xf] }
 0x279   :  { %2214 = vmatpush.bf16.msra.mxu0 %v6274_v52  ;;  %2227 = vmatpush.bf16.msra.mxu1 %v6402_v56  ;;  %v8019_v52 = vld [vmem:[#allocation13 + $0x34] sm:$0xf0]  ;;  %v6214_v56 = vor.u32 %v8021_v5, %v6211_v20  ;;  %v6526_v20 = vld [vmem:[#allocation10 + $0xd0] sm:$0xf0] }
 0x27a   :  { %2240 = vmatpush.bf16.msrb.mxu2 %v6278_v24  ;;  %2253 = vmatpush.bf16.msrb.mxu3 %v6406_v63  ;;  %v8051_v24 = vld [vmem:[#allocation13 + $0x134] sm:$0xf0]  ;;  %v8017_v63 = vld [vmem:[#allocation13 + $0x2c] sm:$0xf]  ;;  %v6194_v19 = vor.u32 %v8019_v52, %v6193_v36  ;;  %v6529_v52 = vor.u32 %v8100_v50, %v6526_v20  ;;  %v8084_v50 = vld [vmem:[#allocation10 + $0x44] sm:$0xf] }
 0x27b   :  { %v6322_v26 = vor.u32 %v8051_v24, %v6321_v14  ;;  %v6198_v42 = vor.u32 %v8017_v63, %v6195_v32  ;;  %v8099_v36 = vld [vmem:[#allocation10 + $0xb4] sm:$0xf0]  ;;  %v6492_v24 = vld [vmem:[#allocation10 + $0x80] sm:$0xf]  ;;  %v8094_v63 = vld [vmem:[#allocation10 + $0x8c] sm:$0xf0] }
 0x27c   :  { %v6500_v32 = vld [vmem:[#allocation10 + $0x88] sm:$0xf] }
 0x27d   :  { %2215 = vmatpush.bf16.msra.mxu0 %v6258_v23  ;;  %2228 = vmatpush.bf16.msra.mxu1 %v6386_v39  ;;  %v8015_v23 = vld [vmem:[#allocation13 + $0x14] sm:$0xf0]  ;;  %v6305_v39 = vld [vmem:[#allocation13 + $0x108] sm:$0xf] }
 0x27e   :  { %2241 = vmatpush.bf16.msrb.mxu2 %v6262_v44  ;;  %2254 = vmatpush.bf16.msrb.mxu3 %v6390_v2  ;;  %v8047_v44 = vld [vmem:[#allocation13 + $0x114] sm:$0xf0]  ;;  %v8013_v2 = vld [vmem:[#allocation13 + $0xc] sm:$0xf] }
 0x27f   :  { %v6306_v58 = vor.u32 %v8047_v44, %v6305_v39  ;;  %v6182_v33 = vor.u32 %v8013_v2, %v6179_v48  ;;  %v6484_v44 = vld [vmem:[#allocation10 + $0x68] sm:$0xf]  ;;  %v8091_v2 = vld [vmem:[#allocation10 + $0x74] sm:$0xf0]  ;;  %v8092_v48 = vld [vmem:[#allocation10 + $0x84] sm:$0xf] }
 0x281   :  { %2216 = vmatpush.bf16.msra.mxu0 %v6242_v28  ;;  %2229 = vmatpush.bf16.msra.mxu1 %v6370_v31  ;;  %v8107_v28 = vld [vmem:[#allocation10 + $0xf4] sm:$0xf0]  ;;  %v6178_v31 = vor.u32 %v8015_v23, %v6177_v22  ;;  %v6518_v22 = vld [vmem:[#allocation10 + $0xb8] sm:$0xf0]  ;;  %v6501_v23 = vor.u32 %v8095_v41, %v6500_v32  ;;  %v6673_v32 = vld [vmem:[#allocation12 + $0xf0] sm:$0xf0] }
 0x282   :  { %2242 = vmatpush.bf16.msrb.mxu2 %v6246_v6  ;;  %2255 = vmatpush.bf16.msrb.mxu3 %v6374_v11  ;;  %v6310_v6 = vor.u32 %v8045_v10, %v6307_v35  ;;  %v6524_v11 = vld [vmem:[#allocation10 + $0xc0] sm:$0xf]  ;;  %v6549_v60 = vor.u32 %v8107_v28, %v6548_v49  ;;  %v6494_v10 = vld [vmem:[#allocation10 + $0x90] sm:$0xf0]  ;;  %v8093_v35 = vld [vmem:[#allocation10 + $0x8c] sm:$0xf]  ;;  %v6485_v28 = vor.u32 %v8091_v2, %v6484_v44 }
 0x283   :  { %v6497_v53 = vor.u32 %v8092_v48, %v6494_v10  ;;  %v8080_v41 = vld [vmem:[#allocation10 + $0x24] sm:$0xf]  ;;  %v8134_v44 = vld [vmem:[#allocation12 + $0xcc] sm:$0xf0]  ;;  %v6657_v48 = vld [vmem:[#allocation12 + $0xd0] sm:$0xf0] }
 0x284   :  { %v8132_v2 = vld [vmem:[#allocation12 + $0xc4] sm:$0xf] }
 0x285   :  { %2217 = vmatpush.bf16.msra.mxu0 %v6226_v16  ;;  %2230 = vmatpush.bf16.msra.mxu1 %v6354_v43  ;;  %v8102_v16 = vld [vmem:[#allocation10 + $0xcc] sm:$0xf0]  ;;  %v6532_v43 = vld [vmem:[#allocation10 + $0xc8] sm:$0xf]  ;;  %v8076_v10 = vld [vmem:[#allocation10 + $0x4] sm:$0xf] }
 0x286   :  { %2243 = vmatpush.bf16.msrb.mxu2 %v6230_v38  ;;  %2256 = vmatpush.bf16.msrb.mxu3 %v6358_v46  ;;  %v6553_v38 = vor.u32 %v8105_v1, %v6550_v18  ;;  %v6508_v46 = vld [vmem:[#allocation10 + $0xa0] sm:$0xf]  ;;  %v6525_v61 = vor.u32 %v8102_v16, %v6524_v11  ;;  %v6533_v5 = vor.u32 %v8103_v55, %v6532_v43  ;;  %v8087_v11 = vld [vmem:[#allocation10 + $0x54] sm:$0xf0]  ;;  %v6486_v1 = vld [vmem:[#allocation10 + $0x78] sm:$0xf0] }
 0x287   :  { %v6444_v55 = vld [vmem:[#allocation10 + $0x20] sm:$0xf] }
 0x289   :  { %2218 = vmatpush.bf16.msra.mxu0 %v6210_v25  ;;  %2231 = vmatpush.bf16.msra.mxu1 %v6338_v27  ;;  %v8098_v25 = vld [vmem:[#allocation10 + $0xac] sm:$0xf0]  ;;  %v6516_v27 = vld [vmem:[#allocation10 + $0xa8] sm:$0xf] }
 0x28a   :  { %2244 = vmatpush.bf16.msrb.mxu2 %v6214_v56  ;;  %2257 = vmatpush.bf16.msrb.mxu3 %v6342_v17  ;;  %v6537_v56 = vor.u32 %v8101_v7, %v6534_v15  ;;  %v6509_v17 = vor.u32 %v8098_v25, %v6508_v46  ;;  %v6517_v14 = vor.u32 %v8099_v36, %v6516_v27  ;;  %v8083_v46 = vld [vmem:[#allocation10 + $0x34] sm:$0xf0]  ;;  %v6470_v7 = vld [vmem:[#allocation10 + $0x58] sm:$0xf0]  ;;  %v6428_v15 = vld [vmem:[#allocation10] sm:$0xf] }
 0x28b   :  { %v8078_v25 = vld [vmem:[#allocation10 + $0xc] sm:$0xf0] }
 0x28d   :  { %2219 = vmatpush.bf16.msra.mxu0 %v6194_v19  ;;  %2232 = vmatpush.bf16.msra.mxu1 %v6322_v26  ;;  %v6510_v19 = vld [vmem:[#allocation10 + $0xb0] sm:$0xf0]  ;;  %v8097_v26 = vld [vmem:[#allocation10 + $0xac] sm:$0xf] }
 0x28e   :  { %2245 = vmatpush.bf16.msrb.mxu2 %v6198_v42  ;;  %2258 = vmatpush.bf16.msrb.mxu3 %v6326_v21  ;;  %v6521_v39 = vor.u32 %v8097_v26, %v6518_v22  ;;  %v6476_v42 = vld [vmem:[#allocation10 + $0x60] sm:$0xf]  ;;  %v8090_v21 = vld [vmem:[#allocation10 + $0x6c] sm:$0xf0]  ;;  %v6429_v22 = vor.u32 %v8078_v25, %v6428_v15 }
 0x28f   :  { %v6477_v49 = vor.u32 %v8090_v21, %v6476_v42  ;;  %v6623_v15 = vld [vmem:[#allocation12 + $0x80] sm:$0xf]  ;;  %v10454_v25 = vld [vmem:[#allocation29_spill] sm:$0xff] }
 0x291   :  { %2220 = vmatpush.bf16.msra.mxu0 %v6178_v31  ;;  %2233 = vmatpush.bf16.msra.mxu1 %v6306_v58  ;;  %v6505_v31 = vor.u32 %v8093_v35, %v6502_v0  ;;  %v6460_v58 = vld [vmem:[#allocation10 + $0x40] sm:$0xf]  ;;  %v6430_v35 = vld [vmem:[#allocation10 + $0x10] sm:$0xf0] }
 0x292   :  { %2246 = vmatpush.bf16.msrb.mxu2 %v6182_v33  ;;  %2259 = vmatpush.bf16.msrb.mxu3 %v6310_v6  ;;  %v8086_v33 = vld [vmem:[#allocation10 + $0x4c] sm:$0xf0]  ;;  %v6468_v6 = vld [vmem:[#allocation10 + $0x48] sm:$0xf]  ;;  %v6433_v0 = vor.u32 %v8076_v10, %v6430_v35 }
 0x293   :  { %v6461_v18 = vor.u32 %v8086_v33, %v6460_v58  ;;  %v6469_v16 = vor.u32 %v8087_v11, %v6468_v6  ;;  %v8168_v6 = vld [vmem:[#allocation12 + $0x1e4] sm:$0xf]  ;;  %v6801_v11 = vld [vmem:[#allocation12 + $0x1f0] sm:$0xf0] }
 0x294   :  { %2221 = vmatmul.bf16.vlgmr.msra.gmra.mxu0 %v9595_v54  ;;  %2234 = vmatmul.bf16.vlgmr.msra.gmra.mxu1 %v9615_v40 }
 0x295   :  { %2526 = vmatpush.bf16.msrb.mxu0 %v6541_v9  ;;  %2247 = vmatmul.bf16.vlgmr.msrb.gmra.mxu2 %v9595_v54  ;;  %v6513_v54 = vor.u32 %v8096_v4, %v6510_v19  ;;  %v6478_v9 = vld [vmem:[#allocation10 + $0x70] sm:$0xf0]  ;;  %v8081_v19 = vld [vmem:[#allocation10 + $0x2c] sm:$0xf] }
 0x296   :  { %2552 = vmatpush.bf16.msra.mxu2 %v6549_v60  ;;  %2260 = vmatmul.bf16.vlgmr.msrb.gmra.mxu3 %v9615_v40  ;;  %v6493_v40 = vor.u32 %v8094_v63, %v6492_v24  ;;  %v8089_v60 = vld [vmem:[#allocation10 + $0x6c] sm:$0xf]  ;;  %v6481_v45 = vor.u32 %v8088_v51, %v6478_v9  ;;  %v8138_v24 = vld [vmem:[#allocation12 + $0xec] sm:$0xf0]  ;;  %v8136_v63 = vld [vmem:[#allocation12 + $0xe4] sm:$0xf]  ;;  %v6660_v9 = vor.u32 %v8132_v2, %v6657_v48 }
 0x297   :  { %2539 = vmatpush.bf16.msrb.mxu1 %v6545_v12  ;;  %2565 = vmatpush.bf16.msra.mxu3 %v6553_v38  ;;  %v6489_v43 = vor.u32 %v8089_v60, %v6486_v1  ;;  %v8082_v12 = vld [vmem:[#allocation10 + $0x2c] sm:$0xf0]  ;;  %v6452_v38 = vld [vmem:[#allocation10 + $0x28] sm:$0xf]  ;;  %v6446_v4 = vld [vmem:[#allocation10 + $0x30] sm:$0xf0]  ;;  %v6676_v21 = vor.u32 %v8136_v63, %v6673_v32  ;;  %v6804_v60 = vor.u32 %v8168_v6, %v6801_v11 }
 0x298   :  { %v6445_v27 = vor.u32 %v8082_v12, %v6444_v55  ;;  %v6453_v36 = vor.u32 %v8083_v46, %v6452_v38  ;;  %v6449_v26 = vor.u32 %v8080_v41, %v6446_v4  ;;  %v8130_v1 = vld [vmem:[#allocation12 + $0xac] sm:$0xf0]  ;;  %v8164_v12 = vld [vmem:[#allocation12 + $0x1c4] sm:$0xf]  ;;  %v6785_v46 = vld [vmem:[#allocation12 + $0x1d0] sm:$0xf0] }
 0x299   :  { %2527 = vmatpush.bf16.msrb.mxu0 %v6525_v61  ;;  %v6462_v61 = vld [vmem:[#allocation10 + $0x50] sm:$0xf0]  ;;  %v8166_v55 = vld [vmem:[#allocation12 + $0x1cc] sm:$0xf0]  ;;  %v8160_v32 = vld [vmem:[#allocation12 + $0x1a4] sm:$0xf] }
 0x29a   :  { %2553 = vmatpush.bf16.msra.mxu2 %v6533_v5  ;;  %v8085_v5 = vld [vmem:[#allocation10 + $0x4c] sm:$0xf]  ;;  %v6465_v20 = vor.u32 %v8084_v50, %v6462_v61  ;;  %v8162_v63 = vld [vmem:[#allocation12 + $0x1ac] sm:$0xf0]  ;;  %v8156_v48 = vld [vmem:[#allocation12 + $0x184] sm:$0xf] }
 0x29b   :  { %2540 = vmatpush.bf16.msrb.mxu1 %v6529_v52  ;;  %2566 = vmatpush.bf16.msra.mxu3 %v6537_v56  ;;  %v6473_v52 = vor.u32 %v8085_v5, %v6470_v7  ;;  %v6436_v56 = vld [vmem:[#allocation10 + $0x8] sm:$0xf]  ;;  %v6788_v7 = vor.u32 %v8164_v12, %v6785_v46  ;;  %v8158_v2 = vld [vmem:[#allocation12 + $0x18c] sm:$0xf0]  ;;  %v6737_v46 = vld [vmem:[#allocation12 + $0x170] sm:$0xf0] }
 0x29d   :  { %2528 = vmatpush.bf16.msrb.mxu0 %v6509_v17  ;;  %v8079_v17 = vld [vmem:[#allocation10 + $0x14] sm:$0xf0] }
 0x29e   :  { %2554 = vmatpush.bf16.msra.mxu2 %v6517_v14  ;;  %v6671_v14 = vld [vmem:[#allocation12 + $0xe0] sm:$0xf] }
 0x29f   :  { %2541 = vmatpush.bf16.msrb.mxu1 %v6513_v54  ;;  %2567 = vmatpush.bf16.msra.mxu3 %v6521_v39  ;;  %v6454_v54 = vld [vmem:[#allocation10 + $0x38] sm:$0xf0]  ;;  %v6655_v39 = vld [vmem:[#allocation12 + $0xc0] sm:$0xf]  ;;  %v6672_v42 = vor.u32 %v8138_v24, %v6671_v14  ;;  %v6625_v14 = vld [vmem:[#allocation12 + $0x90] sm:$0xf0] }
 0x2a0   :  { %v6656_v51 = vor.u32 %v8134_v44, %v6655_v39  ;;  %v6767_v24 = vld [vmem:[#allocation12 + $0x1a0] sm:$0xf]  ;;  %v8122_v39 = vld [vmem:[#allocation12 + $0x6c] sm:$0xf0] }
 0x2a1   :  { %2529 = vmatpush.bf16.msrb.mxu0 %v6493_v40  ;;  %v6437_v40 = vor.u32 %v8079_v17, %v6436_v56  ;;  %v8126_v56 = vld [vmem:[#allocation12 + $0x8c] sm:$0xf0]  ;;  %v8124_v17 = vld [vmem:[#allocation12 + $0x84] sm:$0xf]  ;;  %v6751_v44 = vld [vmem:[#allocation12 + $0x180] sm:$0xf] }
 0x2a2   :  { %2555 = vmatpush.bf16.msra.mxu2 %v6501_v23  ;;  %v6457_v23 = vor.u32 %v8081_v19, %v6454_v54  ;;  %v6768_v19 = vor.u32 %v8162_v63, %v6767_v24  ;;  %v6624_v54 = vor.u32 %v8126_v56, %v6623_v15  ;;  %v8114_v15 = vld [vmem:[#allocation12 + $0x2c] sm:$0xf0] }
 0x2a3   :  { %2542 = vmatpush.bf16.msrb.mxu1 %v6497_v53  ;;  %2568 = vmatpush.bf16.msra.mxu3 %v6505_v31  ;;  %v8077_v53 = vld [vmem:[#allocation10 + $0xc] sm:$0xf]  ;;  %v8170_v31 = vld [vmem:[#allocation12 + $0x1ec] sm:$0xf0] }
 0x2a5   :  { %2530 = vmatpush.bf16.msrb.mxu0 %v6477_v49  ;;  %v6438_v49 = vld [vmem:[#allocation10 + $0x18] sm:$0xf0] }
 0x2a6   :  { %2556 = vmatpush.bf16.msra.mxu2 %v6485_v28  ;;  %v6799_v28 = vld [vmem:[#allocation12 + $0x1e0] sm:$0xf]  ;;  %v6441_v58 = vor.u32 %v8077_v53, %v6438_v49  ;;  %v6753_v49 = vld [vmem:[#allocation12 + $0x190] sm:$0xf0] }
 0x2a7   :  { %2543 = vmatpush.bf16.msrb.mxu1 %v6481_v45  ;;  %2569 = vmatpush.bf16.msra.mxu3 %v6489_v43  ;;  %v6800_v33 = vor.u32 %v8170_v31, %v6799_v28  ;;  %v6639_v45 = vld [vmem:[#allocation12 + $0xa0] sm:$0xf]  ;;  %v10456_v28 = vld [vmem:[#allocation32_spill] sm:$0xff]  ;;  %v6756_v11 = vor.u32 %v8156_v48, %v6753_v49 }
 0x2a8   :  { %v6783_v43 = vld [vmem:[#allocation12 + $0x1c0] sm:$0xf]  ;;  %v6640_v5 = vor.u32 %v8130_v1, %v6639_v45  ;;  %v6593_v45 = vld [vmem:[#allocation12 + $0x50] sm:$0xf0] }
 0x2a9   :  { %2531 = vmatpush.bf16.msrb.mxu0 %v6461_v18  ;;  %v8128_v18 = vld [vmem:[#allocation12 + $0xa4] sm:$0xf]  ;;  %v6784_v38 = vor.u32 %v8166_v55, %v6783_v43 }
 0x2aa   :  { %2557 = vmatpush.bf16.msra.mxu2 %v6469_v16  ;;  %v6641_v16 = vld [vmem:[#allocation12 + $0xb0] sm:$0xf0] }
 0x2ab   :  { %2544 = vmatpush.bf16.msrb.mxu1 %v6465_v20  ;;  %2570 = vmatpush.bf16.msra.mxu3 %v6473_v52  ;;  %v6644_v20 = vor.u32 %v8128_v18, %v6641_v16  ;;  %v6735_v18 = vld [vmem:[#allocation12 + $0x160] sm:$0xf]  ;;  %v8154_v16 = vld [vmem:[#allocation12 + $0x16c] sm:$0xf0] }
 0x2ac   :  { %v6736_v12 = vor.u32 %v8154_v16, %v6735_v18 }
 0x2ad   :  { %2532 = vmatpush.bf16.msrb.mxu0 %v6445_v27 }
 0x2ae   :  { %2558 = vmatpush.bf16.msra.mxu2 %v6453_v36  ;;  %v10455_v36 = vld [vmem:[#allocation39_spill] sm:$0xff] }
 0x2af   :  { %2545 = vmatpush.bf16.msrb.mxu1 %v6449_v26  ;;  %2571 = vmatpush.bf16.msra.mxu3 %v6457_v23  ;;  %v6769_v26 = vld [vmem:[#allocation12 + $0x1b0] sm:$0xf0]  ;;  %v6607_v23 = vld [vmem:[#allocation12 + $0x60] sm:$0xf] }
 0x2b0   :  { %v1488_v50 = vpop.f32.mrf.mxu0  ;;  %v1501_v61 = vpop.f32.mrf.mxu1  ;;  %v6608_v53 = vor.u32 %v8122_v39, %v6607_v23  ;;  %v8108_v23 = vld [vmem:[#allocation12 + $0x4] sm:$0xf]  ;;  %v6561_v39 = vld [vmem:[#allocation12 + $0x10] sm:$0xf0] }
 0x2b1   :  { %2533 = vmatpush.bf16.msrb.mxu0 %v6429_v22  ;;  %v1531_v27 = vadd.f32 %v1488_v50, %v10454_v25  ;;  %v1532_v52 = vadd.f32 %v1501_v61, %v10455_v36  ;;  %v6628_v22 = vor.u32 %v8124_v17, %v6625_v14  ;;  %v6577_v36 = vld [vmem:[#allocation12 + $0x30] sm:$0xf0]  ;;  %v8150_v14 = vld [vmem:[#allocation12 + $0x14c] sm:$0xf0] }
 0x2b2   :  { %2559 = vmatpush.bf16.msra.mxu2 %v6437_v40  ;;  %v6772_v40 = vor.u32 %v8160_v32, %v6769_v26 }
 0x2b3   :  { %2546 = vmatpush.bf16.msrb.mxu1 %v6433_v0  ;;  %2572 = vmatpush.bf16.msra.mxu3 %v6441_v58  ;;  %v6161_v41 = vmul.f32 -1.442695, %v1531_v27  ;;  %v6162_v4 = vmul.f32 -1.442695, %v1532_v52  ;;  %v6752_v0 = vor.u32 %v8158_v2, %v6751_v44  ;;  %v8112_v27 = vld [vmem:[#allocation12 + $0x24] sm:$0xf] }
 0x2b4   :  { %v6719_v52 = vld [vmem:[#allocation12 + $0x140] sm:$0xf]  ;;  %v6580_v32 = vor.u32 %v8112_v27, %v6577_v36  ;;  %v10457_v44 = vld [vmem:[#allocation33_spill] sm:$0xff] }
 0x2b5   :  { %3040 = vmatpush.bf16.msra.mxu0 %v6672_v42  ;;  %8502 = vpow2.f32 %v6161_v41  ;;  %v8120_v42 = vld [vmem:[#allocation12 + $0x64] sm:$0xf]  ;;  %v6720_v41 = vor.u32 %v8150_v14, %v6719_v52 }
 0x2b6   :  { %3066 = vmatpush.bf16.msrb.mxu2 %v6676_v21  ;;  %v6609_v21 = vld [vmem:[#allocation12 + $0x70] sm:$0xf0]  ;;  %8504 = vpow2.f32 %v6162_v4  ;;  %v8148_v4 = vld [vmem:[#allocation12 + $0x144] sm:$0xf] }
 0x2b7   :  { %3053 = vmatpush.bf16.msra.mxu1 %v6800_v33  ;;  %3079 = vmatpush.bf16.msrb.mxu3 %v6804_v60  ;;  %v1514_v10 = vpop.f32.mrf.mxu2  ;;  %v9627_v35 = vpop.f32.mrf.mxu3  ;;  %v6612_v6 = vor.u32 %v8120_v42, %v6609_v21  ;;  %v8116_v60 = vld [vmem:[#allocation12 + $0x44] sm:$0xf] }
 0x2b8   :  { %v1533_v31 = vadd.f32 %v1514_v10, %v10456_v28  ;;  %v1490_v58 = vpop.f32.mrf.mxu0  ;;  %v1503_v33 = vpop.f32.mrf.mxu1  ;;  %v1534_v2 = vadd.f32 %v9627_v35, %v10457_v44  ;;  %v6564_v10 = vor.u32 %v8108_v23, %v6561_v39 }
 0x2b9   :  { %3041 = vmatpush.bf16.msra.mxu0 %v6656_v51  ;;  %v6591_v51 = vld [vmem:[#allocation12 + $0x40] sm:$0xf]  ;;  %v6705_v58 = vld [vmem:[#allocation12 + $0x130] sm:$0xf0] }
 0x2ba   :  { %3067 = vmatpush.bf16.msrb.mxu2 %v6660_v9  ;;  %v8118_v9 = vld [vmem:[#allocation12 + $0x4c] sm:$0xf0]  ;;  %v6163_v1 = vmul.f32 -1.442695, %v1533_v31  ;;  %v8144_v31 = vld [vmem:[#allocation12 + $0x124] sm:$0xf] }
 0x2bb   :  { %3054 = vmatpush.bf16.msra.mxu1 %v6784_v38  ;;  %3080 = vmatpush.bf16.msrb.mxu3 %v6788_v7  ;;  %v8503_v43 = vpop.eup %8502  ;;  %v6592_v55 = vor.u32 %v8118_v9, %v6591_v51  ;;  %v8152_v38 = vld [vmem:[#allocation12 + $0x164] sm:$0xf]  ;;  %v6575_v7 = vld [vmem:[#allocation12 + $0x20] sm:$0xf] }
 0x2bc   :  { %v8505_v50 = vpop.eup %8504  ;;  %v9630_v61 = vadd.f32 1.0, %v8503_v43  ;;  %8506 = vpow2.f32 %v6163_v1  ;;  %v6576_v63 = vor.u32 %v8114_v15, %v6575_v7  ;;  %v6708_v43 = vor.u32 %v8144_v31, %v6705_v58 }
 0x2bd   :  { %3042 = vmatpush.bf16.msra.mxu0 %v6640_v5  ;;  %v6596_v5 = vor.u32 %v8116_v60, %v6593_v45  ;;  %v9632_v25 = vadd.f32 1.0, %v8505_v50 }
 0x2be   :  { %3068 = vmatpush.bf16.msrb.mxu2 %v6644_v20  ;;  %v6740_v20 = vor.u32 %v8152_v38, %v6737_v46  ;;  %8508 = vrcp.f32 %v9630_v61  ;;  %v1558_v35 = vand.u32 2147483648, %v9630_v61  ;;  %vm1552_vm13 = vweird.f32 %v9630_v61 }
 0x2bf   :  { %3055 = vmatpush.bf16.msra.mxu1 %v6768_v19  ;;  %3081 = vmatpush.bf16.msrb.mxu3 %v6772_v40  ;;  %8510 = vrcp.f32 %v9632_v25  ;;  %v1516_v56 = vpop.f32.mrf.mxu2  ;;  %v1529_v17 = vpop.f32.mrf.mxu3  ;;  %v6721_v19 = vld [vmem:[#allocation12 + $0x150] sm:$0xf0]  ;;  %v1573_v1 = vand.u32 2147483648, %v9632_v25  ;;  %v1571_v46 = vand.u32 2147483647, %v9632_v25  ;;  %vm1567_vm12 = vweird.f32 %v9632_v25 }
 0x2c0   :  { %v1608_v24 = vpop.f32.mrf.mxu0  ;;  %v6724_v26 = vor.u32 %v8148_v4, %v6721_v19  ;;  %v1559_v17 = vor.u32 1.1754944e-38, %v1558_v35  ;;  %v8139_v35 = vld [vmem:[#allocation12 + $0xf4] sm:$0xf0] }
 0x2c1   :  { %3043 = vmatpush.bf16.msra.mxu0 %v6624_v54  ;;  %v6559_v54 = vld [vmem:[#allocation12] sm:$0xf]  ;;  %v1609_v51 = vadd.f32 %v1608_v24, %v979_v59  ;;  %v8140_v59 = vld [vmem:[#allocation12 + $0x104] sm:$0xf]  ;;  %v1574_v24 = vor.u32 1.1754944e-38, %v1573_v1  ;;  %vm1572_vm1 = vcmp.eq.f32.partialorder %v1571_v46, 8.507059e+37 }
 0x2c2   :  { %3069 = vmatpush.bf16.msrb.mxu2 %v6628_v22  ;;  %v8110_v22 = vld [vmem:[#allocation12 + $0xc] sm:$0xf0]  ;;  %v8507_v40 = vpop.eup %8506  ;;  %v6809_v46 = vld [vmem:[#allocation12 + $0x1f8] sm:$0xf0] }
 0x2c3   :  { %3056 = vmatpush.bf16.msra.mxu1 %v6752_v0  ;;  %3082 = vmatpush.bf16.msrb.mxu3 %v6756_v11  ;;  %v9636_v42 = vadd.f32 1.0, %v8507_v40  ;;  %v6560_v48 = vor.u32 %v8110_v22, %v6559_v54  ;;  %v8146_v0 = vld [vmem:[#allocation12 + $0x12c] sm:$0xf0] }
 0x2c4   :  { %v8509_v21 = vpop.eup %8508 }
 0x2c5   :  { %3044 = vmatpush.bf16.msra.mxu0 %v6608_v53  ;;  %v6703_v53 = vld [vmem:[#allocation12 + $0x120] sm:$0xf]  ;;  %v8511_v49 = vpop.eup %8510  ;;  %v1548_v28 = vmul.f32 %v8509_v21, %v9630_v61  ;;  %8512 = vrcp.f32 %v9636_v42  ;;  %vm1553_vm10 = vweird.f32 %v8509_v21  ;;  %vm1582_vm3 = vweird.f32 %v9636_v42 }
 0x2c6   :  { %3070 = vmatpush.bf16.msrb.mxu2 %v6612_v6  ;;  %v1563_v33 = vmul.f32 %v8511_v49, %v9632_v25  ;;  %v1556_v6 = vand.u32 2147483647, %v9630_v61  ;;  %v6704_v60 = vor.u32 %v8146_v0, %v6703_v53  ;;  %8514 = vtanh.f32 %v1534_v2  ;;  %vm1554_vm14 = vmor %vm1552_vm13, %vm1553_vm10 }
 0x2c7   :  { %3057 = vmatpush.bf16.msra.mxu1 %v6736_v12  ;;  %3083 = vmatpush.bf16.msrb.mxu3 %v6740_v20  ;;  %v1549_v11 = vsub.f32 1.0, %v1548_v28  ;;  %v1634_v9 = vpop.f32.mrf.mxu2  ;;  %v8142_v12 = vld [vmem:[#allocation12 + $0x10c] sm:$0xf0]  ;;  %vm1568_vm11 = vweird.f32 %v8511_v49  ;;  %v1588_v53 = vand.u32 2147483648, %v9636_v42 }
 0x2c8   :  { %v1564_v45 = vsub.f32 1.0, %v1563_v33  ;;  %v1610_v18 = vpop.f32.mrf.mxu0  ;;  %v1621_v16 = vpop.f32.mrf.mxu1  ;;  %vm1557_vm15 = vcmp.eq.f32.partialorder %v1556_v6, 8.507059e+37  ;;  %vm1569_vm0 = vmor %vm1567_vm12, %vm1568_vm11  ;;  %v6679_v33 = vld [vmem:[#allocation12 + $0xe8] sm:$0xf] }
 0x2c9   :  { %3045 = vmatpush.bf16.msra.mxu0 %v6592_v55  ;;  %v6687_v55 = vld [vmem:[#allocation12 + $0x100] sm:$0xf]  ;;  %v1550_v38 = vmul.f32 %v8509_v21, %v1549_v11  ;;  %v1622_v50 = vadd.f32 %v1621_v16, %v1609_v51  ;;  %v1589_v31 = vor.u32 1.1754944e-38, %v1588_v53  ;;  %v8137_v51 = vld [vmem:[#allocation12 + $0xec] sm:$0xf] }
 0x2ca   :  { %3071 = vmatpush.bf16.msrb.mxu2 %v6596_v5  ;;  %v6689_v5 = vld [vmem:[#allocation12 + $0x110] sm:$0xf0]  ;;  %v1565_v20 = vmul.f32 %v8511_v49, %v1564_v45  ;;  %v6688_v7 = vor.u32 %v8142_v12, %v6687_v55  ;;  %v6681_v18 = vld [vmem:[#allocation12 + $0xf8] sm:$0xf0]  ;;  %v6807_v16 = vld [vmem:[#allocation12 + $0x1e8] sm:$0xf] }
 0x2cb   :  { %3058 = vmatpush.bf16.msra.mxu1 %v6720_v41  ;;  %3084 = vmatpush.bf16.msrb.mxu3 %v6724_v26  ;;  %v6692_v15 = vor.u32 %v8140_v59, %v6689_v5  ;;  %v8513_v27 = vpop.eup %8512  ;;  %v1551_v36 = vadd.f32 %v8509_v21, %v1550_v38  ;;  %v6164_v52 = vmul.f32 -1.442695, %v1622_v50  ;;  %v8171_v12 = vld [vmem:[#allocation12 + $0x1f4] sm:$0xf0]  ;;  %v8169_v38 = vld [vmem:[#allocation12 + $0x1ec] sm:$0xf] }
 0x2cc   :  { %v1578_v56 = vmul.f32 %v8513_v27, %v9636_v42  ;;  %v1566_v14 = vadd.f32 %v8511_v49, %v1565_v20  ;;  %v8515_v25 = vpop.eup %8514  ;;  %vm1583_vm2 = vweird.f32 %v8513_v27  ;;  %v6663_v59 = vld [vmem:[#allocation12 + $0xc8] sm:$0xf] }
 0x2cd   :  { %3046 = vmatpush.bf16.msra.mxu0 %v6576_v63  ;;  %v1555_v63 = vsel %vm1554_vm14, %v8509_v21, %v1551_v36  ;;  %8516 = vpow2.f32 %v6164_v52  ;;  %vm1584_vm4 = vmor %vm1582_vm3, %vm1583_vm2  ;;  %v8133_v36 = vld [vmem:[#allocation12 + $0xcc] sm:$0xf]  ;;  %v6665_v52 = vld [vmem:[#allocation12 + $0xd8] sm:$0xf0] }
 0x2ce   :  { %3072 = vmatpush.bf16.msrb.mxu2 %v6580_v32  ;;  %v1635_v32 = vadd.f32 %v1634_v9, %v980_v57  ;;  %v1579_v41 = vsub.f32 1.0, %v1578_v56  ;;  %v1560_v4 = vsel %vm1557_vm15, %v1559_v17, %v1555_v63  ;;  %v1570_v61 = vsel %vm1569_vm0, %v8511_v49, %v1566_v14  ;;  %v1647_v19 = vpop.f32.mrf.mxu3  ;;  %v6791_v14 = vld [vmem:[#allocation12 + $0x1c8] sm:$0xf] }
 0x2cf   :  { %3059 = vmatpush.bf16.msra.mxu1 %v6704_v60  ;;  %3085 = vmatpush.bf16.msrb.mxu3 %v6708_v43  ;;  %v1575_v26 = vsel %vm1572_vm1, %v1574_v24, %v1570_v61  ;;  %v1594_v54 = vmul.f32 %v8515_v25, %v1560_v4  ;;  %v1636_v22 = vpop.f32.mrf.mxu2  ;;  %v1586_v49 = vand.u32 2147483647, %v9636_v42  ;;  %v6808_v56 = vor.u32 %v8171_v12, %v6807_v16  ;;  %v8167_v24 = vld [vmem:[#allocation12 + $0x1d4] sm:$0xf0]  ;;  %v8165_v25 = vld [vmem:[#allocation12 + $0x1cc] sm:$0xf] }
 0x2d0   :  { %v1648_v40 = vadd.f32 %v1647_v19, %v1635_v32  ;;  %v1580_v23 = vmul.f32 %v8513_v27, %v1579_v41  ;;  %v1593_v39 = vmul.f32 %v1575_v26, %v9527_v3  ;;  %v1623_v21 = vpop.f32.mrf.mxu1  ;;  %v6812_v17 = vor.u32 %v8169_v38, %v6809_v46  ;;  %v6793_v41 = vld [vmem:[#allocation12 + $0x1d8] sm:$0xf0]  ;;  %v8131_v22 = vld [vmem:[#allocation12 + $0xb4] sm:$0xf0]  ;;  %v6759_v12 = vld [vmem:[#allocation12 + $0x188] sm:$0xf] }
 0x2d1   :  { %3047 = vmatpush.bf16.msra.mxu0 %v6560_v48  ;;  %v1660_v57 = vpop.f32.mrf.mxu0  ;;  %vm1587_vm5 = vcmp.eq.f32.partialorder %v1586_v49, 8.507059e+37  ;;  %v6668_v37 = vor.u32 %v8133_v36, %v6665_v52  ;;  %v6649_v21 = vld [vmem:[#allocation12 + $0xb8] sm:$0xf0]  ;;  %v9689_v49 = vld [vmem:[#allocation12 + $0x88] sm:$0xf] }
 0x2d2   :  { %3073 = vmatpush.bf16.msrb.mxu2 %v6564_v10  ;;  %v6165_v44 = vmul.f32 -1.442695, %v1648_v40  ;;  %v9656_v2 = vadd.f32 %v1594_v54, %v1593_v39  ;;  %v1581_v10 = vadd.f32 %v8513_v27, %v1580_v23  ;;  %v1661_v11 = vadd.f32 %v1660_v57, %v981_v62  ;;  %v8129_v39 = vld [vmem:[#allocation12 + $0xac] sm:$0xf]  ;;  %v9714_v36 = vld [vmem:[%s10269_s9] sm:$0xf] }
 0x2d3   :  { %3060 = vmatpush.bf16.msra.mxu1 %v6688_v7  ;;  %3086 = vmatpush.bf16.msrb.mxu3 %v6692_v15  ;;  %v8517_v48 = vpop.eup %8516  ;;  %v6680_v62 = vor.u32 %v8139_v35, %v6679_v33  ;;  %v6684_v15 = vor.u32 %v8137_v51, %v6681_v18  ;;  %v6796_v57 = vor.u32 %v8165_v25, %v6793_v41  ;;  %v6615_v52 = vld [vmem:[#allocation12 + $0x68] sm:$0xf]  ;;  %v8113_v16 = vld [vmem:[#allocation12 + $0x2c] sm:$0xf] }
 0x2d4   :  { %8518 = vpow2.f32 %v6165_v44  ;;  %v9660_v0 = vadd.f32 1.0, %v8517_v48  ;;  %v1585_v28 = vsel %vm1584_vm4, %v8513_v27, %v1581_v10  ;;  %v8135_v27 = vld [vmem:[#allocation12 + $0xd4] sm:$0xf0]  ;;  %v6792_v44 = vor.u32 %v8167_v24, %v6791_v14  ;;  %v6775_v48 = vld [vmem:[#allocation12 + $0x1a8] sm:$0xf] }
 0x2d5   :  { %8520 = vtanh.f32 %v9656_v2  ;;  %v1590_v60 = vsel %vm1587_vm5, %v1589_v31, %v1585_v28  ;;  %v6664_v19 = vor.u32 %v8135_v27, %v6663_v59  ;;  %v8161_v28 = vld [vmem:[#allocation12 + $0x1ac] sm:$0xf]  ;;  %v6777_v31 = vld [vmem:[#allocation12 + $0x1b8] sm:$0xf0] }
 0x2d6   :  { %8522 = vrcp.f32 %v9660_v0  ;;  %v1649_v3 = vpop.f32.mrf.mxu3  ;;  %vm1720_vm7 = vweird.f32 %v9660_v0  ;;  %v8157_v59 = vld [vmem:[#allocation12 + $0x18c] sm:$0xf]  ;;  %v6617_v24 = vld [vmem:[#allocation12 + $0x78] sm:$0xf0] }
 0x2d7   :  { %v8163_v3 = vld [vmem:[#allocation12 + $0x1b4] sm:$0xf0]  ;;  %v8121_v14 = vld [vmem:[#allocation12 + $0x6c] sm:$0xf] }
 0x2d8   :  { %v1673_v1 = vpop.f32.mrf.mxu1 }
 0x2d9   :  { %v1662_v42 = vpop.f32.mrf.mxu0  ;;  %v1674_v55 = vadd.f32 %v1673_v1, %v1661_v11  ;;  %v8125_v11 = vld [vmem:[#allocation12 + $0x8c] sm:$0xf] }
 0x2da   :  { %v1686_v58 = vpop.f32.mrf.mxu2  ;;  %v8519_v6 = vpop.eup %8518  ;;  %v6633_v42 = vld [vmem:[#allocation12 + $0x98] sm:$0xf0] }
 0x2db   :  { %v8521_v9 = vpop.eup %8520  ;;  %v9667_v45 = vadd.f32 1.0, %v8519_v6  ;;  %v6166_v7 = vmul.f32 -1.442695, %v1674_v55  ;;  %v1687_v32 = vadd.f32 %v1686_v58, %v982_v8  ;;  %v6647_v8 = vld [vmem:[#allocation12 + $0xa8] sm:$0xf]  ;;  %v1726_v58 = vand.u32 2147483648, %v9660_v0 }
 0x2dc   :  { %v1597_v43 = vmul.f32 %v8521_v9, %v1590_v60  ;;  %v9669_v50 = vpop.eup %8522  ;;  %v6648_v33 = vor.u32 %v8131_v22, %v6647_v8  ;;  %v8127_v6 = vld [vmem:[#allocation12 + $0x94] sm:$0xf0]  ;;  %v1724_v9 = vand.u32 2147483647, %v9660_v0  ;;  %v6652_v60 = vor.u32 %v8129_v39, %v6649_v21 }
 0x2dd   :  { %8524 = vrcp.f32 %v9667_v45  ;;  %v1716_v20 = vmul.f32 %v9669_v50, %v9660_v0  ;;  %vm1721_vm6 = vweird.f32 %v9669_v50  ;;  %v1741_v1 = vand.u32 2147483648, %v9667_v45  ;;  %v8159_v0 = vld [vmem:[#allocation12 + $0x194] sm:$0xf0] }
 0x2de   :  { %v9672_v5 = vpack.c.bf16 %v1597_v43, %v1597_v43  ;;  %8526 = vpow2.f32 %v6166_v7  ;;  %v1699_v61 = vpop.f32.mrf.mxu3  ;;  %vm9699_vm8 = vmor %vm1720_vm7, %vm1721_vm6  ;;  %v6776_v43 = vor.u32 %v8163_v3, %v6775_v48  ;;  %v6780_v55 = vor.u32 %v8161_v28, %v6777_v31  ;;  %v6727_v3 = vld [vmem:[#allocation12 + $0x148] sm:$0xf]  ;;  %v8151_v31 = vld [vmem:[#allocation12 + $0x154] sm:$0xf0] }
 0x2df   :  { %v1717_v63 = vsub.f32 1.0, %v1716_v20  ;;  %v1700_v26 = vadd.f32 %v1699_v61, %v1687_v32  ;;  %v6761_v20 = vld [vmem:[#allocation12 + $0x198] sm:$0xf0]  ;;  %v1727_v7 = vor.u32 1.1754944e-38, %v1726_v58  ;;  %v6632_v27 = vor.u32 %v8127_v6, %v9689_v49  ;;  %v6743_v61 = vld [vmem:[#allocation12 + $0x168] sm:$0xf] }
 0x2e0   :  { %2534 = vmatmul.bf16.vlgmr.msrb.gmra.mxu0 %v9672_v5  ;;  %2547 = vmatmul.bf16.vlgmr.msrb.gmra.mxu1 %v9672_v5  ;;  %v1675_v23 = vpop.f32.mrf.mxu1  ;;  %vm1735_vm10 = vweird.f32 %v9667_v45  ;;  %vm1725_vm11 = vcmp.eq.f32.partialorder %v1724_v9, 8.507059e+37  ;;  %v1742_v32 = vor.u32 1.1754944e-38, %v1741_v1  ;;  %v6760_v41 = vor.u32 %v8159_v0, %v6759_v12  ;;  %v8149_v58 = vld [vmem:[#allocation12 + $0x14c] sm:$0xf] }
 0x2e1   :  { %2560 = vmatmul.bf16.vlgmr.msra.gmra.mxu2 %v9672_v5  ;;  %2573 = vmatmul.bf16.vlgmr.msra.gmra.mxu3 %v9672_v5  ;;  %v1718_v54 = vmul.f32 %v9669_v50, %v1717_v63  ;;  %8528 = vtanh.f32 %v1700_v26  ;;  %v8153_v26 = vld [vmem:[#allocation12 + $0x16c] sm:$0xf]  ;;  %v1833_v39 = vperm.slane %v9714_v36, 0  ;;  %v6620_v21 = vor.u32 %v8121_v14, %v6617_v24 }
 0x2e2   :  { %v1688_v4 = vpop.f32.mrf.mxu2  ;;  %3092 = vmatpush.bf16.msrb.mxu0 %v6680_v62  ;;  %3118 = vmatpush.bf16.msra.mxu2 %v6684_v15  ;;  %v1739_v62 = vand.u32 2147483647, %v9667_v45  ;;  %v1834_v12 = vperm.slane %v9714_v36, 1  ;;  %v6728_v0 = vor.u32 %v8151_v31, %v6727_v3  ;;  %v8198_v3 = vld [vmem:[#allocation13 + $0xcc] sm:$0xf0] }
 0x2e3   :  { %v9683_v40 = vpop.eup %8524  ;;  %3105 = vmatpush.bf16.msrb.mxu1 %v6808_v56  ;;  %3131 = vmatpush.bf16.msra.mxu3 %v6812_v17  ;;  %v1719_v53 = vadd.f32 %v9669_v50, %v1718_v54  ;;  %v8123_v56 = vld [vmem:[#allocation12 + $0x74] sm:$0xf0]  ;;  %v6636_v17 = vor.u32 %v8125_v11, %v6633_v42  ;;  %v6764_v4 = vor.u32 %v8157_v59, %v6761_v20  ;;  %v6745_v54 = vld [vmem:[#allocation12 + $0x178] sm:$0xf0]  ;;  %v6695_v31 = vld [vmem:[#allocation12 + $0x108] sm:$0xf] }
 0x2e4   :  { %v1731_v10 = vmul.f32 %v9683_v40, %v9667_v45  ;;  %v8527_v35 = vpop.eup %8526  ;;  %vm1736_vm9 = vweird.f32 %v9683_v40  ;;  %v8155_v45 = vld [vmem:[#allocation12 + $0x174] sm:$0xf0]  ;;  %vm1740_vm13 = vcmp.eq.f32.partialorder %v1739_v62, 8.507059e+37  ;;  %v6616_v8 = vor.u32 %v8123_v56, %v6615_v52  ;;  %v6567_v56 = vld [vmem:[#allocation12 + $0x8] sm:$0xf] }
 0x2e5   :  { %v9695_v18 = vadd.f32 1.0, %v8527_v35  ;;  %v1723_v46 = vsel %vm9699_vm8, %v9669_v50, %v1719_v53  ;;  %vm1737_vm12 = vmor %vm1735_vm10, %vm1736_vm9  ;;  %v6744_v53 = vor.u32 %v8155_v45, %v6743_v61  ;;  %v6748_v49 = vor.u32 %v8153_v26, %v6745_v54  ;;  %v6583_v35 = vld [vmem:[#allocation12 + $0x28] sm:$0xf]  ;;  %v8147_v62 = vld [vmem:[#allocation12 + $0x134] sm:$0xf0] }
 0x2e6   :  { %v1732_v51 = vsub.f32 1.0, %v1731_v10  ;;  %3093 = vmatpush.bf16.msrb.mxu0 %v6664_v19  ;;  %3119 = vmatpush.bf16.msra.mxu2 %v6668_v37  ;;  %v1701_v15 = vpop.f32.mrf.mxu3  ;;  %v1728_v25 = vsel %vm1725_vm11, %v1727_v7, %v1723_v46  ;;  %v6601_v10 = vld [vmem:[#allocation12 + $0x58] sm:$0xf0]  ;;  %v6711_v46 = vld [vmem:[#allocation12 + $0x128] sm:$0xf] }
 0x2e7   :  { %3106 = vmatpush.bf16.msrb.mxu1 %v6792_v44  ;;  %3132 = vmatpush.bf16.msra.mxu3 %v6796_v57  ;;  %8530 = vrcp.f32 %v9695_v18  ;;  %v8529_v63 = vpop.eup %8528  ;;  %v6599_v44 = vld [vmem:[#allocation12 + $0x48] sm:$0xf]  ;;  %v8119_v57 = vld [vmem:[#allocation12 + $0x54] sm:$0xf0]  ;;  %v1754_v20 = vand.u32 2147483647, %v9695_v18  ;;  %vm1750_vm15 = vweird.f32 %v9695_v18 }
 0x2e8   :  { %v1733_v38 = vmul.f32 %v9683_v40, %v1732_v51  ;;  %v1762_v23 = vmul.f32 %v8529_v63, %v1728_v25  ;;  %v6600_v11 = vor.u32 %v8119_v57, %v6599_v44  ;;  %v8115_v51 = vld [vmem:[#allocation12 + $0x34] sm:$0xf0]  ;;  %v8145_v15 = vld [vmem:[#allocation12 + $0x12c] sm:$0xf]  ;;  %v6930_v61 = vld [vmem:[#allocation13 + $0xe0] sm:$0xf] }
 0x2e9   :  { %v6584_v52 = vor.u32 %v8115_v51, %v6583_v35  ;;  %v8109_v63 = vld [vmem:[#allocation12 + $0xc] sm:$0xf]  ;;  %v8202_v45 = vld [vmem:[#allocation13 + $0xec] sm:$0xf0]  ;;  %vm1755_vm1 = vcmp.eq.f32.partialorder %v1754_v20, 8.507059e+37 }
 0x2ea   :  { %v1734_v50 = vadd.f32 %v9683_v40, %v1733_v38  ;;  %3094 = vmatpush.bf16.msrb.mxu0 %v6648_v33  ;;  %3120 = vmatpush.bf16.msra.mxu2 %v6652_v60  ;;  %v6729_v33 = vld [vmem:[#allocation12 + $0x158] sm:$0xf0]  ;;  %v8192_v20 = vld [vmem:[#allocation13 + $0xa4] sm:$0xf]  ;;  %v6882_v25 = vld [vmem:[#allocation13 + $0x80] sm:$0xf] }
 0x2eb   :  { %3107 = vmatpush.bf16.msrb.mxu1 %v6776_v43  ;;  %3133 = vmatpush.bf16.msra.mxu3 %v6780_v55  ;;  %v6585_v43 = vld [vmem:[#allocation12 + $0x38] sm:$0xf0]  ;;  %v1756_v55 = vand.u32 2147483648, %v9695_v18  ;;  %v6732_v38 = vor.u32 %v8149_v58, %v6729_v33  ;;  %v8143_v33 = vld [vmem:[#allocation12 + $0x114] sm:$0xf0] }
 0x2ec   :  { %v1738_v19 = vsel %vm1737_vm12, %v9683_v40, %v1734_v50  ;;  %v8117_v40 = vld [vmem:[#allocation12 + $0x4c] sm:$0xf]  ;;  %v8111_v50 = vld [vmem:[#allocation12 + $0x14] sm:$0xf0]  ;;  %v6588_v24 = vor.u32 %v8113_v16, %v6585_v43  ;;  %v7060_v16 = vld [vmem:[#allocation13 + $0x1f0] sm:$0xf0] }
 0x2ed   :  { %v1743_v37 = vsel %vm1740_vm13, %v1742_v32, %v1738_v19  ;;  %v9723_v48 = vpop.eup %8530  ;;  %v6604_v1 = vor.u32 %v8117_v40, %v6601_v10  ;;  %v6569_v32 = vld [vmem:[#allocation12 + $0x18] sm:$0xf0]  ;;  %v6712_v19 = vor.u32 %v8147_v62, %v6711_v46  ;;  %v6568_v44 = vor.u32 %v8111_v50, %v6567_v56  ;;  %v6898_v62 = vld [vmem:[#allocation13 + $0xa0] sm:$0xf]  ;;  %v6900_v56 = vld [vmem:[#allocation13 + $0xb0] sm:$0xf0] }
 0x2ee   :  { %v1761_v22 = vmul.f32 %v1743_v37, %v9577_v34  ;;  %3095 = vmatpush.bf16.msrb.mxu0 %v6632_v27  ;;  %3121 = vmatpush.bf16.msra.mxu2 %v6636_v17  ;;  %v1746_v34 = vmul.f32 %v9723_v48, %v9695_v18  ;;  %vm1751_vm14 = vweird.f32 %v9723_v48  ;;  %v6713_v27 = vld [vmem:[#allocation12 + $0x138] sm:$0xf0]  ;;  %v6572_v10 = vor.u32 %v8109_v63, %v6569_v32  ;;  %v7042_v50 = vld [vmem:[#allocation13 + $0x1c0] sm:$0xf] }
 0x2ef   :  { %3108 = vmatpush.bf16.msrb.mxu1 %v6760_v41  ;;  %3134 = vmatpush.bf16.msra.mxu3 %v6764_v4  ;;  %vm9741_vm0 = vmor %vm1750_vm15, %vm1751_vm14  ;;  %v1757_v41 = vor.u32 1.1754944e-38, %v1756_v55  ;;  %v6716_v18 = vor.u32 %v8145_v15, %v6713_v27  ;;  %v6696_v55 = vor.u32 %v8143_v33, %v6695_v31  ;;  %v6903_v32 = vor.u32 %v8192_v20, %v6900_v56  ;;  %v7012_v31 = vld [vmem:[#allocation13 + $0x190] sm:$0xf0]  ;;  %v8176_v56 = vld [vmem:[#allocation13 + $0x24] sm:$0xf] }
 0x2f0   :  { %v9727_v28 = vadd.f32 %v1762_v23, %v1761_v22  ;;  %3048 = vmatmul.bf16.vlgmr.msra.gmra.mxu0 %v9672_v5  ;;  %v1747_v9 = vsub.f32 1.0, %v1746_v34  ;;  %v8200_v22 = vld [vmem:[#allocation13 + $0xe4] sm:$0xf]  ;;  %v6932_v23 = vld [vmem:[#allocation13 + $0xf0] sm:$0xf0] }
 0x2f1   :  { %v2170_v6 = vpop.f32.mrf.mxu0  ;;  %3074 = vmatmul.bf16.vlgmr.msrb.gmra.mxu2 %v9672_v5  ;;  %v2183_v42 = vpop.f32.mrf.mxu1  ;;  %v8196_v34 = vld [vmem:[#allocation13 + $0xc4] sm:$0xf]  ;;  %v6935_v58 = vor.u32 %v8200_v22, %v6932_v23 }
 0x2f2   :  { %8532 = vtanh.f32 %v9727_v28  ;;  %v2171_v60 = vadd.f32 %v2170_v6, %v1833_v39  ;;  %3096 = vmatpush.bf16.msrb.mxu0 %v6616_v8  ;;  %3122 = vmatpush.bf16.msra.mxu2 %v6620_v21  ;;  %v1748_v59 = vmul.f32 %v9723_v48, %v1747_v9  ;;  %v8141_v6 = vld [vmem:[#allocation12 + $0x10c] sm:$0xf]  ;;  %v6916_v9 = vld [vmem:[#allocation13 + $0xd0] sm:$0xf0] }
 0x2f3   :  { %3109 = vmatpush.bf16.msrb.mxu1 %v6744_v53  ;;  %3135 = vmatpush.bf16.msra.mxu3 %v6748_v49  ;;  %v6914_v49 = vld [vmem:[#allocation13 + $0xc0] sm:$0xf]  ;;  %v6919_v46 = vor.u32 %v8196_v34, %v6916_v9  ;;  %v8220_v34 = vld [vmem:[#allocation13 + $0x184] sm:$0xf]  ;;  %v6852_v9 = vld [vmem:[#allocation13 + $0x50] sm:$0xf0] }
 0x2f4   :  { %v2184_v7 = vadd.f32 %v2183_v42, %v2171_v60  ;;  %v1749_v17 = vadd.f32 %v9723_v48, %v1748_v59  ;;  %v7058_v60 = vld [vmem:[#allocation13 + $0x1e0] sm:$0xf]  ;;  %v8234_v42 = vld [vmem:[#allocation13 + $0x1ec] sm:$0xf0] }
 0x2f5   :  { %v8194_v59 = vld [vmem:[#allocation13 + $0xac] sm:$0xf0]  ;;  %v7059_v27 = vor.u32 %v8234_v42, %v7058_v60 }
 0x2f6   :  { %v6423_v14 = vmul.f32 -1.442695, %v2184_v7  ;;  %3097 = vmatpush.bf16.msrb.mxu0 %v6600_v11  ;;  %3123 = vmatpush.bf16.msra.mxu2 %v6604_v1  ;;  %v1753_v54 = vsel %vm9741_vm0, %v9723_v48, %v1749_v17  ;;  %v6931_v48 = vor.u32 %v8202_v45, %v6930_v61  ;;  %v6697_v11 = vld [vmem:[#allocation12 + $0x118] sm:$0xf0]  ;;  %v8232_v1 = vld [vmem:[#allocation13 + $0x1e4] sm:$0xf]  ;;  %v6899_v63 = vor.u32 %v8194_v59, %v6898_v62 }
 0x2f7   :  { %3110 = vmatpush.bf16.msrb.mxu1 %v6728_v0  ;;  %3136 = vmatpush.bf16.msra.mxu3 %v6732_v38  ;;  %v1758_v39 = vsel %vm1755_vm1, %v1757_v41, %v1753_v54  ;;  %v6915_v38 = vor.u32 %v8198_v3, %v6914_v49  ;;  %v8230_v17 = vld [vmem:[#allocation13 + $0x1cc] sm:$0xf0]  ;;  %v6996_v62 = vld [vmem:[#allocation13 + $0x170] sm:$0xf0]  ;;  %v6834_v59 = vld [vmem:[#allocation13 + $0x20] sm:$0xf] }
 0x2f8   :  { %v8533_v26 = vpop.eup %8532  ;;  %8534 = vpow2.f32 %v6423_v14  ;;  %v8228_v14 = vld [vmem:[#allocation13 + $0x1c4] sm:$0xf]  ;;  %v8190_v41 = vld [vmem:[#allocation13 + $0x8c] sm:$0xf0]  ;;  %v7043_v45 = vor.u32 %v8230_v17, %v7042_v50  ;;  %v6836_v50 = vld [vmem:[#allocation13 + $0x30] sm:$0xf0] }
 0x2f9   :  { %v2172_v21 = vpop.f32.mrf.mxu0  ;;  %v1765_v57 = vmul.f32 %v8533_v26, %v1758_v39  ;;  %v2185_v53 = vpop.f32.mrf.mxu1  ;;  %v8226_v26 = vld [vmem:[#allocation13 + $0x1ac] sm:$0xf0]  ;;  %v6883_v22 = vor.u32 %v8190_v41, %v6882_v25  ;;  %v6866_v39 = vld [vmem:[#allocation13 + $0x60] sm:$0xf]  ;;  %v6980_v25 = vld [vmem:[#allocation13 + $0x150] sm:$0xf0] }
 0x2fa   :  { %v2196_v4 = vpop.f32.mrf.mxu2  ;;  %v2209_v8 = vpop.f32.mrf.mxu3  ;;  %3098 = vmatpush.bf16.msrb.mxu0 %v6584_v52  ;;  %3124 = vmatpush.bf16.msra.mxu2 %v6588_v24  ;;  %v7063_v52 = vor.u32 %v8232_v1, %v7060_v16  ;;  %v7044_v24 = vld [vmem:[#allocation13 + $0x1d0] sm:$0xf0]  ;;  %v7010_v53 = vld [vmem:[#allocation13 + $0x180] sm:$0xf]  ;;  %v8222_v3 = vld [vmem:[#allocation13 + $0x18c] sm:$0xf0]  ;;  %v7015_v16 = vor.u32 %v8220_v34, %v7012_v31 }
 0x2fb   :  { %v2197_v37 = vadd.f32 %v2196_v4, %v1834_v12  ;;  %3111 = vmatpush.bf16.msrb.mxu1 %v6712_v19  ;;  %3137 = vmatpush.bf16.msra.mxu3 %v6716_v18  ;;  %v9748_v35 = vpack.c.bf16 %v1765_v57, %v1765_v57  ;;  %v6700_v12 = vor.u32 %v8141_v6, %v6697_v11  ;;  %v8188_v4 = vld [vmem:[#allocation13 + $0x84] sm:$0xf]  ;;  %v7026_v18 = vld [vmem:[#allocation13 + $0x1a0] sm:$0xf]  ;;  %v8186_v57 = vld [vmem:[#allocation13 + $0x6c] sm:$0xf0] }
 0x2fc   :  { %v7047_v19 = vor.u32 %v8228_v14, %v7044_v24  ;;  %v7027_v21 = vor.u32 %v8226_v26, %v7026_v18  ;;  %v6850_v6 = vld [vmem:[#allocation13 + $0x40] sm:$0xf]  ;;  %v8182_v11 = vld [vmem:[#allocation13 + $0x4c] sm:$0xf0]  ;;  %v7011_v1 = vor.u32 %v8222_v3, %v7010_v53  ;;  %v1836_v14 = vperm.slane %v9714_v36, 3 }
 0x2fd   :  { %v2210_v40 = vadd.f32 %v2209_v8, %v2197_v37  ;;  %3061 = vmatmul.bf16.vlgmr.msra.gmra.mxu1 %v9748_v35  ;;  %3087 = vmatmul.bf16.vlgmr.msrb.gmra.mxu3 %v9748_v35  ;;  %v8224_v37 = vld [vmem:[#allocation13 + $0x1a4] sm:$0xf]  ;;  %v7028_v8 = vld [vmem:[#allocation13 + $0x1b0] sm:$0xf0]  ;;  %v6978_v24 = vld [vmem:[#allocation13 + $0x140] sm:$0xf] }
 0x2fe   :  { %v8535_v43 = vpop.eup %8534  ;;  %3099 = vmatpush.bf16.msrb.mxu0 %v6568_v44  ;;  %3125 = vmatpush.bf16.msra.mxu2 %v6572_v10  ;;  %v7031_v44 = vor.u32 %v8224_v37, %v7028_v8  ;;  %v6868_v10 = vld [vmem:[#allocation13 + $0x70] sm:$0xf0]  ;;  %v9776_v18 = vld [vmem:[#allocation13 + $0x4] sm:$0xf]  ;;  %v9778_v37 = vld [vmem:[#allocation13 + $0xe8] sm:$0xf] }
 0x2ff   :  { %v6424_v51 = vmul.f32 -1.442695, %v2210_v40  ;;  %v9750_v7 = vadd.f32 1.0, %v8535_v43  ;;  %3112 = vmatpush.bf16.msrb.mxu1 %v6696_v55  ;;  %3138 = vmatpush.bf16.msra.mxu3 %v6700_v12  ;;  %v8184_v40 = vld [vmem:[#allocation13 + $0x64] sm:$0xf] }
 0x300   :  { %v6871_v33 = vor.u32 %v8184_v40, %v6868_v10  ;;  %v6994_v43 = vld [vmem:[#allocation13 + $0x160] sm:$0xf]  ;;  %v8218_v55 = vld [vmem:[#allocation13 + $0x16c] sm:$0xf0]  ;;  %v6820_v26 = vld [vmem:[#allocation13 + $0x10] sm:$0xf0] }
 0x301   :  { %8536 = vpow2.f32 %v6424_v51  ;;  %3100 = vmatmul.bf16.vlgmr.msrb.gmra.mxu0 %v9672_v5  ;;  %3126 = vmatmul.bf16.vlgmr.msra.gmra.mxu2 %v9672_v5  ;;  %v6884_v5 = vld [vmem:[#allocation13 + $0x90] sm:$0xf0]  ;;  %v8180_v51 = vld [vmem:[#allocation13 + $0x44] sm:$0xf]  ;;  %v9787_v40 = vld [vmem:[#allocation13 + $0x12c] sm:$0xf0]  ;;  %vm2282_vm6 = vweird.f32 %v9750_v7 }
 0x302   :  { %v2198_v0 = vpop.f32.mrf.mxu2  ;;  %3602 = vmatpush.bf16.msra.mxu0 %v6931_v48  ;;  %3628 = vmatpush.bf16.msrb.mxu2 %v6935_v58  ;;  %v2211_v15 = vpop.f32.mrf.mxu3  ;;  %8538 = vrcp.f32 %v9750_v7  ;;  %v6887_v23 = vor.u32 %v8188_v4, %v6884_v5  ;;  %v1835_v48 = vperm.slane %v9714_v36, 2  ;;  %v6867_v58 = vor.u32 %v8186_v57, %v6866_v39  ;;  %v9774_v5 = vld [vmem:[#allocation13 + $0xc] sm:$0xf0]  ;;  %v9782_v39 = vld [vmem:[#allocation13 + $0xec] sm:$0xf] }
 0x303   :  { %3615 = vmatpush.bf16.msra.mxu1 %v7059_v27  ;;  %3641 = vmatpush.bf16.msrb.mxu3 %v7063_v52  ;;  %v6851_v15 = vor.u32 %v8182_v11, %v6850_v6  ;;  %v6855_v27 = vor.u32 %v8180_v51, %v6852_v9  ;;  %v8178_v52 = vld [vmem:[#allocation13 + $0x2c] sm:$0xf0]  ;;  %v9785_v57 = vld [vmem:[#allocation13 + $0x120] sm:$0xf]  ;;  %v6823_v51 = vor.u32 %v9776_v18, %v6820_v26  ;;  %v6964_v9 = vld [vmem:[#allocation13 + $0x130] sm:$0xf0] }
 0x304   :  { %v6835_v8 = vor.u32 %v8178_v52, %v6834_v59  ;;  %v6906_v26 = vld [vmem:[#allocation13 + $0xa8] sm:$0xf] }
 0x306   :  { %3603 = vmatpush.bf16.msra.mxu0 %v6915_v38  ;;  %3629 = vmatpush.bf16.msrb.mxu2 %v6919_v46  ;;  %v8216_v46 = vld [vmem:[#allocation13 + $0x164] sm:$0xf] }
 0x307   :  { %v8537_v61 = vpop.eup %8536  ;;  %3616 = vmatpush.bf16.msra.mxu1 %v7043_v45  ;;  %3642 = vmatpush.bf16.msrb.mxu3 %v7047_v19  ;;  %v6999_v45 = vor.u32 %v8216_v46, %v6996_v62  ;;  %v9772_v19 = vld [vmem:[#allocation13] sm:$0xf]  ;;  %v2288_v62 = vand.u32 2147483648, %v9750_v7 }
 0x308   :  { %v9757_v54 = vadd.f32 1.0, %v8537_v61  ;;  %v9760_v49 = vpop.eup %8538  ;;  %v6995_v61 = vor.u32 %v8218_v55, %v6994_v43  ;;  %v6819_v11 = vor.u32 %v9774_v5, %v9772_v19 }
 0x309   :  { %v2278_v42 = vmul.f32 %v9760_v49, %v9750_v7  ;;  %vm2283_vm3 = vweird.f32 %v9760_v49 }
 0x30a   :  { %8540 = vrcp.f32 %v9757_v54  ;;  %3604 = vmatpush.bf16.msra.mxu0 %v6899_v63  ;;  %3630 = vmatpush.bf16.msrb.mxu2 %v6903_v32  ;;  %v8214_v63 = vld [vmem:[#allocation13 + $0x14c] sm:$0xf0]  ;;  %v8212_v32 = vld [vmem:[#allocation13 + $0x144] sm:$0xf]  ;;  %vm2297_vm4 = vweird.f32 %v9757_v54  ;;  %vm9834_vm8 = vmor %vm2282_vm6, %vm2283_vm3 }
 0x30b   :  { %3617 = vmatpush.bf16.msra.mxu1 %v7027_v21  ;;  %3643 = vmatpush.bf16.msrb.mxu3 %v7031_v44  ;;  %v2279_v41 = vsub.f32 1.0, %v2278_v42  ;;  %v6940_v44 = vld [vmem:[#allocation13 + $0xf8] sm:$0xf0]  ;;  %v6979_v34 = vor.u32 %v8214_v63, %v6978_v24  ;;  %v6983_v31 = vor.u32 %v8212_v32, %v6980_v25  ;;  %v9793_v42 = vld [vmem:[#allocation13 + $0xc8] sm:$0xf] }
 0x30c   :  { %v6943_v55 = vor.u32 %v9782_v39, %v6940_v44  ;;  %v7066_v24 = vld [vmem:[#allocation13 + $0x1e8] sm:$0xf]  ;;  %v8235_v63 = vld [vmem:[#allocation13 + $0x1f4] sm:$0xf0]  ;;  %v6908_v44 = vld [vmem:[#allocation13 + $0xb8] sm:$0xf0] }
 0x30d   :  { %3113 = vmatmul.bf16.vlgmr.msrb.gmra.mxu1 %v9748_v35  ;;  %3139 = vmatmul.bf16.vlgmr.msra.gmra.mxu3 %v9748_v35  ;;  %v2280_v3 = vmul.f32 %v9760_v49, %v2279_v41  ;;  %v8221_v41 = vld [vmem:[#allocation13 + $0x18c] sm:$0xf] }
 0x30e   :  { %3605 = vmatpush.bf16.msra.mxu0 %v6883_v22  ;;  %3631 = vmatpush.bf16.msrb.mxu2 %v6887_v23  ;;  %v6839_v22 = vor.u32 %v8176_v56, %v6836_v50  ;;  %v9780_v23 = vld [vmem:[#allocation13 + $0xf4] sm:$0xf0]  ;;  %v8204_v50 = vld [vmem:[#allocation13 + $0x104] sm:$0xf] }
 0x30f   :  { %3618 = vmatpush.bf16.msra.mxu1 %v7011_v1  ;;  %3644 = vmatpush.bf16.msrb.mxu3 %v7015_v16  ;;  %v9795_v1 = vld [vmem:[#allocation13 + $0xd4] sm:$0xf0]  ;;  %v2286_v16 = vand.u32 2147483647, %v9750_v7  ;;  %v6939_v43 = vor.u32 %v9780_v23, %v9778_v37  ;;  %v2281_v52 = vadd.f32 %v9760_v49, %v2280_v3  ;;  %v2289_v7 = vor.u32 1.1754944e-38, %v2288_v62 }
 0x310   :  { %v9763_v60 = vpop.eup %8540  ;;  %v8195_v37 = vld [vmem:[#allocation13 + $0xb4] sm:$0xf0] }
 0x311   :  { %v2293_v12 = vmul.f32 %v9763_v60, %v9757_v54  ;;  %v2222_v0 = vpop.f32.mrf.mxu0  ;;  %v2235_v38 = vpop.f32.mrf.mxu1  ;;  %vm2298_vm2 = vweird.f32 %v9763_v60  ;;  %vm9824_vm7 = vcmp.eq.f32.partialorder %v2286_v16, 8.507059e+37  ;;  %v8231_v3 = vld [vmem:[#allocation13 + $0x1d4] sm:$0xf0] }
 0x312   :  { %v2223_v20 = vadd.f32 %v2222_v0, %v1835_v48  ;;  %3606 = vmatpush.bf16.msra.mxu0 %v6867_v58  ;;  %3632 = vmatpush.bf16.msrb.mxu2 %v6871_v33  ;;  %v8208_v48 = vld [vmem:[#allocation13 + $0x124] sm:$0xf]  ;;  %v9803_v0 = vld [vmem:[#allocation13 + $0xcc] sm:$0xf]  ;;  %vm9819_vm5 = vmor %vm2297_vm4, %vm2298_vm2 }
 0x313   :  { %v2294_v17 = vsub.f32 1.0, %v2293_v12  ;;  %3619 = vmatpush.bf16.msra.mxu1 %v6995_v61  ;;  %3645 = vmatpush.bf16.msrb.mxu3 %v6999_v45  ;;  %v6963_v12 = vor.u32 %v9787_v40, %v9785_v57  ;;  %v6967_v56 = vor.u32 %v8208_v48, %v6964_v9  ;;  %v7068_v61 = vld [vmem:[#allocation13 + $0x1f8] sm:$0xf0]  ;;  %v7067_v40 = vor.u32 %v8235_v63, %v7066_v24  ;;  %v8191_v9 = vld [vmem:[#allocation13 + $0x94] sm:$0xf0] }
 0x314   :  { %v2236_v4 = vadd.f32 %v2235_v38, %v2223_v20  ;;  %v9805_v38 = vld [vmem:[#allocation13 + $0xd8] sm:$0xf0]  ;;  %v9810_v20 = vld [vmem:[#allocation13 + $0x100] sm:$0xf]  ;;  %v7018_v63 = vld [vmem:[#allocation13 + $0x188] sm:$0xf] }
 0x315   :  { %v2295_v21 = vmul.f32 %v9763_v60, %v2294_v17  ;;  %v6948_v17 = vld [vmem:[#allocation13 + $0x110] sm:$0xf0]  ;;  %v6927_v18 = vor.u32 %v9803_v0, %v9805_v38  ;;  %v471_v57 = vld [vmem:[#allocation7 + $0x10] sm:$0xff]  ;;  %v8225_v38 = vld [vmem:[#allocation13 + $0x1ac] sm:$0xf] }
 0x316   :  { %v6425_v36 = vmul.f32 -1.442695, %v2236_v4  ;;  %3607 = vmatpush.bf16.msra.mxu0 %v6851_v15  ;;  %3633 = vmatpush.bf16.msrb.mxu2 %v6855_v27  ;;  %v8206_v15 = vld [vmem:[#allocation13 + $0x10c] sm:$0xf0]  ;;  %v2303_v27 = vand.u32 2147483648, %v9757_v54 }
 0x317   :  { %v2296_v59 = vadd.f32 %v9763_v60, %v2295_v21  ;;  %3620 = vmatpush.bf16.msra.mxu1 %v6979_v34  ;;  %3646 = vmatpush.bf16.msrb.mxu3 %v6983_v31  ;;  %v8233_v4 = vld [vmem:[#allocation13 + $0x1ec] sm:$0xf]  ;;  %v6947_v39 = vor.u32 %v8206_v15, %v9810_v20  ;;  %v6951_v21 = vor.u32 %v8204_v50, %v6948_v17  ;;  %v7052_v31 = vld [vmem:[#allocation13 + $0x1d8] sm:$0xf0]  ;;  %v8227_v0 = vld [vmem:[#allocation13 + $0x1b4] sm:$0xf0] }
 0x318   :  { %8542 = vpow2.f32 %v6425_v36  ;;  %v2248_v10 = vpop.f32.mrf.mxu2  ;;  %v2304_v36 = vor.u32 1.1754944e-38, %v2303_v27  ;;  %v8229_v34 = vld [vmem:[#allocation13 + $0x1cc] sm:$0xf]  ;;  %v6874_v27 = vld [vmem:[#allocation13 + $0x68] sm:$0xf] }
 0x319   :  { %v2261_v53 = vpop.f32.mrf.mxu3  ;;  %v2249_v58 = vadd.f32 %v2248_v10, %v1836_v14  ;;  %v2224_v33 = vpop.f32.mrf.mxu0  ;;  %v2301_v14 = vand.u32 2147483647, %v9757_v54  ;;  %v6923_v54 = vor.u32 %v9795_v1, %v9793_v42  ;;  %v2300_v5 = vsel %vm9819_vm5, %v9763_v60, %v2296_v59  ;;  %v8193_v60 = vld [vmem:[#allocation13 + $0xac] sm:$0xf]  ;;  %v6892_v1 = vld [vmem:[#allocation13 + $0x98] sm:$0xf0] }
 0x31a   :  { %v2237_v6 = vpop.f32.mrf.mxu1  ;;  %3608 = vmatpush.bf16.msra.mxu0 %v6835_v8  ;;  %3634 = vmatpush.bf16.msrb.mxu2 %v6839_v22  ;;  %v2285_v8 = vsel %vm9834_vm8, %v9760_v49, %v2281_v52  ;;  %v7071_v10 = vor.u32 %v8233_v4, %v7068_v61  ;;  %v7050_v49 = vld [vmem:[#allocation13 + $0x1c8] sm:$0xf]  ;;  %v6907_v33 = vor.u32 %v8195_v37, %v6906_v26  ;;  %v8189_v42 = vld [vmem:[#allocation13 + $0x8c] sm:$0xf]  ;;  %v6876_v17 = vld [vmem:[#allocation13 + $0x78] sm:$0xf0] }
 0x31b   :  { %v2262_v46 = vadd.f32 %v2261_v53, %v2249_v58  ;;  %3621 = vmatpush.bf16.msra.mxu1 %v6963_v12  ;;  %3647 = vmatpush.bf16.msrb.mxu3 %v6967_v56  ;;  %vm2302_vm9 = vcmp.eq.f32.partialorder %v2301_v14, 8.507059e+37  ;;  %v2290_v58 = vsel %vm9824_vm7, %v2289_v7, %v2285_v8  ;;  %v6911_v6 = vor.u32 %v8193_v60, %v6908_v44  ;;  %v7034_v12 = vld [vmem:[#allocation13 + $0x1a8] sm:$0xf]  ;;  %v8187_v56 = vld [vmem:[#allocation13 + $0x74] sm:$0xf0] }
 0x31c   :  { %v2305_v53 = vsel %vm2302_vm9, %v2304_v36, %v2300_v5  ;;  %v6895_v15 = vor.u32 %v8189_v42, %v6892_v1  ;;  %v8185_v50 = vld [vmem:[#allocation13 + $0x6c] sm:$0xf]  ;;  %v7035_v14 = vor.u32 %v8227_v0, %v7034_v12  ;;  %v6875_v61 = vor.u32 %v8187_v56, %v6874_v27  ;;  %v6858_v7 = vld [vmem:[#allocation13 + $0x48] sm:$0xf]  ;;  %v8183_v5 = vld [vmem:[#allocation13 + $0x54] sm:$0xf0] }
 0x31d   :  { %8544 = vtanh.f32 %v2262_v46  ;;  %v2323_v16 = vmul.f32 %v2305_v53, %v471_v57  ;;  %v7036_v46 = vld [vmem:[#allocation13 + $0x1b8] sm:$0xf0]  ;;  %v6879_v19 = vor.u32 %v8185_v50, %v6876_v17  ;;  %v8181_v37 = vld [vmem:[#allocation13 + $0x4c] sm:$0xf]  ;;  %v6842_v53 = vld [vmem:[#allocation13 + $0x28] sm:$0xf] }
 0x31e   :  { %v8543_v32 = vpop.eup %8542  ;;  %3609 = vmatpush.bf16.msra.mxu0 %v6819_v11  ;;  %3635 = vmatpush.bf16.msrb.mxu2 %v6823_v51  ;;  %v6890_v11 = vld [vmem:[#allocation13 + $0x88] sm:$0xf]  ;;  %v7039_v24 = vor.u32 %v8225_v38, %v7036_v46  ;;  %v6860_v36 = vld [vmem:[#allocation13 + $0x58] sm:$0xf0]  ;;  %v8217_v60 = vld [vmem:[#allocation13 + $0x16c] sm:$0xf] }
 0x31f   :  { %v9830_v45 = vadd.f32 1.0, %v8543_v32  ;;  %3622 = vmatpush.bf16.msra.mxu1 %v6947_v39  ;;  %3648 = vmatpush.bf16.msrb.mxu3 %v6951_v21  ;;  %v6891_v20 = vor.u32 %v8191_v9, %v6890_v11  ;;  %v8223_v32 = vld [vmem:[#allocation13 + $0x194] sm:$0xf0]  ;;  %v7004_v44 = vld [vmem:[#allocation13 + $0x178] sm:$0xf0] }
 0x320   :  { %v2250_v22 = vpop.f32.mrf.mxu2  ;;  %v7019_v8 = vor.u32 %v8223_v32, %v7018_v63  ;;  %v8219_v21 = vld [vmem:[#allocation13 + $0x174] sm:$0xf0]  ;;  %v6986_v11 = vld [vmem:[#allocation13 + $0x148] sm:$0xf]  ;;  %v8213_v42 = vld [vmem:[#allocation13 + $0x14c] sm:$0xf] }
 0x321   :  { %v2263_v23 = vpop.f32.mrf.mxu3  ;;  %8546 = vrcp.f32 %v9830_v45  ;;  %3610 = vmatmul.bf16.vlgmr.msra.gmra.mxu0 %v9748_v35  ;;  %3636 = vmatmul.bf16.vlgmr.msrb.gmra.mxu2 %v9748_v35  ;;  %v2318_v4 = vand.u32 2147483648, %v9830_v45  ;;  %v2316_v26 = vand.u32 2147483647, %v9830_v45  ;;  %vm2312_vm11 = vweird.f32 %v9830_v45  ;;  %v8215_v9 = vld [vmem:[#allocation13 + $0x154] sm:$0xf0] }
 0x322   :  { %3654 = vmatpush.bf16.msrb.mxu0 %v6939_v43  ;;  %3680 = vmatpush.bf16.msra.mxu2 %v6943_v55  ;;  %v7051_v43 = vor.u32 %v8231_v3, %v7050_v49  ;;  %v7055_v55 = vor.u32 %v8229_v34, %v7052_v31  ;;  %v7002_v23 = vld [vmem:[#allocation13 + $0x168] sm:$0xf]  ;;  %v6863_v49 = vor.u32 %v8181_v37, %v6860_v36  ;;  %v8179_v3 = vld [vmem:[#allocation13 + $0x34] sm:$0xf0]  ;;  %v8177_v31 = vld [vmem:[#allocation13 + $0x2c] sm:$0xf] }
 0x323   :  { %v8545_v48 = vpop.eup %8544  ;;  %3667 = vmatpush.bf16.msrb.mxu1 %v7067_v40  ;;  %3693 = vmatpush.bf16.msra.mxu3 %v7071_v10  ;;  %v2319_v40 = vor.u32 1.1754944e-38, %v2318_v4  ;;  %v6859_v10 = vor.u32 %v8183_v5, %v6858_v7  ;;  %vm2317_vm13 = vcmp.eq.f32.partialorder %v2316_v26, 8.507059e+37  ;;  %v6988_v1 = vld [vmem:[#allocation13 + $0x158] sm:$0xf0]  ;;  %v8175_v12 = vld [vmem:[#allocation13 + $0x14] sm:$0xf0] }
 0x324   :  { %v2324_v51 = vmul.f32 %v8545_v48, %v2290_v58  ;;  %v8173_v0 = vld [vmem:[#allocation13 + $0xc] sm:$0xf]  ;;  %v6828_v46 = vld [vmem:[#allocation13 + $0x18] sm:$0xf0]  ;;  %v6991_v27 = vor.u32 %v8213_v42, %v6988_v1  ;;  %v8264_v56 = vld [vmem:[#allocation12 + $0xe4] sm:$0xf] }
 0x325   :  { %v7191_v50 = vld [vmem:[#allocation12 + $0xf0] sm:$0xf0]  ;;  %v8211_v17 = vld [vmem:[#allocation13 + $0x134] sm:$0xf0]  ;;  %v6831_v32 = vor.u32 %v8173_v0, %v6828_v46  ;;  %v7173_v4 = vld [vmem:[#allocation12 + $0xc0] sm:$0xf] }
 0x326   :  { %3655 = vmatpush.bf16.msrb.mxu0 %v6923_v54  ;;  %3681 = vmatpush.bf16.msra.mxu2 %v6927_v18  ;;  %v9852_v59 = vadd.f32 %v2324_v51, %v2323_v16  ;;  %v7020_v54 = vld [vmem:[#allocation13 + $0x198] sm:$0xf0]  ;;  %v6843_v16 = vor.u32 %v8179_v3, %v6842_v53  ;;  %v8262_v7 = vld [vmem:[#allocation12 + $0xcc] sm:$0xf0]  ;;  %v8260_v5 = vld [vmem:[#allocation12 + $0xc4] sm:$0xf] }
 0x327   :  { %v8547_v62 = vpop.eup %8546  ;;  %3668 = vmatpush.bf16.msrb.mxu1 %v7051_v43  ;;  %3694 = vmatpush.bf16.msra.mxu3 %v7055_v55  ;;  %v7023_v22 = vor.u32 %v8221_v41, %v7020_v54  ;;  %v6826_v55 = vld [vmem:[#allocation13 + $0x8] sm:$0xf]  ;;  %v7194_v54 = vor.u32 %v8264_v56, %v7191_v50  ;;  %v8207_v26 = vld [vmem:[#allocation13 + $0x114] sm:$0xf0]  ;;  %v8205_v37 = vld [vmem:[#allocation13 + $0x10c] sm:$0xf] }
 0x328   :  { %v2308_v52 = vmul.f32 %v8547_v62, %v9830_v45  ;;  %8548 = vtanh.f32 %v9852_v59  ;;  %vm2313_vm10 = vweird.f32 %v8547_v62  ;;  %v6844_v45 = vld [vmem:[#allocation13 + $0x38] sm:$0xf0]  ;;  %v6827_v63 = vor.u32 %v8175_v12, %v6826_v55  ;;  %v7159_v57 = vld [vmem:[#allocation12 + $0xb0] sm:$0xf0]  ;;  %v8254_v53 = vld [vmem:[#allocation12 + $0x8c] sm:$0xf0] }
 0x329   :  { %vm9859_vm12 = vmor %vm2312_vm11, %vm2313_vm10  ;;  %v6847_v43 = vor.u32 %v8177_v31, %v6844_v45  ;;  %v6956_v36 = vld [vmem:[#allocation13 + $0x118] sm:$0xf0]  ;;  %v8252_v3 = vld [vmem:[#allocation12 + $0x84] sm:$0xf] }
 0x32a   :  { %3656 = vmatpush.bf16.msrb.mxu0 %v6907_v33  ;;  %3682 = vmatpush.bf16.msra.mxu2 %v6911_v6  ;;  %v2309_v25 = vsub.f32 1.0, %v2308_v52  ;;  %v7003_v33 = vor.u32 %v8219_v21, %v7002_v23  ;;  %v7007_v6 = vor.u32 %v8217_v60, %v7004_v44  ;;  %v8266_v52 = vld [vmem:[#allocation12 + $0xec] sm:$0xf0]  ;;  %v7157_v23 = vld [vmem:[#allocation12 + $0xa0] sm:$0xf]  ;;  %v6959_v21 = vor.u32 %v8205_v37, %v6956_v36 }
 0x32b   :  { %3669 = vmatpush.bf16.msrb.mxu1 %v7035_v14  ;;  %3695 = vmatpush.bf16.msra.mxu3 %v7039_v24  ;;  %v8209_v14 = vld [vmem:[#allocation13 + $0x12c] sm:$0xf]  ;;  %v6972_v24 = vld [vmem:[#allocation13 + $0x138] sm:$0xf0]  ;;  %v8258_v60 = vld [vmem:[#allocation12 + $0xac] sm:$0xf0] }
 0x32c   :  { %v2310_v18 = vmul.f32 %v8547_v62, %v2309_v25  ;;  %v6954_v25 = vld [vmem:[#allocation13 + $0x108] sm:$0xf]  ;;  %v8256_v44 = vld [vmem:[#allocation12 + $0xa4] sm:$0xf]  ;;  %v8246_v42 = vld [vmem:[#allocation12 + $0x4c] sm:$0xf0] }
 0x32d   :  { %v8244_v1 = vld [vmem:[#allocation12 + $0x44] sm:$0xf]  ;;  %v7093_v12 = vld [vmem:[#allocation12 + $0x20] sm:$0xf]  ;;  %v8242_v0 = vld [vmem:[#allocation12 + $0x2c] sm:$0xf0] }
 0x32e   :  { %3657 = vmatpush.bf16.msrb.mxu0 %v6891_v20  ;;  %3683 = vmatpush.bf16.msra.mxu2 %v6895_v15  ;;  %v2311_v39 = vadd.f32 %v8547_v62, %v2310_v18  ;;  %v8549_v48 = vpop.eup %8548  ;;  %v7189_v20 = vld [vmem:[#allocation12 + $0xe0] sm:$0xf]  ;;  %v6987_v15 = vor.u32 %v8215_v9, %v6986_v11  ;;  %v7175_v18 = vld [vmem:[#allocation12 + $0xd0] sm:$0xf0]  ;;  %v8240_v46 = vld [vmem:[#allocation12 + $0x24] sm:$0xf] }
 0x32f   :  { %3670 = vmatpush.bf16.msrb.mxu1 %v7019_v8  ;;  %3696 = vmatpush.bf16.msra.mxu3 %v7023_v22  ;;  %v7190_v41 = vor.u32 %v8266_v52, %v7189_v20  ;;  %v7174_v8 = vor.u32 %v8262_v7, %v7173_v4  ;;  %v7178_v22 = vor.u32 %v8260_v5, %v7175_v18  ;;  %v7109_v9 = vld [vmem:[#allocation12 + $0x40] sm:$0xf]  ;;  %v8236_v52 = vld [vmem:[#allocation12 + $0x4] sm:$0xf]  ;;  %v7079_v56 = vld [vmem:[#allocation12 + $0x10] sm:$0xf0] }
 0x330   :  { %v2315_v34 = vsel %vm9859_vm12, %v8547_v62, %v2311_v39  ;;  %v6970_v62 = vld [vmem:[#allocation13 + $0x128] sm:$0xf]  ;;  %v6955_v39 = vor.u32 %v8207_v26, %v6954_v25  ;;  %v8263_v4 = vld [vmem:[#allocation12 + $0xd4] sm:$0xf0]  ;;  %v8257_v37 = vld [vmem:[#allocation12 + $0xac] sm:$0xf] }
 0x331   :  { %v2320_v58 = vsel %vm2317_vm13, %v2319_v40, %v2315_v34  ;;  %v7158_v40 = vor.u32 %v8258_v60, %v7157_v23  ;;  %v7143_v34 = vld [vmem:[#allocation12 + $0x90] sm:$0xf0]  ;;  %v7197_v50 = vld [vmem:[#allocation12 + $0xe8] sm:$0xf]  ;;  %v8259_v26 = vld [vmem:[#allocation12 + $0xb4] sm:$0xf0] }
 0x332   :  { %3658 = vmatpush.bf16.msrb.mxu0 %v6875_v61  ;;  %3684 = vmatpush.bf16.msra.mxu2 %v6879_v19  ;;  %v9865_v51 = vmul.f32 %v8549_v48, %v2320_v58  ;;  %v6971_v61 = vor.u32 %v8211_v17, %v6970_v62  ;;  %v6975_v19 = vor.u32 %v8209_v14, %v6972_v24  ;;  %v7125_v48 = vld [vmem:[#allocation12 + $0x60] sm:$0xf]  ;;  %v8250_v58 = vld [vmem:[#allocation12 + $0x6c] sm:$0xf0]  ;;  %v7095_v62 = vld [vmem:[#allocation12 + $0x30] sm:$0xf0] }
 0x333   :  { %3671 = vmatpush.bf16.msrb.mxu1 %v7003_v33  ;;  %3697 = vmatpush.bf16.msra.mxu3 %v7007_v6  ;;  %v7146_v45 = vor.u32 %v8252_v3, %v7143_v34  ;;  %v8248_v33 = vld [vmem:[#allocation12 + $0x64] sm:$0xf]  ;;  %v7126_v6 = vor.u32 %v8250_v58, %v7125_v48  ;;  %v7098_v20 = vor.u32 %v8240_v46, %v7095_v62  ;;  %v8267_v17 = vld [vmem:[#allocation12 + $0xf4] sm:$0xf0]  ;;  %v8265_v14 = vld [vmem:[#allocation12 + $0xec] sm:$0xf] }
 0x334   :  { %v9869_v38 = vpack.c.bf16 %v9865_v51, %v9865_v51  ;;  %v7198_v25 = vor.u32 %v8267_v17, %v7197_v50  ;;  %v7165_v18 = vld [vmem:[#allocation12 + $0xa8] sm:$0xf]  ;;  %v7167_v36 = vld [vmem:[#allocation12 + $0xb8] sm:$0xf0]  ;;  %v8296_v58 = vld [vmem:[#allocation12 + $0x1e4] sm:$0xf] }
 0x335   :  { %v7149_v23 = vld [vmem:[#allocation12 + $0x88] sm:$0xf]  ;;  %v10470_v60 = vld [vmem:[#allocation34_spill] sm:$0xff]  ;;  %v8292_v62 = vld [vmem:[#allocation12 + $0x1c4] sm:$0xf] }
 0x336   :  { %3659 = vmatpush.bf16.msrb.mxu0 %v6859_v10  ;;  %3685 = vmatpush.bf16.msra.mxu2 %v6863_v49  ;;  %v7162_v10 = vor.u32 %v8256_v44, %v7159_v57  ;;  %v7141_v49 = vld [vmem:[#allocation12 + $0x80] sm:$0xf]  ;;  %v387_v44 = vadd.f32 %v10470_v60, %v10421_v13  ;;  %v10471_v57 = vld [vmem:[#allocation40_spill] sm:$0xff]  ;;  %v8286_v60 = vld [vmem:[#allocation12 + $0x18c] sm:$0xf0] }
 0x337   :  { %3623 = vmatmul.bf16.vlgmr.msra.gmra.mxu1 %v9869_v38  ;;  %3649 = vmatmul.bf16.vlgmr.msrb.gmra.mxu3 %v9869_v38  ;;  %v7142_v31 = vor.u32 %v8254_v53, %v7141_v49  ;;  %v7317_v49 = vld [vmem:[#allocation12 + $0x1e0] sm:$0xf]  ;;  %v8298_v53 = vld [vmem:[#allocation12 + $0x1ec] sm:$0xf0]  ;;  %v7133_v13 = vld [vmem:[#allocation12 + $0x68] sm:$0xf] }
 0x338   :  { %3672 = vmatpush.bf16.msrb.mxu1 %v6987_v15  ;;  %3698 = vmatpush.bf16.msra.mxu3 %v6991_v27  ;;  %v7077_v15 = vld [vmem:[#allocation12] sm:$0xf]  ;;  %v8238_v27 = vld [vmem:[#allocation12 + $0xc] sm:$0xf0]  ;;  %v7318_v48 = vor.u32 %v8298_v53, %v7317_v49  ;;  %v8245_v50 = vld [vmem:[#allocation12 + $0x4c] sm:$0xf] }
 0x339   :  { %v7078_v24 = vor.u32 %v8238_v27, %v7077_v15  ;;  %v8284_v49 = vld [vmem:[#allocation12 + $0x184] sm:$0xf]  ;;  %v7271_v53 = vld [vmem:[#allocation12 + $0x190] sm:$0xf0] }
 0x33a   :  { %3660 = vmatpush.bf16.msrb.mxu0 %v6843_v16  ;;  %3686 = vmatpush.bf16.msra.mxu2 %v6847_v43  ;;  %v7111_v16 = vld [vmem:[#allocation12 + $0x50] sm:$0xf0]  ;;  %v7110_v43 = vor.u32 %v8246_v42, %v7109_v9  ;;  %v8251_v9 = vld [vmem:[#allocation12 + $0x74] sm:$0xf0]  ;;  %v8249_v42 = vld [vmem:[#allocation12 + $0x6c] sm:$0xf] }
 0x33b   :  { %v7114_v55 = vor.u32 %v8244_v1, %v7111_v16  ;;  %v7135_v16 = vld [vmem:[#allocation12 + $0x78] sm:$0xf0] }
 0x33c   :  { %3673 = vmatpush.bf16.msrb.mxu1 %v6971_v61  ;;  %3699 = vmatpush.bf16.msra.mxu3 %v6975_v19  ;;  %v8261_v61 = vld [vmem:[#allocation12 + $0xcc] sm:$0xf]  ;;  %v7183_v19 = vld [vmem:[#allocation12 + $0xd8] sm:$0xf0] }
 0x33d   :  { %v7186_v5 = vor.u32 %v8261_v61, %v7183_v19  ;;  %v8288_v61 = vld [vmem:[#allocation12 + $0x1a4] sm:$0xf]  ;;  %v7287_v19 = vld [vmem:[#allocation12 + $0x1b0] sm:$0xf0] }
 0x33e   :  { %3661 = vmatpush.bf16.msrb.mxu0 %v6827_v63  ;;  %3687 = vmatpush.bf16.msra.mxu2 %v6831_v32  ;;  %v7082_v63 = vor.u32 %v8236_v52, %v7079_v56  ;;  %v7199_v32 = vld [vmem:[#allocation12 + $0xf8] sm:$0xf0]  ;;  %v7117_v52 = vld [vmem:[#allocation12 + $0x48] sm:$0xf]  ;;  %v8247_v56 = vld [vmem:[#allocation12 + $0x54] sm:$0xf0] }
 0x340   :  { %3674 = vmatpush.bf16.msrb.mxu1 %v6955_v39  ;;  %3700 = vmatpush.bf16.msra.mxu3 %v6959_v21  ;;  %v8255_v39 = vld [vmem:[#allocation12 + $0x94] sm:$0xf0]  ;;  %v8253_v21 = vld [vmem:[#allocation12 + $0x8c] sm:$0xf] }
 0x341   :  { %3662 = vmatmul.bf16.vlgmr.msrb.gmra.mxu0 %v9748_v35  ;;  %3688 = vmatmul.bf16.vlgmr.msra.gmra.mxu2 %v9748_v35  ;;  %v7127_v35 = vld [vmem:[#allocation12 + $0x70] sm:$0xf0] }
 0x342   :  { %4166 = vmatpush.bf16.msra.mxu0 %v7190_v41  ;;  %4192 = vmatpush.bf16.msrb.mxu2 %v7194_v54  ;;  %v7130_v11 = vor.u32 %v8248_v33, %v7127_v35  ;;  %v7202_v41 = vor.u32 %v8265_v14, %v7199_v32  ;;  %v7181_v54 = vld [vmem:[#allocation12 + $0xc8] sm:$0xf]  ;;  %v7319_v33 = vld [vmem:[#allocation12 + $0x1f0] sm:$0xf0]  ;;  %v8290_v32 = vld [vmem:[#allocation12 + $0x1ac] sm:$0xf0] }
 0x343   :  { %v7182_v7 = vor.u32 %v8263_v4, %v7181_v54 }
 0x344   :  { %4179 = vmatpush.bf16.msra.mxu1 %v7318_v48 }
 0x346   :  { %4167 = vmatpush.bf16.msra.mxu0 %v7174_v8  ;;  %4193 = vmatpush.bf16.msrb.mxu2 %v7178_v22  ;;  %v7166_v8 = vor.u32 %v8259_v26, %v7165_v18  ;;  %v7170_v22 = vor.u32 %v8257_v37, %v7167_v36  ;;  %v7101_v26 = vld [vmem:[#allocation12 + $0x28] sm:$0xf]  ;;  %v8243_v37 = vld [vmem:[#allocation12 + $0x34] sm:$0xf0] }
 0x347   :  { %3675 = vmatmul.bf16.vlgmr.msrb.gmra.mxu1 %v9869_v38  ;;  %3701 = vmatmul.bf16.vlgmr.msra.gmra.mxu3 %v9869_v38  ;;  %v7094_v38 = vor.u32 %v8242_v0, %v7093_v12  ;;  %v7134_v12 = vor.u32 %v8251_v9, %v7133_v13  ;;  %v7138_v0 = vor.u32 %v8249_v42, %v7135_v16  ;;  %v7253_v13 = vld [vmem:[#allocation12 + $0x160] sm:$0xf]  ;;  %v8282_v9 = vld [vmem:[#allocation12 + $0x16c] sm:$0xf0] }
 0x348   :  { %v7254_v16 = vor.u32 %v8282_v9, %v7253_v13 }
 0x34a   :  { %4168 = vmatpush.bf16.msra.mxu0 %v7158_v40  ;;  %4194 = vmatpush.bf16.msrb.mxu2 %v7162_v10  ;;  %v406_v40 = vadd.f32 %v10471_v57, %v10423_v30  ;;  %v7151_v10 = vld [vmem:[#allocation12 + $0x98] sm:$0xf0]  ;;  %v7102_v57 = vor.u32 %v8243_v37, %v7101_v26  ;;  %v7223_v26 = vld [vmem:[#allocation12 + $0x130] sm:$0xf0] }
 0x34e   :  { %4169 = vmatpush.bf16.msra.mxu0 %v7142_v31  ;;  %4195 = vmatpush.bf16.msrb.mxu2 %v7146_v45  ;;  %v7150_v31 = vor.u32 %v8255_v39, %v7149_v23  ;;  %v7154_v45 = vor.u32 %v8253_v21, %v7151_v10  ;;  %v7269_v23 = vld [vmem:[#allocation12 + $0x180] sm:$0xf] }
 0x34f   :  { %v7270_v10 = vor.u32 %v8286_v60, %v7269_v23  ;;  %v8270_v60 = vld [vmem:[#allocation12 + $0x10c] sm:$0xf0] }
 0x352   :  { %4170 = vmatpush.bf16.msra.mxu0 %v7126_v6  ;;  %4196 = vmatpush.bf16.msrb.mxu2 %v7130_v11  ;;  %v7322_v11 = vor.u32 %v8296_v58, %v7319_v33  ;;  %v7274_v58 = vor.u32 %v8284_v49, %v7271_v53  ;;  %v8237_v33 = vld [vmem:[#allocation12 + $0xc] sm:$0xf]  ;;  %v7207_v53 = vld [vmem:[#allocation12 + $0x110] sm:$0xf0] }
 0x354   :  { %4205 = vmatpush.bf16.msrb.mxu3 %v7322_v11 }
 0x356   :  { %4171 = vmatpush.bf16.msra.mxu0 %v7110_v43  ;;  %4197 = vmatpush.bf16.msrb.mxu2 %v7114_v55  ;;  %v7301_v43 = vld [vmem:[#allocation12 + $0x1c0] sm:$0xf]  ;;  %v8294_v55 = vld [vmem:[#allocation12 + $0x1cc] sm:$0xf0] }
 0x357   :  { %v7302_v46 = vor.u32 %v8294_v55, %v7301_v43  ;;  %v8280_v43 = vld [vmem:[#allocation12 + $0x164] sm:$0xf]  ;;  %v7255_v55 = vld [vmem:[#allocation12 + $0x170] sm:$0xf0] }
 0x359   :  { %4180 = vmatpush.bf16.msra.mxu1 %v7302_v46 }
 0x35a   :  { %4172 = vmatpush.bf16.msra.mxu0 %v7094_v38  ;;  %4198 = vmatpush.bf16.msrb.mxu2 %v7098_v20  ;;  %v7303_v38 = vld [vmem:[#allocation12 + $0x1d0] sm:$0xf0]  ;;  %v10472_v20 = vld [vmem:[#allocation35_spill] sm:$0xff] }
 0x35b   :  { %v425_v15 = vadd.f32 %v10472_v20, %v10425_v47  ;;  %v7306_v27 = vor.u32 %v8292_v62, %v7303_v38  ;;  %v7118_v47 = vor.u32 %v8247_v56, %v7117_v52  ;;  %v7237_v38 = vld [vmem:[#allocation12 + $0x140] sm:$0xf]  ;;  %v8278_v20 = vld [vmem:[#allocation12 + $0x14c] sm:$0xf0]  ;;  %v7239_v52 = vld [vmem:[#allocation12 + $0x150] sm:$0xf0] }
 0x35d   :  { %v2535_v3 = vpop.f32.mrf.mxu0  ;;  %v2548_v34 = vpop.f32.mrf.mxu1  ;;  %4206 = vmatpush.bf16.msrb.mxu3 %v7306_v27 }
 0x35e   :  { %4173 = vmatpush.bf16.msra.mxu0 %v7078_v24  ;;  %4199 = vmatpush.bf16.msrb.mxu2 %v7082_v63  ;;  %v2578_v35 = vadd.f32 %v2535_v3, %v387_v44  ;;  %v2579_v6 = vadd.f32 %v2548_v34, %v406_v40  ;;  %v7119_v24 = vld [vmem:[#allocation12 + $0x58] sm:$0xf0]  ;;  %v7285_v63 = vld [vmem:[#allocation12 + $0x1a0] sm:$0xf]  ;;  %v7085_v3 = vld [vmem:[#allocation12 + $0x8] sm:$0xf] }
 0x35f   :  { %v7286_v4 = vor.u32 %v8290_v32, %v7285_v63  ;;  %v7238_v32 = vor.u32 %v8278_v20, %v7237_v38 }
 0x360   :  { %v6554_v30 = vmul.f32 -1.442695, %v2578_v35  ;;  %v6555_v1 = vmul.f32 -1.442695, %v2579_v6  ;;  %v7087_v35 = vld [vmem:[#allocation12 + $0x18] sm:$0xf0] }
 0x361   :  { %4181 = vmatpush.bf16.msra.mxu1 %v7286_v4  ;;  %v7090_v11 = vor.u32 %v8237_v33, %v7087_v35  ;;  %v7325_v35 = vld [vmem:[#allocation12 + $0x1e8] sm:$0xf] }
 0x362   :  { %4218 = vmatpush.bf16.msrb.mxu0 %v7198_v25  ;;  %4244 = vmatpush.bf16.msra.mxu2 %v7202_v41  ;;  %8550 = vpow2.f32 %v6554_v30  ;;  %v10473_v30 = vld [vmem:[#allocation36_spill] sm:$0xff] }
 0x363   :  { %8552 = vpow2.f32 %v6555_v1  ;;  %v444_v1 = vadd.f32 %v10473_v30, %v10427_v29  ;;  %v8276_v29 = vld [vmem:[#allocation12 + $0x144] sm:$0xf] }
 0x364   :  { %v2561_v17 = vpop.f32.mrf.mxu2  ;;  %v9883_v14 = vpop.f32.mrf.mxu3  ;;  %v7242_v4 = vor.u32 %v8276_v29, %v7239_v52  ;;  %v8293_v29 = vld [vmem:[#allocation12 + $0x1cc] sm:$0xf]  ;;  %v7311_v52 = vld [vmem:[#allocation12 + $0x1d8] sm:$0xf0] }
 0x365   :  { %v2580_v25 = vadd.f32 %v2561_v17, %v425_v15  ;;  %v2537_v41 = vpop.f32.mrf.mxu0  ;;  %v2550_v54 = vpop.f32.mrf.mxu1  ;;  %4182 = vmatpush.bf16.msra.mxu1 %v7270_v10  ;;  %v2581_v62 = vadd.f32 %v9883_v14, %v444_v1  ;;  %v8297_v1 = vld [vmem:[#allocation12 + $0x1ec] sm:$0xf] }
 0x366   :  { %4219 = vmatpush.bf16.msrb.mxu0 %v7182_v7  ;;  %4245 = vmatpush.bf16.msra.mxu2 %v7186_v5  ;;  %v7122_v7 = vor.u32 %v8245_v50, %v7119_v24  ;;  %v7290_v5 = vor.u32 %v8288_v61, %v7287_v19  ;;  %v9909_v24 = vld [vmem:[%s10267_s7] sm:$0xf]  ;;  %v7221_v61 = vld [vmem:[#allocation12 + $0x120] sm:$0xf] }
 0x367   :  { %v6556_v18 = vmul.f32 -1.442695, %v2580_v25  ;;  %v8274_v19 = vld [vmem:[#allocation12 + $0x12c] sm:$0xf0] }
 0x368   :  { %v8551_v36 = vpop.eup %8550  ;;  %4207 = vmatpush.bf16.msrb.mxu3 %v7290_v5  ;;  %v7222_v5 = vor.u32 %v8274_v19, %v7221_v61 }
 0x369   :  { %v8553_v39 = vpop.eup %8552  ;;  %v9885_v21 = vadd.f32 1.0, %v8551_v36  ;;  %8554 = vpow2.f32 %v6556_v18  ;;  %4183 = vmatpush.bf16.msra.mxu1 %v7254_v16  ;;  %v8272_v18 = vld [vmem:[#allocation12 + $0x124] sm:$0xf]  ;;  %v2712_v36 = vperm.slane %v9909_v24, 0  ;;  %v7327_v16 = vld [vmem:[#allocation12 + $0x1f8] sm:$0xf0] }
 0x36a   :  { %4220 = vmatpush.bf16.msrb.mxu0 %v7166_v8  ;;  %4246 = vmatpush.bf16.msra.mxu2 %v7170_v22  ;;  %v8241_v8 = vld [vmem:[#allocation12 + $0x2c] sm:$0xf]  ;;  %v7103_v22 = vld [vmem:[#allocation12 + $0x38] sm:$0xf0]  ;;  %v9887_v44 = vadd.f32 1.0, %v8553_v39 }
 0x36b   :  { %v7106_v40 = vor.u32 %v8241_v8, %v7103_v22  ;;  %8556 = vrcp.f32 %v9885_v21  ;;  %v2603_v17 = vand.u32 2147483647, %v9885_v21  ;;  %v2605_v14 = vand.u32 2147483648, %v9885_v21  ;;  %v7205_v39 = vld [vmem:[#allocation12 + $0x100] sm:$0xf] }
 0x36c   :  { %8558 = vrcp.f32 %v9887_v44  ;;  %v2563_v34 = vpop.f32.mrf.mxu2  ;;  %4208 = vmatpush.bf16.msrb.mxu3 %v7274_v58  ;;  %v2620_v41 = vand.u32 2147483648, %v9887_v44  ;;  %v7226_v8 = vor.u32 %v8272_v18, %v7223_v26  ;;  %vm2614_vm0 = vweird.f32 %v9887_v44  ;;  %v8330_v26 = vld [vmem:[#allocation13 + $0xec] sm:$0xf0] }
 0x36d   :  { %v9891_v48 = vpop.f32.mrf.mxu0  ;;  %4184 = vmatpush.bf16.msra.mxu1 %v7238_v32  ;;  %vm2599_vm1 = vweird.f32 %v9885_v21  ;;  %vm2604_vm3 = vcmp.eq.f32.partialorder %v2603_v17, 8.507059e+37  ;;  %v2606_v10 = vor.u32 1.1754944e-38, %v2605_v14  ;;  %v7314_v17 = vor.u32 %v8293_v29, %v7311_v52  ;;  %v8322_v29 = vld [vmem:[#allocation13 + $0xac] sm:$0xf0]  ;;  %v7245_v52 = vld [vmem:[#allocation12 + $0x148] sm:$0xf] }
 0x36e   :  { %4221 = vmatpush.bf16.msrb.mxu0 %v7150_v31  ;;  %4247 = vmatpush.bf16.msra.mxu2 %v7154_v45  ;;  %v2576_v31 = vpop.f32.mrf.mxu3  ;;  %v8239_v45 = vld [vmem:[#allocation12 + $0x14] sm:$0xf0]  ;;  %v3050_v9 = vadd.f32 %v9891_v48, %v2712_v36 }
 0x36f   :  { %v7086_v6 = vor.u32 %v8239_v45, %v7085_v3  ;;  %v8555_v42 = vpop.eup %8554 }
 0x371   :  { %v8557_v46 = vpop.eup %8556  ;;  %4185 = vmatpush.bf16.msra.mxu1 %v7222_v5 }
 0x372   :  { %4222 = vmatpush.bf16.msrb.mxu0 %v7134_v12  ;;  %4248 = vmatpush.bf16.msra.mxu2 %v7138_v0  ;;  %v9895_v12 = vadd.f32 1.0, %v8555_v42  ;;  %v7258_v0 = vor.u32 %v8280_v43, %v7255_v55  ;;  %v9898_v15 = vpop.eup %8558  ;;  %v2595_v27 = vmul.f32 %v8557_v46, %v9885_v21  ;;  %vm2600_vm14 = vweird.f32 %v8557_v46 }
 0x373   :  { %v2610_v56 = vmul.f32 %v9898_v15, %v9887_v44  ;;  %vm2615_vm15 = vweird.f32 %v9898_v15  ;;  %vm2601_vm2 = vmor %vm2599_vm1, %vm2600_vm14  ;;  %v7206_v21 = vor.u32 %v8270_v60, %v7205_v39  ;;  %v7277_v39 = vld [vmem:[#allocation12 + $0x188] sm:$0xf]  ;;  %v8287_v60 = vld [vmem:[#allocation12 + $0x194] sm:$0xf0] }
 0x374   :  { %8560 = vrcp.f32 %v9895_v12  ;;  %4209 = vmatpush.bf16.msrb.mxu3 %v7258_v0  ;;  %v2596_v50 = vsub.f32 1.0, %v2595_v27  ;;  %v9911_v63 = vpop.f32.mrf.mxu2  ;;  %vm2616_vm4 = vmor %vm2614_vm0, %vm2615_vm15  ;;  %v8295_v27 = vld [vmem:[#allocation12 + $0x1d4] sm:$0xf0]  ;;  %v2635_v14 = vand.u32 2147483648, %v9895_v12  ;;  %vm2629_vm7 = vweird.f32 %v9895_v12 }
 0x375   :  { %v2611_v25 = vsub.f32 1.0, %v2610_v56  ;;  %8562 = vtanh.f32 %v2581_v62  ;;  %v3051_v54 = vpop.f32.mrf.mxu0  ;;  %v2713_v62 = vperm.slane %v9909_v24, 1  ;;  %4186 = vmatpush.bf16.msra.mxu1 %v7206_v21  ;;  %v2633_v32 = vand.u32 2147483647, %v9895_v12  ;;  %v7279_v21 = vld [vmem:[#allocation12 + $0x198] sm:$0xf0] }
 0x376   :  { %4223 = vmatpush.bf16.msrb.mxu0 %v7118_v47  ;;  %4249 = vmatpush.bf16.msra.mxu2 %v7122_v7  ;;  %v2597_v47 = vmul.f32 %v8557_v46, %v2596_v50  ;;  %v2618_v7 = vand.u32 2147483647, %v9887_v44  ;;  %v2621_v44 = vor.u32 1.1754944e-38, %v2620_v41  ;;  %v7293_v41 = vld [vmem:[#allocation12 + $0x1a8] sm:$0xf] }
 0x377   :  { %v2612_v37 = vmul.f32 %v9898_v15, %v2611_v25  ;;  %v3076_v25 = vadd.f32 %v9911_v63, %v2713_v62  ;;  %v8291_v54 = vld [vmem:[#allocation12 + $0x1b4] sm:$0xf0]  ;;  %v7448_v63 = vld [vmem:[#allocation13 + $0xe0] sm:$0xf]  ;;  %vm2634_vm9 = vcmp.eq.f32.partialorder %v2633_v32, 8.507059e+37 }
 0x378   :  { %4210 = vmatpush.bf16.msrb.mxu3 %v7242_v4  ;;  %v2598_v23 = vadd.f32 %v8557_v46, %v2597_v47  ;;  %vm2619_vm5 = vcmp.eq.f32.partialorder %v2618_v7, 8.507059e+37  ;;  %v7294_v19 = vor.u32 %v8291_v54, %v7293_v41  ;;  %v8289_v47 = vld [vmem:[#allocation12 + $0x1ac] sm:$0xf]  ;;  %v7295_v7 = vld [vmem:[#allocation12 + $0x1b8] sm:$0xf0] }
 0x379   :  { %v2613_v49 = vadd.f32 %v9898_v15, %v2612_v37  ;;  %v8328_v37 = vld [vmem:[#allocation13 + $0xe4] sm:$0xf]  ;;  %v7298_v36 = vor.u32 %v8289_v47, %v7295_v7  ;;  %v8277_v54 = vld [vmem:[#allocation12 + $0x14c] sm:$0xf]  ;;  %v7247_v4 = vld [vmem:[#allocation12 + $0x158] sm:$0xf0] }
 0x37a   :  { %4224 = vmatpush.bf16.msrb.mxu0 %v7102_v57  ;;  %4250 = vmatpush.bf16.msra.mxu2 %v7106_v40  ;;  %v9918_v22 = vpop.eup %8560  ;;  %v8268_v57 = vld [vmem:[#allocation12 + $0x104] sm:$0xf]  ;;  %v2602_v3 = vsel %vm2601_vm2, %v8557_v46, %v2598_v23  ;;  %v3062_v0 = vpop.f32.mrf.mxu1  ;;  %v7330_v46 = vor.u32 %v8297_v1, %v7327_v16  ;;  %v8283_v1 = vld [vmem:[#allocation12 + $0x174] sm:$0xf0] }
 0x37b   :  { %v2625_v40 = vmul.f32 %v9918_v22, %v9895_v12  ;;  %v8563_v34 = vpop.eup %8562  ;;  %v2607_v45 = vsel %vm2604_vm3, %v2606_v10, %v2602_v3  ;;  %v2617_v58 = vsel %vm2616_vm4, %v9898_v15, %v2613_v49  ;;  %v7210_v33 = vor.u32 %v8268_v57, %v7207_v53  ;;  %v7309_v15 = vld [vmem:[#allocation12 + $0x1c8] sm:$0xf]  ;;  %v7450_v10 = vld [vmem:[#allocation13 + $0xf0] sm:$0xf0]  ;;  %v8285_v3 = vld [vmem:[#allocation12 + $0x18c] sm:$0xf] }
 0x37c   :  { %4211 = vmatpush.bf16.msrb.mxu3 %v7226_v8  ;;  %v2641_v13 = vmul.f32 %v8563_v34, %v2607_v45  ;;  %v3077_v42 = vpop.f32.mrf.mxu2  ;;  %v3063_v38 = vadd.f32 %v3062_v0, %v3050_v9  ;;  %vm2630_vm6 = vweird.f32 %v9918_v22  ;;  %v7310_v50 = vor.u32 %v8295_v27, %v7309_v15  ;;  %v7432_v45 = vld [vmem:[#allocation13 + $0xc0] sm:$0xf] }
 0x37d   :  { %v2626_v31 = vsub.f32 1.0, %v2625_v40  ;;  %vm9943_vm8 = vmor %vm2629_vm7, %vm2630_vm6  ;;  %v2636_v8 = vor.u32 1.1754944e-38, %v2635_v14  ;;  %v2714_v34 = vperm.slane %v9909_v24, 2  ;;  %v7434_v42 = vld [vmem:[#allocation13 + $0xd0] sm:$0xf0] }
 0x37e   :  { %4225 = vmatpush.bf16.msrb.mxu0 %v7086_v6  ;;  %4251 = vmatpush.bf16.msra.mxu2 %v7090_v11  ;;  %v8299_v6 = vld [vmem:[#allocation12 + $0x1f4] sm:$0xf0]  ;;  %v2622_v11 = vsel %vm2619_vm5, %v2621_v44, %v2617_v58  ;;  %v9933_v20 = vpop.f32.mrf.mxu0  ;;  %v7278_v44 = vor.u32 %v8287_v60, %v7277_v39  ;;  %v8326_v58 = vld [vmem:[#allocation13 + $0xcc] sm:$0xf0]  ;;  %v7416_v27 = vld [vmem:[#allocation13 + $0xa0] sm:$0xf] }
 0x37f   :  { %v7326_v30 = vor.u32 %v8299_v6, %v7325_v35  ;;  %v2627_v43 = vmul.f32 %v9918_v22, %v2626_v31  ;;  %v2640_v55 = vmul.f32 %v2622_v11, %v9656_v2  ;;  %v6813_v2 = vmul.f32 -1.442695, %v3063_v38  ;;  %v8324_v11 = vld [vmem:[#allocation13 + $0xc4] sm:$0xf]  ;;  %v8279_v14 = vld [vmem:[#allocation12 + $0x154] sm:$0xf0] }
 0x380   :  { %4212 = vmatpush.bf16.msrb.mxu3 %v7210_v33  ;;  %v3088_v61 = vpop.f32.mrf.mxu3  ;;  %v7449_v35 = vor.u32 %v8330_v26, %v7448_v63  ;;  %v7453_v6 = vor.u32 %v8328_v37, %v7450_v10  ;;  %v3102_v0 = vadd.f32 %v9933_v20, %v2714_v34  ;;  %v7433_v15 = vor.u32 %v8326_v58, %v7432_v45  ;;  %v7229_v63 = vld [vmem:[#allocation12 + $0x128] sm:$0xf]  ;;  %v7402_v37 = vld [vmem:[#allocation13 + $0x90] sm:$0xf0]  ;;  %v8312_v58 = vld [vmem:[#allocation13 + $0x64] sm:$0xf] }
 0x381   :  { %v2642_v48 = vadd.f32 %v2641_v13, %v2640_v55  ;;  %4231 = vmatpush.bf16.msrb.mxu1 %v7326_v30  ;;  %v2628_v56 = vadd.f32 %v9918_v22, %v2627_v43  ;;  %v3089_v5 = vadd.f32 %v3088_v61, %v3076_v25  ;;  %v7261_v13 = vld [vmem:[#allocation12 + $0x168] sm:$0xf]  ;;  %v7282_v30 = vor.u32 %v8285_v3, %v7279_v21  ;;  %v8281_v43 = vld [vmem:[#allocation12 + $0x16c] sm:$0xf]  ;;  %v7263_v55 = vld [vmem:[#allocation12 + $0x178] sm:$0xf0] }
 0x382   :  { %v3064_v23 = vpop.f32.mrf.mxu1  ;;  %v7262_v62 = vor.u32 %v8283_v1, %v7261_v13  ;;  %v7266_v20 = vor.u32 %v8281_v43, %v7263_v55  ;;  %v2715_v25 = vperm.slane %v9909_v24, 3  ;;  %v7246_v41 = vor.u32 %v8279_v14, %v7245_v52  ;;  %v8316_v24 = vld [vmem:[#allocation13 + $0x84] sm:$0xf]  ;;  %v7213_v34 = vld [vmem:[#allocation12 + $0x108] sm:$0xf] }
 0x383   :  { %8564 = vtanh.f32 %v2642_v48  ;;  %5461 = vst [vmem:[#allocation18] sm:$0xff] %v2642_v48  ;;  %v2632_v12 = vsel %vm9943_vm8, %v9918_v22, %v2628_v56  ;;  %v6814_v57 = vmul.f32 -1.442695, %v3089_v5  ;;  %v7437_v48 = vor.u32 %v8324_v11, %v7434_v42  ;;  %v7400_v5 = vld [vmem:[#allocation13 + $0x80] sm:$0xf] }
 0x384   :  { %4257 = vmatpush.bf16.msra.mxu3 %v7330_v46  ;;  %8566 = vpow2.f32 %v6813_v2  ;;  %v9947_v18 = vpop.f32.mrf.mxu2  ;;  %v2637_v53 = vsel %vm2634_vm9, %v2636_v8, %v2632_v12  ;;  %v7417_v47 = vor.u32 %v8322_v29, %v7416_v27  ;;  %v8318_v12 = vld [vmem:[#allocation13 + $0x8c] sm:$0xf0]  ;;  %v8275_v8 = vld [vmem:[#allocation12 + $0x134] sm:$0xf0]  ;;  %v7405_v21 = vor.u32 %v8316_v24, %v7402_v37  ;;  %v8269_v13 = vld [vmem:[#allocation12 + $0x10c] sm:$0xf] }
 0x385   :  { %4232 = vmatpush.bf16.msrb.mxu1 %v7310_v50  ;;  %8568 = vpow2.f32 %v6814_v57  ;;  %v8320_v50 = vld [vmem:[#allocation13 + $0xa4] sm:$0xf]  ;;  %v3128_v23 = vadd.f32 %v9947_v18, %v2715_v25  ;;  %v7230_v60 = vor.u32 %v8275_v8, %v7229_v63  ;;  %v8273_v57 = vld [vmem:[#allocation12 + $0x12c] sm:$0xf]  ;;  %v7401_v3 = vor.u32 %v8318_v12, %v7400_v5  ;;  %v7386_v18 = vld [vmem:[#allocation13 + $0x70] sm:$0xf0] }
 0x386   :  { %v3103_v40 = vpop.f32.mrf.mxu0  ;;  %v7215_v42 = vld [vmem:[#allocation12 + $0x118] sm:$0xf0]  ;;  %v7368_v55 = vld [vmem:[#allocation13 + $0x40] sm:$0xf]  ;;  %v7370_v29 = vld [vmem:[#allocation13 + $0x50] sm:$0xf0] }
 0x387   :  { %v7231_v40 = vld [vmem:[#allocation12 + $0x138] sm:$0xf0]  ;;  %v7218_v52 = vor.u32 %v8269_v13, %v7215_v42  ;;  %v7354_v5 = vld [vmem:[#allocation13 + $0x30] sm:$0xf0]  ;;  %v8302_v24 = vld [vmem:[#allocation13 + $0xc] sm:$0xf0] }
 0x388   :  { %4258 = vmatpush.bf16.msra.mxu3 %v7314_v17  ;;  %v3090_v16 = vpop.f32.mrf.mxu3  ;;  %v7418_v17 = vld [vmem:[#allocation13 + $0xb0] sm:$0xf0]  ;;  %v8327_v13 = vld [vmem:[#allocation13 + $0xd4] sm:$0xf0]  ;;  %v8325_v42 = vld [vmem:[#allocation13 + $0xcc] sm:$0xf] }
 0x389   :  { %v8565_v49 = vpop.eup %8564  ;;  %4233 = vmatpush.bf16.msrb.mxu1 %v7294_v19  ;;  %v7421_v7 = vor.u32 %v8320_v50, %v7418_v17 }
 0x38a   :  { %v8567_v22 = vpop.eup %8566  ;;  %v2644_v31 = vmul.f32 %v8565_v49, %v2637_v53  ;;  %v3114_v38 = vpop.f32.mrf.mxu1  ;;  %v7384_v49 = vld [vmem:[#allocation13 + $0x60] sm:$0xf] }
 0x38b   :  { %v9953_v33 = vadd.f32 1.0, %v8567_v22  ;;  %v8569_v56 = vpop.eup %8568  ;;  %v3115_v2 = vadd.f32 %v3114_v38, %v3102_v0  ;;  %v8314_v22 = vld [vmem:[#allocation13 + $0x6c] sm:$0xf0] }
 0x38c   :  { %4259 = vmatpush.bf16.msra.mxu3 %v7298_v36  ;;  %v9955_v9 = vpack.c.bf16 %v2644_v31, %v2644_v31  ;;  %5460 = vst [vmem:[#allocation16] sm:$0xff] %v2644_v31  ;;  %v3129_v46 = vpop.f32.mrf.mxu2  ;;  %v9961_v32 = vadd.f32 1.0, %v8569_v56  ;;  %v7250_v36 = vor.u32 %v8277_v54, %v7247_v4  ;;  %v8271_v31 = vld [vmem:[#allocation12 + $0x114] sm:$0xf0]  ;;  %v7385_v43 = vor.u32 %v8314_v22, %v7384_v49  ;;  %v8310_v38 = vld [vmem:[#allocation13 + $0x4c] sm:$0xf0] }
 0x38d   :  { %8570 = vrcp.f32 %v9953_v33  ;;  %4234 = vmatpush.bf16.msrb.mxu1 %v7278_v44  ;;  %v6815_v61 = vmul.f32 -1.442695, %v3115_v2  ;;  %v7214_v11 = vor.u32 %v8271_v31, %v7213_v34  ;;  %v3167_v46 = vand.u32 2147483648, %v9953_v33  ;;  %v7352_v4 = vld [vmem:[#allocation13 + $0x20] sm:$0xf] }
 0x38e   :  { %4174 = vmatmul.bf16.vlgmr.msra.gmra.mxu0 %v9955_v9  ;;  %4200 = vmatmul.bf16.vlgmr.msrb.gmra.mxu2 %v9955_v9  ;;  %8572 = vrcp.f32 %v9961_v32  ;;  %vm3161_vm11 = vweird.f32 %v9953_v33  ;;  %v3165_v27 = vand.u32 2147483647, %v9953_v33  ;;  %v3182_v56 = vand.u32 2147483648, %v9961_v32  ;;  %v7576_v2 = vld [vmem:[#allocation13 + $0x1e0] sm:$0xf] }
 0x38f   :  { %4728 = vmatpush.bf16.msra.mxu0 %v7449_v35  ;;  %4754 = vmatpush.bf16.msrb.mxu2 %v7453_v6  ;;  %8574 = vpow2.f32 %v6815_v61  ;;  %v7234_v35 = vor.u32 %v8273_v57, %v7231_v40  ;;  %v3180_v14 = vand.u32 2147483647, %v9961_v32  ;;  %v3168_v25 = vor.u32 1.1754944e-38, %v3167_v46  ;;  %v8306_v61 = vld [vmem:[#allocation13 + $0x2c] sm:$0xf0] }
 0x390   :  { %4260 = vmatpush.bf16.msra.mxu3 %v7282_v30  ;;  %v3140_v39 = vpop.f32.mrf.mxu3  ;;  %vm3176_vm14 = vweird.f32 %v9961_v32  ;;  %vm3166_vm15 = vcmp.eq.f32.partialorder %v3165_v27, 8.507059e+37  ;;  %v3183_v12 = vor.u32 1.1754944e-38, %v3182_v56  ;;  %v7456_v57 = vld [vmem:[#allocation13 + $0xe8] sm:$0xf]  ;;  %v8323_v27 = vld [vmem:[#allocation13 + $0xb4] sm:$0xf0] }
 0x391   :  { %4235 = vmatpush.bf16.msrb.mxu1 %v7262_v62  ;;  %v3141_v53 = vadd.f32 %v3140_v39, %v3128_v23  ;;  %v7389_v62 = vor.u32 %v8312_v58, %v7386_v18  ;;  %vm3181_vm1 = vcmp.eq.f32.partialorder %v3180_v14, 8.507059e+37  ;;  %v8300_v39 = vld [vmem:[#allocation13 + $0x4] sm:$0xf]  ;;  %v7426_v56 = vld [vmem:[#allocation13 + $0xb8] sm:$0xf0] }
 0x392   :  { %v3116_v44 = vpop.f32.mrf.mxu1  ;;  %v7578_v14 = vld [vmem:[#allocation13 + $0x1f0] sm:$0xf0] }
 0x393   :  { %v9964_v19 = vpop.eup %8570  ;;  %4729 = vmatpush.bf16.msra.mxu0 %v7433_v15  ;;  %4755 = vmatpush.bf16.msrb.mxu2 %v7437_v48  ;;  %8576 = vtanh.f32 %v3141_v53  ;;  %v8308_v15 = vld [vmem:[#allocation13 + $0x44] sm:$0xf]  ;;  %v8331_v53 = vld [vmem:[#allocation13 + $0xf4] sm:$0xf0]  ;;  %v8329_v44 = vld [vmem:[#allocation13 + $0xec] sm:$0xf] }
 0x394   :  { %v3157_v26 = vmul.f32 %v9964_v19, %v9953_v33  ;;  %4261 = vmatpush.bf16.msra.mxu3 %v7266_v20  ;;  %v8573_v6 = vpop.eup %8572  ;;  %vm3162_vm10 = vweird.f32 %v9964_v19  ;;  %v7373_v54 = vor.u32 %v8308_v15, %v7370_v29  ;;  %v7457_v18 = vor.u32 %v8331_v53, %v7456_v57  ;;  %v8315_v57 = vld [vmem:[#allocation13 + $0x74] sm:$0xf0] }
 0x395   :  { %4236 = vmatpush.bf16.msrb.mxu1 %v7246_v41  ;;  %v8575_v30 = vpop.eup %8574  ;;  %v3172_v1 = vmul.f32 %v8573_v6, %v9961_v32  ;;  %vm9983_vm12 = vmor %vm3161_vm11, %vm3162_vm10  ;;  %vm3177_vm13 = vweird.f32 %v8573_v6  ;;  %v7369_v41 = vor.u32 %v8310_v38, %v7368_v55  ;;  %v7353_v32 = vor.u32 %v8306_v61, %v7352_v4 }
 0x396   :  { %v3158_v10 = vsub.f32 1.0, %v3157_v26  ;;  %v9974_v0 = vadd.f32 1.0, %v8575_v30  ;;  %vm3178_vm0 = vmor %vm3176_vm14, %vm3177_vm13  ;;  %v7336_v26 = vld [vmem:[#allocation13] sm:$0xf]  ;;  %v7442_v30 = vld [vmem:[#allocation13 + $0xd8] sm:$0xf0] }
 0x397   :  { %4730 = vmatpush.bf16.msra.mxu0 %v7417_v47  ;;  %4756 = vmatpush.bf16.msrb.mxu2 %v7421_v7  ;;  %v3173_v48 = vsub.f32 1.0, %v3172_v1  ;;  %v8304_v7 = vld [vmem:[#allocation13 + $0x24] sm:$0xf]  ;;  %v7337_v31 = vor.u32 %v8302_v24, %v7336_v26  ;;  %v7445_v38 = vor.u32 %v8325_v42, %v7442_v30  ;;  %v7560_v26 = vld [vmem:[#allocation13 + $0x1c0] sm:$0xf] }
 0x398   :  { %v3159_v45 = vmul.f32 %v9964_v19, %v3158_v10  ;;  %4262 = vmatpush.bf16.msra.mxu3 %v7250_v36  ;;  %8578 = vrcp.f32 %v9974_v0  ;;  %v3142_v50 = vpop.f32.mrf.mxu3  ;;  %v7357_v23 = vor.u32 %v8304_v7, %v7354_v5  ;;  %vm3191_vm3 = vweird.f32 %v9974_v0  ;;  %v8319_v7 = vld [vmem:[#allocation13 + $0x94] sm:$0xf0]  ;;  %v7378_v30 = vld [vmem:[#allocation13 + $0x58] sm:$0xf0] }
 0x399   :  { %4237 = vmatpush.bf16.msrb.mxu1 %v7230_v60  ;;  %v3174_v20 = vmul.f32 %v8573_v6, %v3173_v48  ;;  %v7338_v60 = vld [vmem:[#allocation13 + $0x10] sm:$0xf0] }
 0x39a   :  { %v3160_v16 = vadd.f32 %v9964_v19, %v3159_v45  ;;  %v3197_v45 = vand.u32 2147483648, %v9974_v0  ;;  %v7341_v58 = vor.u32 %v8300_v39, %v7338_v60  ;;  %v7392_v60 = vld [vmem:[#allocation13 + $0x68] sm:$0xf] }
 0x39b   :  { %4731 = vmatpush.bf16.msra.mxu0 %v7401_v3  ;;  %4757 = vmatpush.bf16.msrb.mxu2 %v7405_v21  ;;  %v3175_v47 = vadd.f32 %v8573_v6, %v3174_v20  ;;  %v7458_v3 = vld [vmem:[#allocation13 + $0xf8] sm:$0xf0]  ;;  %v8362_v20 = vld [vmem:[#allocation13 + $0x1ec] sm:$0xf0] }
 0x39c   :  { %4263 = vmatpush.bf16.msra.mxu3 %v7234_v35  ;;  %v3164_v33 = vsel %vm9983_vm12, %v9964_v19, %v3160_v16  ;;  %v8577_v19 = vpop.eup %8576  ;;  %v7461_v35 = vor.u32 %v8329_v44, %v7458_v3  ;;  %v10010_v16 = vld [vmem:[%s10269_s9] sm:$0xf]  ;;  %v7544_v44 = vld [vmem:[#allocation13 + $0x1a0] sm:$0xf] }
 0x39d   :  { %4238 = vmatpush.bf16.msrb.mxu1 %v7214_v11  ;;  %v3169_v63 = vsel %vm3166_vm15, %v3168_v25, %v3164_v33  ;;  %v7440_v11 = vld [vmem:[#allocation13 + $0xc8] sm:$0xf]  ;;  %v3274_v48 = vperm.slane %v10010_v16, 0  ;;  %v8360_v33 = vld [vmem:[#allocation13 + $0x1e4] sm:$0xf]  ;;  %v3275_v25 = vperm.slane %v10010_v16, 1 }
 0x39e   :  { %v9987_v17 = vpop.f32.mrf.mxu0  ;;  %4226 = vmatmul.bf16.vlgmr.msrb.gmra.mxu0 %v9955_v9  ;;  %4252 = vmatmul.bf16.vlgmr.msra.gmra.mxu2 %v9955_v9  ;;  %v3179_v9 = vsel %vm3178_vm0, %v8573_v6, %v3175_v47  ;;  %v8579_v37 = vpop.eup %8578  ;;  %v3203_v49 = vmul.f32 %v8577_v19, %v3169_v63  ;;  %v7408_v47 = vld [vmem:[#allocation13 + $0x88] sm:$0xf]  ;;  %v8317_v19 = vld [vmem:[#allocation13 + $0x8c] sm:$0xf]  ;;  %v7577_v63 = vor.u32 %v8362_v20, %v7576_v2 }
 0x39f   :  { %4732 = vmatpush.bf16.msra.mxu0 %v7385_v43  ;;  %4758 = vmatpush.bf16.msrb.mxu2 %v7389_v62  ;;  %v3184_v36 = vsel %vm3181_vm1, %v3183_v12, %v3179_v9  ;;  %v3187_v40 = vmul.f32 %v8579_v37, %v9974_v0  ;;  %vm3192_vm2 = vweird.f32 %v8579_v37  ;;  %v3198_v43 = vor.u32 1.1754944e-38, %v3197_v45  ;;  %v7410_v12 = vld [vmem:[#allocation13 + $0x98] sm:$0xf0] }
 0x3a0   :  { %4264 = vmatpush.bf16.msra.mxu3 %v7218_v52  ;;  %v3202_v10 = vmul.f32 %v3184_v36, %v9727_v28  ;;  %v3195_v28 = vand.u32 2147483647, %v9974_v0  ;;  %vm3193_vm4 = vmor %vm3191_vm3, %vm3192_vm2  ;;  %v7441_v62 = vor.u32 %v8327_v13, %v7440_v11  ;;  %v7424_v0 = vld [vmem:[#allocation13 + $0xa8] sm:$0xf]  ;;  %v8321_v52 = vld [vmem:[#allocation13 + $0xac] sm:$0xf]  ;;  %v7581_v9 = vor.u32 %v8360_v33, %v7578_v14 }
 0x3a1   :  { %v3188_v22 = vsub.f32 1.0, %v3187_v40  ;;  %v7425_v4 = vor.u32 %v8323_v27, %v7424_v0  ;;  %v7429_v61 = vor.u32 %v8321_v52, %v7426_v56  ;;  %v8356_v36 = vld [vmem:[#allocation13 + $0x1c4] sm:$0xf]  ;;  %v7413_v39 = vor.u32 %v8317_v19, %v7410_v12  ;;  %v8313_v40 = vld [vmem:[#allocation13 + $0x6c] sm:$0xf] }
 0x3a2   :  { %v10001_v34 = vadd.f32 %v3203_v49, %v3202_v10  ;;  %vm3196_vm5 = vcmp.eq.f32.partialorder %v3195_v28, 8.507059e+37  ;;  %v7394_v10 = vld [vmem:[#allocation13 + $0x78] sm:$0xf0]  ;;  %v8311_v28 = vld [vmem:[#allocation13 + $0x54] sm:$0xf0] }
 0x3a3   :  { %4733 = vmatpush.bf16.msra.mxu0 %v7369_v41  ;;  %4759 = vmatpush.bf16.msrb.mxu2 %v7373_v54  ;;  %v3189_v6 = vmul.f32 %v8579_v37, %v3188_v22  ;;  %v3612_v54 = vadd.f32 %v9987_v17, %v3274_v48  ;;  %v8352_v22 = vld [vmem:[#allocation13 + $0x1a4] sm:$0xf]  ;;  %v8309_v11 = vld [vmem:[#allocation13 + $0x4c] sm:$0xf]  ;;  %v8307_v52 = vld [vmem:[#allocation13 + $0x34] sm:$0xf0] }
 0x3a4   :  { %v9997_v8 = vpop.f32.mrf.mxu2  ;;  %8580 = vtanh.f32 %v10001_v34  ;;  %v7381_v27 = vor.u32 %v8309_v11, %v7378_v30  ;;  %v8305_v56 = vld [vmem:[#allocation13 + $0x2c] sm:$0xf]  ;;  %v7512_v14 = vld [vmem:[#allocation13 + $0x160] sm:$0xf]  ;;  %v7344_v12 = vld [vmem:[#allocation13 + $0x8] sm:$0xf] }
 0x3a5   :  { %v3190_v1 = vadd.f32 %v8579_v37, %v3189_v6  ;;  %v3638_v3 = vadd.f32 %v9997_v8, %v3275_v25  ;;  %v7376_v6 = vld [vmem:[#allocation13 + $0x48] sm:$0xf]  ;;  %v8346_v25 = vld [vmem:[#allocation13 + $0x16c] sm:$0xf0] }
 0x3a6   :  { %v3613_v21 = vpop.f32.mrf.mxu0  ;;  %v7377_v0 = vor.u32 %v8311_v28, %v7376_v6  ;;  %v8334_v30 = vld [vmem:[#allocation13 + $0x10c] sm:$0xf0] }
 0x3a7   :  { %4734 = vmatpush.bf16.msra.mxu0 %v7353_v32  ;;  %4760 = vmatpush.bf16.msrb.mxu2 %v7357_v23  ;;  %v3194_v46 = vsel %vm3193_vm4, %v8579_v37, %v3190_v1  ;;  %v8358_v37 = vld [vmem:[#allocation13 + $0x1cc] sm:$0xf0]  ;;  %v7562_v32 = vld [vmem:[#allocation13 + $0x1d0] sm:$0xf0]  ;;  %v7409_v23 = vor.u32 %v8319_v7, %v7408_v47 }
 0x3a8   :  { %v3199_v15 = vsel %vm3196_vm5, %v3198_v43, %v3194_v46  ;;  %v7561_v49 = vor.u32 %v8358_v37, %v7560_v26  ;;  %v7565_v53 = vor.u32 %v8356_v36, %v7562_v32  ;;  %v8354_v21 = vld [vmem:[#allocation13 + $0x1ac] sm:$0xf0]  ;;  %v7528_v43 = vld [vmem:[#allocation13 + $0x180] sm:$0xf]  ;;  %v7346_v37 = vld [vmem:[#allocation13 + $0x18] sm:$0xf0]  ;;  %v7513_v36 = vor.u32 %v8346_v25, %v7512_v14 }
 0x3a9   :  { %v7545_v1 = vor.u32 %v8354_v21, %v7544_v44 }
 0x3aa   :  { %v8581_v29 = vpop.eup %8580 }
 0x3ab   :  { %4735 = vmatpush.bf16.msra.mxu0 %v7337_v31  ;;  %4761 = vmatpush.bf16.msrb.mxu2 %v7341_v58  ;;  %v3206_v50 = vmul.f32 %v8581_v29, %v3199_v15  ;;  %v7546_v31 = vld [vmem:[#allocation13 + $0x1b0] sm:$0xf0]  ;;  %v3276_v15 = vperm.slane %v10010_v16, 2  ;;  %v7360_v29 = vld [vmem:[#allocation13 + $0x28] sm:$0xf] }
 0x3ac   :  { %v3639_v55 = vpop.f32.mrf.mxu2  ;;  %v7549_v8 = vor.u32 %v8352_v22, %v7546_v31 }
 0x3ad   :  { %v10014_v41 = vpack.c.bf16 %v3206_v50, %v3206_v50  ;;  %v8350_v55 = vld [vmem:[#allocation13 + $0x18c] sm:$0xf0]  ;;  %v7362_v50 = vld [vmem:[#allocation13 + $0x38] sm:$0xf0] }
 0x3ae   :  { %v7529_v20 = vor.u32 %v8350_v55, %v7528_v43  ;;  %v7365_v19 = vor.u32 %v8305_v56, %v7362_v50 }
 0x3af   :  { %4780 = vmatpush.bf16.msrb.mxu0 %v7457_v18  ;;  %4806 = vmatpush.bf16.msra.mxu2 %v7461_v35  ;;  %v7393_v18 = vor.u32 %v8315_v57, %v7392_v60  ;;  %v7397_v35 = vor.u32 %v8313_v40, %v7394_v10  ;;  %v8342_v60 = vld [vmem:[#allocation13 + $0x14c] sm:$0xf0]  ;;  %v8340_v57 = vld [vmem:[#allocation13 + $0x144] sm:$0xf]  ;;  %v7498_v40 = vld [vmem:[#allocation13 + $0x150] sm:$0xf0] }
 0x3b0   :  { %4187 = vmatmul.bf16.vlgmr.msra.gmra.mxu1 %v10014_v41  ;;  %4213 = vmatmul.bf16.vlgmr.msrb.gmra.mxu3 %v10014_v41  ;;  %v7501_v31 = vor.u32 %v8340_v57, %v7498_v40  ;;  %v7554_v57 = vld [vmem:[#allocation13 + $0x1b8] sm:$0xf0] }
 0x3b1   :  { %4736 = vmatmul.bf16.vlgmr.msra.gmra.mxu0 %v10014_v41  ;;  %4762 = vmatmul.bf16.vlgmr.msrb.gmra.mxu2 %v10014_v41 }
 0x3b2   :  { %4741 = vmatpush.bf16.msra.mxu1 %v7577_v63  ;;  %4767 = vmatpush.bf16.msrb.mxu3 %v7581_v9  ;;  %v8303_v63 = vld [vmem:[#allocation13 + $0x14] sm:$0xf0] }
 0x3b3   :  { %4781 = vmatpush.bf16.msrb.mxu0 %v7441_v62  ;;  %4807 = vmatpush.bf16.msra.mxu2 %v7445_v38  ;;  %v8348_v62 = vld [vmem:[#allocation13 + $0x184] sm:$0xf]  ;;  %v7530_v38 = vld [vmem:[#allocation13 + $0x190] sm:$0xf0]  ;;  %v7345_v44 = vor.u32 %v8303_v63, %v7344_v12  ;;  %v8357_v63 = vld [vmem:[#allocation13 + $0x1cc] sm:$0xf] }
 0x3b4   :  { %v3624_v5 = vpop.f32.mrf.mxu1  ;;  %v7533_v33 = vor.u32 %v8348_v62, %v7530_v38  ;;  %v7466_v62 = vld [vmem:[#allocation13 + $0x110] sm:$0xf0] }
 0x3b5   :  { %v3625_v24 = vadd.f32 %v3624_v5, %v3612_v54  ;;  %v8344_v54 = vld [vmem:[#allocation13 + $0x164] sm:$0xf]  ;;  %v7361_v5 = vor.u32 %v8307_v52, %v7360_v29  ;;  %v8361_v29 = vld [vmem:[#allocation13 + $0x1ec] sm:$0xf]  ;;  %v7586_v52 = vld [vmem:[#allocation13 + $0x1f8] sm:$0xf0] }
 0x3b6   :  { %4742 = vmatpush.bf16.msra.mxu1 %v7561_v49  ;;  %4768 = vmatpush.bf16.msrb.mxu3 %v7565_v53  ;;  %v3277_v49 = vperm.slane %v10010_v16, 3  ;;  %v8336_v16 = vld [vmem:[#allocation13 + $0x124] sm:$0xf] }
 0x3b7   :  { %v7072_v17 = vmul.f32 -1.442695, %v3625_v24  ;;  %4782 = vmatpush.bf16.msrb.mxu0 %v7425_v4  ;;  %4808 = vmatpush.bf16.msra.mxu2 %v7429_v61  ;;  %v7514_v4 = vld [vmem:[#allocation13 + $0x170] sm:$0xf0]  ;;  %v8301_v24 = vld [vmem:[#allocation13 + $0xc] sm:$0xf] }
 0x3b8   :  { %v7517_v32 = vor.u32 %v8344_v54, %v7514_v4 }
 0x3b9   :  { %8582 = vpow2.f32 %v7072_v17  ;;  %v7496_v17 = vld [vmem:[#allocation13 + $0x140] sm:$0xf] }
 0x3ba   :  { %v3650_v45 = vpop.f32.mrf.mxu3  ;;  %4743 = vmatpush.bf16.msra.mxu1 %v7545_v1  ;;  %4769 = vmatpush.bf16.msrb.mxu3 %v7549_v8  ;;  %v7497_v22 = vor.u32 %v8342_v60, %v7496_v17  ;;  %v8355_v17 = vld [vmem:[#allocation13 + $0x1b4] sm:$0xf0]  ;;  %v8353_v60 = vld [vmem:[#allocation13 + $0x1ac] sm:$0xf] }
 0x3bb   :  { %v3651_v58 = vadd.f32 %v3650_v45, %v3638_v3  ;;  %4783 = vmatpush.bf16.msrb.mxu0 %v7409_v23  ;;  %4809 = vmatpush.bf16.msra.mxu2 %v7413_v39  ;;  %v7349_v3 = vor.u32 %v8301_v24, %v7346_v37  ;;  %v7480_v45 = vld [vmem:[#allocation13 + $0x120] sm:$0xf] }
 0x3bc   :  { %v3626_v13 = vpop.f32.mrf.mxu1 }
 0x3bd   :  { %v7073_v46 = vmul.f32 -1.442695, %v3651_v58 }
 0x3be   :  { %v3663_v42 = vpop.f32.mrf.mxu0  ;;  %4744 = vmatpush.bf16.msra.mxu1 %v7529_v20  ;;  %4770 = vmatpush.bf16.msrb.mxu3 %v7533_v33 }
 0x3bf   :  { %v8583_v48 = vpop.eup %8582  ;;  %8584 = vpow2.f32 %v7073_v46  ;;  %4784 = vmatpush.bf16.msrb.mxu0 %v7393_v18  ;;  %4810 = vmatpush.bf16.msra.mxu2 %v7397_v35  ;;  %v3664_v7 = vadd.f32 %v3663_v42, %v3276_v15  ;;  %v8338_v18 = vld [vmem:[#allocation13 + $0x12c] sm:$0xf0]  ;;  %v7482_v35 = vld [vmem:[#allocation13 + $0x130] sm:$0xf0]  ;;  %v7464_v42 = vld [vmem:[#allocation13 + $0x100] sm:$0xf] }
 0x3c0   :  { %v10023_v2 = vadd.f32 1.0, %v8583_v48  ;;  %4239 = vmatmul.bf16.vlgmr.msrb.gmra.mxu1 %v10014_v41  ;;  %4265 = vmatmul.bf16.vlgmr.msra.gmra.mxu3 %v10014_v41  ;;  %v7481_v43 = vor.u32 %v8338_v18, %v7480_v45  ;;  %v7485_v55 = vor.u32 %v8336_v16, %v7482_v35  ;;  %v8332_v46 = vld [vmem:[#allocation13 + $0x104] sm:$0xf]  ;;  %v7584_v15 = vld [vmem:[#allocation13 + $0x1e8] sm:$0xf] }
 0x3c1   :  { %v8363_v48 = vld [vmem:[#allocation13 + $0x1f4] sm:$0xf0]  ;;  %v7469_v33 = vor.u32 %v8332_v46, %v7466_v62  ;;  %v7536_v45 = vld [vmem:[#allocation13 + $0x188] sm:$0xf]  ;;  %v8349_v35 = vld [vmem:[#allocation13 + $0x18c] sm:$0xf] }
 0x3c2   :  { %8586 = vrcp.f32 %v10023_v2  ;;  %v3652_v61 = vpop.f32.mrf.mxu3  ;;  %4745 = vmatpush.bf16.msra.mxu1 %v7513_v36  ;;  %4771 = vmatpush.bf16.msrb.mxu3 %v7517_v32  ;;  %v3729_v25 = vand.u32 2147483648, %v10023_v2  ;;  %v7585_v54 = vor.u32 %v8363_v48, %v7584_v15  ;;  %vm3723_vm7 = vweird.f32 %v10023_v2  ;;  %v7552_v32 = vld [vmem:[#allocation13 + $0x1a8] sm:$0xf]  ;;  %v8351_v16 = vld [vmem:[#allocation13 + $0x194] sm:$0xf0] }
 0x3c3   :  { %4785 = vmatpush.bf16.msrb.mxu0 %v7377_v0  ;;  %4811 = vmatpush.bf16.msra.mxu2 %v7381_v27  ;;  %v7465_v27 = vor.u32 %v8334_v30, %v7464_v42  ;;  %v3727_v61 = vand.u32 2147483647, %v10023_v2  ;;  %v7537_v42 = vor.u32 %v8351_v16, %v7536_v45  ;;  %v7522_v46 = vld [vmem:[#allocation13 + $0x178] sm:$0xf0] }
 0x3c4   :  { %v3689_v47 = vpop.f32.mrf.mxu2  ;;  %v3676_v9 = vpop.f32.mrf.mxu1  ;;  %v3730_v37 = vor.u32 1.1754944e-38, %v3729_v25 }
 0x3c5   :  { %v8585_v23 = vpop.eup %8584  ;;  %v3677_v39 = vadd.f32 %v3676_v9, %v3664_v7  ;;  %v3690_v6 = vadd.f32 %v3689_v47, %v3277_v49  ;;  %v7589_v47 = vor.u32 %v8361_v29, %v7586_v52  ;;  %v8359_v7 = vld [vmem:[#allocation13 + $0x1d4] sm:$0xf0]  ;;  %v7570_v9 = vld [vmem:[#allocation13 + $0x1d8] sm:$0xf0]  ;;  %vm3728_vm11 = vcmp.eq.f32.partialorder %v3727_v61, 8.507059e+37 }
 0x3c6   :  { %v3665_v26 = vpop.f32.mrf.mxu0  ;;  %v10028_v10 = vadd.f32 1.0, %v8585_v23  ;;  %4746 = vmatpush.bf16.msra.mxu1 %v7497_v22  ;;  %4772 = vmatpush.bf16.msrb.mxu3 %v7501_v31  ;;  %v7553_v22 = vor.u32 %v8355_v17, %v7552_v32  ;;  %v7557_v31 = vor.u32 %v8353_v60, %v7554_v57  ;;  %v8343_v52 = vld [vmem:[#allocation13 + $0x154] sm:$0xf0]  ;;  %v8337_v61 = vld [vmem:[#allocation13 + $0x12c] sm:$0xf] }
 0x3c7   :  { %v7074_v53 = vmul.f32 -1.442695, %v3677_v39  ;;  %4786 = vmatpush.bf16.msrb.mxu0 %v7361_v5  ;;  %4812 = vmatpush.bf16.msra.mxu2 %v7365_v19  ;;  %v7573_v39 = vor.u32 %v8357_v63, %v7570_v9  ;;  %v7472_v19 = vld [vmem:[#allocation13 + $0x108] sm:$0xf]  ;;  %v8333_v63 = vld [vmem:[#allocation13 + $0x10c] sm:$0xf] }
 0x3c8   :  { %v10031_v21 = vpop.eup %8586  ;;  %8588 = vrcp.f32 %v10028_v10  ;;  %v3744_v5 = vand.u32 2147483648, %v10028_v10  ;;  %v3742_v24 = vand.u32 2147483647, %v10028_v10  ;;  %vm3738_vm10 = vweird.f32 %v10028_v10  ;;  %v7474_v9 = vld [vmem:[#allocation13 + $0x118] sm:$0xf0] }
 0x3c9   :  { %v3719_v58 = vmul.f32 %v10031_v21, %v10023_v2  ;;  %8590 = vpow2.f32 %v7074_v53  ;;  %vm3724_vm6 = vweird.f32 %v10031_v21  ;;  %v8390_v17 = vld [vmem:[#allocation13 + $0xcc] sm:$0xf0]  ;;  %v7675_v57 = vld [vmem:[#allocation13 + $0xa0] sm:$0xf] }
 0x3ca   :  { %v3702_v28 = vpop.f32.mrf.mxu3  ;;  %4747 = vmatpush.bf16.msra.mxu1 %v7481_v43  ;;  %4773 = vmatpush.bf16.msrb.mxu3 %v7485_v55  ;;  %vm10051_vm8 = vmor %vm3723_vm7, %vm3724_vm6  ;;  %v3745_v49 = vor.u32 1.1754944e-38, %v3744_v5  ;;  %vm3743_vm13 = vcmp.eq.f32.partialorder %v3742_v24, 8.507059e+37  ;;  %v8347_v43 = vld [vmem:[#allocation13 + $0x174] sm:$0xf0]  ;;  %v8345_v55 = vld [vmem:[#allocation13 + $0x16c] sm:$0xf] }
 0x3cb   :  { %v3720_v13 = vsub.f32 1.0, %v3719_v58  ;;  %4787 = vmatpush.bf16.msrb.mxu0 %v7345_v44  ;;  %4813 = vmatpush.bf16.msra.mxu2 %v7349_v3  ;;  %v3703_v1 = vadd.f32 %v3702_v28, %v3690_v6  ;;  %v7538_v6 = vld [vmem:[#allocation13 + $0x198] sm:$0xf0]  ;;  %v7707_v24 = vld [vmem:[#allocation13 + $0xe0] sm:$0xf] }
 0x3cc   :  { %v3691_v11 = vpop.f32.mrf.mxu2  ;;  %v3678_v8 = vpop.f32.mrf.mxu1  ;;  %v7541_v30 = vor.u32 %v8349_v35, %v7538_v6  ;;  %v8388_v6 = vld [vmem:[#allocation13 + $0xc4] sm:$0xf] }
 0x3cd   :  { %v3721_v38 = vmul.f32 %v10031_v21, %v3720_v13  ;;  %8592 = vtanh.f32 %v3703_v1 }
 0x3ce   :  { %v8589_v0 = vpop.eup %8588  ;;  %4788 = vmatmul.bf16.vlgmr.msrb.gmra.mxu0 %v10014_v41  ;;  %4814 = vmatmul.bf16.vlgmr.msra.gmra.mxu2 %v10014_v41  ;;  %v7568_v41 = vld [vmem:[#allocation13 + $0x1c8] sm:$0xf] }
 0x3cf   :  { %v8591_v56 = vpop.eup %8590  ;;  %v3734_v50 = vmul.f32 %v8589_v0, %v10028_v10  ;;  %v3722_v20 = vadd.f32 %v10031_v21, %v3721_v38  ;;  %vm3739_vm9 = vweird.f32 %v8589_v0  ;;  %4748 = vmatpush.bf16.msra.mxu1 %v7465_v27  ;;  %4774 = vmatpush.bf16.msrb.mxu3 %v7469_v33  ;;  %v7569_v36 = vor.u32 %v8359_v7, %v7568_v41  ;;  %v7504_v27 = vld [vmem:[#allocation13 + $0x148] sm:$0xf] }
 0x3d0   :  { %v10042_v14 = vadd.f32 1.0, %v8591_v56  ;;  %vm3740_vm12 = vmor %vm3738_vm10, %vm3739_vm9  ;;  %v8341_v56 = vld [vmem:[#allocation13 + $0x14c] sm:$0xf]  ;;  %v7505_v25 = vor.u32 %v8343_v52, %v7504_v27  ;;  %v7595_v52 = vld [vmem:[#allocation13] sm:$0xf] }
 0x3d1   :  { %v3735_v4 = vsub.f32 1.0, %v3734_v50  ;;  %v3726_v2 = vsel %vm10051_vm8, %v10031_v21, %v3722_v20  ;;  %v7506_v50 = vld [vmem:[#allocation13 + $0x158] sm:$0xf0] }
 0x3d2   :  { %8594 = vrcp.f32 %v10042_v14  ;;  %v3704_v12 = vpop.f32.mrf.mxu3  ;;  %v3731_v53 = vsel %vm3728_vm11, %v3730_v37, %v3726_v2  ;;  %v3759_v13 = vand.u32 2147483648, %v10042_v14  ;;  %v3757_v8 = vand.u32 2147483647, %v10042_v14  ;;  %v8394_v37 = vld [vmem:[#allocation13 + $0xec] sm:$0xf0] }
 0x3d3   :  { %v3736_v26 = vmul.f32 %v8589_v0, %v3735_v4  ;;  %4793 = vmatpush.bf16.msrb.mxu1 %v7585_v54  ;;  %4819 = vmatpush.bf16.msra.mxu3 %v7589_v47  ;;  %v8593_v40 = vpop.eup %8592  ;;  %vm3753_vm15 = vweird.f32 %v10042_v14  ;;  %v7488_v54 = vld [vmem:[#allocation13 + $0x128] sm:$0xf]  ;;  %v8339_v4 = vld [vmem:[#allocation13 + $0x134] sm:$0xf0]  ;;  %v7490_v47 = vld [vmem:[#allocation13 + $0x138] sm:$0xf0]  ;;  %v7477_v2 = vor.u32 %v8333_v63, %v7474_v9  ;;  %v7708_v32 = vor.u32 %v8394_v37, %v7707_v24 }
 0x3d4   :  { %v3765_v18 = vmul.f32 %v8593_v40, %v3731_v53  ;;  %v3760_v38 = vor.u32 1.1754944e-38, %v3759_v13  ;;  %vm3758_vm1 = vcmp.eq.f32.partialorder %v3757_v8, 8.507059e+37  ;;  %v7489_v7 = vor.u32 %v8339_v4, %v7488_v54  ;;  %v8335_v12 = vld [vmem:[#allocation13 + $0x114] sm:$0xf0]  ;;  %v8386_v40 = vld [vmem:[#allocation13 + $0xac] sm:$0xf0] }
 0x3d5   :  { %v3737_v23 = vadd.f32 %v8589_v0, %v3736_v26  ;;  %v7493_v5 = vor.u32 %v8337_v61, %v7490_v47  ;;  %v7473_v26 = vor.u32 %v8335_v12, %v7472_v19  ;;  %5292 = vmatpush.bf16.msra.mxu0 %v7708_v32  ;;  %v7676_v53 = vor.u32 %v8386_v40, %v7675_v57  ;;  %v8384_v8 = vld [vmem:[#allocation13 + $0xa4] sm:$0xf]  ;;  %v7699_v19 = vld [vmem:[#allocation13 + $0xc8] sm:$0xf]  ;;  %v8391_v63 = vld [vmem:[#allocation13 + $0xd4] sm:$0xf0] }
 0x3d6   :  { %v7700_v9 = vor.u32 %v8391_v63, %v7699_v19  ;;  %v7613_v24 = vld [vmem:[#allocation13 + $0x30] sm:$0xf0]  ;;  %v7683_v32 = vld [vmem:[#allocation13 + $0xa8] sm:$0xf] }
 0x3d7   :  { %v3741_v44 = vsel %vm3740_vm12, %v8589_v0, %v3737_v23  ;;  %4794 = vmatpush.bf16.msrb.mxu1 %v7569_v36  ;;  %4820 = vmatpush.bf16.msra.mxu3 %v7573_v39  ;;  %v7525_v0 = vor.u32 %v8345_v55, %v7522_v46  ;;  %v7691_v36 = vld [vmem:[#allocation13 + $0xc0] sm:$0xf] }
 0x3d8   :  { %v8595_v3 = vpop.eup %8594  ;;  %v3746_v21 = vsel %vm3743_vm13, %v3745_v49, %v3741_v44  ;;  %v7692_v39 = vor.u32 %v8390_v17, %v7691_v36  ;;  %v7659_v44 = vld [vmem:[#allocation13 + $0x80] sm:$0xf]  ;;  %v8387_v17 = vld [vmem:[#allocation13 + $0xb4] sm:$0xf0] }
 0x3d9   :  { %v3749_v10 = vmul.f32 %v8595_v3, %v10042_v14  ;;  %v3764_v58 = vmul.f32 %v3746_v21, %v9852_v59  ;;  %vm3754_vm14 = vweird.f32 %v8595_v3  ;;  %v7520_v59 = vld [vmem:[#allocation13 + $0x168] sm:$0xf]  ;;  %v7509_v14 = vor.u32 %v8341_v56, %v7506_v50  ;;  %v7611_v46 = vld [vmem:[#allocation13 + $0x20] sm:$0xf]  ;;  %v8366_v56 = vld [vmem:[#allocation13 + $0xc] sm:$0xf0] }
 0x3da   :  { %vm3755_vm0 = vmor %vm3753_vm15, %vm3754_vm14  ;;  %v7521_v48 = vor.u32 %v8347_v43, %v7520_v59  ;;  %5293 = vmatpush.bf16.msra.mxu0 %v7692_v39  ;;  %v7677_v59 = vld [vmem:[#allocation13 + $0xb0] sm:$0xf0]  ;;  %v7596_v50 = vor.u32 %v8366_v56, %v7595_v52  ;;  %v7685_v56 = vld [vmem:[#allocation13 + $0xb8] sm:$0xf0] }
 0x3db   :  { %v3750_v28 = vsub.f32 1.0, %v3749_v10  ;;  %v10063_v11 = vadd.f32 %v3765_v18, %v3764_v58  ;;  %4795 = vmatpush.bf16.msrb.mxu1 %v7553_v22  ;;  %4821 = vmatpush.bf16.msra.mxu3 %v7557_v31  ;;  %v8392_v22 = vld [vmem:[#allocation13 + $0xe4] sm:$0xf]  ;;  %v7709_v31 = vld [vmem:[#allocation13 + $0xf0] sm:$0xf0]  ;;  %v7680_v43 = vor.u32 %v8384_v8, %v7677_v59 }
 0x3dc   :  { %v7712_v45 = vor.u32 %v8392_v22, %v7709_v31  ;;  %v7643_v58 = vld [vmem:[#allocation13 + $0x60] sm:$0xf]  ;;  %v8378_v18 = vld [vmem:[#allocation13 + $0x6c] sm:$0xf0]  ;;  %v8383_v22 = vld [vmem:[#allocation13 + $0x94] sm:$0xf0] }
 0x3dd   :  { %v3751_v1 = vmul.f32 %v8595_v3, %v3750_v28  ;;  %8596 = vtanh.f32 %v10063_v11  ;;  %v7644_v35 = vor.u32 %v8378_v18, %v7643_v58  ;;  %v7693_v28 = vld [vmem:[#allocation13 + $0xd0] sm:$0xf0]  ;;  %v8393_v31 = vld [vmem:[#allocation13 + $0xec] sm:$0xf]  ;;  %v7717_v58 = vld [vmem:[#allocation13 + $0xf8] sm:$0xf0] }
 0x3de   :  { %5294 = vmatpush.bf16.msra.mxu0 %v7676_v53  ;;  %5318 = vmatpush.bf16.msrb.mxu2 %v7712_v45  ;;  %v7696_v13 = vor.u32 %v8388_v6, %v7693_v28  ;;  %v8389_v8 = vld [vmem:[#allocation13 + $0xcc] sm:$0xf]  ;;  %v7701_v59 = vld [vmem:[#allocation13 + $0xd8] sm:$0xf0] }
 0x3df   :  { %v3752_v62 = vadd.f32 %v8595_v3, %v3751_v1  ;;  %4796 = vmatpush.bf16.msrb.mxu1 %v7537_v42  ;;  %4822 = vmatpush.bf16.msra.mxu3 %v7541_v30  ;;  %v7627_v42 = vld [vmem:[#allocation13 + $0x40] sm:$0xf]  ;;  %v8374_v30 = vld [vmem:[#allocation13 + $0x4c] sm:$0xf0] }
 0x3e0   :  { %v7628_v1 = vor.u32 %v8374_v30, %v7627_v42  ;;  %v8379_v42 = vld [vmem:[#allocation13 + $0x74] sm:$0xf0] }
 0x3e1   :  { %v3756_v15 = vsel %vm3755_vm0, %v8595_v3, %v3752_v62  ;;  %v8382_v3 = vld [vmem:[#allocation13 + $0x8c] sm:$0xf0] }
 0x3e2   :  { %v3761_v29 = vsel %vm3758_vm1, %v3760_v38, %v3756_v15  ;;  %v7660_v21 = vor.u32 %v8382_v3, %v7659_v44  ;;  %5319 = vmatpush.bf16.msrb.mxu2 %v7696_v13  ;;  %v8370_v62 = vld [vmem:[#allocation13 + $0x2c] sm:$0xf0]  ;;  %v8364_v44 = vld [vmem:[#allocation13 + $0x4] sm:$0xf]  ;;  %v7597_v3 = vld [vmem:[#allocation13 + $0x10] sm:$0xf0] }
 0x3e3   :  { %v8597_v20 = vpop.eup %8596  ;;  %4797 = vmatpush.bf16.msrb.mxu1 %v7521_v48  ;;  %4823 = vmatpush.bf16.msra.mxu3 %v7525_v0  ;;  %v7612_v15 = vor.u32 %v8370_v62, %v7611_v46  ;;  %v8380_v48 = vld [vmem:[#allocation13 + $0x84] sm:$0xf]  ;;  %v7661_v0 = vld [vmem:[#allocation13 + $0x90] sm:$0xf0]  ;;  %v7651_v13 = vld [vmem:[#allocation13 + $0x68] sm:$0xf] }
 0x3e4   :  { %v10069_v33 = vmul.f32 %v8597_v20, %v3761_v29  ;;  %5295 = vmatpush.bf16.msra.mxu0 %v7660_v21  ;;  %v7664_v27 = vor.u32 %v8380_v48, %v7661_v0  ;;  %v10084_v29 = vld [vmem:[%s10267_s7] sm:$0xf]  ;;  %v8376_v20 = vld [vmem:[#allocation13 + $0x64] sm:$0xf]  ;;  %v7600_v21 = vor.u32 %v8364_v44, %v7597_v3  ;;  %v8375_v48 = vld [vmem:[#allocation13 + $0x54] sm:$0xf0] }
 0x3e5   :  { %v3838_v47 = vperm.slane %v10084_v29, 0  ;;  %v3839_v39 = vperm.slane %v10084_v29, 1  ;;  %v3840_v62 = vperm.slane %v10084_v29, 2  ;;  %v8385_v0 = vld [vmem:[#allocation13 + $0xac] sm:$0xf]  ;;  %v3841_v63 = vperm.slane %v10084_v29, 3 }
 0x3e6   :  { %v4333_v41 = vpack.c.bf16 %v10069_v33, %v10069_v33  ;;  %5320 = vmatpush.bf16.msrb.mxu2 %v7680_v43  ;;  %v8373_v3 = vld [vmem:[#allocation13 + $0x4c] sm:$0xf]  ;;  %s5586_s7 = sshll.u32 %s10273_s13, 4  ;;  %s8888_s13 = smov [#allocation15]   ;;  %s5587_s7 = int_to_ptr.hbm [resolvable:$true] %s5586_s7 }
 0x3e7   :  { %4798 = vmatpush.bf16.msrb.mxu1 %v7505_v25  ;;  %4824 = vmatpush.bf16.msra.mxu3 %v7509_v14  ;;  %v7645_v25 = vld [vmem:[#allocation13 + $0x70] sm:$0xf0]  ;;  %v7715_v14 = vld [vmem:[#allocation13 + $0xe8] sm:$0xf]  ;;  %s5571_s15 = sshll.u32 %s8888_s13, 4  ;;  %s5572_s15 = int_to_ptr.vmem [resolvable:$true] %s5571_s15 }
 0x3e8   :  { %4749 = vmatmul.bf16.vlgmr.msra.gmra.mxu1 %v4333_v41  ;;  %4775 = vmatmul.bf16.vlgmr.msrb.gmra.mxu3 %v4333_v41  ;;  %v7648_v54 = vor.u32 %v8376_v20, %v7645_v25  ;;  %v7688_v20 = vor.u32 %v8385_v0, %v7685_v56  ;;  %v8371_v25 = vld [vmem:[#allocation13 + $0x34] sm:$0xf0] }
 0x3e9   :  { %5296 = vmatpush.bf16.msra.mxu0 %v7644_v35  ;;  %v7720_v35 = vor.u32 %v8393_v31, %v7717_v58 }
 0x3ea   :  { %5321 = vmatpush.bf16.msrb.mxu2 %v7664_v27 }
 0x3eb   :  { %4799 = vmatpush.bf16.msrb.mxu1 %v7489_v7  ;;  %4825 = vmatpush.bf16.msra.mxu3 %v7493_v5  ;;  %v8372_v7 = vld [vmem:[#allocation13 + $0x44] sm:$0xf]  ;;  %v7629_v5 = vld [vmem:[#allocation13 + $0x50] sm:$0xf0] }
 0x3ec   :  { %v7632_v12 = vor.u32 %v8372_v7, %v7629_v5 }
 0x3ed   :  { %5297 = vmatpush.bf16.msra.mxu0 %v7628_v1  ;;  %v7652_v1 = vor.u32 %v8379_v42, %v7651_v13 }
 0x3ee   :  { %5322 = vmatpush.bf16.msrb.mxu2 %v7648_v54  ;;  %v7669_v54 = vld [vmem:[#allocation13 + $0x98] sm:$0xf0] }
 0x3ef   :  { %4800 = vmatpush.bf16.msrb.mxu1 %v7473_v26  ;;  %4826 = vmatpush.bf16.msra.mxu3 %v7477_v2  ;;  %v8368_v2 = vld [vmem:[#allocation13 + $0x24] sm:$0xf] }
 0x3f0   :  { %v7616_v36 = vor.u32 %v8368_v2, %v7613_v24  ;;  %v7603_v2 = vld [vmem:[#allocation13 + $0x8] sm:$0xf]  ;;  %v8367_v24 = vld [vmem:[#allocation13 + $0x14] sm:$0xf0] }
 0x3f1   :  { %5298 = vmatpush.bf16.msra.mxu0 %v7612_v15  ;;  %v7635_v15 = vld [vmem:[#allocation13 + $0x48] sm:$0xf] }
 0x3f2   :  { %5323 = vmatpush.bf16.msrb.mxu2 %v7632_v12  ;;  %v7636_v52 = vor.u32 %v8375_v48, %v7635_v15  ;;  %v8422_v15 = vld [vmem:[#allocation13 + $0x1cc] sm:$0xf0] }
 0x3f5   :  { %5299 = vmatpush.bf16.msra.mxu0 %v7596_v50  ;;  %v7619_v50 = vld [vmem:[#allocation13 + $0x28] sm:$0xf] }
 0x3f6   :  { %5324 = vmatpush.bf16.msrb.mxu2 %v7616_v36 }
 0x3f8   :  { %4801 = vmatmul.bf16.vlgmr.msrb.gmra.mxu1 %v4333_v41  ;;  %4827 = vmatmul.bf16.vlgmr.msra.gmra.mxu3 %v4333_v41  ;;  %v8395_v41 = vld [vmem:[#allocation13 + $0xf4] sm:$0xf0] }
 0x3f9   :  { %v7716_v61 = vor.u32 %v8395_v41, %v7715_v14  ;;  %v8381_v14 = vld [vmem:[#allocation13 + $0x8c] sm:$0xf] }
 0x3fa   :  { %5325 = vmatpush.bf16.msrb.mxu2 %v7600_v21  ;;  %v7672_v5 = vor.u32 %v8381_v14, %v7669_v54  ;;  %v7637_v21 = vld [vmem:[#allocation13 + $0x58] sm:$0xf0]  ;;  %v7821_v54 = vld [vmem:[#allocation13 + $0x1d0] sm:$0xf0] }
 0x3fb   :  { %5344 = vmatpush.bf16.msrb.mxu0 %v7716_v61  ;;  %v7640_v31 = vor.u32 %v8373_v3, %v7637_v21  ;;  %v8414_v3 = vld [vmem:[#allocation13 + $0x18c] sm:$0xf0] }
 0x3fe   :  { %5370 = vmatpush.bf16.msra.mxu2 %v7720_v35  ;;  %v8424_v35 = vld [vmem:[#allocation13 + $0x1e4] sm:$0xf] }
 0x3ff   :  { %5345 = vmatpush.bf16.msrb.mxu0 %v7700_v9 }
 0x40b   :  { %v10073_v23 = vpop.f32.mrf.mxu0 }
 0x40c   :  { %v4176_v26 = vadd.f32 %v10073_v23, %v3838_v47  ;;  %v7667_v23 = vld [vmem:[#allocation13 + $0x88] sm:$0xf]  ;;  %v7620_v47 = vor.u32 %v8371_v25, %v7619_v50  ;;  %v8420_v50 = vld [vmem:[#allocation13 + $0x1c4] sm:$0xf] }
 0x411   :  { %v10075_v60 = vpop.f32.mrf.mxu2 }
 0x412   :  { %v4202_v45 = vadd.f32 %v10075_v60, %v3839_v39  ;;  %v7704_v60 = vor.u32 %v8389_v8, %v7701_v59 }
 0x413   :  { %v4177_v49 = vpop.f32.mrf.mxu0 }
 0x414   :  { %v7684_v49 = vor.u32 %v8387_v17, %v7683_v32  ;;  %5371 = vmatpush.bf16.msra.mxu2 %v7704_v60  ;;  %v7604_v32 = vor.u32 %v8367_v24, %v7603_v2  ;;  %v7653_v17 = vld [vmem:[#allocation13 + $0x78] sm:$0xf0] }
 0x416   :  { %5346 = vmatpush.bf16.msrb.mxu0 %v7684_v49 }
 0x418   :  { %5372 = vmatpush.bf16.msra.mxu2 %v7688_v20 }
 0x419   :  { %v4203_v10 = vpop.f32.mrf.mxu2 }
 0x41a   :  { %v7668_v10 = vor.u32 %v8383_v22, %v7667_v23 }
 0x41b   :  { %v10077_v16 = vpop.f32.mrf.mxu0 }
 0x41c   :  { %5347 = vmatpush.bf16.msrb.mxu0 %v7668_v10  ;;  %5373 = vmatpush.bf16.msra.mxu2 %v7672_v5  ;;  %v8426_v10 = vld [vmem:[#allocation13 + $0x1ec] sm:$0xf0] }
 0x420   :  { %5348 = vmatpush.bf16.msrb.mxu0 %v7652_v1 }
 0x421   :  { %v10079_v55 = vpop.f32.mrf.mxu2 }
 0x422   :  { %v4254_v29 = vadd.f32 %v10079_v55, %v3841_v63  ;;  %v7803_v63 = vld [vmem:[#allocation13 + $0x1a0] sm:$0xf] }
 0x423   :  { %v4229_v38 = vpop.f32.mrf.mxu0 }
 0x424   :  { %5349 = vmatpush.bf16.msrb.mxu0 %v7636_v52 }
 0x428   :  { %5350 = vmatpush.bf16.msrb.mxu0 %v7620_v47  ;;  %v7605_v47 = vld [vmem:[#allocation13 + $0x18] sm:$0xf0] }
 0x429   :  { %v4255_v4 = vpop.f32.mrf.mxu2 }
 0x42a   :  { %v4228_v4 = vadd.f32 %v10077_v16, %v3840_v62  ;;  %v8377_v16 = vld [vmem:[#allocation13 + $0x6c] sm:$0xf] }
 0x42c   :  { %5351 = vmatpush.bf16.msrb.mxu0 %v7604_v32  ;;  %v7805_v32 = vld [vmem:[#allocation13 + $0x1b0] sm:$0xf0] }
 0x42d   :  { %v4188_v37 = vpop.f32.mrf.mxu1 }
 0x42e   :  { %v4189_v57 = vadd.f32 %v4188_v37, %v4176_v26  ;;  %v10089_v40 = vpop.f32.mrf.mxu0 }
 0x430   :  { %v7331_v53 = vmul.f32 -1.442695, %v4189_v57  ;;  %v7656_v57 = vor.u32 %v8377_v16, %v7653_v17 }
 0x432   :  { %8598 = vpow2.f32 %v7331_v53  ;;  %5374 = vmatpush.bf16.msra.mxu2 %v7656_v57 }
 0x433   :  { %v4214_v18 = vpop.f32.mrf.mxu3 }
 0x434   :  { %v4215_v6 = vadd.f32 %v4214_v18, %v4202_v45  ;;  %v10092_v28 = vpop.f32.mrf.mxu2  ;;  %v7835_v45 = vld [vmem:[#allocation13 + $0x1e0] sm:$0xf] }
 0x435   :  { %v4190_v30 = vpop.f32.mrf.mxu1  ;;  %v7836_v55 = vor.u32 %v8426_v10, %v7835_v45 }
 0x436   :  { %v7332_v43 = vmul.f32 -1.442695, %v4215_v6  ;;  %v4739_v46 = vpop.f32.mrf.mxu0  ;;  %v7837_v6 = vld [vmem:[#allocation13 + $0x1f0] sm:$0xf0]  ;;  %5375 = vmatpush.bf16.msra.mxu2 %v7640_v31 }
 0x437   :  { %v7840_v1 = vor.u32 %v8424_v35, %v7837_v6  ;;  %5305 = vmatpush.bf16.msra.mxu1 %v7836_v55  ;;  %v7621_v46 = vld [vmem:[#allocation13 + $0x38] sm:$0xf0]  ;;  %v7789_v31 = vld [vmem:[#allocation13 + $0x190] sm:$0xf0] }
 0x438   :  { %v8599_v38 = vpop.eup %8598  ;;  %8600 = vpow2.f32 %v7332_v43  ;;  %v8369_v43 = vld [vmem:[#allocation13 + $0x2c] sm:$0xf] }
 0x439   :  { %v10095_v27 = vadd.f32 1.0, %v8599_v38  ;;  %5331 = vmatpush.bf16.msrb.mxu3 %v7840_v1  ;;  %v7624_v62 = vor.u32 %v8369_v43, %v7621_v46  ;;  %v7819_v38 = vld [vmem:[#allocation13 + $0x1c0] sm:$0xf]  ;;  %v7773_v1 = vld [vmem:[#allocation13 + $0x170] sm:$0xf0] }
 0x43a   :  { %v7820_v14 = vor.u32 %v8422_v15, %v7819_v38  ;;  %v7755_v38 = vld [vmem:[#allocation13 + $0x140] sm:$0xf]  ;;  %v8406_v15 = vld [vmem:[#allocation13 + $0x14c] sm:$0xf0] }
 0x43b   :  { %8602 = vrcp.f32 %v10095_v27  ;;  %v4216_v41 = vpop.f32.mrf.mxu3  ;;  %v4291_v18 = vand.u32 2147483647, %v10095_v27  ;;  %v4293_v59 = vand.u32 2147483648, %v10095_v27  ;;  %vm4287_vm3 = vweird.f32 %v10095_v27  ;;  %5376 = vmatpush.bf16.msra.mxu2 %v7624_v62 }
 0x43c   :  { %v4765_v61 = vpop.f32.mrf.mxu2  ;;  %5306 = vmatpush.bf16.msra.mxu1 %v7820_v14  ;;  %v8402_v41 = vld [vmem:[#allocation13 + $0x12c] sm:$0xf0] }
 0x43d   :  { %v4240_v7 = vpop.f32.mrf.mxu1  ;;  %vm10133_vm6 = vcmp.eq.f32.partialorder %v4291_v18, 8.507059e+37  ;;  %v8365_v61 = vld [vmem:[#allocation13 + $0xc] sm:$0xf] }
 0x43e   :  { %v8601_v19 = vpop.eup %8600  ;;  %v4241_v12 = vadd.f32 %v4240_v7, %v4228_v4  ;;  %v4294_v4 = vor.u32 1.1754944e-38, %v4293_v59  ;;  %v10148_v59 = vld [vmem:[%s10269_s9] sm:$0xf] }
 0x43f   :  { %v10100_v9 = vadd.f32 1.0, %v8601_v19  ;;  %v7824_v19 = vor.u32 %v8420_v50, %v7821_v54  ;;  %v7757_v50 = vld [vmem:[#allocation13 + $0x150] sm:$0xf0]  ;;  %v7739_v54 = vld [vmem:[#allocation13 + $0x120] sm:$0xf] }
 0x440   :  { %v7333_v26 = vmul.f32 -1.442695, %v4241_v12  ;;  %v7608_v12 = vor.u32 %v8365_v61, %v7605_v47  ;;  %v7740_v47 = vor.u32 %v8402_v41, %v7739_v54  ;;  %v4403_v54 = vperm.slane %v10148_v59, 3 }
 0x441   :  { %v10102_v37 = vpop.eup %8602  ;;  %8604 = vrcp.f32 %v10100_v9  ;;  %v4308_v48 = vand.u32 2147483648, %v10100_v9  ;;  %v4306_v52 = vand.u32 2147483647, %v10100_v9  ;;  %vm4302_vm7 = vweird.f32 %v10100_v9  ;;  %5332 = vmatpush.bf16.msrb.mxu3 %v7824_v19 }
 0x442   :  { %v4283_v36 = vmul.f32 %v10102_v37, %v10095_v27  ;;  %8606 = vpow2.f32 %v7333_v26  ;;  %vm4288_vm2 = vweird.f32 %v10102_v37  ;;  %v8418_v26 = vld [vmem:[#allocation13 + $0x1ac] sm:$0xf0]  ;;  %5377 = vmatpush.bf16.msra.mxu2 %v7608_v12 }
 0x443   :  { %v4266_v39 = vpop.f32.mrf.mxu3  ;;  %vm10123_vm4 = vmor %vm4287_vm3, %vm4288_vm2  ;;  %v4309_v24 = vor.u32 1.1754944e-38, %v4308_v48  ;;  %v7804_v16 = vor.u32 %v8418_v26, %v7803_v63  ;;  %vm4307_vm9 = vcmp.eq.f32.partialorder %v4306_v52, 8.507059e+37  ;;  %v4400_v48 = vperm.slane %v10148_v59, 0 }
 0x444   :  { %v4284_v49 = vsub.f32 1.0, %v4283_v36  ;;  %v4267_v53 = vadd.f32 %v4266_v39, %v4254_v29  ;;  %v8416_v36 = vld [vmem:[#allocation13 + $0x1a4] sm:$0xf]  ;;  %v7756_v52 = vor.u32 %v8406_v15, %v7755_v38  ;;  %v4401_v63 = vperm.slane %v10148_v59, 1  ;;  %v8415_v38 = vld [vmem:[#allocation13 + $0x194] sm:$0xf0] }
 0x445   :  { %v4242_v44 = vpop.f32.mrf.mxu1  ;;  %5307 = vmatpush.bf16.msra.mxu1 %v7804_v16 }
 0x446   :  { %v4285_v23 = vmul.f32 %v10102_v37, %v4284_v49  ;;  %8608 = vtanh.f32 %v4267_v53  ;;  %v7787_v44 = vld [vmem:[#allocation13 + $0x180] sm:$0xf] }
 0x447   :  { %v8605_v58 = vpop.eup %8604  ;;  %v7788_v21 = vor.u32 %v8414_v3, %v7787_v44 }
 0x448   :  { %v8607_v13 = vpop.eup %8606  ;;  %v4298_v42 = vmul.f32 %v8605_v58, %v10100_v9  ;;  %v4286_v30 = vadd.f32 %v10102_v37, %v4285_v23  ;;  %vm4303_vm5 = vweird.f32 %v8605_v58  ;;  %v7808_v9 = vor.u32 %v8416_v36, %v7805_v32  ;;  %v8412_v23 = vld [vmem:[#allocation13 + $0x184] sm:$0xf]  ;;  %v7725_v32 = vld [vmem:[#allocation13 + $0x110] sm:$0xf0] }
 0x449   :  { %v10115_v8 = vadd.f32 1.0, %v8607_v13  ;;  %vm4304_vm8 = vmor %vm4302_vm7, %vm4303_vm5  ;;  %v7792_v18 = vor.u32 %v8412_v23, %v7789_v31  ;;  %5308 = vmatpush.bf16.msra.mxu1 %v7788_v21  ;;  %v8410_v13 = vld [vmem:[#allocation13 + $0x16c] sm:$0xf0]  ;;  %v8433_v21 = vld [vmem:[%s10270_s10 + $0x28] sm:$0xff] }
 0x44a   :  { %v4299_v60 = vsub.f32 1.0, %v4298_v42  ;;  %v4290_v27 = vsel %vm10123_vm4, %v10102_v37, %v4286_v30  ;;  %5333 = vmatpush.bf16.msrb.mxu3 %v7808_v9  ;;  %v8408_v30 = vld [vmem:[#allocation13 + $0x164] sm:$0xf]  ;;  %v7827_v31 = vld [vmem:[#allocation13 + $0x1c8] sm:$0xf] }
 0x44b   :  { %v10109_v22 = vpop.f32.mrf.mxu0  ;;  %8610 = vrcp.f32 %v10115_v8  ;;  %v4268_v56 = vpop.f32.mrf.mxu3  ;;  %v4295_v37 = vsel %vm10133_vm6, %v4294_v4, %v4290_v27  ;;  %v4321_v55 = vand.u32 2147483647, %v10115_v8  ;;  %v4323_v35 = vand.u32 2147483648, %v10115_v8 }
 0x44c   :  { %v4300_v20 = vmul.f32 %v8605_v58, %v4299_v60  ;;  %v8609_v2 = vpop.eup %8608  ;;  %vm4317_vm11 = vweird.f32 %v10115_v8  ;;  %v7776_v46 = vor.u32 %v8408_v30, %v7773_v1  ;;  %v8404_v56 = vld [vmem:[#allocation13 + $0x144] sm:$0xf]  ;;  %v4738_v4 = vadd.f32 %v10089_v40, %v4400_v48  ;;  %v8419_v30 = vld [vmem:[#allocation13 + $0x1b4] sm:$0xf0]  ;;  %v8417_v1 = vld [vmem:[#allocation13 + $0x1ac] sm:$0xf] }
 0x44d   :  { %v4329_v53 = vmul.f32 %v8609_v2, %v4295_v37  ;;  %v4324_v60 = vor.u32 1.1754944e-38, %v4323_v35  ;;  %vm4322_vm13 = vcmp.eq.f32.partialorder %v4321_v55, 8.507059e+37  ;;  %v7760_v27 = vor.u32 %v8404_v56, %v7757_v50  ;;  %v8434_v40 = vld [vmem:[%s10270_s10 + $0x30] sm:$0xff]  ;;  %v7829_v55 = vld [vmem:[#allocation13 + $0x1d8] sm:$0xf0]  ;;  %v8431_v48 = vld [vmem:[%s10270_s10 + $0x18] sm:$0xff] }
 0x44e   :  { %v4301_v7 = vadd.f32 %v8605_v58, %v4300_v20  ;;  %5334 = vmatpush.bf16.msrb.mxu3 %v7792_v18  ;;  %v7723_v2 = vld [vmem:[#allocation13 + $0x100] sm:$0xf]  ;;  %v8396_v37 = vld [vmem:[#allocation13 + $0x104] sm:$0xf]  ;;  %v8413_v50 = vld [vmem:[#allocation13 + $0x18c] sm:$0xf] }
 0x44f   :  { %v7728_v9 = vor.u32 %v8396_v37, %v7725_v32  ;;  %v8429_v37 = vld [vmem:[%s10270_s10 + $0x8] sm:$0xff] }
 0x450   :  { %v4305_v17 = vsel %vm4304_vm8, %v8605_v58, %v4301_v7  ;;  %v8400_v7 = vld [vmem:[#allocation13 + $0x124] sm:$0xf] }
 0x451   :  { %v10131_v25 = vpop.f32.mrf.mxu2  ;;  %v8611_v29 = vpop.eup %8610  ;;  %v4310_v39 = vsel %vm4307_vm9, %v4309_v24, %v4305_v17  ;;  %v8398_v24 = vld [vmem:[#allocation13 + $0x10c] sm:$0xf0]  ;;  %v7843_v17 = vld [vmem:[#allocation13 + $0x1e8] sm:$0xf] }
 0x452   :  { %v4313_v57 = vmul.f32 %v8611_v29, %v10115_v8  ;;  %v4328_v49 = vmul.f32 %v4310_v39, %v10001_v34  ;;  %vm4318_vm10 = vweird.f32 %v8611_v29  ;;  %v7771_v34 = vld [vmem:[#allocation13 + $0x160] sm:$0xf]  ;;  %5335 = vmatpush.bf16.msrb.mxu3 %v7776_v46  ;;  %v8435_v8 = vld [vmem:[%s10270_s10 + $0x38] sm:$0xff]  ;;  %v7724_v36 = vor.u32 %v8398_v24, %v7723_v2 }
 0x453   :  { %v4791_v5 = vpop.f32.mrf.mxu0  ;;  %v7772_v42 = vor.u32 %v8410_v13, %v7771_v34  ;;  %vm4319_vm12 = vmor %vm4317_vm11, %vm4318_vm10  ;;  %v8425_v39 = vld [vmem:[#allocation13 + $0x1ec] sm:$0xf]  ;;  %v8432_v34 = vld [vmem:[%s10270_s10 + $0x20] sm:$0xff]  ;;  %v4816_v2 = vadd.f32 %v10131_v25, %v4403_v54 }
 0x454   :  { %v4314_v45 = vsub.f32 1.0, %v4313_v57  ;;  %v4330_v10 = vadd.f32 %v4329_v53, %v4328_v49  ;;  %v7741_v5 = vld [vmem:[#allocation13 + $0x130] sm:$0xf0]  ;;  %v7845_v57 = vld [vmem:[#allocation13 + $0x1f8] sm:$0xf0]  ;;  %v4764_v49 = vadd.f32 %v10092_v28, %v4401_v63 }
 0x455   :  { %5309 = vmatpush.bf16.msra.mxu1 %v7772_v42  ;;  %v7744_v12 = vor.u32 %v8400_v7, %v7741_v5  ;;  %v7848_v44 = vor.u32 %v8425_v39, %v7845_v57  ;;  %v7811_v42 = vld [vmem:[#allocation13 + $0x1a8] sm:$0xf]  ;;  %v8411_v5 = vld [vmem:[#allocation13 + $0x174] sm:$0xf0]  ;;  %v7781_v63 = vld [vmem:[#allocation13 + $0x178] sm:$0xf0] }
 0x456   :  { %v4315_v6 = vmul.f32 %v8611_v29, %v4314_v45  ;;  %8612 = vtanh.f32 %v4330_v10  ;;  %5465 = vst [vmem:[#allocation18 + $0x8] sm:$0xff] %v4330_v10  ;;  %5336 = vmatpush.bf16.msrb.mxu3 %v7760_v27  ;;  %v8423_v45 = vld [vmem:[#allocation13 + $0x1d4] sm:$0xf0]  ;;  %v8421_v10 = vld [vmem:[#allocation13 + $0x1cc] sm:$0xf]  ;;  %v7812_v46 = vor.u32 %v8419_v30, %v7811_v42 }
 0x457   :  { %v7828_v18 = vor.u32 %v8423_v45, %v7827_v31  ;;  %v7832_v35 = vor.u32 %v8421_v10, %v7829_v55  ;;  %v7779_v7 = vld [vmem:[#allocation13 + $0x168] sm:$0xf]  ;;  %v8401_v10 = vld [vmem:[#allocation13 + $0x12c] sm:$0xf] }
 0x458   :  { %v4316_v43 = vadd.f32 %v8611_v29, %v4315_v6  ;;  %v4402_v6 = vperm.slane %v10148_v59, 2  ;;  %v7747_v57 = vld [vmem:[#allocation13 + $0x128] sm:$0xf] }
 0x459   :  { %v4817_v58 = vpop.f32.mrf.mxu2  ;;  %5310 = vmatpush.bf16.msra.mxu1 %v7756_v52 }
 0x45a   :  { %v4320_v62 = vsel %vm4319_vm12, %v8611_v29, %v4316_v43  ;;  %5337 = vmatpush.bf16.msrb.mxu3 %v7744_v12  ;;  %v8427_v29 = vld [vmem:[#allocation13 + $0x1f4] sm:$0xf0]  ;;  %v4790_v52 = vadd.f32 %v10109_v22, %v4402_v6  ;;  %v8430_v22 = vld [vmem:[%s10270_s10 + $0x10] sm:$0xff]  ;;  %v7780_v12 = vor.u32 %v8411_v5, %v7779_v7 }
 0x45b   :  { %v4325_v0 = vsel %vm4322_vm13, %v4324_v60, %v4320_v62  ;;  %v7844_v53 = vor.u32 %v8427_v29, %v7843_v17  ;;  %v7813_v60 = vld [vmem:[#allocation13 + $0x1b8] sm:$0xf0]  ;;  %v7795_v62 = vld [vmem:[#allocation13 + $0x188] sm:$0xf]  ;;  %v8405_v17 = vld [vmem:[#allocation13 + $0x14c] sm:$0xf] }
 0x45c   :  { %v8613_v20 = vpop.eup %8612  ;;  %v7796_v56 = vor.u32 %v8415_v38, %v7795_v62  ;;  %v7733_v38 = vld [vmem:[#allocation13 + $0x118] sm:$0xf0] }
 0x45d   :  { %v4332_v14 = vmul.f32 %v8613_v20, %v4325_v0  ;;  %5311 = vmatpush.bf16.msra.mxu1 %v7740_v47  ;;  %v7816_v0 = vor.u32 %v8417_v1, %v7813_v60  ;;  %v7797_v20 = vld [vmem:[#allocation13 + $0x198] sm:$0xf0] }
 0x45e   :  { %5338 = vmatpush.bf16.msrb.mxu3 %v7728_v9  ;;  %v7765_v9 = vld [vmem:[#allocation13 + $0x158] sm:$0xf0] }
 0x45f   :  { %v10156_v61 = vpack.c.bf16 %v4332_v14, %v4332_v14  ;;  %5463 = vst [vmem:[#allocation16 + $0x8] sm:$0xff] %v4332_v14 }
 0x461   :  { %5300 = vmatmul.bf16.vlgmr.msra.gmra.mxu0 %v10156_v61  ;;  %5326 = vmatmul.bf16.vlgmr.msrb.gmra.mxu2 %v10156_v61 }
 0x462   :  { %5544 = vmatpush.bf16.msra.mxu0 %v8435_v8  ;;  %5312 = vmatpush.bf16.msra.mxu1 %v7724_v36 }
 0x463   :  { %5383 = vmatpush.bf16.msra.mxu3 %v7848_v44  ;;  %v8428_v44 = vld [vmem:[%s10270_s10] sm:$0xff] }
 0x465   :  { %v4750_v19 = vpop.f32.mrf.mxu1 }
 0x466   :  { %v4751_v26 = vadd.f32 %v4750_v19, %v4738_v4  ;;  %5545 = vmatpush.bf16.msra.mxu0 %v8434_v40  ;;  %5357 = vmatpush.bf16.msrb.mxu1 %v7844_v53  ;;  %v7800_v4 = vor.u32 %v8413_v50, %v7797_v20  ;;  %v8407_v40 = vld [vmem:[#allocation13 + $0x154] sm:$0xf0] }
 0x467   :  { %5384 = vmatpush.bf16.msra.mxu3 %v7832_v35  ;;  %v8399_v35 = vld [vmem:[#allocation13 + $0x114] sm:$0xf0] }
 0x468   :  { %v7590_v16 = vmul.f32 -1.442695, %v4751_v26  ;;  %v7763_v26 = vld [vmem:[#allocation13 + $0x148] sm:$0xf] }
 0x469   :  { %v7764_v32 = vor.u32 %v8407_v40, %v7763_v26 }
 0x46a   :  { %8614 = vpow2.f32 %v7590_v16  ;;  %5546 = vmatpush.bf16.msra.mxu0 %v8433_v21  ;;  %5358 = vmatpush.bf16.msrb.mxu1 %v7828_v18 }
 0x46b   :  { %v4776_v3 = vpop.f32.mrf.mxu3  ;;  %5385 = vmatpush.bf16.msra.mxu3 %v7816_v0 }
 0x46c   :  { %v4777_v23 = vadd.f32 %v4776_v3, %v4764_v49  ;;  %v8403_v49 = vld [vmem:[#allocation13 + $0x134] sm:$0xf0]  ;;  %v7768_v3 = vor.u32 %v8405_v17, %v7765_v9  ;;  %v10231_v17 = vld [vmem:[%s10271_s11] ss:$0 sm:$0xff] }
 0x46d   :  { %v4752_v58 = vpop.f32.mrf.mxu1  ;;  %v7748_v45 = vor.u32 %v8403_v49, %v7747_v57 }
 0x46e   :  { %v7591_v28 = vmul.f32 -1.442695, %v4777_v23  ;;  %5547 = vmatpush.bf16.msra.mxu0 %v8432_v34  ;;  %5359 = vmatpush.bf16.msrb.mxu1 %v7812_v46  ;;  %v7749_v58 = vld [vmem:[#allocation13 + $0x138] sm:$0xf0] }
 0x46f   :  { %5386 = vmatpush.bf16.msra.mxu3 %v7800_v4  ;;  %v7752_v60 = vor.u32 %v8401_v10, %v7749_v58 }
 0x470   :  { %v8615_v13 = vpop.eup %8614  ;;  %8616 = vpow2.f32 %v7591_v28  ;;  %v7731_v28 = vld [vmem:[#allocation13 + $0x108] sm:$0xf] }
 0x471   :  { %v10172_v43 = vadd.f32 1.0, %v8615_v13  ;;  %5352 = vmatmul.bf16.vlgmr.msrb.gmra.mxu0 %v10156_v61  ;;  %5378 = vmatmul.bf16.vlgmr.msra.gmra.mxu2 %v10156_v61  ;;  %v8409_v61 = vld [vmem:[#allocation13 + $0x16c] sm:$0xf]  ;;  %v5474_v13 = vpack.c.bf16 %v10069_v33, %v9865_v51  ;;  %v7732_v33 = vor.u32 %v8399_v35, %v7731_v28 }
 0x472   :  { %5548 = vmatpush.bf16.msra.mxu0 %v8431_v48  ;;  %5360 = vmatpush.bf16.msrb.mxu1 %v7796_v56  ;;  %v7784_v16 = vor.u32 %v8409_v61, %v7781_v63 }
 0x473   :  { %8618 = vrcp.f32 %v10172_v43  ;;  %v4778_v15 = vpop.f32.mrf.mxu3  ;;  %v4855_v55 = vand.u32 2147483648, %v10172_v43  ;;  %vm4849_vm15 = vweird.f32 %v10172_v43  ;;  %v4853_v34 = vand.u32 2147483647, %v10172_v43 }
 0x474   :  { %5387 = vmatpush.bf16.msra.mxu3 %v7784_v16 }
 0x475   :  { %v4802_v27 = vpop.f32.mrf.mxu1  ;;  %v4856_v15 = vor.u32 1.1754944e-38, %v4855_v55  ;;  %vm4854_vm3 = vcmp.eq.f32.partialorder %v4853_v34, 8.507059e+37 }
 0x476   :  { %v8617_v14 = vpop.eup %8616  ;;  %v4803_v8 = vadd.f32 %v4802_v27, %v4790_v52  ;;  %5549 = vmatpush.bf16.msra.mxu0 %v8430_v22  ;;  %5361 = vmatpush.bf16.msrb.mxu1 %v7780_v12 }
 0x477   :  { %v10182_v41 = vadd.f32 1.0, %v8617_v14 }
 0x478   :  { %v7592_v47 = vmul.f32 -1.442695, %v4803_v8  ;;  %5388 = vmatpush.bf16.msra.mxu3 %v7768_v3 }
 0x479   :  { %v10187_v19 = vpop.eup %8618  ;;  %8620 = vrcp.f32 %v10182_v41  ;;  %v4870_v42 = vand.u32 2147483648, %v10182_v41  ;;  %v4868_v1 = vand.u32 2147483647, %v10182_v41  ;;  %vm4864_vm2 = vweird.f32 %v10182_v41 }
 0x47a   :  { %v4845_v59 = vmul.f32 %v10187_v19, %v10172_v43  ;;  %8622 = vpow2.f32 %v7592_v47  ;;  %5550 = vmatpush.bf16.msra.mxu0 %v8429_v37  ;;  %vm4850_vm14 = vweird.f32 %v10187_v19  ;;  %5362 = vmatpush.bf16.msrb.mxu1 %v7764_v32  ;;  %v8397_v43 = vld [vmem:[#allocation13 + $0x10c] sm:$0xf] }
 0x47b   :  { %v4828_v24 = vpop.f32.mrf.mxu3  ;;  %vm10211_vm0 = vmor %vm4849_vm15, %vm4850_vm14  ;;  %v4871_v52 = vor.u32 1.1754944e-38, %v4870_v42  ;;  %v7736_v50 = vor.u32 %v8397_v43, %v7733_v38  ;;  %vm4869_vm5 = vcmp.eq.f32.partialorder %v4868_v1, 8.507059e+37 }
 0x47c   :  { %v4846_v36 = vsub.f32 1.0, %v4845_v59  ;;  %v4829_v29 = vadd.f32 %v4828_v24, %v4816_v2  ;;  %5389 = vmatpush.bf16.msra.mxu3 %v7752_v60 }
 0x47d   :  { %v4804_v39 = vpop.f32.mrf.mxu1 }
 0x47e   :  { %v4847_v53 = vmul.f32 %v10187_v19, %v4846_v36  ;;  %8624 = vtanh.f32 %v4829_v29  ;;  %5551 = vmatpush.bf16.msra.mxu0 %v8428_v44  ;;  %5363 = vmatpush.bf16.msrb.mxu1 %v7748_v45 }
 0x47f   :  { %v8621_v25 = vpop.eup %8620 }
 0x480   :  { %v8623_v21 = vpop.eup %8622  ;;  %v4860_v23 = vmul.f32 %v8621_v25, %v10182_v41  ;;  %v4848_v31 = vadd.f32 %v10187_v19, %v4847_v53  ;;  %vm4865_vm1 = vweird.f32 %v8621_v25  ;;  %5390 = vmatpush.bf16.msra.mxu3 %v7736_v50  ;;  %v4962_v53 = vld [vmem:[%s10269_s9] sm:$0xf]  ;;  %s8886_s9 = smov [#allocation16]  }
 0x481   :  { %v4843_v18 = vadd.f32 1.0, %v8623_v21  ;;  %5552 = vmatmul.bf16.vlgmr.msra.gmra.mxu0 %v5474_v13  ;;  %vm4866_vm4 = vmor %vm4864_vm2, %vm4865_vm1  ;;  %v4965_v21 = vperm.slane %v4962_v53, 1  ;;  %v4966_v35 = vperm.slane %v4962_v53, 2  ;;  %s5584_s11 = sshll.u32 %s8886_s9, 4  ;;  %s5585_s11 = int_to_ptr.vmem [resolvable:$true] %s5584_s11 }
 0x482   :  { %v4861_v6 = vsub.f32 1.0, %v4860_v23  ;;  %v4852_v51 = vsel %vm10211_vm0, %v10187_v19, %v4848_v31  ;;  %5364 = vmatpush.bf16.msrb.mxu1 %v7732_v33 }
 0x483   :  { %8626 = vrcp.f32 %v4843_v18  ;;  %v4830_v46 = vpop.f32.mrf.mxu3  ;;  %v4857_v56 = vsel %vm4854_vm3, %v4856_v15, %v4852_v51  ;;  %v4885_v47 = vand.u32 2147483648, %v4843_v18  ;;  %v4883_v5 = vand.u32 2147483647, %v4843_v18 }
 0x484   :  { %v4862_v62 = vmul.f32 %v8621_v25, %v4861_v6  ;;  %v8625_v0 = vpop.eup %8624  ;;  %vm4879_vm7 = vweird.f32 %v4843_v18  ;;  %v4967_v46 = vperm.slane %v4962_v53, 3 }
 0x485   :  { %v4891_v22 = vmul.f32 %v8625_v0, %v4857_v56  ;;  %v4886_v61 = vor.u32 1.1754944e-38, %v4885_v47  ;;  %vm4884_vm9 = vcmp.eq.f32.partialorder %v4883_v5, 8.507059e+37 }
 0x486   :  { %v4863_v48 = vadd.f32 %v8621_v25, %v4862_v62 }
 0x488   :  { %v4867_v20 = vsel %vm4866_vm4, %v8621_v25, %v4863_v48  ;;  %v4964_v25 = vperm.slane %v4962_v53, 0 }
 0x489   :  { %v8627_v27 = vpop.eup %8626  ;;  %v4872_v14 = vsel %vm4869_vm5, %v4871_v52, %v4867_v20 }
 0x48a   :  { %v4875_v8 = vmul.f32 %v8627_v27, %v4843_v18  ;;  %v4890_v54 = vmul.f32 %v4872_v14, %v10063_v11  ;;  %vm4880_vm6 = vweird.f32 %v8627_v27 }
 0x48b   :  { %vm4881_vm8 = vmor %vm4879_vm7, %vm4880_vm6 }
 0x48c   :  { %v4876_v41 = vsub.f32 1.0, %v4875_v8  ;;  %v10221_v4 = vadd.f32 %v4891_v22, %v4890_v54 }
 0x48e   :  { %v4877_v7 = vmul.f32 %v8627_v27, %v4876_v41  ;;  %8628 = vtanh.f32 %v10221_v4 }
 0x490   :  { %v4878_v19 = vadd.f32 %v8627_v27, %v4877_v7 }
 0x492   :  { %v4882_v59 = vsel %vm4881_vm8, %v8627_v27, %v4878_v19 }
 0x493   :  { %v4887_v12 = vsel %vm4884_vm9, %v4886_v61, %v4882_v59 }
 0x494   :  { %v8629_v63 = vpop.eup %8628 }
 0x495   :  { %v10224_v11 = vmul.f32 %v8629_v63, %v4887_v12 }
 0x497   :  { %v4897_v26 = vpack.c.bf16 %v10224_v11, %v10224_v11 }
 0x499   :  { %5313 = vmatmul.bf16.vlgmr.msra.gmra.mxu1 %v4897_v26  ;;  %5339 = vmatmul.bf16.vlgmr.msrb.gmra.mxu3 %v4897_v26 }
 0x4a9   :  { %5365 = vmatmul.bf16.vlgmr.msrb.gmra.mxu1 %v4897_v26  ;;  %5391 = vmatmul.bf16.vlgmr.msra.gmra.mxu3 %v4897_v26 }
 0x4de   :  { %v5301_v40 = vpop.f32.mrf.mxu0 }
 0x4df   :  { %v5302_v44 = vadd.f32 %v5301_v40, %v4964_v25 }
 0x4e4   :  { %v5327_v2 = vpop.f32.mrf.mxu2 }
 0x4e5   :  { %v5328_v45 = vadd.f32 %v5327_v2, %v4965_v21 }
 0x4e6   :  { %v5303_v24 = vpop.f32.mrf.mxu0 }
 0x4ec   :  { %v5329_v37 = vpop.f32.mrf.mxu2 }
 0x4ee   :  { %v5353_v16 = vpop.f32.mrf.mxu0 }
 0x4ef   :  { %v5354_v13 = vadd.f32 %v5353_v16, %v4966_v35 }
 0x4f4   :  { %v5379_v36 = vpop.f32.mrf.mxu2 }
 0x4f5   :  { %v5380_v43 = vadd.f32 %v5379_v36, %v4967_v46 }
 0x4f6   :  { %v5355_v32 = vpop.f32.mrf.mxu0 }
 0x4fc   :  { %v5381_v9 = vpop.f32.mrf.mxu2 }
 0x4fe   :  { %v5553_v29 = vpop.f32.mrf.mxu0 }
 0x4ff   :  { %v5554_v39 = vadd.f32 %v10231_v17, %v5553_v29 }
 0x501   :  { %5563 = vst [vmem:[#allocation15] sm:$0xff] %v5554_v39 }
 0x506   :  { %v5555_v57 = vpop.f32.mrf.mxu0 }
 0x507   :  { %v5556_v49 = vadd.f32 %v10231_v17, %v5555_v57 }
 0x509   :  { %5564 = vst [vmem:[#allocation15 + $0x8] sm:$0xff] %v5556_v49 }
 0x516   :  { %v5314_v3 = vpop.f32.mrf.mxu1 }
 0x517   :  { %v5315_v23 = vadd.f32 %v5314_v3, %v5302_v44 }
 0x519   :  { %v7849_v31 = vmul.f32 -1.442695, %v5315_v23 }
 0x51b   :  { %8630 = vpow2.f32 %v7849_v31 }
 0x51c   :  { %v5340_v10 = vpop.f32.mrf.mxu3 }
 0x51d   :  { %v5341_v58 = vadd.f32 %v5340_v10, %v5328_v45 }
 0x51e   :  { %v5316_v18 = vpop.f32.mrf.mxu1 }
 0x51f   :  { %v7850_v55 = vmul.f32 -1.442695, %v5341_v58 }
 0x521   :  { %v8631_v28 = vpop.eup %8630  ;;  %8632 = vpow2.f32 %v7850_v55 }
 0x522   :  { %v5405_v6 = vadd.f32 1.0, %v8631_v28 }
 0x524   :  { %8634 = vrcp.f32 %v5405_v6  ;;  %v5342_v34 = vpop.f32.mrf.mxu3  ;;  %v5419_v8 = vand.u32 2147483648, %v5405_v6  ;;  %vm5413_vm11 = vweird.f32 %v5405_v6  ;;  %v5417_v22 = vand.u32 2147483647, %v5405_v6 }
 0x526   :  { %v5366_v42 = vpop.f32.mrf.mxu1  ;;  %v5420_v61 = vor.u32 1.1754944e-38, %v5419_v8  ;;  %vm5418_vm15 = vcmp.eq.f32.partialorder %v5417_v22, 8.507059e+37 }
 0x527   :  { %v8633_v30 = vpop.eup %8632  ;;  %v5367_v1 = vadd.f32 %v5366_v42, %v5354_v13 }
 0x528   :  { %v5406_v60 = vadd.f32 1.0, %v8633_v30 }
 0x529   :  { %v7851_v62 = vmul.f32 -1.442695, %v5367_v1 }
 0x52a   :  { %v8635_v51 = vpop.eup %8634  ;;  %8636 = vrcp.f32 %v5406_v60  ;;  %v5434_v41 = vand.u32 2147483648, %v5406_v60  ;;  %v5432_v19 = vand.u32 2147483647, %v5406_v60  ;;  %vm5428_vm14 = vweird.f32 %v5406_v60 }
 0x52b   :  { %v5409_v33 = vmul.f32 %v8635_v51, %v5405_v6  ;;  %8638 = vpow2.f32 %v7851_v62  ;;  %vm5414_vm10 = vweird.f32 %v8635_v51 }
 0x52c   :  { %v5392_v38 = vpop.f32.mrf.mxu3  ;;  %vm5415_vm12 = vmor %vm5413_vm11, %vm5414_vm10  ;;  %v5435_v63 = vor.u32 1.1754944e-38, %v5434_v41  ;;  %vm5433_vm1 = vcmp.eq.f32.partialorder %v5432_v19, 8.507059e+37 }
 0x52d   :  { %v5410_v15 = vsub.f32 1.0, %v5409_v33  ;;  %v5393_v48 = vadd.f32 %v5392_v38, %v5380_v43 }
 0x52e   :  { %v5368_v0 = vpop.f32.mrf.mxu1 }
 0x52f   :  { %v5411_v52 = vmul.f32 %v8635_v51, %v5410_v15  ;;  %8640 = vtanh.f32 %v5393_v48 }
 0x530   :  { %v8637_v56 = vpop.eup %8636 }
 0x531   :  { %v8639_v50 = vpop.eup %8638  ;;  %v5424_v20 = vmul.f32 %v8637_v56, %v5406_v60  ;;  %v5412_v27 = vadd.f32 %v8635_v51, %v5411_v52  ;;  %vm5429_vm13 = vweird.f32 %v8637_v56 }
 0x532   :  { %v5407_v14 = vadd.f32 1.0, %v8639_v50  ;;  %vm5430_vm0 = vmor %vm5428_vm14, %vm5429_vm13 }
 0x533   :  { %v5425_v54 = vsub.f32 1.0, %v5424_v20  ;;  %v5416_v5 = vsel %vm5415_vm12, %v8635_v51, %v5412_v27 }
 0x534   :  { %8642 = vrcp.f32 %v5407_v14  ;;  %v5394_v47 = vpop.f32.mrf.mxu3  ;;  %v5421_v26 = vsel %vm5418_vm15, %v5420_v61, %v5416_v5  ;;  %v5449_v29 = vand.u32 2147483648, %v5407_v14  ;;  %v5447_v57 = vand.u32 2147483647, %v5407_v14 }
 0x535   :  { %v5426_v7 = vmul.f32 %v8637_v56, %v5425_v54  ;;  %v8641_v12 = vpop.eup %8640  ;;  %vm5443_vm3 = vweird.f32 %v5407_v14 }
 0x536   :  { %v5455_v36 = vmul.f32 %v8641_v12, %v5421_v26  ;;  %v5450_v53 = vor.u32 1.1754944e-38, %v5449_v29  ;;  %vm5448_vm5 = vcmp.eq.f32.partialorder %v5447_v57, 8.507059e+37 }
 0x537   :  { %v5427_v59 = vadd.f32 %v8637_v56, %v5426_v7 }
 0x539   :  { %v5431_v40 = vsel %vm5430_vm0, %v8637_v56, %v5427_v59 }
 0x53a   :  { %v8643_v2 = vpop.eup %8642  ;;  %v5436_v24 = vsel %vm5433_vm1, %v5435_v63, %v5431_v40 }
 0x53b   :  { %v5439_v37 = vmul.f32 %v8643_v2, %v5407_v14  ;;  %v5454_v16 = vmul.f32 %v5436_v24, %v10221_v4  ;;  %vm5444_vm2 = vweird.f32 %v8643_v2 }
 0x53c   :  { %vm5445_vm4 = vmor %vm5443_vm3, %vm5444_vm2 }
 0x53d   :  { %v5440_v32 = vsub.f32 1.0, %v5439_v37  ;;  %v5456_v9 = vadd.f32 %v5455_v36, %v5454_v16 }
 0x53f   :  { %8644 = vtanh.f32 %v5456_v9  ;;  %5469 = vst [vmem:[#allocation18 + $0x10] sm:$0xff] %v5456_v9  ;;  %v5441_v39 = vmul.f32 %v8643_v2, %v5440_v32 }
 0x541   :  { %v5442_v49 = vadd.f32 %v8643_v2, %v5441_v39 }
 0x543   :  { %v5446_v25 = vsel %vm5445_vm4, %v8643_v2, %v5442_v49 }
 0x544   :  { %v5451_v44 = vsel %vm5448_vm5, %v5450_v53, %v5446_v25 }
 0x545   :  { %v8645_v3 = vpop.eup %8644 }
 0x546   :  { %v5458_v21 = vmul.f32 %v8645_v3, %v5451_v44 }
 0x548   :  { %5467 = vst [vmem:[#allocation16 + $0x10] sm:$0xff] %v5458_v21  ;;  %v5475_v4 = vpack.c.bf16 %v5458_v21, %v10224_v11 }
 0x549   :  { %5592 = dma.vmem_to_hbm [thread:$0]  %s5585_s11, 384, %s5587_s7, [#allocation17], %s8875_s18, %s8875_s18, %s8876_s19  }
 0x54a   :  { %5557 = vmatmul.bf16.gmra.mxu0 %v5475_v4  ;;  %5605 = dma.vmem_to_hbm [thread:$0]  %s5598_s2, 384, %s5600_s30, [#allocation17], %s8875_s18, %s8875_s18, %s8876_s19  }
 0x5c7   :  { %v5558_v11 = vpop.f32.mrf.mxu0 }
 0x5c8   :  { %v5559_v23 = vadd.f32 %v10231_v17, %v5558_v11 }
 0x5ca   :  { %5565 = vst [vmem:[#allocation15 + $0x10] sm:$0xff] %v5559_v23 }
 0x5cf   :  { %v5560_v31 = vpop.f32.mrf.mxu0 }
 0x5d0   :  { %v5561_v45 = vadd.f32 %v10231_v17, %v5560_v31 }
 0x5d2   :  { %5566 = vst [vmem:[#allocation15 + $0x18] sm:$0xff] %v5561_v45 }
 0x5d3   :  { %5579 = dma.vmem_to_hbm [thread:$0]  %s5572_s15, 512, %s5574_s16, [#allocation6], %s8875_s18, %s8875_s18, %s8876_s19  }
 0x5d4   :  { %8870 = dma.done.wait [#allocation6], 512  }
 0x5d5   :  { %8871 = vsyncadd [#allocation6], 4294966784 }
 0x5d6   :  { %8872 = dma.done.wait [#allocation17], 768  }
 0x5d7   :  { %8873 = vsyncadd [#allocation17], 4294966528 }
 0x5d8   :  { %5618 = vsyncpa [#allocation5], 1 }
 0x5d9   :  { %5619 = vsyncpa [#allocation8], 1 }
 0x5da   :  { %5620 = vsyncpa [#allocation11], 1 }
 0x5db   :  { %5621 = vsyncpa [#allocation14], 1 }
 0x5dc   :  { %5622 = vsyncpa [#allocation6], 1 }
 0x5dd   :  { %5623 = vsyncpa [#allocation17], 1 }

</bundles_post_ra>
